<compile_context>
chip_gen: v5e
topology: v5e:2x2
jax: 0.10.0
libtpu: 0.0.40
codegen_flags: <defaults>
</compile_context>

<pallas_src>
import jax
import jax.numpy as jnp
from jax.experimental import pallas as pl
from jax.experimental.pallas import tpu as pltpu

K = 5  # deconv kernel size (fixed by deconv5x5s2)


# ----------------------------------------------------------------------------
# Fused Pallas kernel: deconv1 -> IGDN -> deconv2, one image per grid step
# ----------------------------------------------------------------------------
def _decoder_fused_kernel(x_ref, w1_ref, b1_ref, g_ref, beta_ref, w2_ref,
                          b2_ref, o_ref, xpad_s, hpad_s):
    """Shapes (per grid step, one image):
      x_ref   : (1, H, W, Cin)
      w1_ref  : (9*Cin, 4*Ch)   phase-packed deconv1 weight
      b1_ref  : (1, 4*Ch)       deconv1 bias, tiled over the 4 phases
      g_ref   : (4*Ch, 4*Ch)    block-diag(gamma^T) for the inverse GDN
      beta_ref: (1, 4*Ch)       GDN beta, tiled over the 4 phases
      w2_ref  : (9*Ch, 4*Cout)  phase-packed deconv2 weight
      b2_ref  : (1, 4*Cout)
      o_ref   : (1, 2H*2W, 4*Cout)  phase-packed deconv2 output
      xpad_s  : (H+2, W+2, Cin)     VMEM scratch (zero-padded input)
      hpad_s  : (2H+2, 2W+2, Ch)    VMEM scratch (zero-padded hidden activation)
    """
    _, H, W, Cin = x_ref.shape
    Ch = hpad_s.shape[-1]
    H2, W2 = 2 * H, 2 * W

    def im2col3x3(pad_ref, h, w, c):
        # (h*w, 9*c) patch matrix: 9 shifted slices, concatenated on lanes.
        cols = [pad_ref[dy:dy + h, dx:dx + w, :].reshape(h * w, c)
                for dy in range(3) for dx in range(3)]
        return jnp.concatenate(cols, axis=-1)

    def interleave(a, b, axis):
        # out[..., 2i, ...] = a[..., i, ...]; out[..., 2i+1, ...] = b[..., i, ...]
        # `axis` is never the minormost (lane) axis -> lane-preserving reshapes.
        sh = list(a.shape)
        sh[axis] *= 2
        a = jnp.expand_dims(a, axis + 1)
        b = jnp.expand_dims(b, axis + 1)
        return jnp.concatenate([a, b], axis=axis + 1).reshape(sh)

    # ---- deconv1, phase decomposed: one MXU matmul (contraction 9*Cin) ------
    xpad_s[...] = jnp.zeros_like(xpad_s)
    xpad_s[1:H + 1, 1:W + 1, :] = x_ref[0]
    p1 = im2col3x3(xpad_s, H, W, Cin)                               # (H*W, 9*Cin)
    y1 = jnp.dot(p1, w1_ref[...],
                 preferred_element_type=jnp.float32) + b1_ref[...]  # (H*W, 4*Ch)

    # ---- inverse GDN on the phase-packed activation -------------------------
    # y = x * sqrt(beta + x^2 @ gamma^T), applied per phase via block-diag gamma.
    nrm = jnp.dot(y1 * y1, g_ref[...],
                  preferred_element_type=jnp.float32) + beta_ref[...]
    h1 = y1 * jnp.sqrt(nrm)                                         # (H*W, 4*Ch)

    # ---- pixel-shuffle the 4 phases into the (2H, 2W, Ch) grid (stays in VMEM)
    h00 = h1[:, 0 * Ch:1 * Ch].reshape(H, W, Ch)                    # (r=0, s=0)
    h01 = h1[:, 1 * Ch:2 * Ch].reshape(H, W, Ch)                    # (r=0, s=1)
    h10 = h1[:, 2 * Ch:3 * Ch].reshape(H, W, Ch)                    # (r=1, s=0)
    h11 = h1[:, 3 * Ch:4 * Ch].reshape(H, W, Ch)                    # (r=1, s=1)
    h_sp = interleave(interleave(h00, h01, axis=1),
                      interleave(h10, h11, axis=1), axis=0)         # (2H, 2W, Ch)
    hpad_s[...] = jnp.zeros_like(hpad_s)
    hpad_s[1:H2 + 1, 1:W2 + 1, :] = h_sp

    # ---- deconv2, phase decomposed: one MXU matmul (contraction 9*Ch) -------
    p2 = im2col3x3(hpad_s, H2, W2, Ch)                              # (2H*2W, 9*Ch)
    y2 = jnp.dot(p2, w2_ref[...],
                 preferred_element_type=jnp.float32) + b2_ref[...]  # (2H*2W, 4*Cout)
    o_ref[0] = y2.astype(o_ref.dtype)


# ----------------------------------------------------------------------------
# One-time parameter packing (done at load time, NOT per forward call)
# ----------------------------------------------------------------------------
def _phase_deconv_weight(w_pt):
    """PyTorch ConvTranspose2d weight (Cin, Cout, 5, 5) -> (9*Cin, 4*Cout).

    Row index = (dy*3 + dx)*Cin + ci over the 3x3 taps of the 1-padded input,
    column index = (r*2 + s)*Cout + co over the 4 output sub-pixel phases:
      out[2q+r, 2p+s, co] = sum_{dy,dx,ci} xpad[q+dy, p+dx, ci] * W[row, col]
    with kh = 4 - 2*dy + r (valid if 0 <= kh < 5), same for kw/s/dx.
    """
    cin, cout = w_pt.shape[0], w_pt.shape[1]
    w = jnp.zeros((3, 3, cin, 2, 2, cout), w_pt.dtype)
    for r in range(2):
        for dy in range(3):
            kh = 4 - 2 * dy + r
            if not 0 <= kh < K:
                continue
            for s in range(2):
                for dx in range(3):
                    kw = 4 - 2 * dx + s
                    if not 0 <= kw < K:
                        continue
                    w = w.at[dy, dx, :, r, s, :].set(w_pt[:, :, kh, kw])
    return w.reshape(9 * cin, 4 * cout)


def prepare_decoder_params(p):
    """Pack PyTorch-layout params into kernel-ready matrices (call once)."""
    return dict(
        w1=_phase_deconv_weight(p["w1"]),
        b1=jnp.tile(p["b1"], 4)[None, :],
        g=jnp.kron(jnp.eye(4, dtype=p["gamma"].dtype), p["gamma"].T),
        beta=jnp.tile(p["beta"], 4)[None, :],
        w2=_phase_deconv_weight(p["w2"]),
        b2=jnp.tile(p["b2"], 4)[None, :],
    )


# ----------------------------------------------------------------------------
# Forward wrapper
# ----------------------------------------------------------------------------
def mnist_decoder_forward(x_nchw, kp):
    """Fused MNISTDecoder forward: NCHW in -> NCHW out (matches PyTorch)."""
    N, _, H, W = x_nchw.shape
    Cin = kp["w1"].shape[0] // 9
    Ch = kp["b1"].shape[1] // 4
    Cout = kp["b2"].shape[1] // 4
    H2, W2 = 2 * H, 2 * W
    OH, OW = 4 * H, 4 * W

    x_nhwc = jnp.transpose(x_nchw, (0, 2, 3, 1))

    y2 = pl.pallas_call(
        _decoder_fused_kernel,
        out_shape=jax.ShapeDtypeStruct((N, H2 * W2, 4 * Cout), x_nchw.dtype),
        grid=(N,),
        in_specs=[
            pl.BlockSpec((1, H, W, Cin), lambda n: (n, 0, 0, 0)),
            pl.BlockSpec(kp["w1"].shape, lambda n: (0, 0)),
            pl.BlockSpec(kp["b1"].shape, lambda n: (0, 0)),
            pl.BlockSpec(kp["g"].shape, lambda n: (0, 0)),
            pl.BlockSpec(kp["beta"].shape, lambda n: (0, 0)),
            pl.BlockSpec(kp["w2"].shape, lambda n: (0, 0)),
            pl.BlockSpec(kp["b2"].shape, lambda n: (0, 0)),
        ],
        out_specs=pl.BlockSpec((1, H2 * W2, 4 * Cout), lambda n: (n, 0, 0)),
        scratch_shapes=[
            pltpu.VMEM((H + 2, W + 2, Cin), jnp.float32),
            pltpu.VMEM((H2 + 2, W2 + 2, Ch), jnp.float32),
        ],
        compiler_params=pltpu.CompilerParams(dimension_semantics=("parallel",)),
    )(x_nhwc, kp["w1"], kp["b1"], kp["g"], kp["beta"], kp["w2"], kp["b2"])

    # Un-shuffle the 4 sub-pixel phases into raster order, then NHWC -> NCHW.
    out = y2.reshape(N, H2, W2, 2, 2, Cout)        # [n, q, p, r, s, co]
    out = jnp.transpose(out, (0, 5, 1, 3, 2, 4))   # [n, co, q, r, p, s]
    return out.reshape(N, Cout, OH, OW)


# ----------------------------------------------------------------------------
# Deterministic parameter init (synthetic, not a checkpoint load)
# ----------------------------------------------------------------------------
def init_params(key, cin=64, chid=32, cout=1):
    k1, k2, k3, k4, k5 = jax.random.split(key, 5)
    w1 = 0.1 * jax.random.normal(k1, (cin, chid, K, K), jnp.float32)
    b1 = 0.05 * jax.random.normal(k2, (chid,), jnp.float32)
    w2 = 0.1 * jax.random.normal(k3, (chid, cout, K, K), jnp.float32)
    b2 = 0.05 * jax.random.normal(k4, (cout,), jnp.float32)
    beta = jnp.ones((chid,), jnp.float32)                      # GDN beta init
    gamma = 0.1 * jnp.eye(chid, dtype=jnp.float32) + 0.01 * jnp.abs(
        jax.random.normal(k5, (chid, chid), jnp.float32))      # GDN gamma init
    return dict(w1=w1, b1=b1, w2=w2, b2=b2, beta=beta, gamma=gamma)


# ----------------------------------------------------------------------------
# Pure-JAX reference (for correctness check only)
# ----------------------------------------------------------------------------
def _deconv_ref(x_nhwc, w_pt, b):
    w_eq = jnp.transpose(w_pt[:, :, ::-1, ::-1], (2, 3, 0, 1))
    out = jax.lax.conv_general_dilated(
        x_nhwc, w_eq, window_strides=(1, 1), padding=((2, 3), (2, 3)),
        lhs_dilation=(2, 2), dimension_numbers=("NHWC", "HWIO", "NHWC"),
        precision=jax.lax.Precision.HIGHEST)
    return out + b[None, None, None, :]


def _igdn_ref(x, gamma, beta):
    norm = beta + jnp.einsum("nhwj,ij->nhwi", x * x, gamma,
                             precision=jax.lax.Precision.HIGHEST)
    return x * jnp.sqrt(norm)


def decoder_ref(x_nchw, p):
    x = jnp.transpose(x_nchw, (0, 2, 3, 1))
    h = _deconv_ref(x, p["w1"], p["b1"])
    h = _igdn_ref(h, p["gamma"], p["beta"])
    y = _deconv_ref(h, p["w2"], p["b2"])
    return jnp.transpose(y, (0, 3, 1, 2))


if __name__ == "__main__":
    # Module defaults: in_channels=64, hidden_channels=32, out_channels=1.
    # MNIST-style latent: batch=2, 7x7 latent -> 28x28 image.
    CIN, CHID, COUT = 64, 32, 1
    N, H, W = 2, 7, 7

    key = jax.random.PRNGKey(0)
    pkey, xkey = jax.random.split(key)
    params = init_params(pkey, CIN, CHID, COUT)
    kparams = prepare_decoder_params(params)            # one-time weight packing
    x = jax.random.normal(xkey, (N, CIN, H, W), jnp.float32)  # NCHW like PyTorch

    fwd = jax.jit(mnist_decoder_forward)
    out = jax.block_until_ready(fwd(x, kparams))
    assert out.shape == (N, COUT, 4 * H, 4 * W), out.shape

    ref = jax.block_until_ready(decoder_ref(x, params))
    err = float(jnp.max(jnp.abs(out - ref)))
    assert jnp.allclose(out, ref, atol=2e-3, rtol=2e-3), f"max abs err {err}"

    print("KERNEL_OK")
</pallas_src>

<mosaic_0001>
module attributes {stable_mosaic.version = 11 : i64} {
  func.func @_decoder_fused_kernel(%arg0: i32, %arg1: memref<1x7x7x64xf32, #tpu.memory_space<vmem>>, %arg2: memref<576x128xf32, #tpu.memory_space<vmem>>, %arg3: memref<1x128xf32, #tpu.memory_space<vmem>>, %arg4: memref<128x128xf32, #tpu.memory_space<vmem>>, %arg5: memref<1x128xf32, #tpu.memory_space<vmem>>, %arg6: memref<288x4xf32, #tpu.memory_space<vmem>>, %arg7: memref<1x4xf32, #tpu.memory_space<vmem>>, %arg8: memref<1x196x4xf32, #tpu.memory_space<vmem>>, %arg9: memref<9x9x64xf32, #tpu.memory_space<vmem>>, %arg10: memref<16x16x32xf32, #tpu.memory_space<vmem>>) attributes {dimension_semantics = [#tpu.dimension_semantics<parallel>], iteration_bounds = array<i64: 2>, scalar_prefetch = 0 : i64, scratch_operands = 2 : i64, tpu.core_type = #tpu.core_type<tc>, window_params = [{transform_indices = @transform_0, window_bounds = array<i64: 1, 7, 7, 64>}, {pipeline_mode = #tpu.pipeline_mode<synchronous>, transform_indices = @transform_1, window_bounds = array<i64: 576, 128>}, {pipeline_mode = #tpu.pipeline_mode<synchronous>, transform_indices = @transform_2, window_bounds = array<i64: 1, 128>}, {pipeline_mode = #tpu.pipeline_mode<synchronous>, transform_indices = @transform_3, window_bounds = array<i64: 128, 128>}, {pipeline_mode = #tpu.pipeline_mode<synchronous>, transform_indices = @transform_4, window_bounds = array<i64: 1, 128>}, {pipeline_mode = #tpu.pipeline_mode<synchronous>, transform_indices = @transform_5, window_bounds = array<i64: 288, 4>}, {pipeline_mode = #tpu.pipeline_mode<synchronous>, transform_indices = @transform_6, window_bounds = array<i64: 1, 4>}, {transform_indices = @transform_7, window_bounds = array<i64: 1, 196, 4>}]} {
    %cst = arith.constant 0.000000e+00 : f32
    %0 = vector.broadcast %cst : f32 to vector<9x9x64xf32>
    %c0 = arith.constant 0 : index
    %c0_0 = arith.constant 0 : index
    %c0_1 = arith.constant 0 : index
    %1 = vector.load %arg9[%c0, %c0_0, %c0_1] : memref<9x9x64xf32, #tpu.memory_space<vmem>>, vector<9x9x64xf32>
    tpu.vector_store %arg9[%c0, %c0_0, %c0_1], %0 {strides = array<i32>} : memref<9x9x64xf32, #tpu.memory_space<vmem>>, vector<9x9x64xf32>,
    %c0_2 = arith.constant 0 : index
    %c0_3 = arith.constant 0 : index
    %c0_4 = arith.constant 0 : index
    %c0_5 = arith.constant 0 : index
    %2 = vector.load %arg1[%c0_2, %c0_3, %c0_4, %c0_5] : memref<1x7x7x64xf32, #tpu.memory_space<vmem>>, vector<1x7x7x64xf32>
    %3 = vector.shape_cast %2 : vector<1x7x7x64xf32> to vector<7x7x64xf32>
    %c1 = arith.constant 1 : index
    %c1_6 = arith.constant 1 : index
    %c0_7 = arith.constant 0 : index
    %4 = vector.load %arg9[%c1, %c1_6, %c0_7] : memref<9x9x64xf32, #tpu.memory_space<vmem>>, vector<7x7x64xf32>
    tpu.vector_store %arg9[%c1, %c1_6, %c0_7], %3 {strides = array<i32>} : memref<9x9x64xf32, #tpu.memory_space<vmem>>, vector<7x7x64xf32>,
    %c0_8 = arith.constant 0 : index
    %c0_9 = arith.constant 0 : index
    %c0_10 = arith.constant 0 : index
    %5 = vector.load %arg9[%c0_8, %c0_9, %c0_10] : memref<9x9x64xf32, #tpu.memory_space<vmem>>, vector<7x7x64xf32>
    %6 = vector.shape_cast %5 : vector<7x7x64xf32> to vector<49x64xf32>
    %c0_11 = arith.constant 0 : index
    %c1_12 = arith.constant 1 : index
    %c0_13 = arith.constant 0 : index
    %7 = vector.load %arg9[%c0_11, %c1_12, %c0_13] : memref<9x9x64xf32, #tpu.memory_space<vmem>>, vector<7x7x64xf32>
    %8 = vector.shape_cast %7 : vector<7x7x64xf32> to vector<49x64xf32>
    %c0_14 = arith.constant 0 : index
    %c2 = arith.constant 2 : index
    %c0_15 = arith.constant 0 : index
    %9 = vector.load %arg9[%c0_14, %c2, %c0_15] : memref<9x9x64xf32, #tpu.memory_space<vmem>>, vector<7x7x64xf32>
    %10 = vector.shape_cast %9 : vector<7x7x64xf32> to vector<49x64xf32>
    %c1_16 = arith.constant 1 : index
    %c0_17 = arith.constant 0 : index
    %c0_18 = arith.constant 0 : index
    %11 = vector.load %arg9[%c1_16, %c0_17, %c0_18] : memref<9x9x64xf32, #tpu.memory_space<vmem>>, vector<7x7x64xf32>
    %12 = vector.shape_cast %11 : vector<7x7x64xf32> to vector<49x64xf32>
    %c1_19 = arith.constant 1 : index
    %c1_20 = arith.constant 1 : index
    %c0_21 = arith.constant 0 : index
    %13 = vector.load %arg9[%c1_19, %c1_20, %c0_21] : memref<9x9x64xf32, #tpu.memory_space<vmem>>, vector<7x7x64xf32>
    %14 = vector.shape_cast %13 : vector<7x7x64xf32> to vector<49x64xf32>
    %c1_22 = arith.constant 1 : index
    %c2_23 = arith.constant 2 : index
    %c0_24 = arith.constant 0 : index
    %15 = vector.load %arg9[%c1_22, %c2_23, %c0_24] : memref<9x9x64xf32, #tpu.memory_space<vmem>>, vector<7x7x64xf32>
    %16 = vector.shape_cast %15 : vector<7x7x64xf32> to vector<49x64xf32>
    %c2_25 = arith.constant 2 : index
    %c0_26 = arith.constant 0 : index
    %c0_27 = arith.constant 0 : index
    %17 = vector.load %arg9[%c2_25, %c0_26, %c0_27] : memref<9x9x64xf32, #tpu.memory_space<vmem>>, vector<7x7x64xf32>
    %18 = vector.shape_cast %17 : vector<7x7x64xf32> to vector<49x64xf32>
    %c2_28 = arith.constant 2 : index
    %c1_29 = arith.constant 1 : index
    %c0_30 = arith.constant 0 : index
    %19 = vector.load %arg9[%c2_28, %c1_29, %c0_30] : memref<9x9x64xf32, #tpu.memory_space<vmem>>, vector<7x7x64xf32>
    %20 = vector.shape_cast %19 : vector<7x7x64xf32> to vector<49x64xf32>
    %c2_31 = arith.constant 2 : index
    %c2_32 = arith.constant 2 : index
    %c0_33 = arith.constant 0 : index
    %21 = vector.load %arg9[%c2_31, %c2_32, %c0_33] : memref<9x9x64xf32, #tpu.memory_space<vmem>>, vector<7x7x64xf32>
    %22 = vector.shape_cast %21 : vector<7x7x64xf32> to vector<49x64xf32>
    %23 = tpu.concatenate %6, %8, %10, %12, %14, %16, %18, %20, %22 in 1 : vector<49x64xf32>, vector<49x64xf32>, vector<49x64xf32>, vector<49x64xf32>, vector<49x64xf32>, vector<49x64xf32>, vector<49x64xf32>, vector<49x64xf32>, vector<49x64xf32> -> vector<49x576xf32>
    %c0_34 = arith.constant 0 : index
    %c0_35 = arith.constant 0 : index
    %24 = vector.load %arg2[%c0_34, %c0_35] : memref<576x128xf32, #tpu.memory_space<vmem>>, vector<576x128xf32>
    %cst_36 = arith.constant dense<0.000000e+00> : vector<49x128xf32>
    %25 = tpu.matmul %23, %24, %cst_36 {dimension_numbers = #tpu.dot_dimension_numbers<[1], [0], [0], [1], [0, 0, 1, 1], [], []>} : vector<49x576xf32>, vector<576x128xf32>, vector<49x128xf32> -> vector<49x128xf32>
    %c0_37 = arith.constant 0 : index
    %c0_38 = arith.constant 0 : index
    %26 = vector.load %arg3[%c0_37, %c0_38] : memref<1x128xf32, #tpu.memory_space<vmem>>, vector<1x128xf32>
    %27 = vector.broadcast %26 : vector<1x128xf32> to vector<49x128xf32>
    %28 = arith.addf %25, %27 : vector<49x128xf32>
    %29 = arith.mulf %28, %28 : vector<49x128xf32>
    %c0_39 = arith.constant 0 : index
    %c0_40 = arith.constant 0 : index
    %30 = vector.load %arg4[%c0_39, %c0_40] : memref<128x128xf32, #tpu.memory_space<vmem>>, vector<128x128xf32>
    %cst_41 = arith.constant dense<0.000000e+00> : vector<49x128xf32>
    %31 = tpu.matmul %29, %30, %cst_41 {dimension_numbers = #tpu.dot_dimension_numbers<[1], [0], [0], [1], [0, 0, 1, 1], [], []>} : vector<49x128xf32>, vector<128x128xf32>, vector<49x128xf32> -> vector<49x128xf32>
    %c0_42 = arith.constant 0 : index
    %c0_43 = arith.constant 0 : index
    %32 = vector.load %arg5[%c0_42, %c0_43] : memref<1x128xf32, #tpu.memory_space<vmem>>, vector<1x128xf32>
    %33 = vector.broadcast %32 : vector<1x128xf32> to vector<49x128xf32>
    %34 = arith.addf %31, %33 : vector<49x128xf32>
    %35 = math.sqrt %34 : vector<49x128xf32>
    %36 = arith.mulf %28, %35 : vector<49x128xf32>
    %37 = vector.extract_strided_slice %36 {offsets = [0, 0], sizes = [49, 32], strides = [1, 1]} : vector<49x128xf32> to vector<49x32xf32>
    %38 = vector.shape_cast %37 : vector<49x32xf32> to vector<7x7x32xf32>
    %39 = vector.extract_strided_slice %36 {offsets = [0, 32], sizes = [49, 32], strides = [1, 1]} : vector<49x128xf32> to vector<49x32xf32>
    %40 = vector.shape_cast %39 : vector<49x32xf32> to vector<7x7x32xf32>
    %41 = vector.extract_strided_slice %36 {offsets = [0, 64], sizes = [49, 32], strides = [1, 1]} : vector<49x128xf32> to vector<49x32xf32>
    %42 = vector.shape_cast %41 : vector<49x32xf32> to vector<7x7x32xf32>
    %43 = vector.extract_strided_slice %36 {offsets = [0, 96], sizes = [49, 32], strides = [1, 1]} : vector<49x128xf32> to vector<49x32xf32>
    %44 = vector.shape_cast %43 : vector<49x32xf32> to vector<7x7x32xf32>
    %45 = vector.shape_cast %38 : vector<7x7x32xf32> to vector<7x7x1x32xf32>
    %46 = vector.shape_cast %40 : vector<7x7x32xf32> to vector<7x7x1x32xf32>
    %47 = tpu.concatenate %45, %46 in 2 : vector<7x7x1x32xf32>, vector<7x7x1x32xf32> -> vector<7x7x2x32xf32>
    %48 = vector.shape_cast %47 : vector<7x7x2x32xf32> to vector<7x14x32xf32>
    %49 = vector.shape_cast %42 : vector<7x7x32xf32> to vector<7x7x1x32xf32>
    %50 = vector.shape_cast %44 : vector<7x7x32xf32> to vector<7x7x1x32xf32>
    %51 = tpu.concatenate %49, %50 in 2 : vector<7x7x1x32xf32>, vector<7x7x1x32xf32> -> vector<7x7x2x32xf32>
    %52 = vector.shape_cast %51 : vector<7x7x2x32xf32> to vector<7x14x32xf32>
    %53 = vector.shape_cast %48 : vector<7x14x32xf32> to vector<7x1x14x32xf32>
    %54 = vector.shape_cast %52 : vector<7x14x32xf32> to vector<7x1x14x32xf32>
    %55 = tpu.concatenate %53, %54 in 1 : vector<7x1x14x32xf32>, vector<7x1x14x32xf32> -> vector<7x2x14x32xf32>
    %56 = vector.shape_cast %55 : vector<7x2x14x32xf32> to vector<14x14x32xf32>
    %cst_44 = arith.constant 0.000000e+00 : f32
    %57 = vector.broadcast %cst_44 : f32 to vector<16x16x32xf32>
    %c0_45 = arith.constant 0 : index
    %c0_46 = arith.constant 0 : index
    %c0_47 = arith.constant 0 : index
    %58 = vector.load %arg10[%c0_45, %c0_46, %c0_47] : memref<16x16x32xf32, #tpu.memory_space<vmem>>, vector<16x16x32xf32>
    tpu.vector_store %arg10[%c0_45, %c0_46, %c0_47], %57 {strides = array<i32>} : memref<16x16x32xf32, #tpu.memory_space<vmem>>, vector<16x16x32xf32>,
    %c1_48 = arith.constant 1 : index
    %c1_49 = arith.constant 1 : index
    %c0_50 = arith.constant 0 : index
    %59 = vector.load %arg10[%c1_48, %c1_49, %c0_50] : memref<16x16x32xf32, #tpu.memory_space<vmem>>, vector<14x14x32xf32>
    tpu.vector_store %arg10[%c1_48, %c1_49, %c0_50], %56 {strides = array<i32>} : memref<16x16x32xf32, #tpu.memory_space<vmem>>, vector<14x14x32xf32>,
    %c0_51 = arith.constant 0 : index
    %c0_52 = arith.constant 0 : index
    %c0_53 = arith.constant 0 : index
    %60 = vector.load %arg10[%c0_51, %c0_52, %c0_53] : memref<16x16x32xf32, #tpu.memory_space<vmem>>, vector<14x14x32xf32>
    %61 = vector.shape_cast %60 : vector<14x14x32xf32> to vector<196x32xf32>
    %c0_54 = arith.constant 0 : index
    %c1_55 = arith.constant 1 : index
    %c0_56 = arith.constant 0 : index
    %62 = vector.load %arg10[%c0_54, %c1_55, %c0_56] : memref<16x16x32xf32, #tpu.memory_space<vmem>>, vector<14x14x32xf32>
    %63 = vector.shape_cast %62 : vector<14x14x32xf32> to vector<196x32xf32>
    %c0_57 = arith.constant 0 : index
    %c2_58 = arith.constant 2 : index
    %c0_59 = arith.constant 0 : index
    %64 = vector.load %arg10[%c0_57, %c2_58, %c0_59] : memref<16x16x32xf32, #tpu.memory_space<vmem>>, vector<14x14x32xf32>
    %65 = vector.shape_cast %64 : vector<14x14x32xf32> to vector<196x32xf32>
    %c1_60 = arith.constant 1 : index
    %c0_61 = arith.constant 0 : index
    %c0_62 = arith.constant 0 : index
    %66 = vector.load %arg10[%c1_60, %c0_61, %c0_62] : memref<16x16x32xf32, #tpu.memory_space<vmem>>, vector<14x14x32xf32>
    %67 = vector.shape_cast %66 : vector<14x14x32xf32> to vector<196x32xf32>
    %c1_63 = arith.constant 1 : index
    %c1_64 = arith.constant 1 : index
    %c0_65 = arith.constant 0 : index
    %68 = vector.load %arg10[%c1_63, %c1_64, %c0_65] : memref<16x16x32xf32, #tpu.memory_space<vmem>>, vector<14x14x32xf32>
    %69 = vector.shape_cast %68 : vector<14x14x32xf32> to vector<196x32xf32>
    %c1_66 = arith.constant 1 : index
    %c2_67 = arith.constant 2 : index
    %c0_68 = arith.constant 0 : index
    %70 = vector.load %arg10[%c1_66, %c2_67, %c0_68] : memref<16x16x32xf32, #tpu.memory_space<vmem>>, vector<14x14x32xf32>
    %71 = vector.shape_cast %70 : vector<14x14x32xf32> to vector<196x32xf32>
    %c2_69 = arith.constant 2 : index
    %c0_70 = arith.constant 0 : index
    %c0_71 = arith.constant 0 : index
    %72 = vector.load %arg10[%c2_69, %c0_70, %c0_71] : memref<16x16x32xf32, #tpu.memory_space<vmem>>, vector<14x14x32xf32>
    %73 = vector.shape_cast %72 : vector<14x14x32xf32> to vector<196x32xf32>
    %c2_72 = arith.constant 2 : index
    %c1_73 = arith.constant 1 : index
    %c0_74 = arith.constant 0 : index
    %74 = vector.load %arg10[%c2_72, %c1_73, %c0_74] : memref<16x16x32xf32, #tpu.memory_space<vmem>>, vector<14x14x32xf32>
    %75 = vector.shape_cast %74 : vector<14x14x32xf32> to vector<196x32xf32>
    %c2_75 = arith.constant 2 : index
    %c2_76 = arith.constant 2 : index
    %c0_77 = arith.constant 0 : index
    %76 = vector.load %arg10[%c2_75, %c2_76, %c0_77] : memref<16x16x32xf32, #tpu.memory_space<vmem>>, vector<14x14x32xf32>
    %77 = vector.shape_cast %76 : vector<14x14x32xf32> to vector<196x32xf32>
    %78 = tpu.concatenate %61, %63, %65, %67, %69, %71, %73, %75, %77 in 1 : vector<196x32xf32>, vector<196x32xf32>, vector<196x32xf32>, vector<196x32xf32>, vector<196x32xf32>, vector<196x32xf32>, vector<196x32xf32>, vector<196x32xf32>, vector<196x32xf32> -> vector<196x288xf32>
    %c0_78 = arith.constant 0 : index
    %c0_79 = arith.constant 0 : index
    %79 = vector.load %arg6[%c0_78, %c0_79] : memref<288x4xf32, #tpu.memory_space<vmem>>, vector<288x4xf32>
    %cst_80 = arith.constant dense<0.000000e+00> : vector<196x4xf32>
    %80 = tpu.matmul %78, %79, %cst_80 {dimension_numbers = #tpu.dot_dimension_numbers<[1], [0], [0], [1], [0, 0, 1, 1], [], []>} : vector<196x288xf32>, vector<288x4xf32>, vector<196x4xf32> -> vector<196x4xf32>
    %c0_81 = arith.constant 0 : index
    %c0_82 = arith.constant 0 : index
    %81 = vector.load %arg7[%c0_81, %c0_82] : memref<1x4xf32, #tpu.memory_space<vmem>>, vector<1x4xf32>
    %82 = vector.broadcast %81 : vector<1x4xf32> to vector<196x4xf32>
    %83 = arith.addf %80, %82 : vector<196x4xf32>
    %c0_83 = arith.constant 0 : index
    %c0_84 = arith.constant 0 : index
    %c0_85 = arith.constant 0 : index
    %84 = vector.load %arg8[%c0_83, %c0_84, %c0_85] : memref<1x196x4xf32, #tpu.memory_space<vmem>>, vector<1x196x4xf32>
    %85 = vector.shape_cast %84 : vector<1x196x4xf32> to vector<196x4xf32>
    %86 = vector.shape_cast %83 : vector<196x4xf32> to vector<1x196x4xf32>
    tpu.vector_store %arg8[%c0_83, %c0_84, %c0_85], %86 {strides = array<i32>} : memref<1x196x4xf32, #tpu.memory_space<vmem>>, vector<1x196x4xf32>,
    return
  }
  func.func @transform_0(%arg0: i32) -> (i32, i32, i32, i32) {
    %c0_i32 = arith.constant 0 : i32
    %c0_i32_0 = arith.constant 0 : i32
    %c0_i32_1 = arith.constant 0 : i32
    %c0_i32_2 = arith.constant 0 : i32
    return %arg0, %c0_i32, %c0_i32_0, %c0_i32_1 : i32, i32, i32, i32
  }
  func.func @transform_1(%arg0: i32) -> (i32, i32) {
    %c0_i32 = arith.constant 0 : i32
    %c0_i32_0 = arith.constant 0 : i32
    %c0_i32_1 = arith.constant 0 : i32
    return %c0_i32, %c0_i32_0 : i32, i32
  }
  func.func @transform_2(%arg0: i32) -> (i32, i32) {
    %c0_i32 = arith.constant 0 : i32
    %c0_i32_0 = arith.constant 0 : i32
    %c0_i32_1 = arith.constant 0 : i32
    return %c0_i32, %c0_i32_0 : i32, i32
  }
  func.func @transform_3(%arg0: i32) -> (i32, i32) {
    %c0_i32 = arith.constant 0 : i32
    %c0_i32_0 = arith.constant 0 : i32
    %c0_i32_1 = arith.constant 0 : i32
    return %c0_i32, %c0_i32_0 : i32, i32
  }
  func.func @transform_4(%arg0: i32) -> (i32, i32) {
    %c0_i32 = arith.constant 0 : i32
    %c0_i32_0 = arith.constant 0 : i32
    %c0_i32_1 = arith.constant 0 : i32
    return %c0_i32, %c0_i32_0 : i32, i32
  }
  func.func @transform_5(%arg0: i32) -> (i32, i32) {
    %c0_i32 = arith.constant 0 : i32
    %c0_i32_0 = arith.constant 0 : i32
    %c0_i32_1 = arith.constant 0 : i32
    return %c0_i32, %c0_i32_0 : i32, i32
  }
  func.func @transform_6(%arg0: i32) -> (i32, i32) {
    %c0_i32 = arith.constant 0 : i32
    %c0_i32_0 = arith.constant 0 : i32
    %c0_i32_1 = arith.constant 0 : i32
    return %c0_i32, %c0_i32_0 : i32, i32
  }
  func.func @transform_7(%arg0: i32) -> (i32, i32, i32) {
    %c0_i32 = arith.constant 0 : i32
    %c0_i32_0 = arith.constant 0 : i32
    %c0_i32_1 = arith.constant 0 : i32
    return %arg0, %c0_i32, %c0_i32_0 : i32, i32, i32
  }
}

</mosaic_0001>

<bundles_post_ra>
// kernel: mnist_decoder_forward.1
= control target key start
LH: loop header
LB: loop body
LE: loop exit
PB: predicated region body
PF: predicated region fallthrough
CT: control target
= control target key end

     0   :  { %12 = vsyncpa [#allocation5], 0  ;;  %s6669_s24 = smov 0   ;;  %s10190_s0 = inlined_call_operand.vmem [shape: f32[2,7,7,64], index: 0, kind: input, shape index: {}]   ;;  %s10191_s1 = inlined_call_operand.hbm [shape: f32[576,128], index: 1, kind: input, shape index: {}]   ;;  %s10192_s2 = inlined_call_operand.vmem [shape: f32[1,128], index: 2, kind: input, shape index: {}]   ;;  %s10193_s3 = inlined_call_operand.vmem [shape: f32[128,128], index: 3, kind: input, shape index: {}]   ;;  %s10194_s4 = inlined_call_operand.vmem [shape: f32[1,128], index: 4, kind: input, shape index: {}]   ;;  %s10195_s5 = inlined_call_operand.vmem [shape: f32[288,4], index: 5, kind: input, shape index: {}]   ;;  %s10196_s6 = inlined_call_operand.vmem [shape: f32[1,4], index: 6, kind: input, shape index: {}]   ;;  %s10197_s7 = inlined_call_operand.vmem [shape: f32[2,196,4], index: 7, kind: output, shape index: {}]  }
   0x1 LB: > { %s212_s27 = sshll.u32 %s10191_s1, 4  ;;  %s6103_s28 = sadd.s32 4294967295, %s6620_s24   ;;  %s6620_s24 = sphi %s6669_s24, %s18_s24   ;;  %s213_s27 = int_to_ptr.hbm [resolvable:$true] %s212_s27 }
   0x2   : > { %p6105_p0 = scmp.ge.s32.totalorder %s6620_s24, 1  ;;  %p201_p1 = scmp.lt.s32.totalorder %s6620_s24, 3 }
   0x3   : > { %p6176_p2 = scmp.eq.s32.totalorder %s6103_s28, 0  ;;  %s6622_s29 = smov [#allocation4]  }
   0x4   : > { %p202_p3 = pnand %p6105_p0, %p201_p1  ;;  %s214_s30 = sshll.u32 %s6622_s29, 4  ;;  %s215_s30 = int_to_ptr.vmem [resolvable:$true] %s214_s30 }
   0x5   : > { %s6623_s8 = smov 128   ;;  %s6624_s9 = smov 8  }
   0x6   : > { %p6172_p4 = pneg %p202_p3  ;;  %253 = sbr.rel (%p202_p3) target bundleno = 3275 (0xccb), region = 48 }
   0x8   : > { %p6173_p5 = pnand %p6176_p2, %p6172_p4 }
   0xa   : > { %6175 = dma.hbm_to_vmem [thread:$0]  (!%p6173_p5), %s213_s27, 9216, %s215_s30, [#allocation5], %s6623_s8, %s6623_s8, %s6624_s9  }
   0xb   : > { %6615 = dma.done.wait (%p6176_p2), [#allocation5], 9216  }
   0xc   : > { %6617 = vsyncadd (%p6176_p2), [#allocation5], 4294958080  ;;  %p286_p6 = scmp.lt.s32.totalorder %s6103_s28, 1  ;;  %vm296_vm0 = vcmask 523264   ;;  %v6625_v0 = vmov 0.0   ;;  %vm324_vm1 = vcmask 522240  }
   0xd   : > { %297 = vst.msk [vmem:[#allocation2] sm:$0xff] %vm296_vm0, %v6625_v0  ;;  %s6626_s14 = smov 64   ;;  %vm298_vm2 = vcmask 516096   ;;  %vm2267_vm13 = vcmask 1040384   ;;  %s6628_s11 = smov 32  }
   0xe   : > { %s11077_s28 = smov (!%p286_p6, %s6103_s28), 1  ;;  %300 = vst.msk [vmem:[#allocation2 + $0x10] sm:$0xff] %vm296_vm0, %v6625_v0 }
   0xf   : > { %302 = vst.msk [vmem:[#allocation2 + $0x20] sm:$0xff] %vm296_vm0, %v6625_v0  ;;  %s6166_s10 = smul.u32 56, %s11077_s28 }
  0x10   : > { %304 = vst.msk [vmem:[#allocation2 + $0x30] sm:$0xff] %vm296_vm0, %v6625_v0 }
  0x11   : > { %306 = vst.msk [vmem:[#allocation2 + $0x40] sm:$0xff] %vm296_vm0, %v6625_v0  ;;  %s6696_s13 = scalar_lea.vmem %s10190_s0, %s6166_s10  ;;  %s6627_s10 = smov 96  }
  0x12   : > { %308 = vst.msk [vmem:[#allocation2 + $0x50] sm:$0xff] %vm296_vm0, %v6625_v0  ;;  %v316_v1 = vld [vmem:[%s6696_s13] sm:$0x7f]  ;;  %v317_v2 = vld [vmem:[%s6696_s13 + $0x8] sm:$0x7f] }
  0x13   : > { %310 = vst.msk [vmem:[#allocation2 + $0x60] sm:$0xff] %vm296_vm0, %v6625_v0  ;;  %v318_v3 = vld [vmem:[%s6696_s13 + $0x10] sm:$0x7f]  ;;  %v319_v4 = vld [vmem:[%s6696_s13 + $0x18] sm:$0x7f] }
  0x14   : > { %325 = vst.msk [vmem:[#allocation2 + $0x11] sm:$0x7f] %vm324_vm1, %v316_v1  ;;  %v332_v5 = vld [vmem:[#allocation2] sm:$0x7f]  ;;  %v320_v6 = vld [vmem:[%s6696_s13 + $0x20] sm:$0x7f] }
  0x15   : > { %326 = vst.msk [vmem:[#allocation2 + $0x21] sm:$0x7f] %vm324_vm1, %v317_v2  ;;  %v321_v7 = vld [vmem:[%s6696_s13 + $0x28] sm:$0x7f]  ;;  %v346_v8 = vrot.slane %v332_v5, 1  ;;  %v347_v9 = vrot.slane %v332_v5, 2 }
  0x16   : > { %327 = vst.msk [vmem:[#allocation2 + $0x31] sm:$0x7f] %vm324_vm1, %v318_v3  ;;  %v348_v10 = vrot.slane %v332_v5, 3  ;;  %v349_v11 = vrot.slane %v332_v5, 4  ;;  %v350_v12 = vrot.slane %v332_v5, 5  ;;  %v351_v13 = vrot.slane %v332_v5, 6 }
  0x17   : > { %328 = vst.msk [vmem:[#allocation2 + $0x41] sm:$0x7f] %vm324_vm1, %v319_v4  ;;  %v388_v62 = vld [vmem:[#allocation2 + $0x1] sm:$0x7f] }
  0x18   : > { %329 = vst.msk [vmem:[#allocation2 + $0x51] sm:$0x7f] %vm324_vm1, %v320_v6  ;;  %v402_v63 = vrot.slane %v388_v62, 1  ;;  %v403_v1 = vrot.slane %v388_v62, 2  ;;  %v404_v2 = vrot.slane %v388_v62, 3  ;;  %v405_v4 = vrot.slane %v388_v62, 4 }
  0x19   : > { %330 = vst.msk [vmem:[#allocation2 + $0x61] sm:$0x7f] %vm324_vm1, %v321_v7  ;;  %v407_v6 = vrot.slane %v388_v62, 6 }
  0x1a   : > { %837 = vst [vmem:[#allocation1] ss:$9 sm:$0xff] %v332_v5  ;;  %v406_v5 = vrot.slane %v388_v62, 5 }
  0x1b   : > { %839 = vst [vmem:[#allocation1 + $0x1] ss:$9 sm:$0xff] %v346_v8  ;;  %v333_v14 = vld [vmem:[#allocation2 + $0x10] sm:$0x7f] }
  0x1c   : > { %841 = vst [vmem:[#allocation1 + $0x2] ss:$9 sm:$0xff] %v347_v9  ;;  %v352_v15 = vrot.slane %v333_v14, 1  ;;  %v353_v16 = vrot.slane %v333_v14, 2  ;;  %v354_v17 = vrot.slane %v333_v14, 3  ;;  %v355_v18 = vrot.slane %v333_v14, 4 }
  0x1d   : > { %843 = vst [vmem:[#allocation1 + $0x3] ss:$9 sm:$0xff] %v348_v10  ;;  %v334_v20 = vld [vmem:[#allocation2 + $0x20] sm:$0x7f]  ;;  %v356_v21 = vrot.slane %v333_v14, 5  ;;  %v357_v22 = vrot.slane %v333_v14, 6 }
  0x1e   : > { %845 = vst [vmem:[#allocation1 + $0x4] ss:$9 sm:$0xff] %v349_v11  ;;  %v358_v23 = vrot.slane %v334_v20, 1  ;;  %v359_v24 = vrot.slane %v334_v20, 2  ;;  %v360_v25 = vrot.slane %v334_v20, 3  ;;  %v361_v26 = vrot.slane %v334_v20, 4 }
  0x1f   : > { %847 = vst [vmem:[#allocation1 + $0x5] ss:$9 sm:$0xff] %v350_v12  ;;  %v335_v27 = vld [vmem:[#allocation2 + $0x30] sm:$0x7f]  ;;  %v362_v28 = vrot.slane %v334_v20, 5  ;;  %v363_v30 = vrot.slane %v334_v20, 6 }
  0x20   : > { %849 = vst [vmem:[#allocation1 + $0x6] ss:$9 sm:$0xff] %v351_v13  ;;  %v364_v31 = vrot.slane %v335_v27, 1  ;;  %v365_v32 = vrot.slane %v335_v27, 2  ;;  %v366_v33 = vrot.slane %v335_v27, 3  ;;  %v367_v34 = vrot.slane %v335_v27, 4 }
  0x21   : > { %851 = vst [vmem:[#allocation1 + $0x7] ss:$9 sm:$0xff] %v333_v14  ;;  %v336_v35 = vld [vmem:[#allocation2 + $0x40] sm:$0x7f]  ;;  %v368_v36 = vrot.slane %v335_v27, 5  ;;  %v369_v37 = vrot.slane %v335_v27, 6 }
  0x22   : > { %312 = vst.msk [vmem:[#allocation2 + $0x70] sm:$0xff] %vm296_vm0, %v6625_v0  ;;  %v370_v39 = vrot.slane %v336_v35, 1  ;;  %v371_v40 = vrot.slane %v336_v35, 2  ;;  %v372_v41 = vrot.slane %v336_v35, 3  ;;  %v373_v42 = vrot.slane %v336_v35, 4 }
  0x23   : > { %314 = vst.msk [vmem:[#allocation2 + $0x80] sm:$0xff] %vm296_vm0, %v6625_v0  ;;  %v337_v43 = vld [vmem:[#allocation2 + $0x50] sm:$0x7f]  ;;  %v374_v44 = vrot.slane %v336_v35, 5  ;;  %v375_v45 = vrot.slane %v336_v35, 6 }
  0x24   : > { %v376_v47 = vrot.slane %v337_v43, 1  ;;  %v377_v48 = vrot.slane %v337_v43, 2  ;;  %v378_v49 = vrot.slane %v337_v43, 3  ;;  %v379_v50 = vrot.slane %v337_v43, 4  ;;  %v338_v51 = vld [vmem:[#allocation2 + $0x60] sm:$0x7f] }
  0x25   : > { %v380_v52 = vrot.slane %v337_v43, 5  ;;  %v381_v53 = vrot.slane %v337_v43, 6  ;;  %v382_v54 = vrot.slane %v338_v51, 1  ;;  %v383_v56 = vrot.slane %v338_v51, 2  ;;  %v389_v7 = vld [vmem:[#allocation2 + $0x11] sm:$0x7f] }
  0x26   : > { %v384_v57 = vrot.slane %v338_v51, 3  ;;  %v385_v58 = vrot.slane %v338_v51, 4  ;;  %v386_v59 = vrot.slane %v338_v51, 5  ;;  %v387_v60 = vrot.slane %v338_v51, 6  ;;  %v390_v13 = vld [vmem:[#allocation2 + $0x21] sm:$0x7f] }
  0x27   : > { %v408_v8 = vrot.slane %v389_v7, 1  ;;  %v409_v9 = vrot.slane %v389_v7, 2  ;;  %v410_v10 = vrot.slane %v389_v7, 3  ;;  %v411_v12 = vrot.slane %v389_v7, 4  ;;  %299 = vst.msk [vmem:[#allocation2 + $0x8] sm:$0x1] %vm298_vm2, %v6625_v0 }
  0x28   : > { %v6718_v19 = vld [vmem:[#allocation1] sm:$0xff]  ;;  %v412_v14 = vrot.slane %v389_v7, 5  ;;  %301 = vst.msk [vmem:[#allocation2 + $0x18] sm:$0x1] %vm298_vm2, %v6625_v0 }
  0x29   : > { %853 = vst [vmem:[#allocation1] ss:$9 sm:$0xff] %v352_v15  ;;  %v413_v15 = vrot.slane %v389_v7, 6 }
  0x2a   : > { %854 = vst [vmem:[#allocation1 + $0x1] ss:$9 sm:$0xff] %v353_v16  ;;  %v414_v16 = vrot.slane %v390_v13, 1 }
  0x2b   : > { %855 = vst [vmem:[#allocation1 + $0x2] ss:$9 sm:$0xff] %v354_v17  ;;  %v415_v17 = vrot.slane %v390_v13, 2 }
  0x2c   : > { %856 = vst [vmem:[#allocation1 + $0x3] ss:$9 sm:$0xff] %v355_v18  ;;  %v416_v18 = vrot.slane %v390_v13, 3 }
  0x2d   : > { %857 = vst [vmem:[#allocation1 + $0x4] ss:$9 sm:$0xff] %v356_v21 }
  0x2e   : > { %858 = vst [vmem:[#allocation1 + $0x5] ss:$9 sm:$0xff] %v357_v22  ;;  %v391_v22 = vld [vmem:[#allocation2 + $0x31] sm:$0x7f] }
  0x2f   : > { %859 = vst [vmem:[#allocation1 + $0x6] ss:$9 sm:$0xff] %v334_v20  ;;  %v417_v20 = vrot.slane %v390_v13, 4 }
  0x30   : > { %860 = vst [vmem:[#allocation1 + $0x7] ss:$9 sm:$0xff] %v358_v23  ;;  %v418_v23 = vrot.slane %v390_v13, 5 }
  0x31   : > { %303 = vst.msk [vmem:[#allocation2 + $0x28] sm:$0x1] %vm298_vm2, %v6625_v0 }
  0x32   : > { %305 = vst.msk [vmem:[#allocation2 + $0x38] sm:$0x1] %vm298_vm2, %v6625_v0 }
  0x33   : > { %307 = vst.msk [vmem:[#allocation2 + $0x48] sm:$0x1] %vm298_vm2, %v6625_v0 }
  0x34   : > { %309 = vst.msk [vmem:[#allocation2 + $0x58] sm:$0x1] %vm298_vm2, %v6625_v0 }
  0x35   : > { %311 = vst.msk [vmem:[#allocation2 + $0x68] sm:$0x1] %vm298_vm2, %v6625_v0 }
  0x36   : > { %313 = vst.msk [vmem:[#allocation2 + $0x78] sm:$0x1] %vm298_vm2, %v6625_v0 }
  0x37   : > { %v6720_v29 = vld [vmem:[#allocation1] sm:$0xff]  ;;  %315 = vst.msk [vmem:[#allocation2 + $0x88] sm:$0x1] %vm298_vm2, %v6625_v0  ;;  %vm2659_vm2 = vcmask 259072  }
  0x38   : > { %862 = vst [vmem:[#allocation1] ss:$9 sm:$0xff] %v359_v24  ;;  %v419_v24 = vrot.slane %v390_v13, 6 }
  0x39   : > { %863 = vst [vmem:[#allocation1 + $0x1] ss:$9 sm:$0xff] %v360_v25  ;;  %v420_v25 = vrot.slane %v391_v22, 1 }
  0x3a   : > { %864 = vst [vmem:[#allocation1 + $0x2] ss:$9 sm:$0xff] %v361_v26  ;;  %v421_v26 = vrot.slane %v391_v22, 2 }
  0x3b   : > { %865 = vst [vmem:[#allocation1 + $0x3] ss:$9 sm:$0xff] %v362_v28  ;;  %v423_v28 = vrot.slane %v391_v22, 4 }
  0x3c   : > { %866 = vst [vmem:[#allocation1 + $0x4] ss:$9 sm:$0xff] %v363_v30  ;;  %v392_v30 = vld [vmem:[#allocation2 + $0x41] sm:$0x7f] }
  0x3d   : > { %867 = vst [vmem:[#allocation1 + $0x5] ss:$9 sm:$0xff] %v335_v27  ;;  %v422_v27 = vrot.slane %v391_v22, 3 }
  0x3e   : > { %868 = vst [vmem:[#allocation1 + $0x6] ss:$9 sm:$0xff] %v364_v31  ;;  %v424_v31 = vrot.slane %v391_v22, 5 }
  0x3f   : > { %869 = vst [vmem:[#allocation1 + $0x7] ss:$9 sm:$0xff] %v365_v32 }
  0x46   : > { %v6722_v38 = vld [vmem:[#allocation1] sm:$0xff] }
  0x47   : > { %871 = vst [vmem:[#allocation1] ss:$9 sm:$0xff] %v366_v33  ;;  %v425_v33 = vrot.slane %v391_v22, 6 }
  0x48   : > { %872 = vst [vmem:[#allocation1 + $0x1] ss:$9 sm:$0xff] %v367_v34  ;;  %v426_v34 = vrot.slane %v392_v30, 1 }
  0x49   : > { %873 = vst [vmem:[#allocation1 + $0x2] ss:$9 sm:$0xff] %v368_v36  ;;  %v428_v36 = vrot.slane %v392_v30, 3 }
  0x4a   : > { %874 = vst [vmem:[#allocation1 + $0x3] ss:$9 sm:$0xff] %v369_v37  ;;  %v429_v37 = vrot.slane %v392_v30, 4 }
  0x4b   : > { %875 = vst [vmem:[#allocation1 + $0x4] ss:$9 sm:$0xff] %v336_v35  ;;  %v427_v35 = vrot.slane %v392_v30, 2 }
  0x4c   : > { %876 = vst [vmem:[#allocation1 + $0x5] ss:$9 sm:$0xff] %v370_v39  ;;  %v393_v39 = vld [vmem:[#allocation2 + $0x51] sm:$0x7f] }
  0x4d   : > { %877 = vst [vmem:[#allocation1 + $0x6] ss:$9 sm:$0xff] %v371_v40  ;;  %v430_v40 = vrot.slane %v392_v30, 5 }
  0x4e   : > { %878 = vst [vmem:[#allocation1 + $0x7] ss:$9 sm:$0xff] %v372_v41  ;;  %v431_v41 = vrot.slane %v392_v30, 6 }
  0x55   : > { %v6724_v46 = vld [vmem:[#allocation1] sm:$0xff] }
  0x56   : > { %880 = vst [vmem:[#allocation1] ss:$9 sm:$0xff] %v373_v42 }
  0x57   : > { %881 = vst [vmem:[#allocation1 + $0x1] ss:$9 sm:$0xff] %v374_v44  ;;  %v433_v44 = vrot.slane %v393_v39, 2 }
  0x58   : > { %882 = vst [vmem:[#allocation1 + $0x2] ss:$9 sm:$0xff] %v375_v45  ;;  %v434_v45 = vrot.slane %v393_v39, 3 }
  0x59   : > { %883 = vst [vmem:[#allocation1 + $0x3] ss:$9 sm:$0xff] %v337_v43  ;;  %v432_v43 = vrot.slane %v393_v39, 1 }
  0x5a   : > { %884 = vst [vmem:[#allocation1 + $0x4] ss:$9 sm:$0xff] %v376_v47  ;;  %v435_v47 = vrot.slane %v393_v39, 4 }
  0x5b   : > { %885 = vst [vmem:[#allocation1 + $0x5] ss:$9 sm:$0xff] %v377_v48  ;;  %v394_v48 = vld [vmem:[#allocation2 + $0x61] sm:$0x7f] }
  0x5c   : > { %886 = vst [vmem:[#allocation1 + $0x6] ss:$9 sm:$0xff] %v378_v49  ;;  %v436_v49 = vrot.slane %v393_v39, 5 }
  0x5d   : > { %887 = vst [vmem:[#allocation1 + $0x7] ss:$9 sm:$0xff] %v379_v50  ;;  %v437_v50 = vrot.slane %v393_v39, 6 }
  0x64   : > { %v6726_v55 = vld [vmem:[#allocation1] sm:$0xff] }
  0x65   : > { %889 = vst [vmem:[#allocation1] ss:$9 sm:$0xff] %v380_v52 }
  0x66   : > { %890 = vst [vmem:[#allocation1 + $0x1] ss:$9 sm:$0xff] %v381_v53  ;;  %v439_v53 = vrot.slane %v394_v48, 2 }
  0x67   : > { %891 = vst [vmem:[#allocation1 + $0x2] ss:$9 sm:$0xff] %v338_v51  ;;  %v438_v51 = vrot.slane %v394_v48, 1 }
  0x68   : > { %892 = vst [vmem:[#allocation1 + $0x3] ss:$9 sm:$0xff] %v382_v54  ;;  %v440_v54 = vrot.slane %v394_v48, 3 }
  0x69   : > { %893 = vst [vmem:[#allocation1 + $0x4] ss:$9 sm:$0xff] %v383_v56  ;;  %v441_v56 = vrot.slane %v394_v48, 4 }
  0x6a   : > { %894 = vst [vmem:[#allocation1 + $0x5] ss:$9 sm:$0xff] %v384_v57  ;;  %v442_v57 = vrot.slane %v394_v48, 5 }
  0x6b   : > { %895 = vst [vmem:[#allocation1 + $0x6] ss:$9 sm:$0xff] %v385_v58  ;;  %v443_v58 = vrot.slane %v394_v48, 6 }
  0x6c   : > { %896 = vst [vmem:[#allocation1 + $0x7] ss:$9 sm:$0xff] %v386_v59 }
  0x73   : > { %v6728_v61 = vld [vmem:[#allocation1] sm:$0xff] }
  0x74   : > { %898 = vst [vmem:[#allocation1] ss:$9 sm:$0xff] %v387_v60  ;;  %v444_v60 = vld [vmem:[#allocation2 + $0x2] sm:$0x7f] }
  0x7b   : > { %v6730_v3 = vld [vmem:[#allocation1] sm:$0xff] }
  0x7c   : > { %907 = vst [vmem:[#allocation1] ss:$9 sm:$0xff] %v388_v62  ;;  %v458_v62 = vrot.slane %v444_v60, 1 }
  0x7d   : > { %909 = vst [vmem:[#allocation1 + $0x1] ss:$9 sm:$0xff] %v402_v63  ;;  %v459_v63 = vrot.slane %v444_v60, 2 }
  0x7e   : > { %911 = vst [vmem:[#allocation1 + $0x2] ss:$9 sm:$0xff] %v403_v1 }
  0x7f   : > { %913 = vst [vmem:[#allocation1 + $0x3] ss:$9 sm:$0xff] %v404_v2  ;;  %v460_v2 = vrot.slane %v444_v60, 3 }
  0x80   : > { %915 = vst [vmem:[#allocation1 + $0x4] ss:$9 sm:$0xff] %v405_v4  ;;  %v461_v4 = vrot.slane %v444_v60, 4 }
  0x81   : > { %917 = vst [vmem:[#allocation1 + $0x5] ss:$9 sm:$0xff] %v406_v5  ;;  %v462_v5 = vrot.slane %v444_v60, 5 }
  0x82   : > { %919 = vst [vmem:[#allocation1 + $0x6] ss:$9 sm:$0xff] %v407_v6  ;;  %v463_v6 = vrot.slane %v444_v60, 6 }
  0x83   : > { %921 = vst [vmem:[#allocation1 + $0x7] ss:$9 sm:$0xff] %v389_v7  ;;  %v445_v7 = vld [vmem:[#allocation2 + $0x12] sm:$0x7f] }
  0x8a   : > { %v922_v11 = vld [vmem:[#allocation1] sm:$0xff] }
  0x8b   : > { %970 = vrot.lane.b32.xlu0 %v922_v11, %s6626_s14  ;;  %923 = vst [vmem:[#allocation1] ss:$9 sm:$0xff] %v408_v8  ;;  %v464_v8 = vrot.slane %v445_v7, 1  ;;  %v467_v11 = vrot.slane %v445_v7, 4 }
  0x8c   : > { %924 = vst [vmem:[#allocation1 + $0x1] ss:$9 sm:$0xff] %v409_v9  ;;  %v465_v9 = vrot.slane %v445_v7, 2 }
  0x8d   : > { %925 = vst [vmem:[#allocation1 + $0x2] ss:$9 sm:$0xff] %v410_v10  ;;  %v466_v10 = vrot.slane %v445_v7, 3 }
  0x8e   : > { %926 = vst [vmem:[#allocation1 + $0x3] ss:$9 sm:$0xff] %v411_v12 }
  0x8f   : > { %927 = vst [vmem:[#allocation1 + $0x4] ss:$9 sm:$0xff] %v412_v14  ;;  %v468_v14 = vrot.slane %v445_v7, 5 }
  0x90   : > { %928 = vst [vmem:[#allocation1 + $0x5] ss:$9 sm:$0xff] %v413_v15  ;;  %v469_v15 = vrot.slane %v445_v7, 6 }
  0x91   : > { %929 = vst [vmem:[#allocation1 + $0x6] ss:$9 sm:$0xff] %v390_v13  ;;  %v446_v13 = vld [vmem:[#allocation2 + $0x22] sm:$0x7f] }
  0x92   : > { %930 = vst [vmem:[#allocation1 + $0x7] ss:$9 sm:$0xff] %v414_v16  ;;  %v470_v16 = vrot.slane %v446_v13, 1 }
  0x99   : > { %v931_v21 = vld [vmem:[#allocation1] sm:$0xff] }
  0x9a   : > { %972 = vrot.lane.b32.xlu0 %v931_v21, %s6626_s14  ;;  %932 = vst [vmem:[#allocation1] ss:$9 sm:$0xff] %v415_v17  ;;  %v471_v17 = vrot.slane %v446_v13, 2  ;;  %v447_v21 = vld [vmem:[#allocation2 + $0x32] sm:$0x7f] }
  0x9b   : > { %933 = vst [vmem:[#allocation1 + $0x1] ss:$9 sm:$0xff] %v416_v18  ;;  %v472_v18 = vrot.slane %v446_v13, 3 }
  0x9c   : > { %934 = vst [vmem:[#allocation1 + $0x2] ss:$9 sm:$0xff] %v417_v20  ;;  %v473_v20 = vrot.slane %v446_v13, 4 }
  0x9d   : > { %935 = vst [vmem:[#allocation1 + $0x3] ss:$9 sm:$0xff] %v418_v23 }
  0x9e   : > { %936 = vst [vmem:[#allocation1 + $0x4] ss:$9 sm:$0xff] %v419_v24  ;;  %v475_v24 = vrot.slane %v446_v13, 6 }
  0x9f   : > { %937 = vst [vmem:[#allocation1 + $0x5] ss:$9 sm:$0xff] %v391_v22  ;;  %v474_v22 = vrot.slane %v446_v13, 5 }
  0xa0   : > { %938 = vst [vmem:[#allocation1 + $0x6] ss:$9 sm:$0xff] %v420_v25  ;;  %v476_v25 = vrot.slane %v447_v21, 1 }
  0xa1   : > { %939 = vst [vmem:[#allocation1 + $0x7] ss:$9 sm:$0xff] %v421_v26  ;;  %v477_v26 = vrot.slane %v447_v21, 2 }
  0xa8   : > { %v940_v32 = vld [vmem:[#allocation1] sm:$0xff] }
  0xa9   : > { %974 = vrot.lane.b32.xlu1 %v940_v32, %s6626_s14  ;;  %941 = vst [vmem:[#allocation1] ss:$9 sm:$0xff] %v422_v27  ;;  %v478_v27 = vrot.slane %v447_v21, 3  ;;  %v481_v32 = vrot.slane %v447_v21, 6 }
  0xaa   : > { %942 = vst [vmem:[#allocation1 + $0x1] ss:$9 sm:$0xff] %v423_v28  ;;  %v479_v28 = vrot.slane %v447_v21, 4 }
  0xab   : > { %943 = vst [vmem:[#allocation1 + $0x2] ss:$9 sm:$0xff] %v424_v31  ;;  %v480_v31 = vrot.slane %v447_v21, 5 }
  0xac   : > { %944 = vst [vmem:[#allocation1 + $0x3] ss:$9 sm:$0xff] %v425_v33 }
  0xad   : > { %945 = vst [vmem:[#allocation1 + $0x4] ss:$9 sm:$0xff] %v392_v30  ;;  %v448_v30 = vld [vmem:[#allocation2 + $0x42] sm:$0x7f] }
  0xae   : > { %946 = vst [vmem:[#allocation1 + $0x5] ss:$9 sm:$0xff] %v426_v34  ;;  %v482_v34 = vrot.slane %v448_v30, 1 }
  0xaf   : > { %947 = vst [vmem:[#allocation1 + $0x6] ss:$9 sm:$0xff] %v427_v35  ;;  %v483_v35 = vrot.slane %v448_v30, 2 }
  0xb0   : > { %948 = vst [vmem:[#allocation1 + $0x7] ss:$9 sm:$0xff] %v428_v36  ;;  %v484_v36 = vrot.slane %v448_v30, 3 }
  0xb7   : > { %v949_v42 = vld [vmem:[#allocation1] sm:$0xff] }
  0xb8   : > { %976 = vrot.lane.b32.xlu1 %v949_v42, %s6626_s14  ;;  %950 = vst [vmem:[#allocation1] ss:$9 sm:$0xff] %v429_v37  ;;  %v485_v37 = vrot.slane %v448_v30, 4 }
  0xb9   : > { %951 = vst [vmem:[#allocation1 + $0x1] ss:$9 sm:$0xff] %v430_v40  ;;  %v486_v40 = vrot.slane %v448_v30, 5 }
  0xba   : > { %952 = vst [vmem:[#allocation1 + $0x2] ss:$9 sm:$0xff] %v431_v41  ;;  %v487_v41 = vrot.slane %v448_v30, 6 }
  0xbb   : > { %953 = vst [vmem:[#allocation1 + $0x3] ss:$9 sm:$0xff] %v393_v39  ;;  %v449_v39 = vld [vmem:[#allocation2 + $0x52] sm:$0x7f] }
  0xbc   : > { %954 = vst [vmem:[#allocation1 + $0x4] ss:$9 sm:$0xff] %v432_v43  ;;  %v488_v43 = vrot.slane %v449_v39, 1 }
  0xbd   : > { %955 = vst [vmem:[#allocation1 + $0x5] ss:$9 sm:$0xff] %v433_v44  ;;  %v489_v44 = vrot.slane %v449_v39, 2 }
  0xbe   : > { %956 = vst [vmem:[#allocation1 + $0x6] ss:$9 sm:$0xff] %v434_v45  ;;  %v490_v45 = vrot.slane %v449_v39, 3 }
  0xbf   : > { %957 = vst [vmem:[#allocation1 + $0x7] ss:$9 sm:$0xff] %v435_v47  ;;  %v491_v47 = vrot.slane %v449_v39, 4 }
  0xc6   : > { %v958_v52 = vld [vmem:[#allocation1] sm:$0xff] }
  0xc7   : > { %959 = vst [vmem:[#allocation1] ss:$9 sm:$0xff] %v436_v49  ;;  %978 = vrot.lane.b32.xlu2 %v958_v52, %s6626_s14  ;;  %v492_v49 = vrot.slane %v449_v39, 5 }
  0xc8   : > { %960 = vst [vmem:[#allocation1 + $0x1] ss:$9 sm:$0xff] %v437_v50  ;;  %v493_v50 = vrot.slane %v449_v39, 6 }
  0xc9   : > { %961 = vst [vmem:[#allocation1 + $0x2] ss:$9 sm:$0xff] %v394_v48  ;;  %v450_v48 = vld [vmem:[#allocation2 + $0x62] sm:$0x7f] }
  0xca   : > { %962 = vst [vmem:[#allocation1 + $0x3] ss:$9 sm:$0xff] %v438_v51  ;;  %v494_v51 = vrot.slane %v450_v48, 1 }
  0xcb   : > { %963 = vst [vmem:[#allocation1 + $0x4] ss:$9 sm:$0xff] %v439_v53  ;;  %v495_v53 = vrot.slane %v450_v48, 2 }
  0xcc   : > { %964 = vst [vmem:[#allocation1 + $0x5] ss:$9 sm:$0xff] %v440_v54  ;;  %v496_v54 = vrot.slane %v450_v48, 3 }
  0xcd   : > { %965 = vst [vmem:[#allocation1 + $0x6] ss:$9 sm:$0xff] %v441_v56  ;;  %v497_v56 = vrot.slane %v450_v48, 4 }
  0xce   : > { %966 = vst [vmem:[#allocation1 + $0x7] ss:$9 sm:$0xff] %v442_v57  ;;  %v498_v57 = vrot.slane %v450_v48, 5 }
  0xd5   : > { %v967_v59 = vld [vmem:[#allocation1] sm:$0xff] }
  0xd6   : > { %968 = vst [vmem:[#allocation1] ss:$9 sm:$0xff] %v443_v58  ;;  %980 = vrot.lane.b32.xlu2 %v967_v59, %s6626_s14  ;;  %v499_v58 = vrot.slane %v450_v48, 6 }
  0xdd   : > { %v969_v1 = vld [vmem:[#allocation1] sm:$0xff] }
  0xde   : > { %982 = vrot.lane.b32.xlu0 %v969_v1, %s6626_s14  ;;  %991 = vst [vmem:[#allocation1] ss:$9 sm:$0xff] %v444_v60  ;;  %v500_v60 = vld [vmem:[#allocation2 + $0x10] sm:$0x7f] }
  0xdf   : > { %993 = vst [vmem:[#allocation1 + $0x1] ss:$9 sm:$0xff] %v458_v62  ;;  %v514_v62 = vrot.slane %v500_v60, 1  ;;  %v516_v1 = vrot.slane %v500_v60, 3 }
  0xe0   : > { %995 = vst [vmem:[#allocation1 + $0x2] ss:$9 sm:$0xff] %v459_v63  ;;  %v515_v63 = vrot.slane %v500_v60, 2 }
  0xe1   : > { %997 = vst [vmem:[#allocation1 + $0x3] ss:$9 sm:$0xff] %v460_v2 }
  0xe2   : > { %999 = vst [vmem:[#allocation1 + $0x4] ss:$9 sm:$0xff] %v461_v4  ;;  %v517_v4 = vrot.slane %v500_v60, 4 }
  0xe3   : > { %1001 = vst [vmem:[#allocation1 + $0x5] ss:$9 sm:$0xff] %v462_v5  ;;  %v518_v5 = vrot.slane %v500_v60, 5 }
  0xe4   : > { %1003 = vst [vmem:[#allocation1 + $0x6] ss:$9 sm:$0xff] %v463_v6  ;;  %v519_v6 = vrot.slane %v500_v60, 6 }
  0xe5   : > { %1005 = vst [vmem:[#allocation1 + $0x7] ss:$9 sm:$0xff] %v445_v7  ;;  %v501_v7 = vld [vmem:[#allocation2 + $0x20] sm:$0x7f] }
  0xec   : > { %v6757_v12 = vld [vmem:[#allocation1] sm:$0xff] }
  0xed   : > { %1007 = vst [vmem:[#allocation1] ss:$9 sm:$0xff] %v464_v8  ;;  %v520_v8 = vrot.slane %v501_v7, 1 }
  0xee   : > { %1008 = vst [vmem:[#allocation1 + $0x1] ss:$9 sm:$0xff] %v465_v9  ;;  %v521_v9 = vrot.slane %v501_v7, 2 }
  0xef   : > { %1009 = vst [vmem:[#allocation1 + $0x2] ss:$9 sm:$0xff] %v466_v10  ;;  %v522_v10 = vrot.slane %v501_v7, 3 }
  0xf0   : > { %1010 = vst [vmem:[#allocation1 + $0x3] ss:$9 sm:$0xff] %v467_v11 }
  0xf1   : > { %1011 = vst [vmem:[#allocation1 + $0x4] ss:$9 sm:$0xff] %v468_v14  ;;  %v502_v14 = vld [vmem:[#allocation2 + $0x30] sm:$0x7f] }
  0xf2   : > { %1012 = vst [vmem:[#allocation1 + $0x5] ss:$9 sm:$0xff] %v469_v15  ;;  %v524_v15 = vrot.slane %v501_v7, 5 }
  0xf3   : > { %1013 = vst [vmem:[#allocation1 + $0x6] ss:$9 sm:$0xff] %v446_v13  ;;  %v523_v13 = vrot.slane %v501_v7, 4 }
  0xf4   : > { %1014 = vst [vmem:[#allocation1 + $0x7] ss:$9 sm:$0xff] %v470_v16  ;;  %v525_v16 = vrot.slane %v501_v7, 6 }
  0xfb   : > { %v6759_v23 = vld [vmem:[#allocation1] sm:$0xff] }
  0xfc   : > { %1016 = vst [vmem:[#allocation1] ss:$9 sm:$0xff] %v471_v17  ;;  %v526_v17 = vrot.slane %v502_v14, 1 }
  0xfd   : > { %1017 = vst [vmem:[#allocation1 + $0x1] ss:$9 sm:$0xff] %v472_v18  ;;  %v322_v18 = vld [vmem:[%s6696_s13 + $0x30] sm:$0x7f] }
  0xfe   : > { %1018 = vst [vmem:[#allocation1 + $0x2] ss:$9 sm:$0xff] %v473_v20  ;;  %v527_v20 = vrot.slane %v502_v14, 2 }
  0xff   : > { %1019 = vst [vmem:[#allocation1 + $0x3] ss:$9 sm:$0xff] %v474_v22  ;;  %v529_v22 = vrot.slane %v502_v14, 4 }
 0x100   : > { %1020 = vst [vmem:[#allocation1 + $0x4] ss:$9 sm:$0xff] %v475_v24  ;;  %v1559_v24 = vld [vmem:[#allocation4 + $0x78] sm:$0xff] }
 0x101   : > { %1021 = vst [vmem:[#allocation1 + $0x5] ss:$9 sm:$0xff] %v447_v21  ;;  %v528_v21 = vrot.slane %v502_v14, 3  ;;  %1634 = vmatpush.msra.mxu1 %v1559_v24  ;;  %v556_v24 = vld [vmem:[#allocation2 + $0x11] sm:$0x7f] }
 0x102   : > { %1022 = vst [vmem:[#allocation1 + $0x6] ss:$9 sm:$0xff] %v476_v25  ;;  %v1558_v25 = vld [vmem:[#allocation4 + $0x70] sm:$0xff] }
 0x103   : > { %1023 = vst [vmem:[#allocation1 + $0x7] ss:$9 sm:$0xff] %v477_v26  ;;  %v503_v26 = vld [vmem:[#allocation2 + $0x40] sm:$0x7f]  ;;  %1635 = vmatpush.msra.mxu1 %v1558_v25  ;;  %v570_v25 = vrot.slane %v556_v24, 1 }
 0x104   : > { %331 = vst.msk [vmem:[#allocation2 + $0x71] sm:$0x7f] %vm324_vm1, %v322_v18  ;;  %vm2464_vm1 = vcmask 261120  }
 0x105   : > { %2465 = vst.msk [vmem:[#allocation3] sm:$0xff] %vm2464_vm1, %v6625_v0 }
 0x106   : > { %2466 = vst.msk [vmem:[#allocation3 + $0x8] sm:$0xff] %vm2464_vm1, %v6625_v0 }
 0x107   : > { %2469 = vst.msk [vmem:[#allocation3 + $0x20] sm:$0xff] %vm2464_vm1, %v6625_v0 }
 0x108   : > { %2470 = vst.msk [vmem:[#allocation3 + $0x28] sm:$0xff] %vm2464_vm1, %v6625_v0 }
 0x109   : > { %2471 = vst.msk [vmem:[#allocation3 + $0x30] sm:$0xff] %vm2464_vm1, %v6625_v0 }
 0x10a   : > { %v6761_v33 = vld [vmem:[#allocation1] sm:$0xff]  ;;  %2472 = vst.msk [vmem:[#allocation3 + $0x38] sm:$0xff] %vm2464_vm1, %v6625_v0 }
 0x10b   : > { %1025 = vst [vmem:[#allocation1] ss:$9 sm:$0xff] %v478_v27  ;;  %v530_v27 = vrot.slane %v502_v14, 5 }
 0x10c   : > { %1026 = vst [vmem:[#allocation1 + $0x1] ss:$9 sm:$0xff] %v479_v28 }
 0x10d   : > { %1027 = vst [vmem:[#allocation1 + $0x2] ss:$9 sm:$0xff] %v480_v31  ;;  %v1557_v31 = vld [vmem:[#allocation4 + $0x68] sm:$0xff] }
 0x10e   : > { %1028 = vst [vmem:[#allocation1 + $0x3] ss:$9 sm:$0xff] %v481_v32  ;;  %v532_v32 = vrot.slane %v503_v26, 1  ;;  %1636 = vmatpush.msra.mxu1 %v1557_v31  ;;  %v574_v31 = vrot.slane %v556_v24, 5 }
 0x10f   : > { %1029 = vst [vmem:[#allocation1 + $0x4] ss:$9 sm:$0xff] %v448_v30  ;;  %v531_v30 = vrot.slane %v502_v14, 6 }
 0x110   : > { %1030 = vst [vmem:[#allocation1 + $0x5] ss:$9 sm:$0xff] %v482_v34  ;;  %v1556_v34 = vld [vmem:[#allocation4 + $0x60] sm:$0xff] }
 0x111   : > { %1031 = vst [vmem:[#allocation1 + $0x6] ss:$9 sm:$0xff] %v483_v35  ;;  %v533_v35 = vrot.slane %v503_v26, 2  ;;  %1637 = vmatpush.msra.mxu1 %v1556_v34  ;;  %v557_v34 = vld [vmem:[#allocation2 + $0x21] sm:$0x7f] }
 0x112   : > { %1032 = vst [vmem:[#allocation1 + $0x7] ss:$9 sm:$0xff] %v484_v36  ;;  %v1555_v36 = vld [vmem:[#allocation4 + $0x58] sm:$0xff] }
 0x113   : > { %1638 = vmatpush.msra.mxu1 %v1555_v36  ;;  %v577_v36 = vrot.slane %v557_v34, 2  ;;  %2473 = vst.msk [vmem:[#allocation3 + $0x40] sm:$0xff] %vm2464_vm1, %v6625_v0 }
 0x114   : > { %2474 = vst.msk [vmem:[#allocation3 + $0x48] sm:$0xff] %vm2464_vm1, %v6625_v0 }
 0x115   : > { %2475 = vst.msk [vmem:[#allocation3 + $0x50] sm:$0xff] %vm2464_vm1, %v6625_v0 }
 0x116   : > { %2476 = vst.msk [vmem:[#allocation3 + $0x58] sm:$0xff] %vm2464_vm1, %v6625_v0 }
 0x117   : > { %2477 = vst.msk [vmem:[#allocation3 + $0x60] sm:$0xff] %vm2464_vm1, %v6625_v0 }
 0x118   : > { %2478 = vst.msk [vmem:[#allocation3 + $0x68] sm:$0xff] %vm2464_vm1, %v6625_v0 }
 0x119   : > { %v6763_v42 = vld [vmem:[#allocation1] sm:$0xff]  ;;  %2479 = vst.msk [vmem:[#allocation3 + $0x70] sm:$0xff] %vm2464_vm1, %v6625_v0 }
 0x11a   : > { %1034 = vst [vmem:[#allocation1] ss:$9 sm:$0xff] %v485_v37  ;;  %v1554_v37 = vld [vmem:[#allocation4 + $0x50] sm:$0xff] }
 0x11b   : > { %1035 = vst [vmem:[#allocation1 + $0x1] ss:$9 sm:$0xff] %v486_v40  ;;  %1639 = vmatpush.msra.mxu1 %v1554_v37  ;;  %v535_v40 = vrot.slane %v503_v26, 4  ;;  %v578_v37 = vrot.slane %v557_v34, 3 }
 0x11c   : > { %1036 = vst [vmem:[#allocation1 + $0x2] ss:$9 sm:$0xff] %v487_v41  ;;  %v504_v41 = vld [vmem:[#allocation2 + $0x50] sm:$0x7f] }
 0x11d   : > { %1037 = vst [vmem:[#allocation1 + $0x3] ss:$9 sm:$0xff] %v449_v39  ;;  %v534_v39 = vrot.slane %v503_v26, 3 }
 0x11e   : > { %1038 = vst [vmem:[#allocation1 + $0x4] ss:$9 sm:$0xff] %v488_v43  ;;  %v536_v43 = vrot.slane %v503_v26, 5 }
 0x11f   : > { %1039 = vst [vmem:[#allocation1 + $0x5] ss:$9 sm:$0xff] %v489_v44 }
 0x120   : > { %1040 = vst [vmem:[#allocation1 + $0x6] ss:$9 sm:$0xff] %v490_v45  ;;  %v537_v45 = vrot.slane %v503_v26, 6 }
 0x121   : > { %1041 = vst [vmem:[#allocation1 + $0x7] ss:$9 sm:$0xff] %v491_v47  ;;  %v538_v47 = vrot.slane %v504_v41, 1 }
 0x122   : > { %2480 = vst.msk [vmem:[#allocation3 + $0x78] sm:$0xff] %vm2464_vm1, %v6625_v0 }
 0x123   : > { %2481 = vst.msk [vmem:[#allocation3 + $0x80] sm:$0xff] %vm2464_vm1, %v6625_v0 }
 0x124   : > { %2482 = vst.msk [vmem:[#allocation3 + $0x88] sm:$0xff] %vm2464_vm1, %v6625_v0 }
 0x125   : > { %2483 = vst.msk [vmem:[#allocation3 + $0x90] sm:$0xff] %vm2464_vm1, %v6625_v0 }
 0x126   : > { %2484 = vst.msk [vmem:[#allocation3 + $0x98] sm:$0xff] %vm2464_vm1, %v6625_v0 }
 0x127   : > { %2485 = vst.msk [vmem:[#allocation3 + $0xa0] sm:$0xff] %vm2464_vm1, %v6625_v0 }
 0x128   : > { %v6765_v52 = vld [vmem:[#allocation1] sm:$0xff]  ;;  %2486 = vst.msk [vmem:[#allocation3 + $0xa8] sm:$0xff] %vm2464_vm1, %v6625_v0 }
 0x129   : > { %1043 = vst [vmem:[#allocation1] ss:$9 sm:$0xff] %v492_v49  ;;  %v540_v49 = vrot.slane %v504_v41, 3 }
 0x12a   : > { %1044 = vst [vmem:[#allocation1 + $0x1] ss:$9 sm:$0xff] %v493_v50  ;;  %v541_v50 = vrot.slane %v504_v41, 4 }
 0x12b   : > { %1045 = vst [vmem:[#allocation1 + $0x2] ss:$9 sm:$0xff] %v450_v48  ;;  %v539_v48 = vrot.slane %v504_v41, 2 }
 0x12c   : > { %1046 = vst [vmem:[#allocation1 + $0x3] ss:$9 sm:$0xff] %v494_v51  ;;  %v505_v51 = vld [vmem:[#allocation2 + $0x60] sm:$0x7f] }
 0x12d   : > { %1047 = vst [vmem:[#allocation1 + $0x4] ss:$9 sm:$0xff] %v495_v53  ;;  %v542_v53 = vrot.slane %v504_v41, 5 }
 0x12e   : > { %1048 = vst [vmem:[#allocation1 + $0x5] ss:$9 sm:$0xff] %v496_v54  ;;  %v543_v54 = vrot.slane %v504_v41, 6 }
 0x12f   : > { %1049 = vst [vmem:[#allocation1 + $0x6] ss:$9 sm:$0xff] %v497_v56  ;;  %v1553_v56 = vld [vmem:[#allocation4 + $0x48] sm:$0xff] }
 0x130   : > { %1050 = vst [vmem:[#allocation1 + $0x7] ss:$9 sm:$0xff] %v498_v57  ;;  %v1552_v57 = vld [vmem:[#allocation4 + $0x40] sm:$0xff]  ;;  %1640 = vmatpush.msra.mxu1 %v1553_v56 }
 0x131   : > { %2487 = vst.msk [vmem:[#allocation3 + $0xb0] sm:$0xff] %vm2464_vm1, %v6625_v0 }
 0x132   : > { %1641 = vmatpush.msra.mxu1 %v1552_v57  ;;  %2488 = vst.msk [vmem:[#allocation3 + $0xb8] sm:$0xff] %vm2464_vm1, %v6625_v0 }
 0x133   : > { %2489 = vst.msk [vmem:[#allocation3 + $0xc0] sm:$0xff] %vm2464_vm1, %v6625_v0 }
 0x134   : > { %2490 = vst.msk [vmem:[#allocation3 + $0xc8] sm:$0xff] %vm2464_vm1, %v6625_v0 }
 0x135   : > { %2491 = vst.msk [vmem:[#allocation3 + $0xd0] sm:$0xff] %vm2464_vm1, %v6625_v0 }
 0x136   : > { %2492 = vst.msk [vmem:[#allocation3 + $0xd8] sm:$0xff] %vm2464_vm1, %v6625_v0 }
 0x137   : > { %v6767_v59 = vld [vmem:[#allocation1] sm:$0xff]  ;;  %2493 = vst.msk [vmem:[#allocation3 + $0xe0] sm:$0xff] %vm2464_vm1, %v6625_v0 }
 0x138   : > { %1052 = vst [vmem:[#allocation1] ss:$9 sm:$0xff] %v499_v58 }
 0x139   : > { %2494 = vst.msk [vmem:[#allocation3 + $0xe8] sm:$0xff] %vm2464_vm1, %v6625_v0 }
 0x13a   : > { %2467 = vst.msk [vmem:[#allocation3 + $0x10] sm:$0xff] %vm2464_vm1, %v6625_v0 }
 0x13b   : > { %2468 = vst.msk [vmem:[#allocation3 + $0x18] sm:$0xff] %vm2464_vm1, %v6625_v0 }
 0x13c   : > { %2495 = vst.msk [vmem:[#allocation3 + $0xf0] sm:$0xff] %vm2464_vm1, %v6625_v0 }
 0x13d   : > { %2496 = vst.msk [vmem:[#allocation3 + $0xf8] sm:$0xff] %vm2464_vm1, %v6625_v0 }
 0x13f   : > { %v6769_v2 = vld [vmem:[#allocation1] sm:$0xff] }
 0x140   : > { %1061 = vst [vmem:[#allocation1] ss:$9 sm:$0xff] %v500_v60  ;;  %v544_v60 = vrot.slane %v505_v51, 1 }
 0x141   : > { %1063 = vst [vmem:[#allocation1 + $0x1] ss:$9 sm:$0xff] %v514_v62  ;;  %v1551_v62 = vld [vmem:[#allocation4 + $0x38] sm:$0xff] }
 0x142   : > { %1065 = vst [vmem:[#allocation1 + $0x2] ss:$9 sm:$0xff] %v515_v63  ;;  %v545_v63 = vrot.slane %v505_v51, 2  ;;  %1642 = vmatpush.msra.mxu1 %v1551_v62  ;;  %v560_v62 = vld [vmem:[#allocation2 + $0x51] sm:$0x7f] }
 0x143   : > { %1067 = vst [vmem:[#allocation1 + $0x3] ss:$9 sm:$0xff] %v516_v1  ;;  %v546_v1 = vrot.slane %v505_v51, 3 }
 0x144   : > { %1069 = vst [vmem:[#allocation1 + $0x4] ss:$9 sm:$0xff] %v517_v4  ;;  %v1550_v4 = vld [vmem:[#allocation4 + $0x30] sm:$0xff] }
 0x145   : > { %1071 = vst [vmem:[#allocation1 + $0x5] ss:$9 sm:$0xff] %v518_v5  ;;  %v547_v5 = vrot.slane %v505_v51, 4  ;;  %1643 = vmatpush.msra.mxu1 %v1550_v4 }
 0x146   : > { %1073 = vst [vmem:[#allocation1 + $0x6] ss:$9 sm:$0xff] %v519_v6  ;;  %v1549_v6 = vld [vmem:[#allocation4 + $0x28] sm:$0xff] }
 0x147   : > { %1075 = vst [vmem:[#allocation1 + $0x7] ss:$9 sm:$0xff] %v501_v7  ;;  %v1548_v7 = vld [vmem:[#allocation4 + $0x20] sm:$0xff]  ;;  %1644 = vmatpush.msra.mxu1 %v1549_v6  ;;  %v595_v6 = vrot.slane %v560_v62, 2 }
 0x149   : > { %1645 = vmatpush.msra.mxu1 %v1548_v7  ;;  %v596_v7 = vrot.slane %v560_v62, 3 }
 0x14e   : > { %v1076_v11 = vld [vmem:[#allocation1] sm:$0xff] }
 0x14f   : > { %1124 = vrot.lane.b32.xlu1 %v1076_v11, %s6626_s14  ;;  %1077 = vst [vmem:[#allocation1] ss:$9 sm:$0xff] %v520_v8  ;;  %v1547_v8 = vld [vmem:[#allocation4 + $0x18] sm:$0xff]  ;;  %v548_v11 = vrot.slane %v505_v51, 5 }
 0x150   : > { %1078 = vst [vmem:[#allocation1 + $0x1] ss:$9 sm:$0xff] %v521_v9  ;;  %v1546_v9 = vld [vmem:[#allocation4 + $0x10] sm:$0xff]  ;;  %1646 = vmatpush.msra.mxu1 %v1547_v8  ;;  %v597_v8 = vrot.slane %v560_v62, 4 }
 0x151   : > { %1079 = vst [vmem:[#allocation1 + $0x2] ss:$9 sm:$0xff] %v522_v10  ;;  %v506_v10 = vld [vmem:[#allocation2 + $0x70] sm:$0x7f] }
 0x152   : > { %1080 = vst [vmem:[#allocation1 + $0x3] ss:$9 sm:$0xff] %v523_v13  ;;  %v549_v13 = vrot.slane %v505_v51, 6  ;;  %1647 = vmatpush.msra.mxu1 %v1546_v9  ;;  %v553_v18 = vrot.slane %v506_v10, 4  ;;  %v561_v9 = vld [vmem:[#allocation2 + $0x61] sm:$0x7f] }
 0x153   : > { %1081 = vst [vmem:[#allocation1 + $0x4] ss:$9 sm:$0xff] %v524_v15 }
 0x154   : > { %1082 = vst [vmem:[#allocation1 + $0x5] ss:$9 sm:$0xff] %v525_v16  ;;  %v551_v16 = vrot.slane %v506_v10, 2 }
 0x155   : > { %1083 = vst [vmem:[#allocation1 + $0x6] ss:$9 sm:$0xff] %v502_v14  ;;  %v550_v14 = vrot.slane %v506_v10, 1 }
 0x156   : > { %1084 = vst [vmem:[#allocation1 + $0x7] ss:$9 sm:$0xff] %v526_v17  ;;  %v552_v17 = vrot.slane %v506_v10, 3 }
 0x15d   : > { %v1085_v28 = vld [vmem:[#allocation1] sm:$0xff] }
 0x15e   : > { %1086 = vst [vmem:[#allocation1] ss:$9 sm:$0xff] %v527_v20  ;;  %1126 = vrot.lane.b32.xlu2 %v1085_v28, %s6626_s14  ;;  %v554_v20 = vrot.slane %v506_v10, 5  ;;  %v572_v28 = vrot.slane %v556_v24, 3 }
 0x15f   : > { %1087 = vst [vmem:[#allocation1 + $0x1] ss:$9 sm:$0xff] %v528_v21  ;;  %v555_v21 = vrot.slane %v506_v10, 6 }
 0x160   : > { %1088 = vst [vmem:[#allocation1 + $0x2] ss:$9 sm:$0xff] %v529_v22 }
 0x161   : > { %1089 = vst [vmem:[#allocation1 + $0x3] ss:$9 sm:$0xff] %v530_v27 }
 0x162   : > { %1090 = vst [vmem:[#allocation1 + $0x4] ss:$9 sm:$0xff] %v531_v30  ;;  %v573_v30 = vrot.slane %v556_v24, 4 }
 0x163   : > { %1091 = vst [vmem:[#allocation1 + $0x5] ss:$9 sm:$0xff] %v503_v26  ;;  %v571_v26 = vrot.slane %v556_v24, 2 }
 0x164   : > { %1092 = vst [vmem:[#allocation1 + $0x6] ss:$9 sm:$0xff] %v532_v32  ;;  %v575_v32 = vrot.slane %v556_v24, 6 }
 0x165   : > { %1093 = vst [vmem:[#allocation1 + $0x7] ss:$9 sm:$0xff] %v533_v35  ;;  %v576_v35 = vrot.slane %v557_v34, 1 }
 0x16c   : > { %v1094_v44 = vld [vmem:[#allocation1] sm:$0xff] }
 0x16d   : > { %1128 = vrot.lane.b32.xlu0 %v1094_v44, %s6626_s14  ;;  %1095 = vst [vmem:[#allocation1] ss:$9 sm:$0xff] %v534_v39  ;;  %v579_v39 = vrot.slane %v557_v34, 4  ;;  %v581_v44 = vrot.slane %v557_v34, 6 }
 0x16e   : > { %1096 = vst [vmem:[#allocation1 + $0x1] ss:$9 sm:$0xff] %v535_v40 }
 0x16f   : > { %1097 = vst [vmem:[#allocation1 + $0x2] ss:$9 sm:$0xff] %v536_v43  ;;  %v580_v43 = vrot.slane %v557_v34, 5 }
 0x170   : > { %1098 = vst [vmem:[#allocation1 + $0x3] ss:$9 sm:$0xff] %v537_v45 }
 0x171   : > { %1099 = vst [vmem:[#allocation1 + $0x4] ss:$9 sm:$0xff] %v504_v41  ;;  %v558_v41 = vld [vmem:[#allocation2 + $0x31] sm:$0x7f] }
 0x172   : > { %1100 = vst [vmem:[#allocation1 + $0x5] ss:$9 sm:$0xff] %v538_v47  ;;  %v582_v45 = vrot.slane %v558_v41, 1  ;;  %v583_v47 = vrot.slane %v558_v41, 2 }
 0x173   : > { %1101 = vst [vmem:[#allocation1 + $0x6] ss:$9 sm:$0xff] %v539_v48  ;;  %v584_v48 = vrot.slane %v558_v41, 3 }
 0x174   : > { %1102 = vst [vmem:[#allocation1 + $0x7] ss:$9 sm:$0xff] %v540_v49  ;;  %v585_v49 = vrot.slane %v558_v41, 4 }
 0x17b   : > { %v1103_v58 = vld [vmem:[#allocation1] sm:$0xff] }
 0x17c   : > { %1130 = vrot.lane.b32.xlu1 %v1103_v58, %s6626_s14  ;;  %1104 = vst [vmem:[#allocation1] ss:$9 sm:$0xff] %v541_v50  ;;  %v559_v50 = vld [vmem:[#allocation2 + $0x41] sm:$0x7f] }
 0x17d   : > { %1105 = vst [vmem:[#allocation1 + $0x1] ss:$9 sm:$0xff] %v542_v53  ;;  %v588_v56 = vrot.slane %v559_v50, 1  ;;  %v589_v57 = vrot.slane %v559_v50, 2  ;;  %v590_v58 = vrot.slane %v559_v50, 3 }
 0x17e   : > { %1106 = vst [vmem:[#allocation1 + $0x2] ss:$9 sm:$0xff] %v543_v54  ;;  %v587_v54 = vrot.slane %v558_v41, 6 }
 0x17f   : > { %1107 = vst [vmem:[#allocation1 + $0x3] ss:$9 sm:$0xff] %v505_v51  ;;  %v586_v51 = vrot.slane %v558_v41, 5 }
 0x180   : > { %1108 = vst [vmem:[#allocation1 + $0x4] ss:$9 sm:$0xff] %v544_v60  ;;  %v591_v60 = vrot.slane %v559_v50, 4 }
 0x181   : > { %1109 = vst [vmem:[#allocation1 + $0x5] ss:$9 sm:$0xff] %v545_v63  ;;  %v592_v63 = vrot.slane %v559_v50, 5 }
 0x182   : > { %1110 = vst [vmem:[#allocation1 + $0x6] ss:$9 sm:$0xff] %v546_v1  ;;  %v593_v1 = vrot.slane %v559_v50, 6 }
 0x183   : > { %1111 = vst [vmem:[#allocation1 + $0x7] ss:$9 sm:$0xff] %v547_v5  ;;  %v594_v5 = vrot.slane %v560_v62, 1 }
 0x18a   : > { %v1112_v15 = vld [vmem:[#allocation1] sm:$0xff] }
 0x18b   : > { %1113 = vst [vmem:[#allocation1] ss:$9 sm:$0xff] %v548_v11  ;;  %1132 = vrot.lane.b32.xlu2 %v1112_v15, %s6626_s14  ;;  %v599_v11 = vrot.slane %v560_v62, 6  ;;  %v601_v15 = vrot.slane %v561_v9, 2 }
 0x18c   : > { %1114 = vst [vmem:[#allocation1 + $0x1] ss:$9 sm:$0xff] %v549_v13 }
 0x18d   : > { %1115 = vst [vmem:[#allocation1 + $0x2] ss:$9 sm:$0xff] %v506_v10  ;;  %v598_v10 = vrot.slane %v560_v62, 5 }
 0x18e   : > { %1116 = vst [vmem:[#allocation1 + $0x3] ss:$9 sm:$0xff] %v550_v14  ;;  %v600_v14 = vrot.slane %v561_v9, 1 }
 0x18f   : > { %1117 = vst [vmem:[#allocation1 + $0x4] ss:$9 sm:$0xff] %v551_v16  ;;  %v602_v16 = vrot.slane %v561_v9, 3 }
 0x190   : > { %1118 = vst [vmem:[#allocation1 + $0x5] ss:$9 sm:$0xff] %v552_v17  ;;  %v603_v17 = vrot.slane %v561_v9, 4 }
 0x191   : > { %1119 = vst [vmem:[#allocation1 + $0x6] ss:$9 sm:$0xff] %v553_v18  ;;  %v562_v18 = vld [vmem:[#allocation2 + $0x71] sm:$0x7f] }
 0x192   : > { %1120 = vst [vmem:[#allocation1 + $0x7] ss:$9 sm:$0xff] %v554_v20  ;;  %v604_v20 = vrot.slane %v561_v9, 5 }
 0x199   : > { %v1121_v22 = vld [vmem:[#allocation1] sm:$0xff] }
 0x19a   : > { %1134 = vrot.lane.b32.xlu0 %v1121_v22, %s6626_s14  ;;  %1122 = vst [vmem:[#allocation1] ss:$9 sm:$0xff] %v555_v21  ;;  %v605_v21 = vrot.slane %v561_v9, 6  ;;  %v606_v22 = vrot.slane %v562_v18, 1 }
 0x1a1   : > { %v1123_v27 = vld [vmem:[#allocation1] sm:$0xff] }
 0x1a2   : > { %1136 = vrot.lane.b32.xlu1 %v1123_v27, %s6626_s14  ;;  %1145 = vst [vmem:[#allocation1] ss:$9 sm:$0xff] %v556_v24  ;;  %v609_v27 = vrot.slane %v562_v18, 4 }
 0x1a3   : > { %1147 = vst [vmem:[#allocation1 + $0x1] ss:$9 sm:$0xff] %v570_v25  ;;  %v607_v25 = vrot.slane %v562_v18, 2 }
 0x1a4   : > { %1149 = vst [vmem:[#allocation1 + $0x2] ss:$9 sm:$0xff] %v571_v26  ;;  %v608_v26 = vrot.slane %v562_v18, 3 }
 0x1a5   : > { %1151 = vst [vmem:[#allocation1 + $0x3] ss:$9 sm:$0xff] %v572_v28  ;;  %v610_v28 = vrot.slane %v562_v18, 5 }
 0x1a6   : > { %1153 = vst [vmem:[#allocation1 + $0x4] ss:$9 sm:$0xff] %v573_v30  ;;  %v1545_v30 = vld [vmem:[#allocation4 + $0x8] sm:$0xff] }
 0x1a7   : > { %1155 = vst [vmem:[#allocation1 + $0x5] ss:$9 sm:$0xff] %v574_v31  ;;  %v971_v31 = vpop.permute.xlu0 %970  ;;  %1648 = vmatpush.msra.mxu1 %v1545_v30 }
 0x1a8   : > { %1157 = vst [vmem:[#allocation1 + $0x6] ss:$9 sm:$0xff] %v575_v32  ;;  %v1544_v32 = vld [vmem:[#allocation4] sm:$0xff] }
 0x1a9   : > { %1159 = vst [vmem:[#allocation1 + $0x7] ss:$9 sm:$0xff] %v557_v34  ;;  %v1516_v34 = vsel %vm296_vm0, %v6718_v19, %v971_v31  ;;  %1649 = vmatpush.msra.mxu1 %v1544_v32  ;;  %v975_v19 = vpop.permute.xlu1 %974 }
 0x1aa   : > { %1650 = vmatmul.f32.vlgmr.msra.gmra.mxu1 %v1516_v34 }
 0x1b0   : > { %v6780_v40 = vld [vmem:[#allocation1] sm:$0xff] }
 0x1b1   : > { %1161 = vst [vmem:[#allocation1] ss:$9 sm:$0xff] %v576_v35  ;;  %v1575_v35 = vld [vmem:[#allocation4 + $0xf8] sm:$0xff] }
 0x1b2   : > { %1162 = vst [vmem:[#allocation1 + $0x1] ss:$9 sm:$0xff] %v577_v36  ;;  %v1574_v36 = vld [vmem:[#allocation4 + $0xf0] sm:$0xff]  ;;  %1672 = vmatpush.msrb.mxu1 %v1575_v35 }
 0x1b3   : > { %1163 = vst [vmem:[#allocation1 + $0x2] ss:$9 sm:$0xff] %v578_v37  ;;  %v611_v37 = vrot.slane %v562_v18, 6 }
 0x1b4   : > { %1164 = vst [vmem:[#allocation1 + $0x3] ss:$9 sm:$0xff] %v579_v39  ;;  %v1573_v39 = vld [vmem:[#allocation4 + $0xe8] sm:$0xff]  ;;  %1673 = vmatpush.msrb.mxu1 %v1574_v36  ;;  %v615_v36 = vld [vmem:[#allocation2 + $0x42] sm:$0x7f] }
 0x1b5   : > { %1165 = vst [vmem:[#allocation1 + $0x4] ss:$9 sm:$0xff] %v580_v43  ;;  %v973_v43 = vpop.permute.xlu0 %972 }
 0x1b6   : > { %1166 = vst [vmem:[#allocation1 + $0x5] ss:$9 sm:$0xff] %v581_v44  ;;  %v1572_v44 = vld [vmem:[#allocation4 + $0xe0] sm:$0xff]  ;;  %1674 = vmatpush.msrb.mxu1 %v1573_v39 }
 0x1b7   : > { %1167 = vst [vmem:[#allocation1 + $0x6] ss:$9 sm:$0xff] %v558_v41 }
 0x1b8   : > { %1168 = vst [vmem:[#allocation1 + $0x7] ss:$9 sm:$0xff] %v582_v45  ;;  %v1517_v45 = vsel %vm296_vm0, %v6720_v29, %v973_v43  ;;  %1675 = vmatpush.msrb.mxu1 %v1572_v44  ;;  %v1518_v29 = vsel %vm296_vm0, %v6722_v38, %v975_v19  ;;  %v1564_v38 = vld [vmem:[#allocation4 + $0xa0] sm:$0xff] }
 0x1b9   : > { %1653 = vmatmul.f32.gmra.mxu1 %v1517_v45  ;;  %v644_v45 = vrot.slane %v615_v36, 1 }
 0x1bd   : > { %v983_v35 = vpop.permute.xlu0 %982 }
 0x1be   : > { %v1522_v44 = vsel %vm296_vm0, %v6730_v3, %v983_v35  ;;  %v646_v3 = vrot.slane %v615_v36, 3 }
 0x1bf   : > { %v6782_v53 = vld [vmem:[#allocation1] sm:$0xff] }
 0x1c0   : > { %1170 = vst [vmem:[#allocation1] ss:$9 sm:$0xff] %v583_v47  ;;  %v1571_v47 = vld [vmem:[#allocation4 + $0xd8] sm:$0xff] }
 0x1c1   : > { %1171 = vst [vmem:[#allocation1 + $0x1] ss:$9 sm:$0xff] %v584_v48  ;;  %v612_v48 = vld [vmem:[#allocation2 + $0x12] sm:$0x7f]  ;;  %1676 = vmatpush.msrb.mxu1 %v1571_v47  ;;  %v645_v47 = vrot.slane %v615_v36, 2 }
 0x1c2   : > { %1172 = vst [vmem:[#allocation1 + $0x2] ss:$9 sm:$0xff] %v585_v49  ;;  %v1570_v49 = vld [vmem:[#allocation4 + $0xd0] sm:$0xff]  ;;  %1656 = vmatmul.f32.gmra.mxu1 %v1518_v29  ;;  %v648_v29 = vrot.slane %v615_v36, 5 }
 0x1c3   : > { %1173 = vst [vmem:[#allocation1 + $0x3] ss:$9 sm:$0xff] %v586_v51  ;;  %v1569_v51 = vld [vmem:[#allocation4 + $0xc8] sm:$0xff]  ;;  %1677 = vmatpush.msrb.mxu1 %v1570_v49 }
 0x1c4   : > { %1174 = vst [vmem:[#allocation1 + $0x4] ss:$9 sm:$0xff] %v587_v54  ;;  %v627_v54 = vrot.slane %v612_v48, 2  ;;  %v1589_v49 = vld [vmem:[#allocation4 + $0x168] sm:$0xff] }
 0x1c5   : > { %1175 = vst [vmem:[#allocation1 + $0x5] ss:$9 sm:$0xff] %v559_v50  ;;  %v626_v50 = vrot.slane %v612_v48, 1  ;;  %1678 = vmatpush.msrb.mxu1 %v1569_v51 }
 0x1c6   : > { %1176 = vst [vmem:[#allocation1 + $0x6] ss:$9 sm:$0xff] %v588_v56  ;;  %v628_v56 = vrot.slane %v612_v48, 3 }
 0x1c7   : > { %1177 = vst [vmem:[#allocation1 + $0x7] ss:$9 sm:$0xff] %v589_v57 }
 0x1ce   : > { %v6784_v4 = vld [vmem:[#allocation1] sm:$0xff] }
 0x1cf   : > { %1179 = vst [vmem:[#allocation1] ss:$9 sm:$0xff] %v590_v58  ;;  %v1568_v58 = vld [vmem:[#allocation4 + $0xc0] sm:$0xff] }
 0x1d0   : > { %1180 = vst [vmem:[#allocation1 + $0x1] ss:$9 sm:$0xff] %v591_v60  ;;  %v629_v60 = vrot.slane %v612_v48, 4  ;;  %1679 = vmatpush.msrb.mxu1 %v1568_v58  ;;  %v1586_v58 = vld [vmem:[#allocation4 + $0x150] sm:$0xff] }
 0x1d1   : > { %1181 = vst [vmem:[#allocation1 + $0x2] ss:$9 sm:$0xff] %v592_v63  ;;  %v1567_v63 = vld [vmem:[#allocation4 + $0xb8] sm:$0xff] }
 0x1d2   : > { %1182 = vst [vmem:[#allocation1 + $0x3] ss:$9 sm:$0xff] %v593_v1  ;;  %v631_v1 = vrot.slane %v612_v48, 6  ;;  %1680 = vmatpush.msrb.mxu1 %v1567_v63 }
 0x1d3   : > { %1183 = vst [vmem:[#allocation1 + $0x4] ss:$9 sm:$0xff] %v560_v62  ;;  %v630_v62 = vrot.slane %v612_v48, 5 }
 0x1d4   : > { %1184 = vst [vmem:[#allocation1 + $0x5] ss:$9 sm:$0xff] %v594_v5  ;;  %v1566_v5 = vld [vmem:[#allocation4 + $0xb0] sm:$0xff] }
 0x1d5   : > { %1185 = vst [vmem:[#allocation1 + $0x6] ss:$9 sm:$0xff] %v595_v6  ;;  %v613_v6 = vld [vmem:[#allocation2 + $0x22] sm:$0x7f]  ;;  %1681 = vmatpush.msrb.mxu1 %v1566_v5  ;;  %v1585_v5 = vld [vmem:[#allocation4 + $0x148] sm:$0xff] }
 0x1d6   : > { %1186 = vst [vmem:[#allocation1 + $0x7] ss:$9 sm:$0xff] %v596_v7  ;;  %v977_v7 = vpop.permute.xlu1 %976 }
 0x1dd   : > { %v6786_v13 = vld [vmem:[#allocation1] sm:$0xff] }
 0x1de   : > { %1188 = vst [vmem:[#allocation1] ss:$9 sm:$0xff] %v597_v8  ;;  %v1565_v8 = vld [vmem:[#allocation4 + $0xa8] sm:$0xff]  ;;  %v1125_v19 = vpop.permute.xlu1 %1124 }
 0x1df   : > { %1189 = vst [vmem:[#allocation1 + $0x1] ss:$9 sm:$0xff] %v598_v10  ;;  %1682 = vmatpush.msrb.mxu1 %v1565_v8  ;;  %v1563_v10 = vld [vmem:[#allocation4 + $0x98] sm:$0xff]  ;;  %v1523_v51 = vsel %vm296_vm0, %v6757_v12, %v1125_v19  ;;  %v1584_v12 = vld [vmem:[#allocation4 + $0x140] sm:$0xff] }
 0x1e0   : > { %1190 = vst [vmem:[#allocation1 + $0x2] ss:$9 sm:$0xff] %v599_v11  ;;  %v979_v11 = vpop.permute.xlu2 %978 }
 0x1e1   : > { %1191 = vst [vmem:[#allocation1 + $0x3] ss:$9 sm:$0xff] %v561_v9  ;;  %v1519_v9 = vsel %vm296_vm0, %v6724_v46, %v977_v7  ;;  %1683 = vmatpush.msrb.mxu1 %v1564_v38  ;;  %v1520_v46 = vsel %vm296_vm0, %v6726_v55, %v979_v11  ;;  %v1129_v11 = vpop.permute.xlu0 %1128 }
 0x1e2   : > { %1192 = vst [vmem:[#allocation1 + $0x4] ss:$9 sm:$0xff] %v600_v14  ;;  %1659 = vmatmul.f32.gmra.mxu1 %v1519_v9  ;;  %v1562_v14 = vld [vmem:[#allocation4 + $0x90] sm:$0xff]  ;;  %v1583_v9 = vld [vmem:[#allocation4 + $0x138] sm:$0xff] }
 0x1e3   : > { %1193 = vst [vmem:[#allocation1 + $0x5] ss:$9 sm:$0xff] %v601_v15  ;;  %v632_v15 = vrot.slane %v613_v6, 1  ;;  %1684 = vmatpush.msrb.mxu1 %v1563_v10  ;;  %v1582_v10 = vld [vmem:[#allocation4 + $0x130] sm:$0xff] }
 0x1e4   : > { %1194 = vst [vmem:[#allocation1 + $0x6] ss:$9 sm:$0xff] %v602_v16  ;;  %v633_v16 = vrot.slane %v613_v6, 2 }
 0x1e5   : > { %1195 = vst [vmem:[#allocation1 + $0x7] ss:$9 sm:$0xff] %v603_v17  ;;  %v1561_v17 = vld [vmem:[#allocation4 + $0x88] sm:$0xff]  ;;  %1685 = vmatpush.msrb.mxu1 %v1562_v14 }
 0x1e6   : > { %v1581_v14 = vld [vmem:[#allocation4 + $0x128] sm:$0xff] }
 0x1e7   : > { %1686 = vmatpush.msrb.mxu1 %v1561_v17  ;;  %v1578_v17 = vld [vmem:[#allocation4 + $0x110] sm:$0xff] }
 0x1e8   : > { %v981_v30 = vpop.permute.xlu2 %980 }
 0x1e9   : > { %v1521_v31 = vsel %vm296_vm0, %v6728_v61, %v981_v30  ;;  %v1591_v61 = vld [vmem:[#allocation4 + $0x178] sm:$0xff] }
 0x1ea   : > { %1662 = vmatmul.f32.gmra.mxu1 %v1520_v46 }
 0x1ec   : > { %v6788_v24 = vld [vmem:[#allocation1] sm:$0xff] }
 0x1ed   : > { %1197 = vst [vmem:[#allocation1] ss:$9 sm:$0xff] %v604_v20 }
 0x1ee   : > { %1198 = vst [vmem:[#allocation1 + $0x1] ss:$9 sm:$0xff] %v605_v21  ;;  %v635_v21 = vrot.slane %v613_v6, 4 }
 0x1ef   : > { %1199 = vst [vmem:[#allocation1 + $0x2] ss:$9 sm:$0xff] %v562_v18  ;;  %v634_v18 = vrot.slane %v613_v6, 3 }
 0x1f0   : > { %1200 = vst [vmem:[#allocation1 + $0x3] ss:$9 sm:$0xff] %v606_v22  ;;  %v1560_v22 = vld [vmem:[#allocation4 + $0x80] sm:$0xff] }
 0x1f1   : > { %1201 = vst [vmem:[#allocation1 + $0x4] ss:$9 sm:$0xff] %v607_v25  ;;  %v614_v25 = vld [vmem:[#allocation2 + $0x32] sm:$0x7f]  ;;  %1687 = vmatpush.msrb.mxu1 %v1560_v22 }
 0x1f2   : > { %1202 = vst [vmem:[#allocation1 + $0x5] ss:$9 sm:$0xff] %v608_v26  ;;  %v636_v26 = vrot.slane %v613_v6, 5  ;;  %v639_v32 = vrot.slane %v614_v25, 2  ;;  %1665 = vmatmul.f32.gmra.mxu1 %v1521_v31  ;;  %v640_v34 = vrot.slane %v614_v25, 3  ;;  %v641_v55 = vrot.slane %v614_v25, 4 }
 0x1f3   : > { %1203 = vst [vmem:[#allocation1 + $0x6] ss:$9 sm:$0xff] %v609_v27  ;;  %v637_v27 = vrot.slane %v613_v6, 6  ;;  %v643_v43 = vrot.slane %v614_v25, 6  ;;  %1710 = vmatpush.msra.mxu1 %v1591_v61 }
 0x1f4   : > { %1204 = vst [vmem:[#allocation1 + $0x7] ss:$9 sm:$0xff] %v610_v28  ;;  %v638_v28 = vrot.slane %v614_v25, 1 }
 0x1fa   : > { %1668 = vmatmul.f32.gmra.mxu1 %v1522_v44 }
 0x1fb   : > { %v6792_v41 = vld [vmem:[#allocation1] sm:$0xff] }
 0x1fc   : > { %1206 = vst [vmem:[#allocation1] ss:$9 sm:$0xff] %v611_v37  ;;  %v642_v37 = vrot.slane %v614_v25, 5 }
 0x202   : > { %1688 = vmatmul.f32.vlgmr.msrb.gmra.mxu1 %v1523_v51 }
 0x203   : > { %v6796_v57 = vld [vmem:[#allocation1] sm:$0xff] }
 0x204   : > { %1215 = vst [vmem:[#allocation1] ss:$9 sm:$0xff] %v612_v48  ;;  %v1590_v48 = vld [vmem:[#allocation4 + $0x170] sm:$0xff] }
 0x205   : > { %1217 = vst [vmem:[#allocation1 + $0x1] ss:$9 sm:$0xff] %v626_v50  ;;  %1711 = vmatpush.msra.mxu1 %v1590_v48  ;;  %v1588_v50 = vld [vmem:[#allocation4 + $0x160] sm:$0xff] }
 0x206   : > { %1219 = vst [vmem:[#allocation1 + $0x2] ss:$9 sm:$0xff] %v627_v54  ;;  %v647_v54 = vrot.slane %v615_v36, 4 }
 0x207   : > { %1221 = vst [vmem:[#allocation1 + $0x3] ss:$9 sm:$0xff] %v628_v56  ;;  %1712 = vmatpush.msra.mxu1 %v1589_v49  ;;  %v1587_v56 = vld [vmem:[#allocation4 + $0x158] sm:$0xff] }
 0x208   : > { %1223 = vst [vmem:[#allocation1 + $0x4] ss:$9 sm:$0xff] %v629_v60  ;;  %v616_v60 = vld [vmem:[#allocation2 + $0x52] sm:$0x7f] }
 0x209   : > { %1225 = vst [vmem:[#allocation1 + $0x5] ss:$9 sm:$0xff] %v630_v62  ;;  %1713 = vmatpush.msra.mxu1 %v1588_v50  ;;  %v649_v62 = vrot.slane %v615_v36, 6  ;;  %v651_v7 = vrot.slane %v616_v60, 2  ;;  %v652_v38 = vrot.slane %v616_v60, 3  ;;  %v654_v22 = vrot.slane %v616_v60, 5 }
 0x20a   : > { %1227 = vst [vmem:[#allocation1 + $0x6] ss:$9 sm:$0xff] %v631_v1  ;;  %v1127_v1 = vpop.permute.xlu2 %1126 }
 0x20b   : > { %1229 = vst [vmem:[#allocation1 + $0x7] ss:$9 sm:$0xff] %v613_v6  ;;  %1714 = vmatpush.msra.mxu1 %v1587_v56  ;;  %v650_v6 = vrot.slane %v616_v60, 1  ;;  %v1524_v8 = vsel %vm296_vm0, %v6759_v23, %v1127_v1  ;;  %v1579_v23 = vld [vmem:[#allocation4 + $0x118] sm:$0xff] }
 0x20c   : > { %1691 = vmatmul.f32.gmra.mxu1 %v1524_v8  ;;  %v1135_v35 = vpop.permute.xlu0 %1134 }
 0x20d   : > { %1715 = vmatpush.msra.mxu1 %v1586_v58  ;;  %v1528_v44 = vsel %vm296_vm0, %v6767_v59, %v1135_v35  ;;  %v669_v59 = vld [vmem:[#allocation2 + $0x20] sm:$0x7f] }
 0x20e   : > { %v683_v50 = vrot.slane %v669_v59, 1  ;;  %v684_v51 = vrot.slane %v669_v59, 2  ;;  %v686_v56 = vrot.slane %v669_v59, 4  ;;  %v687_v58 = vrot.slane %v669_v59, 5 }
 0x20f   : > { %1716 = vmatpush.msra.mxu1 %v1585_v5 }
 0x211   : > { %1717 = vmatpush.msra.mxu1 %v1584_v12  ;;  %v671_v12 = vld [vmem:[#allocation2 + $0x40] sm:$0x7f] }
 0x212   : > { %v1230_v20 = vld [vmem:[#allocation1] sm:$0xff]  ;;  %v1133_v31 = vpop.permute.xlu2 %1132 }
 0x213   : > { %1278 = vrot.lane.b32.xlu0 %v1230_v20, %s6626_s14  ;;  %1231 = vst [vmem:[#allocation1] ss:$9 sm:$0xff] %v632_v15  ;;  %1718 = vmatpush.msra.mxu1 %v1583_v9  ;;  %v1580_v15 = vld [vmem:[#allocation4 + $0x120] sm:$0xff]  ;;  %v1131_v20 = vpop.permute.xlu1 %1130  ;;  %v696_v9 = vrot.slane %v671_v12, 2 }
 0x214   : > { %1232 = vst [vmem:[#allocation1 + $0x1] ss:$9 sm:$0xff] %v633_v16  ;;  %v1525_v16 = vsel %vm296_vm0, %v6761_v33, %v1129_v11  ;;  %v1526_v46 = vsel %vm296_vm0, %v6763_v42, %v1131_v20  ;;  %v698_v11 = vrot.slane %v671_v12, 4 }
 0x215   : > { %1233 = vst [vmem:[#allocation1 + $0x2] ss:$9 sm:$0xff] %v634_v18  ;;  %1719 = vmatpush.msra.mxu1 %v1582_v10  ;;  %v653_v18 = vrot.slane %v616_v60, 4  ;;  %v697_v10 = vrot.slane %v671_v12, 3 }
 0x216   : > { %1234 = vst [vmem:[#allocation1 + $0x3] ss:$9 sm:$0xff] %v635_v21  ;;  %1694 = vmatmul.f32.gmra.mxu1 %v1525_v16  ;;  %v617_v21 = vld [vmem:[#allocation2 + $0x62] sm:$0x7f] }
 0x217   : > { %1235 = vst [vmem:[#allocation1 + $0x4] ss:$9 sm:$0xff] %v636_v26  ;;  %1720 = vmatpush.msra.mxu1 %v1581_v14  ;;  %v657_v33 = vrot.slane %v617_v21, 2  ;;  %v659_v30 = vrot.slane %v617_v21, 4  ;;  %v660_v42 = vrot.slane %v617_v21, 5 }
 0x218   : > { %1236 = vst [vmem:[#allocation1 + $0x5] ss:$9 sm:$0xff] %v637_v27  ;;  %v656_v27 = vrot.slane %v617_v21, 1  ;;  %v672_v14 = vld [vmem:[#allocation2 + $0x50] sm:$0x7f] }
 0x219   : > { %1237 = vst [vmem:[#allocation1 + $0x6] ss:$9 sm:$0xff] %v614_v25  ;;  %1721 = vmatpush.msra.mxu1 %v1580_v15  ;;  %v655_v25 = vrot.slane %v616_v60, 6  ;;  %v699_v15 = vrot.slane %v671_v12, 5  ;;  %v703_v20 = vrot.slane %v672_v14, 3 }
 0x21a   : > { %1238 = vst [vmem:[#allocation1 + $0x7] ss:$9 sm:$0xff] %v638_v28  ;;  %v658_v28 = vrot.slane %v617_v21, 3 }
 0x21b   : > { %1722 = vmatpush.msra.mxu1 %v1579_v23  ;;  %v700_v23 = vrot.slane %v671_v12, 6 }
 0x21d   : > { %1723 = vmatpush.msra.mxu1 %v1578_v17  ;;  %v701_v17 = vrot.slane %v672_v14, 1 }
 0x21e   : > { %1697 = vmatmul.f32.gmra.mxu1 %v1526_v46  ;;  %v706_v46 = vrot.slane %v672_v14, 6 }
 0x221   : > { %v6807_v39 = vld [vmem:[#allocation1] sm:$0xff] }
 0x222   : > { %1240 = vst [vmem:[#allocation1] ss:$9 sm:$0xff] %v639_v32  ;;  %v1527_v32 = vsel %vm296_vm0, %v6765_v52, %v1133_v31  ;;  %v1137_v52 = vpop.permute.xlu1 %1136 }
 0x223   : > { %1241 = vst [vmem:[#allocation1 + $0x1] ss:$9 sm:$0xff] %v640_v34  ;;  %v618_v34 = vld [vmem:[#allocation2 + $0x72] sm:$0x7f]  ;;  %v1529_v48 = vsel %vm296_vm0, %v6769_v2, %v1137_v52 }
 0x224   : > { %1242 = vst [vmem:[#allocation1 + $0x2] ss:$9 sm:$0xff] %v641_v55  ;;  %v661_v55 = vrot.slane %v617_v21, 6  ;;  %v666_v61 = vrot.slane %v618_v34, 5  ;;  %v667_v19 = vrot.slane %v618_v34, 6 }
 0x225   : > { %1243 = vst [vmem:[#allocation1 + $0x3] ss:$9 sm:$0xff] %v642_v37 }
 0x226   : > { %1244 = vst [vmem:[#allocation1 + $0x4] ss:$9 sm:$0xff] %v643_v43  ;;  %1700 = vmatmul.f32.gmra.mxu1 %v1527_v32  ;;  %v663_v43 = vrot.slane %v618_v34, 2  ;;  %v674_v32 = vld [vmem:[#allocation2 + $0x70] sm:$0x7f] }
 0x227   : > { %1245 = vst [vmem:[#allocation1 + $0x5] ss:$9 sm:$0xff] %v615_v36  ;;  %v662_v36 = vrot.slane %v618_v34, 1  ;;  %v713_v35 = vrot.slane %v674_v32, 1 }
 0x228   : > { %1246 = vst [vmem:[#allocation1 + $0x6] ss:$9 sm:$0xff] %v644_v45  ;;  %v664_v45 = vrot.slane %v618_v34, 3 }
 0x229   : > { %1247 = vst [vmem:[#allocation1 + $0x7] ss:$9 sm:$0xff] %v645_v47  ;;  %v665_v47 = vrot.slane %v618_v34, 4 }
 0x22e   : > { %1703 = vmatmul.f32.gmra.mxu1 %v1528_v44  ;;  %v716_v44 = vrot.slane %v674_v32, 4 }
 0x230   : > { %v6813_v63 = vld [vmem:[#allocation1] sm:$0xff] }
 0x231   : > { %1249 = vst [vmem:[#allocation1] ss:$9 sm:$0xff] %v646_v3  ;;  %v685_v3 = vrot.slane %v669_v59, 3 }
 0x232   : > { %1250 = vst [vmem:[#allocation1 + $0x1] ss:$9 sm:$0xff] %v647_v54 }
 0x233   : > { %1251 = vst [vmem:[#allocation1 + $0x2] ss:$9 sm:$0xff] %v648_v29  ;;  %v670_v29 = vld [vmem:[#allocation2 + $0x30] sm:$0x7f] }
 0x234   : > { %1252 = vst [vmem:[#allocation1 + $0x3] ss:$9 sm:$0xff] %v649_v62  ;;  %v689_v2 = vrot.slane %v670_v29, 1  ;;  %v690_v62 = vrot.slane %v670_v29, 2  ;;  %v691_v1 = vrot.slane %v670_v29, 3  ;;  %v692_v5 = vrot.slane %v670_v29, 4 }
 0x235   : > { %1253 = vst [vmem:[#allocation1 + $0x4] ss:$9 sm:$0xff] %v616_v60  ;;  %v688_v60 = vrot.slane %v669_v59, 6  ;;  %v694_v8 = vrot.slane %v670_v29, 6 }
 0x236   : > { %1254 = vst [vmem:[#allocation1 + $0x5] ss:$9 sm:$0xff] %v650_v6  ;;  %1706 = vmatmul.f32.gmra.mxu1 %v1529_v48 }
 0x237   : > { %1255 = vst [vmem:[#allocation1 + $0x6] ss:$9 sm:$0xff] %v651_v7  ;;  %v693_v7 = vrot.slane %v670_v29, 5 }
 0x238   : > { %1256 = vst [vmem:[#allocation1 + $0x7] ss:$9 sm:$0xff] %v652_v38  ;;  %v695_v38 = vrot.slane %v671_v12, 1 }
 0x23f   : > { %v6819_v26 = vld [vmem:[#allocation1] sm:$0xff] }
 0x240   : > { %1258 = vst [vmem:[#allocation1] ss:$9 sm:$0xff] %v653_v18  ;;  %v702_v18 = vrot.slane %v672_v14, 2 }
 0x241   : > { %1259 = vst [vmem:[#allocation1 + $0x1] ss:$9 sm:$0xff] %v654_v22  ;;  %v673_v22 = vld [vmem:[#allocation2 + $0x60] sm:$0x7f] }
 0x242   : > { %1260 = vst [vmem:[#allocation1 + $0x2] ss:$9 sm:$0xff] %v655_v25  ;;  %v705_v25 = vrot.slane %v672_v14, 5  ;;  %v710_v31 = vrot.slane %v673_v22, 4 }
 0x243   : > { %1261 = vst [vmem:[#allocation1 + $0x3] ss:$9 sm:$0xff] %v617_v21  ;;  %v704_v21 = vrot.slane %v672_v14, 4 }
 0x244   : > { %1262 = vst [vmem:[#allocation1 + $0x4] ss:$9 sm:$0xff] %v656_v27 }
 0x245   : > { %1263 = vst [vmem:[#allocation1 + $0x5] ss:$9 sm:$0xff] %v657_v33  ;;  %v707_v33 = vrot.slane %v673_v22, 1 }
 0x246   : > { %1264 = vst [vmem:[#allocation1 + $0x6] ss:$9 sm:$0xff] %v658_v28  ;;  %v708_v28 = vrot.slane %v673_v22, 2 }
 0x247   : > { %1265 = vst [vmem:[#allocation1 + $0x7] ss:$9 sm:$0xff] %v659_v30  ;;  %v709_v30 = vrot.slane %v673_v22, 3 }
 0x24e   : > { %v6825_v37 = vld [vmem:[#allocation1] sm:$0xff] }
 0x24f   : > { %1267 = vst [vmem:[#allocation1] ss:$9 sm:$0xff] %v660_v42  ;;  %v712_v42 = vrot.slane %v673_v22, 6 }
 0x250   : > { %1268 = vst [vmem:[#allocation1 + $0x1] ss:$9 sm:$0xff] %v661_v55 }
 0x251   : > { %1269 = vst [vmem:[#allocation1 + $0x2] ss:$9 sm:$0xff] %v618_v34  ;;  %v711_v34 = vrot.slane %v673_v22, 5 }
 0x252   : > { %1270 = vst [vmem:[#allocation1 + $0x3] ss:$9 sm:$0xff] %v662_v36  ;;  %v714_v36 = vrot.slane %v674_v32, 2 }
 0x253   : > { %1271 = vst [vmem:[#allocation1 + $0x4] ss:$9 sm:$0xff] %v663_v43  ;;  %v715_v43 = vrot.slane %v674_v32, 3 }
 0x254   : > { %1272 = vst [vmem:[#allocation1 + $0x5] ss:$9 sm:$0xff] %v664_v45  ;;  %v675_v45 = vld [vmem:[#allocation2 + $0x80] sm:$0x7f] }
 0x255   : > { %1273 = vst [vmem:[#allocation1 + $0x6] ss:$9 sm:$0xff] %v665_v47  ;;  %v717_v47 = vrot.slane %v674_v32, 5  ;;  %v719_v52 = vrot.slane %v675_v45, 1 }
 0x256   : > { %1274 = vst [vmem:[#allocation1 + $0x7] ss:$9 sm:$0xff] %v666_v61  ;;  %v718_v61 = vrot.slane %v674_v32, 6 }
 0x25d   : > { %v6831_v49 = vld [vmem:[#allocation1] sm:$0xff] }
 0x25e   : > { %1276 = vst [vmem:[#allocation1] ss:$9 sm:$0xff] %v667_v19  ;;  %v720_v19 = vrot.slane %v675_v45, 2 }
 0x265   : > { %v6833_v54 = vld [vmem:[#allocation1] sm:$0xff] }
 0x266   : > { %1299 = vst [vmem:[#allocation1] ss:$9 sm:$0xff] %v669_v59  ;;  %v721_v59 = vrot.slane %v675_v45, 3 }
 0x267   : > { %1301 = vst [vmem:[#allocation1 + $0x1] ss:$9 sm:$0xff] %v683_v50  ;;  %v722_v50 = vrot.slane %v675_v45, 4 }
 0x268   : > { %1303 = vst [vmem:[#allocation1 + $0x2] ss:$9 sm:$0xff] %v684_v51  ;;  %v723_v51 = vrot.slane %v675_v45, 5 }
 0x269   : > { %1305 = vst [vmem:[#allocation1 + $0x3] ss:$9 sm:$0xff] %v685_v3  ;;  %v1577_v3 = vld [vmem:[#allocation4 + $0x108] sm:$0xff] }
 0x26a   : > { %1307 = vst [vmem:[#allocation1 + $0x4] ss:$9 sm:$0xff] %v686_v56  ;;  %1724 = vmatpush.msra.mxu1 %v1577_v3 }
 0x26b   : > { %1309 = vst [vmem:[#allocation1 + $0x5] ss:$9 sm:$0xff] %v687_v58  ;;  %v1576_v58 = vld [vmem:[#allocation4 + $0x100] sm:$0xff] }
 0x26c   : > { %1311 = vst [vmem:[#allocation1 + $0x6] ss:$9 sm:$0xff] %v688_v60  ;;  %1725 = vmatpush.msra.mxu1 %v1576_v58 }
 0x26d   : > { %1313 = vst [vmem:[#allocation1 + $0x7] ss:$9 sm:$0xff] %v670_v29  ;;  %v724_v29 = vrot.slane %v675_v45, 6 }
 0x274   : > { %v6835_v6 = vld [vmem:[#allocation1] sm:$0xff] }
 0x275   : > { %1315 = vst [vmem:[#allocation1] ss:$9 sm:$0xff] %v689_v2 }
 0x276   : > { %1316 = vst [vmem:[#allocation1 + $0x1] ss:$9 sm:$0xff] %v690_v62  ;;  %v725_v62 = vld [vmem:[#allocation2 + $0x21] sm:$0x7f] }
 0x277   : > { %1317 = vst [vmem:[#allocation1 + $0x2] ss:$9 sm:$0xff] %v691_v1  ;;  %v739_v1 = vrot.slane %v725_v62, 1 }
 0x278   : > { %1318 = vst [vmem:[#allocation1 + $0x3] ss:$9 sm:$0xff] %v692_v5  ;;  %v740_v5 = vrot.slane %v725_v62, 2 }
 0x279   : > { %1319 = vst [vmem:[#allocation1 + $0x4] ss:$9 sm:$0xff] %v693_v7 }
 0x27a   : > { %1320 = vst [vmem:[#allocation1 + $0x5] ss:$9 sm:$0xff] %v694_v8  ;;  %v742_v8 = vrot.slane %v725_v62, 4 }
 0x27b   : > { %1321 = vst [vmem:[#allocation1 + $0x6] ss:$9 sm:$0xff] %v671_v12  ;;  %v741_v12 = vrot.slane %v725_v62, 3 }
 0x27c   : > { %1322 = vst [vmem:[#allocation1 + $0x7] ss:$9 sm:$0xff] %v695_v38  ;;  %v743_v38 = vrot.slane %v725_v62, 5 }
 0x283   : > { %v6837_v16 = vld [vmem:[#allocation1] sm:$0xff] }
 0x284   : > { %1324 = vst [vmem:[#allocation1] ss:$9 sm:$0xff] %v696_v9  ;;  %v744_v9 = vrot.slane %v725_v62, 6 }
 0x285   : > { %1325 = vst [vmem:[#allocation1 + $0x1] ss:$9 sm:$0xff] %v697_v10  ;;  %v1279_v56 = vpop.permute.xlu0 %1278 }
 0x286   : > { %1326 = vst [vmem:[#allocation1 + $0x2] ss:$9 sm:$0xff] %v698_v11  ;;  %v1530_v60 = vsel %vm296_vm0, %v6780_v40, %v1279_v56  ;;  %v726_v40 = vld [vmem:[#allocation2 + $0x31] sm:$0x7f] }
 0x287   : > { %1327 = vst [vmem:[#allocation1 + $0x3] ss:$9 sm:$0xff] %v699_v15  ;;  %1726 = vmatmul.f32.vlgmr.msra.gmra.mxu1 %v1530_v60  ;;  %v745_v10 = vrot.slane %v726_v40, 1  ;;  %v746_v11 = vrot.slane %v726_v40, 2 }
 0x288   : > { %1328 = vst [vmem:[#allocation1 + $0x4] ss:$9 sm:$0xff] %v700_v23  ;;  %v748_v23 = vrot.slane %v726_v40, 4 }
 0x289   : > { %1329 = vst [vmem:[#allocation1 + $0x5] ss:$9 sm:$0xff] %v672_v14  ;;  %v747_v14 = vrot.slane %v726_v40, 3 }
 0x28a   : > { %1330 = vst [vmem:[#allocation1 + $0x6] ss:$9 sm:$0xff] %v701_v17  ;;  %v727_v17 = vld [vmem:[#allocation2 + $0x41] sm:$0x7f] }
 0x28b   : > { %1331 = vst [vmem:[#allocation1 + $0x7] ss:$9 sm:$0xff] %v702_v18  ;;  %v749_v18 = vrot.slane %v726_v40, 5 }
 0x292   : > { %v6839_v27 = vld [vmem:[#allocation1] sm:$0xff] }
 0x293   : > { %1333 = vst [vmem:[#allocation1] ss:$9 sm:$0xff] %v703_v20  ;;  %v750_v20 = vrot.slane %v726_v40, 6 }
 0x294   : > { %1334 = vst [vmem:[#allocation1 + $0x1] ss:$9 sm:$0xff] %v704_v21  ;;  %v751_v21 = vrot.slane %v727_v17, 1 }
 0x295   : > { %1335 = vst [vmem:[#allocation1 + $0x2] ss:$9 sm:$0xff] %v705_v25  ;;  %v753_v25 = vrot.slane %v727_v17, 3 }
 0x296   : > { %1336 = vst [vmem:[#allocation1 + $0x3] ss:$9 sm:$0xff] %v706_v46  ;;  %v754_v46 = vrot.slane %v727_v17, 4 }
 0x297   : > { %1337 = vst [vmem:[#allocation1 + $0x4] ss:$9 sm:$0xff] %v673_v22  ;;  %v752_v22 = vrot.slane %v727_v17, 2 }
 0x298   : > { %1338 = vst [vmem:[#allocation1 + $0x5] ss:$9 sm:$0xff] %v707_v33  ;;  %v6854_v33 = vpop.f32.mrf.mxu1 }
 0x299   : > { %1339 = vst [vmem:[#allocation1 + $0x6] ss:$9 sm:$0xff] %v708_v28 }
 0x29a   : > { %1340 = vst [vmem:[#allocation1 + $0x7] ss:$9 sm:$0xff] %v709_v30  ;;  %v728_v30 = vld [vmem:[#allocation2 + $0x51] sm:$0x7f] }
 0x2a1   : > { %v6841_v55 = vld [vmem:[#allocation1] sm:$0xff] }
 0x2a2   : > { %1342 = vst [vmem:[#allocation1] ss:$9 sm:$0xff] %v710_v31  ;;  %v755_v31 = vrot.slane %v727_v17, 5 }
 0x2a3   : > { %1343 = vst [vmem:[#allocation1 + $0x1] ss:$9 sm:$0xff] %v711_v34  ;;  %v757_v34 = vrot.slane %v728_v30, 1 }
 0x2a4   : > { %1344 = vst [vmem:[#allocation1 + $0x2] ss:$9 sm:$0xff] %v712_v42  ;;  %v758_v42 = vrot.slane %v728_v30, 2 }
 0x2a5   : > { %1345 = vst [vmem:[#allocation1 + $0x3] ss:$9 sm:$0xff] %v674_v32  ;;  %v756_v32 = vrot.slane %v727_v17, 6 }
 0x2a6   : > { %1346 = vst [vmem:[#allocation1 + $0x4] ss:$9 sm:$0xff] %v713_v35  ;;  %v759_v35 = vrot.slane %v728_v30, 3 }
 0x2a7   : > { %1347 = vst [vmem:[#allocation1 + $0x5] ss:$9 sm:$0xff] %v714_v36  ;;  %v760_v36 = vrot.slane %v728_v30, 4 }
 0x2a8   : > { %1348 = vst [vmem:[#allocation1 + $0x6] ss:$9 sm:$0xff] %v715_v43  ;;  %v729_v43 = vld [vmem:[#allocation2 + $0x61] sm:$0x7f] }
 0x2a9   : > { %1349 = vst [vmem:[#allocation1 + $0x7] ss:$9 sm:$0xff] %v716_v44  ;;  %v761_v44 = vrot.slane %v728_v30, 5  ;;  %v768_v3 = vrot.slane %v729_v43, 6 }
 0x2b0   : > { %v6843_v48 = vld [vmem:[#allocation1] sm:$0xff] }
 0x2b1   : > { %1351 = vst [vmem:[#allocation1] ss:$9 sm:$0xff] %v717_v47  ;;  %v762_v47 = vrot.slane %v728_v30, 6 }
 0x2b2   : > { %1352 = vst [vmem:[#allocation1 + $0x1] ss:$9 sm:$0xff] %v718_v61  ;;  %v763_v61 = vrot.slane %v729_v43, 1 }
 0x2b3   : > { %1353 = vst [vmem:[#allocation1 + $0x2] ss:$9 sm:$0xff] %v675_v45 }
 0x2b4   : > { %1354 = vst [vmem:[#allocation1 + $0x3] ss:$9 sm:$0xff] %v719_v52  ;;  %v764_v52 = vrot.slane %v729_v43, 2 }
 0x2b5   : > { %1355 = vst [vmem:[#allocation1 + $0x4] ss:$9 sm:$0xff] %v720_v19  ;;  %v765_v19 = vrot.slane %v729_v43, 3 }
 0x2b6   : > { %1356 = vst [vmem:[#allocation1 + $0x5] ss:$9 sm:$0xff] %v721_v59 }
 0x2b7   : > { %1357 = vst [vmem:[#allocation1 + $0x6] ss:$9 sm:$0xff] %v722_v50  ;;  %v730_v50 = vld [vmem:[#allocation2 + $0x71] sm:$0x7f] }
 0x2b8   : > { %1358 = vst [vmem:[#allocation1 + $0x7] ss:$9 sm:$0xff] %v723_v51  ;;  %v767_v51 = vrot.slane %v729_v43, 5  ;;  %v769_v60 = vrot.slane %v730_v50, 1 }
 0x2bf   : > { %v6847_v2 = vld [vmem:[#allocation1] sm:$0xff] }
 0x2c0   : > { %1360 = vst [vmem:[#allocation1] ss:$9 sm:$0xff] %v724_v29  ;;  %v770_v29 = vrot.slane %v730_v50, 2 }
 0x2c7   : > { %v6849_v7 = vld [vmem:[#allocation1] sm:$0xff] }
 0x2c8   : > { %1369 = vst [vmem:[#allocation1] ss:$9 sm:$0xff] %v725_v62  ;;  %v771_v62 = vrot.slane %v730_v50, 3 }
 0x2c9   : > { %1371 = vst [vmem:[#allocation1 + $0x1] ss:$9 sm:$0xff] %v739_v1  ;;  %v772_v1 = vrot.slane %v730_v50, 4 }
 0x2ca   : > { %1373 = vst [vmem:[#allocation1 + $0x2] ss:$9 sm:$0xff] %v740_v5  ;;  %v1607_v5 = vld [vmem:[#allocation4 + $0x1f8] sm:$0xff] }
 0x2cb   : > { %1375 = vst [vmem:[#allocation1 + $0x3] ss:$9 sm:$0xff] %v741_v12  ;;  %v1606_v12 = vld [vmem:[#allocation4 + $0x1f0] sm:$0xff]  ;;  %1748 = vmatpush.msra.mxu2 %v1607_v5  ;;  %6146 = vmatpush.msra.mxu3 %v1607_v5 }
 0x2cc   : > { %1377 = vst [vmem:[#allocation1 + $0x4] ss:$9 sm:$0xff] %v742_v8  ;;  %v1605_v8 = vld [vmem:[#allocation4 + $0x1e8] sm:$0xff] }
 0x2cd   : > { %1379 = vst [vmem:[#allocation1 + $0x5] ss:$9 sm:$0xff] %v743_v38  ;;  %1749 = vmatpush.msra.mxu2 %v1606_v12  ;;  %6147 = vmatpush.msra.mxu3 %v1606_v12  ;;  %v1604_v38 = vld [vmem:[#allocation4 + $0x1e0] sm:$0xff] }
 0x2ce   : > { %1381 = vst [vmem:[#allocation1 + $0x6] ss:$9 sm:$0xff] %v744_v9  ;;  %v1615_v9 = vld [vmem:[#allocation4 + $0x238] sm:$0xff] }
 0x2cf   : > { %1383 = vst [vmem:[#allocation1 + $0x7] ss:$9 sm:$0xff] %v726_v40  ;;  %v6873_v40 = vld [vmem:[#allocation2 + $0x81] sm:$0x7f]  ;;  %1750 = vmatpush.msra.mxu2 %v1605_v8  ;;  %1794 = vmatpush.msra.mxu0 %v1615_v9 }
 0x2d0   : > { %6148 = vmatpush.msra.mxu3 %v1605_v8  ;;  %v782_v8 = vld [vmem:[#allocation2 + $0x32] sm:$0x7f] }
 0x2d1   : > { %1751 = vmatpush.msra.mxu2 %v1604_v38 }
 0x2d2   : > { %6149 = vmatpush.msra.mxu3 %v1604_v38 }
 0x2d6   : > { %v1384_v15 = vld [vmem:[#allocation1] sm:$0xff] }
 0x2d7   : > { %1432 = vrot.lane.b32.xlu2 %v1384_v15, %s6626_s14  ;;  %1385 = vst [vmem:[#allocation1] ss:$9 sm:$0xff] %v745_v10  ;;  %v773_v10 = vrot.slane %v730_v50, 5  ;;  %v1603_v15 = vld [vmem:[#allocation4 + $0x1d8] sm:$0xff] }
 0x2d8   : > { %1386 = vst [vmem:[#allocation1 + $0x1] ss:$9 sm:$0xff] %v746_v11  ;;  %v1614_v11 = vld [vmem:[#allocation4 + $0x230] sm:$0xff]  ;;  %1752 = vmatpush.msra.mxu2 %v1603_v15  ;;  %6150 = vmatpush.msra.mxu3 %v1603_v15 }
 0x2d9   : > { %1387 = vst [vmem:[#allocation1 + $0x2] ss:$9 sm:$0xff] %v747_v14  ;;  %v774_v14 = vrot.slane %v730_v50, 6  ;;  %1795 = vmatpush.msra.mxu0 %v1614_v11 }
 0x2da   : > { %1388 = vst [vmem:[#allocation1 + $0x3] ss:$9 sm:$0xff] %v748_v23 }
 0x2db   : > { %1389 = vst [vmem:[#allocation1 + $0x4] ss:$9 sm:$0xff] %v749_v18  ;;  %v1602_v18 = vld [vmem:[#allocation4 + $0x1d0] sm:$0xff] }
 0x2dc   : > { %1390 = vst [vmem:[#allocation1 + $0x5] ss:$9 sm:$0xff] %v750_v20  ;;  %v776_v20 = vrot.slane %v6873_v40, 2  ;;  %1753 = vmatpush.msra.mxu2 %v1602_v18  ;;  %6151 = vmatpush.msra.mxu3 %v1602_v18  ;;  %v802_v18 = vrot.slane %v782_v8, 2 }
 0x2dd   : > { %1391 = vst [vmem:[#allocation1 + $0x6] ss:$9 sm:$0xff] %v727_v17  ;;  %v775_v17 = vrot.slane %v6873_v40, 1 }
 0x2de   : > { %1392 = vst [vmem:[#allocation1 + $0x7] ss:$9 sm:$0xff] %v751_v21  ;;  %v1613_v21 = vld [vmem:[#allocation4 + $0x228] sm:$0xff] }
 0x2df   : > { %1280 = vrot.lane.b32.xlu2 %v6807_v39, %s6626_s14  ;;  %v6859_v39 = vpop.f32.mrf.mxu1  ;;  %1796 = vmatpush.msra.mxu0 %v1613_v21  ;;  %v804_v21 = vrot.slane %v782_v8, 4 }
 0x2e5   : > { %v1393_v28 = vld [vmem:[#allocation1] sm:$0xff] }
 0x2e6   : > { %1434 = vrot.lane.b32.xlu1 %v1393_v28, %s6626_s14  ;;  %1394 = vst [vmem:[#allocation1] ss:$9 sm:$0xff] %v752_v22  ;;  %v777_v22 = vrot.slane %v6873_v40, 3  ;;  %v778_v28 = vrot.slane %v6873_v40, 4 }
 0x2e7   : > { %1395 = vst [vmem:[#allocation1 + $0x1] ss:$9 sm:$0xff] %v753_v25  ;;  %v6862_v59 = vpop.f32.mrf.mxu1  ;;  %v1601_v25 = vld [vmem:[#allocation4 + $0x1c8] sm:$0xff] }
 0x2e8   : > { %1396 = vst [vmem:[#allocation1 + $0x2] ss:$9 sm:$0xff] %v754_v46  ;;  %v1612_v46 = vld [vmem:[#allocation4 + $0x220] sm:$0xff]  ;;  %1754 = vmatpush.msra.mxu2 %v1601_v25  ;;  %6152 = vmatpush.msra.mxu3 %v1601_v25 }
 0x2e9   : > { %1397 = vst [vmem:[#allocation1 + $0x3] ss:$9 sm:$0xff] %v755_v31  ;;  %v779_v31 = vrot.slane %v6873_v40, 5  ;;  %1797 = vmatpush.msra.mxu0 %v1612_v46 }
 0x2ea   : > { %1398 = vst [vmem:[#allocation1 + $0x4] ss:$9 sm:$0xff] %v756_v32  ;;  %v1600_v32 = vld [vmem:[#allocation4 + $0x1c0] sm:$0xff] }
 0x2eb   : > { %1399 = vst [vmem:[#allocation1 + $0x5] ss:$9 sm:$0xff] %v728_v30  ;;  %v1611_v30 = vld [vmem:[#allocation4 + $0x218] sm:$0xff]  ;;  %1755 = vmatpush.msra.mxu2 %v1600_v32  ;;  %6153 = vmatpush.msra.mxu3 %v1600_v32 }
 0x2ec   : > { %1400 = vst [vmem:[#allocation1 + $0x6] ss:$9 sm:$0xff] %v757_v34  ;;  %v1610_v34 = vld [vmem:[#allocation4 + $0x210] sm:$0xff]  ;;  %1798 = vmatpush.msra.mxu0 %v1611_v30 }
 0x2ed   : > { %1401 = vst [vmem:[#allocation1 + $0x7] ss:$9 sm:$0xff] %v758_v42 }
 0x2ee   : > { %1282 = vrot.lane.b32.xlu1 %v6813_v63, %s6626_s14  ;;  %v766_v63 = vrot.slane %v729_v43, 4  ;;  %1799 = vmatpush.msra.mxu0 %v1610_v34 }
 0x2ef   : > { %v6866_v56 = vpop.f32.mrf.mxu1 }
 0x2f4   : > { %v1402_v45 = vld [vmem:[#allocation1] sm:$0xff] }
 0x2f5   : > { %1436 = vrot.lane.b32.xlu0 %v1402_v45, %s6626_s14  ;;  %1403 = vst [vmem:[#allocation1] ss:$9 sm:$0xff] %v759_v35  ;;  %v1598_v35 = vld [vmem:[#allocation4 + $0x1b0] sm:$0xff]  ;;  %v780_v45 = vrot.slane %v6873_v40, 6 }
 0x2f6   : > { %1404 = vst [vmem:[#allocation1 + $0x1] ss:$9 sm:$0xff] %v760_v36  ;;  %v1609_v36 = vld [vmem:[#allocation4 + $0x208] sm:$0xff] }
 0x2f7   : > { %1405 = vst [vmem:[#allocation1 + $0x2] ss:$9 sm:$0xff] %v761_v44  ;;  %v1597_v44 = vld [vmem:[#allocation4 + $0x1a8] sm:$0xff]  ;;  %1800 = vmatpush.msra.mxu0 %v1609_v36 }
 0x2f8   : > { %1406 = vst [vmem:[#allocation1 + $0x3] ss:$9 sm:$0xff] %v762_v47  ;;  %v1596_v47 = vld [vmem:[#allocation4 + $0x1a0] sm:$0xff] }
 0x2f9   : > { %1407 = vst [vmem:[#allocation1 + $0x4] ss:$9 sm:$0xff] %v729_v43  ;;  %v1608_v43 = vld [vmem:[#allocation4 + $0x200] sm:$0xff] }
 0x2fa   : > { %1408 = vst [vmem:[#allocation1 + $0x5] ss:$9 sm:$0xff] %v763_v61  ;;  %1801 = vmatpush.msra.mxu0 %v1608_v43  ;;  %v1595_v61 = vld [vmem:[#allocation4 + $0x198] sm:$0xff] }
 0x2fb   : > { %1409 = vst [vmem:[#allocation1 + $0x6] ss:$9 sm:$0xff] %v764_v52 }
 0x2fc   : > { %1410 = vst [vmem:[#allocation1 + $0x7] ss:$9 sm:$0xff] %v765_v19  ;;  %v1594_v19 = vld [vmem:[#allocation4 + $0x190] sm:$0xff] }
 0x2fd   : > { %1284 = vrot.lane.b32.xlu0 %v6819_v26, %s6626_s14  ;;  %v6869_v26 = vpop.f32.mrf.mxu1 }
 0x303   : > { %v1411_v58 = vld [vmem:[#allocation1] sm:$0xff] }
 0x304   : > { %1412 = vst [vmem:[#allocation1] ss:$9 sm:$0xff] %v766_v63  ;;  %1438 = vrot.lane.b32.xlu2 %v1411_v58, %s6626_s14  ;;  %v1593_v63 = vld [vmem:[#allocation4 + $0x188] sm:$0xff] }
 0x305   : > { %1413 = vst [vmem:[#allocation1 + $0x1] ss:$9 sm:$0xff] %v767_v51  ;;  %v1592_v51 = vld [vmem:[#allocation4 + $0x180] sm:$0xff] }
 0x306   : > { %1414 = vst [vmem:[#allocation1 + $0x2] ss:$9 sm:$0xff] %v768_v3 }
 0x307   : > { %1415 = vst [vmem:[#allocation1 + $0x3] ss:$9 sm:$0xff] %v730_v50  ;;  %v781_v50 = vld [vmem:[#allocation2 + $0x22] sm:$0x7f] }
 0x308   : > { %1416 = vst [vmem:[#allocation1 + $0x4] ss:$9 sm:$0xff] %v769_v60  ;;  %v795_v3 = vrot.slane %v781_v50, 1  ;;  %v796_v58 = vrot.slane %v781_v50, 2  ;;  %v799_v5 = vrot.slane %v781_v50, 5  ;;  %v800_v12 = vrot.slane %v781_v50, 6 }
 0x309   : > { %1417 = vst [vmem:[#allocation1 + $0x5] ss:$9 sm:$0xff] %v770_v29  ;;  %v797_v29 = vrot.slane %v781_v50, 3 }
 0x30a   : > { %1418 = vst [vmem:[#allocation1 + $0x6] ss:$9 sm:$0xff] %v771_v62 }
 0x30b   : > { %1419 = vst [vmem:[#allocation1 + $0x7] ss:$9 sm:$0xff] %v772_v1  ;;  %v798_v1 = vrot.slane %v781_v50, 4 }
 0x30c   : > { %1286 = vrot.lane.b32.xlu2 %v6825_v37, %s6626_s14  ;;  %v6876_v37 = vpop.f32.mrf.mxu1 }
 0x312   : > { %v1420_v23 = vld [vmem:[#allocation1] sm:$0xff] }
 0x313   : > { %1440 = vrot.lane.b32.xlu1 %v1420_v23, %s6626_s14  ;;  %1421 = vst [vmem:[#allocation1] ss:$9 sm:$0xff] %v773_v10  ;;  %v783_v23 = vld [vmem:[#allocation2 + $0x42] sm:$0x7f] }
 0x314   : > { %1422 = vst [vmem:[#allocation1 + $0x1] ss:$9 sm:$0xff] %v774_v14  ;;  %1290 = vrot.lane.b32.xlu2 %v6833_v54, %s6626_s14  ;;  %v1599_v54 = vld [vmem:[#allocation4 + $0x1b8] sm:$0xff]  ;;  %v6886_v42 = vpop.f32.mrf.mxu1  ;;  %v807_v25 = vrot.slane %v783_v23, 1  ;;  %v808_v32 = vrot.slane %v783_v23, 2  ;;  %v809_v34 = vrot.slane %v783_v23, 3 }
 0x315   : > { %1423 = vst [vmem:[#allocation1 + $0x2] ss:$9 sm:$0xff] %v6873_v40  ;;  %1756 = vmatpush.msra.mxu2 %v1599_v54  ;;  %6154 = vmatpush.msra.mxu3 %v1599_v54  ;;  %v810_v54 = vrot.slane %v783_v23, 4  ;;  %v811_v36 = vrot.slane %v783_v23, 5 }
 0x316   : > { %1424 = vst [vmem:[#allocation1 + $0x3] ss:$9 sm:$0xff] %v775_v17  ;;  %v801_v17 = vrot.slane %v782_v8, 1 }
 0x317   : > { %1425 = vst [vmem:[#allocation1 + $0x4] ss:$9 sm:$0xff] %v776_v20  ;;  %1757 = vmatpush.msra.mxu2 %v1598_v35  ;;  %6155 = vmatpush.msra.mxu3 %v1598_v35  ;;  %v803_v20 = vrot.slane %v782_v8, 3 }
 0x318   : > { %1426 = vst [vmem:[#allocation1 + $0x5] ss:$9 sm:$0xff] %v777_v22  ;;  %v805_v22 = vrot.slane %v782_v8, 5 }
 0x319   : > { %1427 = vst [vmem:[#allocation1 + $0x6] ss:$9 sm:$0xff] %v778_v28  ;;  %1758 = vmatpush.msra.mxu2 %v1597_v44  ;;  %6156 = vmatpush.msra.mxu3 %v1597_v44  ;;  %v812_v44 = vrot.slane %v783_v23, 6 }
 0x31a   : > { %1428 = vst [vmem:[#allocation1 + $0x7] ss:$9 sm:$0xff] %v779_v31  ;;  %v784_v31 = vld [vmem:[#allocation2 + $0x52] sm:$0x7f] }
 0x31b   : > { %1288 = vrot.lane.b32.xlu1 %v6831_v49, %s6626_s14  ;;  %1759 = vmatpush.msra.mxu2 %v1596_v47 }
 0x31c   : > { %v6892_v49 = vpop.f32.mrf.mxu1  ;;  %6157 = vmatpush.msra.mxu3 %v1596_v47  ;;  %v814_v47 = vrot.slane %v784_v31, 2 }
 0x31d   : > { %1760 = vmatpush.msra.mxu2 %v1595_v61 }
 0x31e   : > { %6158 = vmatpush.msra.mxu3 %v1595_v61 }
 0x31f   : > { %1761 = vmatpush.msra.mxu2 %v1594_v19 }
 0x320   : > { %6159 = vmatpush.msra.mxu3 %v1594_v19  ;;  %v815_v19 = vrot.slane %v784_v31, 3 }
 0x321   : > { %v1429_v52 = vld [vmem:[#allocation1] sm:$0xff]  ;;  %1762 = vmatpush.msra.mxu2 %v1593_v63 }
 0x322   : > { %1442 = vrot.lane.b32.xlu0 %v1429_v52, %s6626_s14  ;;  %1430 = vst [vmem:[#allocation1] ss:$9 sm:$0xff] %v780_v45  ;;  %6160 = vmatpush.msra.mxu3 %v1593_v63  ;;  %v813_v45 = vrot.slane %v784_v31, 1  ;;  %v816_v63 = vrot.slane %v784_v31, 4 }
 0x323   : > { %1763 = vmatpush.msra.mxu2 %v1592_v51 }
 0x324   : > { %v6895_v62 = vpop.f32.mrf.mxu1  ;;  %6161 = vmatpush.msra.mxu3 %v1592_v51  ;;  %v817_v51 = vrot.slane %v784_v31, 5 }
 0x329   : > { %v1431_v60 = vld [vmem:[#allocation1] sm:$0xff] }
 0x32a   : > { %1444 = vrot.lane.b32.xlu0 %v1431_v60, %s6626_s14  ;;  %1453 = vst [vmem:[#allocation1] ss:$9 sm:$0xff] %v781_v50  ;;  %v785_v50 = vld [vmem:[#allocation2 + $0x62] sm:$0x7f]  ;;  %v818_v60 = vrot.slane %v784_v31, 6 }
 0x32b   : > { %1455 = vst [vmem:[#allocation1 + $0x1] ss:$9 sm:$0xff] %v795_v3 }
 0x32c   : > { %1457 = vst [vmem:[#allocation1 + $0x2] ss:$9 sm:$0xff] %v796_v58  ;;  %v6897_v9 = vpop.f32.mrf.mxu1 }
 0x32d   : > { %1459 = vst [vmem:[#allocation1 + $0x3] ss:$9 sm:$0xff] %v797_v29 }
 0x32e   : > { %1461 = vst [vmem:[#allocation1 + $0x4] ss:$9 sm:$0xff] %v798_v1  ;;  %v820_v1 = vrot.slane %v785_v50, 2 }
 0x32f   : > { %1463 = vst [vmem:[#allocation1 + $0x5] ss:$9 sm:$0xff] %v799_v5  ;;  %v821_v5 = vrot.slane %v785_v50, 3 }
 0x330   : > { %1465 = vst [vmem:[#allocation1 + $0x6] ss:$9 sm:$0xff] %v800_v12 }
 0x331   : > { %v1433_v38 = vpop.permute.xlu2 %1432  ;;  %1467 = vst [vmem:[#allocation1 + $0x7] ss:$9 sm:$0xff] %v782_v8 }
 0x332   : > { %v1537_v40 = vsel %vm296_vm0, %v6835_v6, %v1433_v38  ;;  %v806_v6 = vrot.slane %v782_v8, 6 }
 0x333   : > { %1764 = vmatmul.f32.vlgmr.msra.gmra.mxu2 %v1537_v40 }
 0x334   : > { %v6902_v14 = vpop.f32.mrf.mxu1 }
 0x338   : > { %v1468_v10 = vld [vmem:[#allocation1] sm:$0xff] }
 0x339   : > { %v1281_v11 = vpop.permute.xlu2 %1280  ;;  %6112 = vmatmul.msk.f32.vlgmr.msra.gmra.mxu0 %vm296_vm0, %v1468_v10  ;;  %1475 = vst [vmem:[#allocation1 + $0x6] ss:$9 sm:$0xff] %v783_v23  ;;  %v822_v23 = vrot.slane %v785_v50, 4 }
 0x33a   : > { %v1531_v15 = vsel %vm296_vm0, %v6782_v53, %v1281_v11  ;;  %1469 = vst [vmem:[#allocation1] ss:$9 sm:$0xff] %v801_v17  ;;  %v6911_v53 = vld [vmem:[%s10192_s2] ss:$0 sm:$0xff]  ;;  %v823_v17 = vrot.slane %v785_v50, 5 }
 0x33b   : > { %1729 = vmatmul.f32.gmra.mxu1 %v1531_v15  ;;  %1470 = vst [vmem:[#allocation1 + $0x1] ss:$9 sm:$0xff] %v802_v18  ;;  %v1667_v28 = vadd.f32 %v6911_v53, %v6876_v37  ;;  %v1670_v37 = vadd.f32 %v6911_v53, %v6886_v42  ;;  %v819_v42 = vrot.slane %v785_v50, 1  ;;  %v786_v15 = vld [vmem:[#allocation2 + $0x72] sm:$0x7f] }
 0x33c   : > { %1471 = vst [vmem:[#allocation1 + $0x2] ss:$9 sm:$0xff] %v803_v20  ;;  %v6906_v46 = vpop.f32.mrf.mxu1  ;;  %v825_v18 = vrot.slane %v786_v15, 1  ;;  %v826_v20 = vrot.slane %v786_v15, 2 }
 0x33d   : > { %1472 = vst [vmem:[#allocation1 + $0x3] ss:$9 sm:$0xff] %v804_v21 }
 0x33e   : > { %1473 = vst [vmem:[#allocation1 + $0x4] ss:$9 sm:$0xff] %v805_v22  ;;  %v827_v22 = vrot.slane %v786_v15, 3 }
 0x33f   : > { %1474 = vst [vmem:[#allocation1 + $0x5] ss:$9 sm:$0xff] %v806_v6  ;;  %v828_v6 = vrot.slane %v786_v15, 4 }
 0x340   : > { %1476 = vst [vmem:[#allocation1 + $0x7] ss:$9 sm:$0xff] %v807_v25 }
 0x344   : > { %v1704_v35 = vpop.f32.mrf.mxu1 }
 0x345   : > { %v6916_v43 = vadd.f32 %v1704_v35, %v1667_v28  ;;  %v787_v28 = vld [vmem:[#allocation2 + $0x82] sm:$0x7f] }
 0x346   : > { %v834_v35 = vrot.slane %v787_v28, 4 }
 0x347   : > { %v1477_v30 = vld [vmem:[#allocation1] sm:$0xff] }
 0x348   : > { %6113 = vmatmul.msk.f32.gmra.mxu0 %vm296_vm0, %v1477_v30  ;;  %1483 = vst [vmem:[#allocation1 + $0x5] ss:$9 sm:$0xff] %v784_v31  ;;  %v829_v30 = vrot.slane %v786_v15, 5  ;;  %v830_v31 = vrot.slane %v786_v15, 6 }
 0x349   : > { %1478 = vst [vmem:[#allocation1] ss:$9 sm:$0xff] %v808_v32 }
 0x34a   : > { %1479 = vst [vmem:[#allocation1 + $0x1] ss:$9 sm:$0xff] %v809_v34  ;;  %v831_v34 = vrot.slane %v787_v28, 1 }
 0x34b   : > { %1480 = vst [vmem:[#allocation1 + $0x2] ss:$9 sm:$0xff] %v810_v54  ;;  %v833_v54 = vrot.slane %v787_v28, 3 }
 0x34c   : > { %1481 = vst [vmem:[#allocation1 + $0x3] ss:$9 sm:$0xff] %v811_v36  ;;  %v1707_v61 = vpop.f32.mrf.mxu1  ;;  %v1846_v36 = vld [vmem:[%s10193_s3 + $0x78] sm:$0xff] }
 0x34d   : > { %1482 = vst [vmem:[#allocation1 + $0x4] ss:$9 sm:$0xff] %v812_v44  ;;  %v6920_v52 = vadd.f32 %v1707_v61, %v1670_v37  ;;  %v835_v44 = vrot.slane %v787_v28, 5  ;;  %1851 = vmatpush.msrb.mxu1 %v1846_v36  ;;  %v1842_v37 = vld [vmem:[%s10193_s3 + $0x58] sm:$0xff] }
 0x34e   : > { %1484 = vst [vmem:[#allocation1 + $0x6] ss:$9 sm:$0xff] %v813_v45  ;;  %v1844_v45 = vld [vmem:[%s10193_s3 + $0x68] sm:$0xff] }
 0x34f   : > { %1485 = vst [vmem:[#allocation1 + $0x7] ss:$9 sm:$0xff] %v814_v47  ;;  %v1843_v47 = vld [vmem:[%s10193_s3 + $0x60] sm:$0xff] }
 0x356   : > { %v1486_v58 = vld [vmem:[#allocation1] sm:$0xff] }
 0x357   : > { %6114 = vmatmul.msk.f32.gmra.mxu0 %vm296_vm0, %v1486_v58  ;;  %1487 = vst [vmem:[#allocation1] ss:$9 sm:$0xff] %v815_v19  ;;  %v1839_v58 = vld [vmem:[%s10193_s3 + $0x40] sm:$0xff] }
 0x358   : > { %v1435_v3 = vpop.permute.xlu1 %1434  ;;  %1488 = vst [vmem:[#allocation1 + $0x1] ss:$9 sm:$0xff] %v816_v63  ;;  %v1841_v63 = vld [vmem:[%s10193_s3 + $0x50] sm:$0xff] }
 0x359   : > { %v1538_v29 = vsel %vm296_vm0, %v6837_v16, %v1435_v3  ;;  %1489 = vst [vmem:[#allocation1 + $0x2] ss:$9 sm:$0xff] %v817_v51  ;;  %v1840_v51 = vld [vmem:[%s10193_s3 + $0x48] sm:$0xff] }
 0x35a   : > { %1767 = vmatmul.f32.gmra.mxu2 %v1538_v29  ;;  %1490 = vst [vmem:[#allocation1 + $0x3] ss:$9 sm:$0xff] %v818_v60  ;;  %v1838_v60 = vld [vmem:[%s10193_s3 + $0x38] sm:$0xff] }
 0x35b   : > { %1491 = vst [vmem:[#allocation1 + $0x4] ss:$9 sm:$0xff] %v785_v50 }
 0x35c   : > { %1492 = vst [vmem:[#allocation1 + $0x5] ss:$9 sm:$0xff] %v819_v42  ;;  %v1837_v42 = vld [vmem:[%s10193_s3 + $0x30] sm:$0xff] }
 0x35d   : > { %1493 = vst [vmem:[#allocation1 + $0x6] ss:$9 sm:$0xff] %v820_v1 }
 0x35e   : > { %v1439_v12 = vpop.permute.xlu2 %1438  ;;  %1494 = vst [vmem:[#allocation1 + $0x7] ss:$9 sm:$0xff] %v821_v5  ;;  %v1836_v5 = vld [vmem:[%s10193_s3 + $0x28] sm:$0xff] }
 0x35f   : > { %v1540_v8 = vsel %vm296_vm0, %v6841_v55, %v1439_v12  ;;  %v824_v55 = vrot.slane %v785_v50, 6  ;;  %v836_v50 = vrot.slane %v787_v28, 6 }
 0x360   : > { %v1283_v38 = vpop.permute.xlu1 %1282  ;;  %1773 = vmatmul.f32.vlgmr.msra.gmra.mxu3 %v1540_v8  ;;  %v1835_v8 = vld [vmem:[%s10193_s3 + $0x20] sm:$0xff] }
 0x361   : > { %v1532_v16 = vsel %vm296_vm0, %v6784_v4, %v1283_v38 }
 0x362   : > { %1732 = vmatmul.f32.gmra.mxu1 %v1532_v16 }
 0x365   : > { %v1495_v10 = vld [vmem:[#allocation1] sm:$0xff] }
 0x366   : > { %6115 = vmatmul.msk.f32.gmra.mxu0 %vm296_vm0, %v1495_v10  ;;  %1499 = vst [vmem:[#allocation1 + $0x3] ss:$9 sm:$0xff] %v786_v15  ;;  %v1833_v10 = vld [vmem:[%s10193_s3 + $0x10] sm:$0xff]  ;;  %v1831_v15 = vld [vmem:[%s10193_s3] sm:$0xff] }
 0x367   : > { %v1437_v40 = vpop.permute.xlu0 %1436  ;;  %1496 = vst [vmem:[#allocation1] ss:$9 sm:$0xff] %v822_v23  ;;  %v1652_v23 = vadd.f32 %v6911_v53, %v6854_v33 }
 0x368   : > { %v1539_v11 = vsel %vm296_vm0, %v6839_v27, %v1437_v40  ;;  %1497 = vst [vmem:[#allocation1 + $0x1] ss:$9 sm:$0xff] %v823_v17  ;;  %v1287_v27 = vpop.permute.xlu2 %1286  ;;  %v1834_v40 = vld [vmem:[%s10193_s3 + $0x18] sm:$0xff]  ;;  %v1727_v17 = vpop.f32.mrf.mxu1 }
 0x369   : > { %1770 = vmatmul.f32.gmra.mxu2 %v1539_v11  ;;  %1498 = vst [vmem:[#allocation1 + $0x2] ss:$9 sm:$0xff] %v824_v55  ;;  %v1534_v25 = vsel %vm296_vm0, %v6788_v24, %v1287_v27  ;;  %v1845_v24 = vld [vmem:[%s10193_s3 + $0x70] sm:$0xff]  ;;  %v1690_v55 = vadd.f32 %v6892_v49, %v1652_v23 }
 0x36a   : > { %1500 = vst [vmem:[#allocation1 + $0x4] ss:$9 sm:$0xff] %v825_v18  ;;  %1852 = vmatpush.msrb.mxu1 %v1845_v24 }
 0x36b   : > { %1501 = vst [vmem:[#allocation1 + $0x5] ss:$9 sm:$0xff] %v826_v20  ;;  %v1728_v18 = vadd.f32 %v1727_v17, %v1690_v55 }
 0x36c   : > { %1502 = vst [vmem:[#allocation1 + $0x6] ss:$9 sm:$0xff] %v827_v22  ;;  %1853 = vmatpush.msrb.mxu1 %v1844_v45 }
 0x36d   : > { %1503 = vst [vmem:[#allocation1 + $0x7] ss:$9 sm:$0xff] %v828_v6  ;;  %v1655_v6 = vadd.f32 %v6911_v53, %v6859_v39  ;;  %v1661_v39 = vadd.f32 %v6911_v53, %v6866_v56 }
 0x36e   : > { %1854 = vmatpush.msrb.mxu1 %v1843_v47 }
 0x36f   : > { %v1285_v21 = vpop.permute.xlu0 %1284  ;;  %v1699_v24 = vadd.f32 %v6902_v14, %v1661_v39 }
 0x370   : > { %v1533_v4 = vsel %vm296_vm0, %v6786_v13, %v1285_v21  ;;  %v832_v13 = vrot.slane %v787_v28, 2  ;;  %1855 = vmatpush.msrb.mxu1 %v1842_v37  ;;  %v1291_v1 = vpop.permute.xlu2 %1290 }
 0x371   : > { %1735 = vmatmul.f32.gmra.mxu1 %v1533_v4  ;;  %v1536_v38 = vsel %vm296_vm0, %v6796_v57, %v1291_v1  ;;  %v1832_v57 = vld [vmem:[%s10193_s3 + $0x8] sm:$0xff] }
 0x372   : > { %1856 = vmatpush.msrb.mxu1 %v1841_v63 }
 0x374   : > { %v1504_v32 = vld [vmem:[#allocation1] sm:$0xff]  ;;  %1857 = vmatpush.msrb.mxu1 %v1840_v51 }
 0x375   : > { %6116 = vmatmul.msk.f32.gmra.mxu0 %vm296_vm0, %v1504_v32  ;;  %1505 = vst [vmem:[#allocation1] ss:$9 sm:$0xff] %v829_v30 }
 0x376   : > { %1506 = vst [vmem:[#allocation1 + $0x1] ss:$9 sm:$0xff] %v830_v31  ;;  %1858 = vmatpush.msrb.mxu1 %v1839_v58 }
 0x377   : > { %1507 = vst [vmem:[#allocation1 + $0x2] ss:$9 sm:$0xff] %v787_v28 }
 0x378   : > { %1508 = vst [vmem:[#allocation1 + $0x3] ss:$9 sm:$0xff] %v831_v34  ;;  %1859 = vmatpush.msrb.mxu1 %v1838_v60 }
 0x379   : > { %1738 = vmatmul.f32.gmra.mxu1 %v1534_v25  ;;  %1509 = vst [vmem:[#allocation1 + $0x4] ss:$9 sm:$0xff] %v832_v13  ;;  %v1693_v25 = vadd.f32 %v6895_v62, %v1655_v6  ;;  %v1658_v13 = vadd.f32 %v6911_v53, %v6862_v59 }
 0x37a   : > { %1510 = vst [vmem:[#allocation1 + $0x5] ss:$9 sm:$0xff] %v833_v54  ;;  %1860 = vmatpush.msrb.mxu1 %v1837_v42 }
 0x37b   : > { %1511 = vst [vmem:[#allocation1 + $0x6] ss:$9 sm:$0xff] %v834_v35  ;;  %v1696_v62 = vadd.f32 %v6897_v9, %v1658_v13  ;;  %v1664_v9 = vadd.f32 %v6911_v53, %v6869_v26 }
 0x37c   : > { %1512 = vst [vmem:[#allocation1 + $0x7] ss:$9 sm:$0xff] %v835_v44  ;;  %1861 = vmatpush.msrb.mxu1 %v1836_v5 }
 0x37d   : > { %v1702_v51 = vadd.f32 %v6906_v46, %v1664_v9 }
 0x37e   : > { %1862 = vmatpush.msrb.mxu1 %v1835_v8 }
 0x380   : > { %1863 = vmatpush.msrb.mxu1 %v1834_v40 }
 0x382   : > { %1864 = vmatpush.msrb.mxu1 %v1833_v10 }
 0x383   : > { %v1513_v3 = vld [vmem:[#allocation1] sm:$0xff] }
 0x384   : > { %6117 = vmatmul.msk.f32.gmra.mxu0 %vm296_vm0, %v1513_v3  ;;  %1514 = vst [vmem:[#allocation1] ss:$9 sm:$0xff] %v836_v50  ;;  %1865 = vmatpush.msrb.mxu1 %v1832_v57 }
 0x385   : > { %v1441_v61 = vpop.permute.xlu1 %1440 }
 0x386   : > { %v1541_v19 = vsel %vm296_vm0, %v6843_v48, %v1441_v61  ;;  %1866 = vmatpush.msrb.mxu1 %v1831_v15 }
 0x387   : > { %1776 = vmatmul.f32.gmra.mxu3 %v1541_v19 }
 0x38b   : > { %v1515_v12 = vld [vmem:[#allocation1] sm:$0xff] }
 0x38c   : > { %6118 = vmatmul.msk.f32.gmra.mxu0 %vm296_vm0, %v1515_v12 }
 0x38d   : > { %v1289_v48 = vpop.permute.xlu1 %1288 }
 0x38e   : > { %v1535_v29 = vsel %vm296_vm0, %v6792_v41, %v1289_v48 }
 0x38f   : > { %1741 = vmatmul.f32.gmra.mxu1 %v1535_v29 }
 0x394   : > { %v1443_v41 = vpop.permute.xlu0 %1442 }
 0x395   : > { %v1542_v16 = vsel %vm296_vm0, %v6847_v2, %v1443_v41 }
 0x396   : > { %1779 = vmatmul.f32.gmra.mxu3 %v1542_v16 }
 0x397   : > { %1744 = vmatmul.f32.gmra.mxu1 %v1536_v38 }
 0x39c   : > { %v1445_v11 = vpop.permute.xlu0 %1444 }
 0x39d   : > { %v1543_v2 = vsel %vm296_vm0, %v6849_v7, %v1445_v11 }
 0x39e   : > { %1782 = vmatmul.f32.gmra.mxu3 %v1543_v2 }
 0x3b6   : > { %v1765_v20 = vpop.f32.mrf.mxu2  ;;  %v1803_v21 = vpop.f32.mrf.mxu0 }
 0x3b7   : > { %v1766_v22 = vadd.f32 %v1765_v20, %v1728_v18 }
 0x3b8   : > { %v1730_v27 = vpop.f32.mrf.mxu1 }
 0x3b9   : > { %v7000_v4 = vadd.f32 %v1803_v21, %v1766_v22  ;;  %v1731_v33 = vadd.f32 %v1730_v27, %v1693_v25 }
 0x3bb   : > { %v1824_v7 = vmul.f32 %v7000_v4, %v7000_v4 }
 0x3bd   : > { %1867 = vmatmul.f32.vlgmr.msrb.gmra.mxu1 %v1824_v7 }
 0x3c5   : > { %v1806_v30 = vpop.f32.mrf.mxu0 }
 0x3d4   : > { %v1809_v54 = vpop.f32.mrf.mxu0 }
 0x3dd   : > { %v1768_v28 = vpop.f32.mrf.mxu2 }
 0x3de   : > { %v1769_v49 = vadd.f32 %v1768_v28, %v1731_v33 }
 0x3df   : > { %v1733_v34 = vpop.f32.mrf.mxu1 }
 0x3e0   : > { %v7007_v31 = vadd.f32 %v1806_v30, %v1769_v49  ;;  %v1734_v35 = vadd.f32 %v1733_v34, %v1696_v62 }
 0x3e2   : > { %v1825_v32 = vmul.f32 %v7007_v31, %v7007_v31 }
 0x3e3   : > { %v1774_v47 = vpop.f32.mrf.mxu3  ;;  %v1812_v63 = vpop.f32.mrf.mxu0 }
 0x3e4   : > { %1870 = vmatmul.f32.gmra.mxu1 %v1825_v32 }
 0x3ec   : > { %v1771_v36 = vpop.f32.mrf.mxu2 }
 0x3ed   : > { %v1772_v44 = vadd.f32 %v1771_v36, %v1734_v35 }
 0x3ee   : > { %v1736_v45 = vpop.f32.mrf.mxu1 }
 0x3ef   : > { %v1737_v37 = vadd.f32 %v1736_v45, %v1699_v24  ;;  %v7017_v61 = vadd.f32 %v1809_v54, %v1772_v44 }
 0x3f1   : > { %v1775_v19 = vadd.f32 %v1774_v47, %v1737_v37  ;;  %v1826_v59 = vmul.f32 %v7017_v61, %v7017_v61 }
 0x3f2   : > { %v1815_v48 = vpop.f32.mrf.mxu0 }
 0x3f3   : > { %1873 = vmatmul.f32.gmra.mxu1 %v1826_v59  ;;  %v7021_v50 = vadd.f32 %v1812_v63, %v1775_v19 }
 0x3f5   : > { %v1827_v56 = vmul.f32 %v7021_v50, %v7021_v50 }
 0x3f6   : > { %v1739_v14 = vpop.f32.mrf.mxu1 }
 0x3f7   : > { %v1740_v3 = vadd.f32 %v1739_v14, %v1702_v51 }
 0x3fb   : > { %1876 = vmatmul.f32.gmra.mxu1 %v1827_v56 }
 0x401   : > { %v1818_v5 = vpop.f32.mrf.mxu0 }
 0x409   : > { %v1821_v40 = vpop.f32.mrf.mxu0 }
 0x40a   : > { %v1777_v58 = vpop.f32.mrf.mxu3 }
 0x40b   : > { %v1778_v60 = vadd.f32 %v1777_v58, %v1740_v3 }
 0x40c   : > { %v1742_v1 = vpop.f32.mrf.mxu1 }
 0x40d   : > { %v7028_v29 = vadd.f32 %v1815_v48, %v1778_v60  ;;  %v1743_v12 = vadd.f32 %v1742_v1, %v6916_v43  ;;  %v7045_v43 = vld [vmem:[%s10194_s4] ss:$0 sm:$0xff] }
 0x40f   : > { %v1828_v42 = vmul.f32 %v7028_v29, %v7028_v29 }
 0x411   : > { %1879 = vmatmul.f32.gmra.mxu1 %v1828_v42 }
 0x414   : > { %v1745_v53 = vpop.f32.mrf.mxu1 }
 0x415   : > { %v1746_v38 = vadd.f32 %v1745_v53, %v6920_v52 }
 0x419   : > { %v1780_v8 = vpop.f32.mrf.mxu3 }
 0x41a   : > { %v1781_v41 = vadd.f32 %v1780_v8, %v1743_v12 }
 0x41c   : > { %v7033_v26 = vadd.f32 %v1818_v5, %v1781_v41 }
 0x41e   : > { %v1829_v46 = vmul.f32 %v7033_v26, %v7033_v26 }
 0x420   : > { %1882 = vmatmul.f32.gmra.mxu1 %v1829_v46 }
 0x421   : > { %v1783_v16 = vpop.f32.mrf.mxu3 }
 0x422   : > { %v1784_v10 = vadd.f32 %v1783_v16, %v1746_v38 }
 0x424   : > { %v7038_v57 = vadd.f32 %v1821_v40, %v1784_v10 }
 0x426   : > { %v1830_v11 = vmul.f32 %v7038_v57, %v7038_v57 }
 0x428   : > { %1885 = vmatmul.f32.gmra.mxu1 %v1830_v11 }
 0x43a   : > { %v1868_v2 = vpop.f32.mrf.mxu1 }
 0x43b   : > { %v1869_v15 = vadd.f32 %v7045_v43, %v1868_v2 }
 0x43d   : > { %6566 = vrsqrt.f32 %v1869_v15  ;;  %vm1896_vm3 = vcmp.eq.f32.partialorder %v1869_v15, inf  ;;  %v1899_v22 = vand.u32 2147483648, %v1869_v15  ;;  %vm1898_vm4 = vcmp.eq.f32.partialorder %v1869_v15, 0.0 }
 0x443   : > { %v6567_v52 = vpop.eup %6566 }
 0x444   : > { %v1890_v23 = vmul.f32 %v6567_v52, %v1869_v15 }
 0x446   : > { %v1891_v17 = vmul.f32 %v6567_v52, %v1890_v23 }
 0x448   : > { %v1892_v55 = vmul.f32 0.5, %v1891_v17 }
 0x44a   : > { %v1893_v18 = vsub.f32 1.5, %v1892_v55 }
 0x44c   : > { %v1894_v20 = vmul.f32 %v6567_v52, %v1893_v18 }
 0x44e   : > { %v1895_v21 = vmul.f32 %v1894_v20, %v1869_v15 }
 0x450   : > { %v1897_v7 = vsel %vm1896_vm3, %v1869_v15, %v1895_v21 }
 0x451   : > { %v1900_v6 = vsel %vm1898_vm4, %v1899_v22, %v1897_v7 }
 0x452   : > { %v7049_v27 = vmul.f32 %v1900_v6, %v7000_v4 }
 0x454   : > { %v2071_v25 = vperm.slane %v7049_v27, 0  ;;  %v1987_v33 = vrot.slane %v7049_v27, 2  ;;  %v1986_v28 = vrot.slane %v7049_v27, 1  ;;  %v1988_v4 = vrot.slane %v7049_v27, 3 }
 0x455   : > { %v1990_v32 = vrot.slane %v7049_v27, 5  ;;  %v1992_v34 = vrot.slane %v7049_v27, 7  ;;  %v1991_v62 = vrot.slane %v7049_v27, 6  ;;  %v1989_v24 = vrot.slane %v7049_v27, 4 }
 0x456   : > { %2120 = vrot.lane.b32.xlu1 %v2071_v25, %s6627_s10  ;;  %v2073_v30 = vperm.slane %v1987_v33, 0  ;;  %v2072_v49 = vperm.slane %v1986_v28, 0  ;;  %v2074_v13 = vperm.slane %v1988_v4, 0 }
 0x457   : > { %v2076_v54 = vperm.slane %v1990_v32, 0  ;;  %v2078_v39 = vperm.slane %v1992_v34, 0  ;;  %v2077_v44 = vperm.slane %v1991_v62, 0  ;;  %v2075_v45 = vperm.slane %v1989_v24, 0 }
 0x458   : > { %2124 = vrot.lane.b32.xlu0 %v2073_v30, %s6627_s10  ;;  %2122 = vrot.lane.b32.xlu2 %v2072_v49, %s6627_s10 }
 0x45e   : > { %2126 = vrot.lane.b32.xlu1 %v2074_v13, %s6627_s10 }
 0x460   : > { %2130 = vrot.lane.b32.xlu0 %v2076_v54, %s6627_s10  ;;  %2134 = vrot.lane.b32.xlu2 %v2078_v39, %s6627_s10 }
 0x461   : > { %v1871_v35 = vpop.f32.mrf.mxu1 }
 0x462   : > { %v1872_v36 = vadd.f32 %v7045_v43, %v1871_v35 }
 0x464   : > { %6568 = vrsqrt.f32 %v1872_v36  ;;  %vm1908_vm5 = vcmp.eq.f32.partialorder %v1872_v36, inf  ;;  %v1911_v3 = vand.u32 2147483648, %v1872_v36  ;;  %vm1910_vm6 = vcmp.eq.f32.partialorder %v1872_v36, 0.0 }
 0x466   : > { %2132 = vrot.lane.b32.xlu1 %v2077_v44, %s6627_s10 }
 0x468   : > { %2128 = vrot.lane.b32.xlu2 %v2075_v45, %s6627_s10 }
 0x46a   : > { %v6569_v47 = vpop.eup %6568 }
 0x46b   : > { %v1902_v37 = vmul.f32 %v6569_v47, %v1872_v36 }
 0x46d   : > { %v1903_v19 = vmul.f32 %v6569_v47, %v1902_v37 }
 0x46f   : > { %v1904_v59 = vmul.f32 0.5, %v1903_v19 }
 0x470   : > { %v1874_v63 = vpop.f32.mrf.mxu1 }
 0x471   : > { %v1905_v56 = vsub.f32 1.5, %v1904_v59  ;;  %v1875_v9 = vadd.f32 %v7045_v43, %v1874_v63 }
 0x473   : > { %v1906_v14 = vmul.f32 %v6569_v47, %v1905_v56  ;;  %6570 = vrsqrt.f32 %v1875_v9  ;;  %vm1920_vm7 = vcmp.eq.f32.partialorder %v1875_v9, inf  ;;  %v1923_v20 = vand.u32 2147483648, %v1875_v9 }
 0x474   : > { %vm1922_vm8 = vcmp.eq.f32.partialorder %v1875_v9, 0.0 }
 0x475   : > { %v1907_v51 = vmul.f32 %v1906_v14, %v1872_v36 }
 0x477   : > { %v1909_v58 = vsel %vm1908_vm5, %v1872_v36, %v1907_v51  ;;  %vm5542_vm5 = vcmask 785408  }
 0x478   : > { %v1912_v48 = vsel %vm1910_vm6, %v1911_v3, %v1909_v58  ;;  %v1877_v60 = vpop.f32.mrf.mxu1  ;;  %vm6009_vm6 = vcmask 31744  }
 0x479   : > { %v6571_v42 = vpop.eup %6570  ;;  %v7084_v1 = vmul.f32 %v1912_v48, %v7007_v31  ;;  %v7087_v5 = vadd.f32 %v7045_v43, %v1877_v60 }
 0x47a   : > { %v1914_v12 = vmul.f32 %v6571_v42, %v1875_v9 }
 0x47b   : > { %6572 = vrsqrt.f32 %v7087_v5  ;;  %v2079_v41 = vperm.slane %v7084_v1, 0  ;;  %v1994_v53 = vrot.slane %v7084_v1, 2  ;;  %v1993_v46 = vrot.slane %v7084_v1, 1 }
 0x47c   : > { %v1915_v8 = vmul.f32 %v6571_v42, %v1914_v12  ;;  %v1998_v10 = vrot.slane %v7084_v1, 6  ;;  %v1996_v52 = vrot.slane %v7084_v1, 4  ;;  %v1999_v23 = vrot.slane %v7084_v1, 7 }
 0x47d   : > { %2136 = vrot.lane.b32.xlu0 %v2079_v41, %s6627_s10  ;;  %v2081_v31 = vperm.slane %v1994_v53, 0  ;;  %v2080_v16 = vperm.slane %v1993_v46, 0  ;;  %v1997_v30 = vrot.slane %v7084_v1, 5  ;;  %v1995_v13 = vrot.slane %v7084_v1, 3 }
 0x47e   : > { %v1916_v38 = vmul.f32 0.5, %v1915_v8  ;;  %v2085_v18 = vperm.slane %v1998_v10, 0  ;;  %v2083_v22 = vperm.slane %v1996_v52, 0  ;;  %v2086_v7 = vperm.slane %v1999_v23, 0 }
 0x47f   : > { %2140 = vrot.lane.b32.xlu2 %v2081_v31, %s6627_s10  ;;  %2138 = vrot.lane.b32.xlu1 %v2080_v16, %s6627_s10  ;;  %v2084_v39 = vperm.slane %v1997_v30, 0  ;;  %v2082_v36 = vperm.slane %v1995_v13, 0  ;;  %vm1932_vm9 = vcmp.eq.f32.partialorder %v7087_v5, inf  ;;  %v1935_v48 = vand.u32 2147483648, %v7087_v5 }
 0x480   : > { %v1917_v40 = vsub.f32 1.5, %v1916_v38  ;;  %vm1934_vm10 = vcmp.eq.f32.partialorder %v7087_v5, 0.0 }
 0x481   : > { %v6573_v11 = vpop.eup %6572 }
 0x482   : > { %v1918_v2 = vmul.f32 %v6571_v42, %v1917_v40  ;;  %v1926_v15 = vmul.f32 %v6573_v11, %v7087_v5 }
 0x484   : > { %v1919_v17 = vmul.f32 %v1918_v2, %v1875_v9  ;;  %v1927_v55 = vmul.f32 %v6573_v11, %v1926_v15 }
 0x485   : > { %2148 = vrot.lane.b32.xlu0 %v2085_v18, %s6627_s10 }
 0x486   : > { %v1921_v21 = vsel %vm1920_vm7, %v1875_v9, %v1919_v17  ;;  %v1928_v25 = vmul.f32 0.5, %v1927_v55 }
 0x487   : > { %v1924_v6 = vsel %vm1922_vm8, %v1923_v20, %v1921_v21  ;;  %2144 = vrot.lane.b32.xlu2 %v2083_v22, %s6627_s10  ;;  %2150 = vrot.lane.b32.xlu1 %v2086_v7, %s6627_s10 }
 0x488   : > { %v7115_v49 = vmul.f32 %v1924_v6, %v7017_v61  ;;  %v1929_v54 = vsub.f32 1.5, %v1928_v25 }
 0x48a   : > { %v2087_v44 = vperm.slane %v7115_v49, 0  ;;  %v1930_v47 = vmul.f32 %v6573_v11, %v1929_v54  ;;  %v2000_v61 = vrot.slane %v7115_v49, 1  ;;  %v2006_v37 = vrot.slane %v7115_v49, 7 }
 0x48b   : > { %v2004_v19 = vrot.slane %v7115_v49, 5  ;;  %v2005_v58 = vrot.slane %v7115_v49, 6  ;;  %v2003_v60 = vrot.slane %v7115_v49, 4  ;;  %v2002_v12 = vrot.slane %v7115_v49, 3 }
 0x48c   : > { %v1931_v59 = vmul.f32 %v1930_v47, %v7087_v5  ;;  %v2088_v63 = vperm.slane %v2000_v61, 0  ;;  %v2094_v56 = vperm.slane %v2006_v37, 0  ;;  %v2001_v17 = vrot.slane %v7115_v49, 2 }
 0x48d   : > { %2146 = vrot.lane.b32.xlu0 %v2084_v39, %s6627_s10  ;;  %v2092_v9 = vperm.slane %v2004_v19, 0  ;;  %v2093_v38 = vperm.slane %v2005_v58, 0  ;;  %v2091_v16 = vperm.slane %v2003_v60, 0 }
 0x48e   : > { %v1880_v35 = vpop.f32.mrf.mxu1  ;;  %v1933_v51 = vsel %vm1932_vm9, %v7087_v5, %v1931_v59  ;;  %v2090_v5 = vperm.slane %v2002_v12, 0  ;;  %v2089_v18 = vperm.slane %v2001_v17, 0 }
 0x48f   : > { %v1881_v45 = vadd.f32 %v7045_v43, %v1880_v35  ;;  %2142 = vrot.lane.b32.xlu1 %v2082_v36, %s6627_s10  ;;  %2152 = vrot.lane.b32.xlu2 %v2087_v44, %s6627_s10  ;;  %v1936_v8 = vsel %vm1934_vm10, %v1935_v48, %v1933_v51 }
 0x490   : > { %v7152_v40 = vmul.f32 %v1936_v8, %v7021_v50 }
 0x491   : > { %6574 = vrsqrt.f32 %v1881_v45  ;;  %vm1944_vm11 = vcmp.eq.f32.partialorder %v1881_v45, inf  ;;  %v1947_v6 = vand.u32 2147483648, %v1881_v45  ;;  %vm1946_vm12 = vcmp.eq.f32.partialorder %v1881_v45, 0.0 }
 0x492   : > { %v2010_v50 = vrot.slane %v7152_v40, 4  ;;  %v2095_v22 = vperm.slane %v7152_v40, 0  ;;  %v2012_v54 = vrot.slane %v7152_v40, 6  ;;  %v2011_v36 = vrot.slane %v7152_v40, 5 }
 0x493   : > { %v2013_v44 = vrot.slane %v7152_v40, 7 }
 0x494   : > { %v2099_v7 = vperm.slane %v2010_v50, 0 }
 0x495   : > { %2154 = vrot.lane.b32.xlu0 %v2088_v63, %s6627_s10  ;;  %v2101_v63 = vperm.slane %v2012_v54, 0 }
 0x497   : > { %v6575_v14 = vpop.eup %6574  ;;  %2166 = vrot.lane.b32.xlu1 %v2094_v56, %s6627_s10  ;;  %2162 = vrot.lane.b32.xlu2 %v2092_v9, %s6627_s10  ;;  %v2100_v56 = vperm.slane %v2011_v36, 0  ;;  %v2102_v9 = vperm.slane %v2013_v44, 0 }
 0x498   : > { %v1938_v3 = vmul.f32 %v6575_v14, %v1881_v45 }
 0x49a   : > { %v1939_v42 = vmul.f32 %v6575_v14, %v1938_v3 }
 0x49c   : > { %v1940_v41 = vmul.f32 0.5, %v1939_v42 }
 0x49d   : > { %v1883_v31 = vpop.f32.mrf.mxu1  ;;  %2164 = vrot.lane.b32.xlu0 %v2093_v38, %s6627_s10 }
 0x49e   : > { %v1941_v11 = vsub.f32 1.5, %v1940_v41  ;;  %v1884_v2 = vadd.f32 %v7045_v43, %v1883_v31 }
 0x49f   : > { %2160 = vrot.lane.b32.xlu2 %v2091_v16, %s6627_s10  ;;  %2158 = vrot.lane.b32.xlu1 %v2090_v5, %s6627_s10 }
 0x4a0   : > { %v1942_v15 = vmul.f32 %v6575_v14, %v1941_v11  ;;  %6576 = vrsqrt.f32 %v1884_v2  ;;  %vm1956_vm14 = vcmp.eq.f32.partialorder %v1884_v2, inf  ;;  %v1959_v3 = vand.u32 2147483648, %v1884_v2 }
 0x4a1   : > { %vm1958_vm15 = vcmp.eq.f32.partialorder %v1884_v2, 0.0 }
 0x4a2   : > { %v1943_v55 = vmul.f32 %v1942_v15, %v1881_v45 }
 0x4a4   : > { %v1945_v21 = vsel %vm1944_vm11, %v1881_v45, %v1943_v55 }
 0x4a5   : > { %2156 = vrot.lane.b32.xlu0 %v2089_v18, %s6627_s10  ;;  %v1948_v39 = vsel %vm1946_vm12, %v1947_v6, %v1945_v21 }
 0x4a6   : > { %v6577_v20 = vpop.eup %6576  ;;  %v7174_v59 = vmul.f32 %v1948_v39, %v7028_v29 }
 0x4a7   : > { %v1950_v25 = vmul.f32 %v6577_v20, %v1884_v2  ;;  %2168 = vrot.lane.b32.xlu2 %v2095_v22, %s6627_s10  ;;  %2176 = vrot.lane.b32.xlu1 %v2099_v7, %s6627_s10 }
 0x4a8   : > { %v2016_v29 = vrot.slane %v7174_v59, 3  ;;  %v2018_v48 = vrot.slane %v7174_v59, 5  ;;  %v2017_v42 = vrot.slane %v7174_v59, 4 }
 0x4a9   : > { %v1951_v35 = vmul.f32 %v6577_v20, %v1950_v25 }
 0x4aa   : > { %v2106_v16 = vperm.slane %v2016_v29, 0  ;;  %v2108_v5 = vperm.slane %v2018_v48, 0 }
 0x4ab   : > { %v1952_v47 = vmul.f32 0.5, %v1951_v35 }
 0x4ad   : > { %v1953_v45 = vsub.f32 1.5, %v1952_v47  ;;  %2180 = vrot.lane.b32.xlu0 %v2101_v63, %s6627_s10 }
 0x4af   : > { %v1954_v14 = vmul.f32 %v6577_v20, %v1953_v45  ;;  %2178 = vrot.lane.b32.xlu2 %v2100_v56, %s6627_s10  ;;  %2182 = vrot.lane.b32.xlu1 %v2102_v9, %s6627_s10 }
 0x4b1   : > { %v1955_v51 = vmul.f32 %v1954_v14, %v1884_v2 }
 0x4b2   : > { %v2123_v8 = vpop.permute.xlu2 %2122 }
 0x4b3   : > { %v1957_v41 = vsel %vm1956_vm14, %v1884_v2, %v1955_v51  ;;  %v2269_v38 = vsel %vm2267_vm13, %v1986_v28, %v2123_v8  ;;  %v2107_v2 = vperm.slane %v2017_v42, 0  ;;  %v2019_v28 = vrot.slane %v7174_v59, 6 }
 0x4b4   : > { %v1960_v31 = vsel %vm1958_vm15, %v1959_v3, %v1957_v41  ;;  %2499 = vst [vmem:[#allocation1 + $0x1] ss:$4 sm:$0xff] %v2269_v38 }
 0x4b5   : > { %v7194_v11 = vmul.f32 %v1960_v31, %v7033_v26  ;;  %2190 = vrot.lane.b32.xlu0 %v2106_v16, %s6627_s10  ;;  %v2109_v18 = vperm.slane %v2019_v28, 0  ;;  %v2007_v16 = vrot.slane %v7152_v40, 1 }
 0x4b7   : > { %2194 = vrot.lane.b32.xlu2 %v2108_v5, %s6627_s10  ;;  %2192 = vrot.lane.b32.xlu1 %v2107_v2, %s6627_s10  ;;  %v2024_v15 = vrot.slane %v7194_v11, 4  ;;  %v2022_v55 = vrot.slane %v7194_v11, 2  ;;  %v2023_v22 = vrot.slane %v7194_v11, 3  ;;  %v2025_v7 = vrot.slane %v7194_v11, 5 }
 0x4b8   : > { %v2096_v5 = vperm.slane %v2007_v16, 0 }
 0x4b9   : > { %v2115_v20 = vperm.slane %v2024_v15, 0  ;;  %v2113_v21 = vperm.slane %v2022_v55, 0  ;;  %v2114_v39 = vperm.slane %v2023_v22, 0  ;;  %v2116_v35 = vperm.slane %v2025_v7, 0 }
 0x4ba   : > { %v2135_v26 = vpop.permute.xlu2 %2134 }
 0x4bd   : > { %2196 = vrot.lane.b32.xlu0 %v2109_v18, %s6627_s10 }
 0x4bf   : > { %2208 = vrot.lane.b32.xlu1 %v2115_v20, %s6627_s10  ;;  %2204 = vrot.lane.b32.xlu2 %v2113_v21, %s6627_s10 }
 0x4c2   : > { %v2129_v6 = vpop.permute.xlu2 %2128 }
 0x4c3   : > { %v2272_v25 = vsel %vm2267_vm13, %v1989_v24, %v2129_v6 }
 0x4c4   : > { %2505 = vst [vmem:[#allocation1 + $0x20] ss:$4 sm:$0xff] %v2272_v25 }
 0x4c5   : > { %2206 = vrot.lane.b32.xlu0 %v2114_v39, %s6627_s10 }
 0x4c7   : > { %2210 = vrot.lane.b32.xlu2 %v2116_v35, %s6627_s10 }
 0x4c8   : > { %v2121_v47 = vpop.permute.xlu1 %2120 }
 0x4c9   : > { %v2268_v63 = vsel %vm2267_vm13, %v7049_v27, %v2121_v47 }
 0x4ca   : > { %v2125_v45 = vpop.permute.xlu0 %2124  ;;  %2366 = vrot.lane.b32.xlu1 %v2268_v63, %s6626_s14  ;;  %2497 = vst [vmem:[#allocation1] ss:$4 sm:$0xff] %v2268_v63 }
 0x4cb   : > { %v2270_v24 = vsel %vm2267_vm13, %v1987_v33, %v2125_v45  ;;  %v7244_v33 = vsel %vm2267_vm13, %v1992_v34, %v2135_v26 }
 0x4cc   : > { %2501 = vst [vmem:[#allocation1 + $0x2] ss:$4 sm:$0xff] %v2270_v24 }
 0x4cd   : > { %2370 = vrot.lane.b32.xlu0 %v2270_v24, %s6626_s14 }
 0x4cf   : > { %2368 = vrot.lane.b32.xlu2 %v2269_v38, %s6626_s14 }
 0x4d0   : > { %v2127_v56 = vpop.permute.xlu1 %2126 }
 0x4d1   : > { %v2271_v9 = vsel %vm2267_vm13, %v1988_v4, %v2127_v56 }
 0x4d2   : > { %v2131_v14 = vpop.permute.xlu0 %2130  ;;  %2372 = vrot.lane.b32.xlu1 %v2271_v9, %s6626_s14  ;;  %2503 = vst [vmem:[#allocation1 + $0x3] ss:$4 sm:$0xff] %v2271_v9 }
 0x4d3   : > { %v2273_v51 = vsel %vm2267_vm13, %v1990_v32, %v2131_v14 }
 0x4d4   : > { %2507 = vst [vmem:[#allocation1 + $0x21] ss:$4 sm:$0xff] %v2273_v51 }
 0x4d5   : > { %2380 = vrot.lane.b32.xlu0 %v7244_v33, %s6626_s14 }
 0x4d7   : > { %2376 = vrot.lane.b32.xlu2 %v2273_v51, %s6626_s14 }
 0x4d8   : > { %v2133_v4 = vpop.permute.xlu1 %2132 }
 0x4d9   : > { %v2274_v3 = vsel %vm2267_vm13, %v1991_v62, %v2133_v4  ;;  %v2141_v8 = vpop.permute.xlu2 %2140  ;;  %v2510_v21 = vld.sshfl [vmem:[#allocation1] sm:$0xff pattern:$0x73625140] }
 0x4da   : > { %2374 = vrot.lane.b32.xlu1 %v2272_v25, %s6626_s14  ;;  %2509 = vst [vmem:[#allocation1 + $0x22] ss:$4 sm:$0xff] %v2274_v3  ;;  %v7256_v32 = vsel %vm2267_vm13, %v1994_v53, %v2141_v8 }
 0x4db   : > { %2658 = vst.msk [vmem:[#allocation3 + $0x11] sm:$0xff] %vm2464_vm1, %v2510_v21 }
 0x4dd   : > { %2386 = vrot.lane.b32.xlu0 %v7256_v32, %s6626_s14 }
 0x4e1   : > { %v7264_v27 = vpop.permute.xlu2 %2144 }
 0x4e5   : > { %2378 = vrot.lane.b32.xlu0 %v2274_v3, %s6626_s14 }
 0x4e9   : > { %v2153_v34 = vpop.permute.xlu2 %2152 }
 0x4ea   : > { %v7364_v25 = vsel %vm2267_vm13, %v7115_v49, %v2153_v34  ;;  %v2021_v49 = vrot.slane %v7194_v11, 1 }
 0x4ef   : > { %v2137_v62 = vpop.permute.xlu0 %2136 }
 0x4f0   : > { %v7299_v53 = vsel %vm2267_vm13, %v7084_v1, %v2137_v62 }
 0x4f1   : > { %v2139_v41 = vpop.permute.xlu1 %2138  ;;  %v2163_v38 = vpop.permute.xlu2 %2162  ;;  %2382 = vrot.lane.b32.xlu1 %v7299_v53, %s6626_s14 }
 0x4f2   : > { %v7310_v31 = vsel %vm2267_vm13, %v1993_v46, %v2139_v41  ;;  %v7375_v63 = vsel %vm2267_vm13, %v2004_v19, %v2163_v38  ;;  %v2008_v19 = vrot.slane %v7152_v40, 2 }
 0x4f3   : > { %2384 = vrot.lane.b32.xlu2 %v7310_v31, %s6626_s14 }
 0x4f4   : > { %v2097_v14 = vperm.slane %v2008_v19, 0 }
 0x4f7   : > { %v2149_v46 = vpop.permute.xlu0 %2148 }
 0x4f8   : > { %v7344_v20 = vsel %vm2267_vm13, %v1998_v10, %v2149_v46  ;;  %v2511_v10 = vld.sshfl [vmem:[#allocation1 + $0x20] sm:$0xff pattern:$0x73625140] }
 0x4f9   : > { %v2151_v2 = vpop.permute.xlu1 %2150  ;;  %v7331_v26 = vpop.permute.xlu2 %2160  ;;  %2170 = vrot.lane.b32.xlu1 %v2096_v5, %s6627_s10  ;;  %2660 = vst.msk [vmem:[#allocation3 + $0x19] sm:$0x3f] %vm2659_vm2, %v2511_v10 }
 0x4fa   : > { %v7339_v18 = vsel %vm2267_vm13, %v1999_v23, %v2151_v2  ;;  %v2009_v23 = vrot.slane %v7152_v40, 3 }
 0x4fb   : > { %2396 = vrot.lane.b32.xlu0 %v7339_v18, %s6626_s14  ;;  %2394 = vrot.lane.b32.xlu2 %v7344_v20, %s6626_s14 }
 0x4fc   : > { %v2098_v47 = vperm.slane %v2009_v23, 0 }
 0x4ff   : > { %v2147_v6 = vpop.permute.xlu0 %2146 }
 0x501   : > { %v2143_v39 = vpop.permute.xlu1 %2142  ;;  %v2169_v35 = vpop.permute.xlu2 %2168  ;;  %2398 = vrot.lane.b32.xlu1 %v7364_v25, %s6626_s14 }
 0x502   : > { %v7398_v51 = vsel %vm2267_vm13, %v7152_v40, %v2169_v35  ;;  %v7436_v46 = vsel %vm2267_vm13, %v1995_v13, %v2143_v39  ;;  %v2015_v35 = vrot.slane %v7174_v59, 2 }
 0x503   : > { %2174 = vrot.lane.b32.xlu0 %v2098_v47, %s6627_s10 }
 0x507   : > { %v2155_v0 = vpop.permute.xlu0 %2154 }
 0x508   : > { %v7380_v45 = vsel %vm2267_vm13, %v2000_v61, %v2155_v0  ;;  %v2105_v0 = vperm.slane %v2015_v35, 0 }
 0x509   : > { %v2167_v24 = vpop.permute.xlu1 %2166  ;;  %v2179_v56 = vpop.permute.xlu2 %2178  ;;  %2408 = vrot.lane.b32.xlu1 %v7375_v63, %s6626_s14  ;;  %2400 = vrot.lane.b32.xlu2 %v7380_v45, %s6626_s14 }
 0x50a   : > { %v7389_v9 = vsel %vm2267_vm13, %v2006_v37, %v2167_v24  ;;  %v7410_v8 = vsel %vm2267_vm13, %v2011_v36, %v2179_v56 }
 0x50b   : > { %2412 = vrot.lane.b32.xlu0 %v7389_v9, %s6626_s14 }
 0x50f   : > { %v2165_v61 = vpop.permute.xlu0 %2164 }
 0x510   : > { %v7415_v34 = vsel %vm2267_vm13, %v2005_v58, %v2165_v61  ;;  %v7431_v58 = vsel %vm2267_vm13, %v1997_v30, %v2147_v6  ;;  %v2103_v6 = vperm.slane %v7174_v59, 0 }
 0x511   : > { %v7400_v4 = vpop.permute.xlu1 %2158  ;;  %v2195_v3 = vpop.permute.xlu2 %2194  ;;  %2414 = vrot.lane.b32.xlu1 %v7398_v51, %s6626_s14  ;;  %2172 = vrot.lane.b32.xlu2 %v2097_v14, %s6627_s10 }
 0x517   : > { %v7405_v37 = vpop.permute.xlu0 %2156 }
 0x519   : > { %v2177_v62 = vpop.permute.xlu1 %2176  ;;  %2424 = vrot.lane.b32.xlu1 %v7410_v8, %s6626_s14  ;;  %2410 = vrot.lane.b32.xlu2 %v7415_v34, %s6626_s14  ;;  %v2205_v41 = vpop.permute.xlu2 %2204 }
 0x51a   : > { %v7424_v38 = vsel %vm2267_vm13, %v2010_v50, %v2177_v62 }
 0x51b   : > { %2422 = vrot.lane.b32.xlu0 %v7424_v38, %s6626_s14 }
 0x51f   : > { %v2181_v36 = vpop.permute.xlu0 %2180 }
 0x520   : > { %v7457_v21 = vsel %vm2267_vm13, %v2012_v54, %v2181_v36  ;;  %v1886_v36 = vpop.f32.mrf.mxu1 }
 0x521   : > { %v2183_v5 = vpop.permute.xlu1 %2182  ;;  %2392 = vrot.lane.b32.xlu1 %v7431_v58, %s6626_s14  ;;  %2388 = vrot.lane.b32.xlu2 %v7436_v46, %s6626_s14  ;;  %v2211_v50 = vpop.permute.xlu2 %2210 }
 0x522   : > { %v7445_v2 = vsel %vm2267_vm13, %v2013_v44, %v2183_v5  ;;  %v7550_v5 = vadd.f32 %v7045_v43, %v1886_v36 }
 0x523   : > { %2428 = vrot.lane.b32.xlu0 %v7445_v2, %s6626_s14 }
 0x524   : > { %6578 = vrsqrt.f32 %v7550_v5  ;;  %vm1968_vm3 = vcmp.eq.f32.partialorder %v7550_v5, inf  ;;  %vm1970_vm4 = vcmp.eq.f32.partialorder %v7550_v5, 0.0 }
 0x527   : > { %v2191_v30 = vpop.permute.xlu0 %2190 }
 0x528   : > { %v7452_v13 = vsel %vm2267_vm13, %v2016_v29, %v2191_v30  ;;  %v7467_v29 = vsel %vm2267_vm13, %v1996_v52, %v7264_v27  ;;  %v7483_v52 = vsel %vm2267_vm13, %v2018_v48, %v2195_v3 }
 0x529   : > { %v2193_v10 = vpop.permute.xlu1 %2192  ;;  %2436 = vrot.lane.b32.xlu1 %v7452_v13, %s6626_s14  ;;  %2426 = vrot.lane.b32.xlu2 %v7457_v21, %s6626_s14  ;;  %v2369_v44 = vpop.permute.xlu2 %2368 }
 0x52a   : > { %2513 = vst [vmem:[#allocation1 + $0x1] ss:$4 sm:$0xff] %v2369_v44  ;;  %v7494_v24 = vsel %vm2267_vm13, %v2017_v42, %v2193_v10  ;;  %v7510_v42 = vsel %vm2267_vm13, %v2022_v55, %v2205_v41  ;;  %v7527_v55 = vsel %vm2267_vm13, %v2002_v12, %v7400_v4  ;;  %v7532_v41 = vsel %vm2267_vm13, %v2025_v7, %v2211_v50 }
 0x52b   : > { %2390 = vrot.lane.b32.xlu0 %v7467_v29, %s6626_s14  ;;  %v2020_v4 = vrot.slane %v7174_v59, 7 }
 0x52d   : > { %v2110_v43 = vperm.slane %v2020_v4, 0 }
 0x52f   : > { %v2197_v54 = vpop.permute.xlu0 %2196 }
 0x530   : > { %v7475_v39 = vsel %vm2267_vm13, %v2019_v28, %v2197_v54  ;;  %v2014_v28 = vrot.slane %v7174_v59, 1 }
 0x531   : > { %2442 = vrot.lane.b32.xlu1 %v7475_v39, %s6626_s14  ;;  %2184 = vrot.lane.b32.xlu2 %v2103_v6, %s6627_s10  ;;  %v2377_v1 = vpop.permute.xlu2 %2376  ;;  %v2209_v27 = vpop.permute.xlu1 %2208 }
 0x532   : > { %2517 = vst [vmem:[#allocation1 + $0x21] ss:$4 sm:$0xff] %v2377_v1  ;;  %v2104_v48 = vperm.slane %v2014_v28, 0  ;;  %v7505_v14 = vsel %vm2267_vm13, %v2024_v15, %v2209_v27 }
 0x533   : > { %2440 = vrot.lane.b32.xlu0 %v7483_v52, %s6626_s14 }
 0x537   : > { %v2207_v47 = vpop.permute.xlu0 %2206 }
 0x538   : > { %v7519_v3 = vsel %vm2267_vm13, %v2023_v22, %v2207_v47  ;;  %v7542_v22 = vsel %vm2267_vm13, %v2001_v17, %v7405_v37  ;;  %v2111_v17 = vperm.slane %v7194_v11, 0 }
 0x539   : > { %2188 = vrot.lane.b32.xlu1 %v2105_v0, %s6627_s10  ;;  %2438 = vrot.lane.b32.xlu2 %v7494_v24, %s6626_s14 }
 0x53b   : > { %2186 = vrot.lane.b32.xlu0 %v2104_v48, %s6627_s10 }
 0x53c   : > { %v2367_v56 = vpop.permute.xlu1 %2366 }
 0x53d   : > { %2512 = vst [vmem:[#allocation1] ss:$4 sm:$0xff] %v2367_v56 }
 0x53f   : > { %v2371_v61 = vpop.permute.xlu0 %2370 }
 0x540   : > { %2514 = vst [vmem:[#allocation1 + $0x2] ss:$4 sm:$0xff] %v2371_v61 }
 0x541   : > { %2454 = vrot.lane.b32.xlu1 %v7505_v14, %s6626_s14  ;;  %2450 = vrot.lane.b32.xlu2 %v7510_v42, %s6626_s14 }
 0x543   : > { %2452 = vrot.lane.b32.xlu0 %v7519_v3, %s6626_s14 }
 0x544   : > { %v2373_v15 = vpop.permute.xlu1 %2372 }
 0x545   : > { %2515 = vst [vmem:[#allocation1 + $0x3] ss:$4 sm:$0xff] %v2373_v15 }
 0x547   : > { %v2381_v62 = vpop.permute.xlu0 %2380 }
 0x549   : > { %2404 = vrot.lane.b32.xlu1 %v7527_v55, %s6626_s14  ;;  %2456 = vrot.lane.b32.xlu2 %v7532_v41, %s6626_s14 }
 0x54b   : > { %2402 = vrot.lane.b32.xlu0 %v7542_v22, %s6626_s14 }
 0x54c   : > { %v2519_v12 = vld.sshfl [vmem:[#allocation1] sm:$0xff pattern:$0x73625140]  ;;  %v2375_v7 = vpop.permute.xlu1 %2374 }
 0x54d   : > { %2521 = vst [vmem:[#allocation1] ss:$4 sm:$0xff] %v7244_v33  ;;  %v7559_v33 = vsel %vm2267_vm13, %v2003_v60, %v7331_v26  ;;  %v6579_v26 = vpop.eup %6578 }
 0x54e   : > { %2522 = vst [vmem:[#allocation1 + $0x1] ss:$4 sm:$0xff] %v7299_v53  ;;  %v2385_v53 = vpop.permute.xlu2 %2384  ;;  %v1962_v30 = vmul.f32 %v6579_v26, %v7550_v5 }
 0x54f   : > { %2523 = vst [vmem:[#allocation1 + $0x2] ss:$4 sm:$0xff] %v7310_v31  ;;  %v2387_v37 = vpop.permute.xlu0 %2386 }
 0x550   : > { %2524 = vst [vmem:[#allocation1 + $0x3] ss:$4 sm:$0xff] %v7256_v32  ;;  %v2112_v32 = vperm.slane %v2021_v49, 0  ;;  %v1963_v10 = vmul.f32 %v6579_v26, %v1962_v30 }
 0x551   : > { %2516 = vst [vmem:[#allocation1 + $0x20] ss:$4 sm:$0xff] %v2375_v7  ;;  %2200 = vrot.lane.b32.xlu1 %v2111_v17, %s6627_s10  ;;  %2406 = vrot.lane.b32.xlu2 %v7559_v33, %s6626_s14 }
 0x552   : > { %2661 = vst.msk [vmem:[#allocation3 + $0x21] sm:$0xff] %vm2464_vm1, %v2519_v12  ;;  %v1964_v1 = vmul.f32 0.5, %v1963_v10  ;;  %v1971_v12 = vand.u32 2147483648, %v7550_v5 }
 0x553   : > { %2198 = vrot.lane.b32.xlu0 %v2110_v43, %s6627_s10 }
 0x554   : > { %v1965_v27 = vsub.f32 1.5, %v1964_v1 }
 0x556   : > { %v2395_v50 = vpop.permute.xlu2 %2394  ;;  %v1966_v56 = vmul.f32 %v6579_v26, %v1965_v27 }
 0x557   : > { %v2528_v60 = vld.sshfl [vmem:[#allocation1] sm:$0xff pattern:$0x73625140]  ;;  %v2379_v31 = vpop.permute.xlu0 %2378 }
 0x558   : > { %2530 = vst [vmem:[#allocation1] ss:$4 sm:$0xff] %v2381_v62  ;;  %v1967_v15 = vmul.f32 %v1966_v56, %v7550_v5 }
 0x559   : > { %2532 = vst [vmem:[#allocation1 + $0x2] ss:$4 sm:$0xff] %v2385_v53  ;;  %2202 = vrot.lane.b32.xlu2 %v2112_v32, %s6627_s10 }
 0x55a   : > { %2533 = vst [vmem:[#allocation1 + $0x3] ss:$4 sm:$0xff] %v2387_v37 }
 0x55b   : > { %2518 = vst [vmem:[#allocation1 + $0x22] ss:$4 sm:$0xff] %v2379_v31 }
 0x55c   : > { %2663 = vst.msk [vmem:[#allocation3 + $0x31] sm:$0xff] %vm2464_vm1, %v2528_v60 }
 0x562   : > { %v2520_v44 = vld.sshfl [vmem:[#allocation1 + $0x20] sm:$0xff pattern:$0x73625140] }
 0x563   : > { %2525 = vst [vmem:[#allocation1 + $0x20] ss:$4 sm:$0xff] %v7436_v46  ;;  %v2383_v54 = vpop.permute.xlu1 %2382  ;;  %v2401_v6 = vpop.permute.xlu2 %2400 }
 0x564   : > { %2526 = vst [vmem:[#allocation1 + $0x21] ss:$4 sm:$0xff] %v7467_v29 }
 0x565   : > { %2527 = vst [vmem:[#allocation1 + $0x22] ss:$4 sm:$0xff] %v7431_v58 }
 0x566   : > { %2531 = vst [vmem:[#allocation1 + $0x1] ss:$4 sm:$0xff] %v2383_v54 }
 0x567   : > { %2662 = vst.msk [vmem:[#allocation3 + $0x29] sm:$0x3f] %vm2659_vm2, %v2520_v44 }
 0x56b   : > { %v2171_v0 = vpop.permute.xlu1 %2170  ;;  %v2173_v48 = vpop.permute.xlu2 %2172 }
 0x56c   : > { %v2529_v47 = vld.sshfl [vmem:[#allocation1 + $0x20] sm:$0xff pattern:$0x73625140]  ;;  %v7582_v46 = vsel %vm2267_vm13, %v2007_v16, %v2171_v0  ;;  %v7587_v29 = vsel %vm2267_vm13, %v2008_v19, %v2173_v48  ;;  %v2026_v16 = vrot.slane %v7194_v11, 6  ;;  %v2027_v19 = vrot.slane %v7194_v11, 7 }
 0x56d   : > { %v2537_v61 = vld.sshfl [vmem:[#allocation1] sm:$0xff pattern:$0x73625140]  ;;  %2664 = vst.msk [vmem:[#allocation3 + $0x39] sm:$0x3f] %vm2659_vm2, %v2529_v47  ;;  %2416 = vrot.lane.b32.xlu0 %v7582_v46, %s6626_s14  ;;  %v2397_v58 = vpop.permute.xlu0 %2396  ;;  %2418 = vrot.lane.b32.xlu1 %v7587_v29, %s6626_s14 }
 0x56e   : > { %2539 = vst [vmem:[#allocation1] ss:$4 sm:$0xff] %v7344_v20  ;;  %v2117_v36 = vperm.slane %v2026_v16, 0 }
 0x56f   : > { %2540 = vst [vmem:[#allocation1 + $0x1] ss:$4 sm:$0xff] %v7339_v18  ;;  %v2118_v18 = vperm.slane %v2027_v19, 0 }
 0x570   : > { %2541 = vst [vmem:[#allocation1 + $0x2] ss:$4 sm:$0xff] %v7364_v25  ;;  %v1969_v25 = vsel %vm1968_vm3, %v7550_v5, %v1967_v15 }
 0x571   : > { %2542 = vst [vmem:[#allocation1 + $0x3] ss:$4 sm:$0xff] %v7380_v45  ;;  %v1972_v17 = vsel %vm1970_vm4, %v1971_v12, %v1969_v25 }
 0x572   : > { %2665 = vst.msk [vmem:[#allocation3 + $0x41] sm:$0xff] %vm2464_vm1, %v2537_v61  ;;  %v7620_v53 = vmul.f32 %v1972_v17, %v7038_v57 }
 0x573   : > { %v2399_v20 = vpop.permute.xlu1 %2398  ;;  %v2411_v62 = vpop.permute.xlu2 %2410 }
 0x574   : > { %v2119_v40 = vperm.slane %v7620_v53, 0 }
 0x575   : > { %2212 = vrot.lane.b32.xlu0 %v2117_v36, %s6627_s10  ;;  %v2175_v7 = vpop.permute.xlu0 %2174  ;;  %2214 = vrot.lane.b32.xlu1 %v2118_v18, %s6627_s10  ;;  %v2687_v36 = vld [vmem:[#allocation3] sm:$0xff] }
 0x576   : > { %v7615_v45 = vsel %vm2267_vm13, %v2009_v23, %v2175_v7  ;;  %v2743_v18 = vrot.slane %v2687_v36, 2 }
 0x577   : > { %2420 = vrot.lane.b32.xlu2 %v7615_v45, %s6626_s14 }
 0x578   : > { %v2546_v37 = vld.sshfl [vmem:[#allocation1] sm:$0xff pattern:$0x73625140] }
 0x579   : > { %2548 = vst [vmem:[#allocation1] ss:$4 sm:$0xff] %v2395_v50 }
 0x57a   : > { %2551 = vst [vmem:[#allocation1 + $0x3] ss:$4 sm:$0xff] %v2401_v6 }
 0x57b   : > { %2549 = vst [vmem:[#allocation1 + $0x1] ss:$4 sm:$0xff] %v2397_v58  ;;  %v2409_v43 = vpop.permute.xlu1 %2408  ;;  %v2389_v60 = vpop.permute.xlu2 %2388 }
 0x57c   : > { %2550 = vst [vmem:[#allocation1 + $0x2] ss:$4 sm:$0xff] %v2399_v20 }
 0x57d   : > { %2534 = vst [vmem:[#allocation1 + $0x20] ss:$4 sm:$0xff] %v2389_v60  ;;  %v2413_v57 = vpop.permute.xlu0 %2412 }
 0x57e   : > { %2667 = vst.msk [vmem:[#allocation3 + $0x51] sm:$0xff] %vm2464_vm1, %v2546_v37  ;;  %v2744_v37 = vrot.slane %v2687_v36, 4 }
 0x57f   : > { %2216 = vrot.lane.b32.xlu2 %v2119_v40, %s6627_s10 }
 0x583   : > { %v2555_v23 = vld.sshfl [vmem:[#allocation1] sm:$0xff pattern:$0x73625140]  ;;  %v2415_v5 = vpop.permute.xlu1 %2414  ;;  %v2427_v32 = vpop.permute.xlu2 %2426 }
 0x584   : > { %2557 = vst [vmem:[#allocation1] ss:$4 sm:$0xff] %v7375_v63 }
 0x585   : > { %2558 = vst [vmem:[#allocation1 + $0x1] ss:$4 sm:$0xff] %v7415_v34 }
 0x586   : > { %2559 = vst [vmem:[#allocation1 + $0x2] ss:$4 sm:$0xff] %v7389_v9 }
 0x587   : > { %2560 = vst [vmem:[#allocation1 + $0x3] ss:$4 sm:$0xff] %v7398_v51 }
 0x588   : > { %2669 = vst.msk [vmem:[#allocation3 + $0x61] sm:$0xff] %vm2464_vm1, %v2555_v23 }
 0x58b   : > { %v2425_v31 = vpop.permute.xlu1 %2424  ;;  %v2185_v26 = vpop.permute.xlu2 %2184 }
 0x58c   : > { %v7632_v50 = vsel %vm2267_vm13, %v7174_v59, %v2185_v26 }
 0x58d   : > { %v2423_v10 = vpop.permute.xlu0 %2422  ;;  %2430 = vrot.lane.b32.xlu0 %v7632_v50, %s6626_s14 }
 0x58e   : > { %v2564_v30 = vld.sshfl [vmem:[#allocation1] sm:$0xff pattern:$0x73625140] }
 0x58f   : > { %2567 = vst [vmem:[#allocation1 + $0x1] ss:$4 sm:$0xff] %v2411_v62 }
 0x590   : > { %2566 = vst [vmem:[#allocation1] ss:$4 sm:$0xff] %v2409_v43 }
 0x591   : > { %2568 = vst [vmem:[#allocation1 + $0x2] ss:$4 sm:$0xff] %v2413_v57  ;;  %v7744_v57 = vld [vmem:[#allocation3 + $0x20] sm:$0xff] }
 0x592   : > { %2569 = vst [vmem:[#allocation1 + $0x3] ss:$4 sm:$0xff] %v2415_v5  ;;  %v7739_v5 = vld [vmem:[#allocation3 + $0x18] sm:$0x3f]  ;;  %v7749_v26 = vrot.slane %v7744_v57, 4 }
 0x593   : > { %2671 = vst.msk [vmem:[#allocation3 + $0x71] sm:$0xff] %vm2464_vm1, %v2564_v30  ;;  %v2393_v63 = vpop.permute.xlu1 %2392  ;;  %v2439_v9 = vpop.permute.xlu2 %2438 }
 0x594   : > { %2536 = vst [vmem:[#allocation1 + $0x22] ss:$4 sm:$0xff] %v2393_v63  ;;  %v7760_v63 = vld [vmem:[#allocation3 + $0x30] sm:$0xff] }
 0x595   : > { %v2429_v51 = vpop.permute.xlu0 %2428  ;;  %10456 = vst [vmem:[#allocation8_spill] sm:$0xff] %v7744_v57 }
 0x596   : > { %10457 = vst [vmem:[#allocation9_spill] sm:$0xff] %v7749_v26 }
 0x597   : > { %10460 = vst [vmem:[#allocation12_spill] sm:$0xff] %v7760_v63 }
 0x599   : > { %v2573_v34 = vld.sshfl [vmem:[#allocation1] sm:$0xff pattern:$0x73625140] }
 0x59a   : > { %2575 = vst [vmem:[#allocation1] ss:$4 sm:$0xff] %v7424_v38 }
 0x59b   : > { %2576 = vst [vmem:[#allocation1 + $0x1] ss:$4 sm:$0xff] %v7410_v8  ;;  %v2437_v44 = vpop.permute.xlu1 %2436  ;;  %v7640_v54 = vpop.permute.xlu2 %2450 }
 0x59c   : > { %2577 = vst [vmem:[#allocation1 + $0x2] ss:$4 sm:$0xff] %v7457_v21 }
 0x59d   : > { %2578 = vst [vmem:[#allocation1 + $0x3] ss:$4 sm:$0xff] %v7445_v2  ;;  %v2391_v6 = vpop.permute.xlu0 %2390 }
 0x59e   : > { %2673 = vst.msk [vmem:[#allocation3 + $0x81] sm:$0xff] %vm2464_vm1, %v2573_v34 }
 0x59f   : > { %2535 = vst [vmem:[#allocation1 + $0x21] ss:$4 sm:$0xff] %v2391_v6 }
 0x5a3   : > { %v2443_v27 = vpop.permute.xlu1 %2442  ;;  %v2457_v47 = vpop.permute.xlu2 %2456 }
 0x5a4   : > { %v2582_v1 = vld.sshfl [vmem:[#allocation1] sm:$0xff pattern:$0x73625140] }
 0x5a5   : > { %2586 = vst [vmem:[#allocation1 + $0x2] ss:$4 sm:$0xff] %v2427_v32  ;;  %v2441_v38 = vpop.permute.xlu0 %2440 }
 0x5a6   : > { %2585 = vst [vmem:[#allocation1 + $0x1] ss:$4 sm:$0xff] %v2425_v31  ;;  %v2538_v0 = vld.sshfl [vmem:[#allocation1 + $0x20] sm:$0xff pattern:$0x73625140] }
 0x5a7   : > { %2584 = vst [vmem:[#allocation1] ss:$4 sm:$0xff] %v2423_v10  ;;  %v7746_v31 = vld [vmem:[#allocation3 + $0x28] sm:$0x3f] }
 0x5a8   : > { %2587 = vst [vmem:[#allocation1 + $0x3] ss:$4 sm:$0xff] %v2429_v51  ;;  %v2756_v10 = vrot.slane %v7746_v31, 2  ;;  %v7763_v51 = vrot.slane %v7760_v63, 6 }
 0x5a9   : > { %2543 = vst [vmem:[#allocation1 + $0x20] ss:$4 sm:$0xff] %v7542_v22 }
 0x5aa   : > { %2544 = vst [vmem:[#allocation1 + $0x21] ss:$4 sm:$0xff] %v7527_v55 }
 0x5ab   : > { %2545 = vst [vmem:[#allocation1 + $0x22] ss:$4 sm:$0xff] %v7559_v33  ;;  %v2189_v8 = vpop.permute.xlu1 %2188  ;;  %v2407_v2 = vpop.permute.xlu2 %2406 }
 0x5ac   : > { %2666 = vst.msk [vmem:[#allocation3 + $0x49] sm:$0x3f] %vm2659_vm2, %v2538_v0  ;;  %v7651_v21 = vsel %vm2267_vm13, %v2015_v35, %v2189_v8 }
 0x5ad   : > { %2675 = vst.msk [vmem:[#allocation3 + $0x91] sm:$0xff] %vm2464_vm1, %v2582_v1  ;;  %v2187_v48 = vpop.permute.xlu0 %2186  ;;  %2434 = vrot.lane.b32.xlu2 %v7651_v21, %s6626_s14 }
 0x5ae   : > { %v7659_v55 = vsel %vm2267_vm13, %v2014_v28, %v2187_v48  ;;  %10461 = vst [vmem:[#allocation13_spill] sm:$0xff] %v7763_v51 }
 0x5af   : > { %v2591_v22 = vld.sshfl [vmem:[#allocation1] sm:$0xff pattern:$0x73625140]  ;;  %2432 = vrot.lane.b32.xlu1 %v7659_v55, %s6626_s14 }
 0x5b0   : > { %2593 = vst [vmem:[#allocation1] ss:$4 sm:$0xff] %v7452_v13 }
 0x5b1   : > { %2594 = vst [vmem:[#allocation1 + $0x1] ss:$4 sm:$0xff] %v7494_v24 }
 0x5b2   : > { %2595 = vst [vmem:[#allocation1 + $0x2] ss:$4 sm:$0xff] %v7483_v52  ;;  %v2547_v35 = vld.sshfl [vmem:[#allocation1 + $0x20] sm:$0xff pattern:$0x73625140] }
 0x5b3   : > { %2596 = vst [vmem:[#allocation1 + $0x3] ss:$4 sm:$0xff] %v7475_v39  ;;  %v2455_v33 = vpop.permute.xlu1 %2454  ;;  %v2203_v56 = vpop.permute.xlu2 %2202  ;;  %v2696_v6 = vld [vmem:[#allocation3 + $0x48] sm:$0x3f] }
 0x5b4   : > { %2554 = vst [vmem:[#allocation1 + $0x22] ss:$4 sm:$0xff] %v2407_v2  ;;  %v7670_v28 = vsel %vm2267_vm13, %v2021_v49, %v2203_v56  ;;  %v2767_v0 = vrot.slane %v2696_v6, 4 }
 0x5b5   : > { %2668 = vst.msk [vmem:[#allocation3 + $0x59] sm:$0x3f] %vm2659_vm2, %v2547_v35  ;;  %v2453_v13 = vpop.permute.xlu0 %2452  ;;  %2448 = vrot.lane.b32.xlu2 %v7670_v28, %s6626_s14 }
 0x5b6   : > { %2677 = vst.msk [vmem:[#allocation3 + $0xa1] sm:$0xff] %vm2464_vm1, %v2591_v22 }
 0x5ba   : > { %v2600_v52 = vld.sshfl [vmem:[#allocation1] sm:$0xff pattern:$0x73625140] }
 0x5bb   : > { %2603 = vst [vmem:[#allocation1 + $0x1] ss:$4 sm:$0xff] %v2439_v9  ;;  %v2405_v39 = vpop.permute.xlu1 %2404  ;;  %v2694_v9 = vld [vmem:[#allocation3 + $0x38] sm:$0x3f] }
 0x5bc   : > { %2602 = vst [vmem:[#allocation1] ss:$4 sm:$0xff] %v2437_v44  ;;  %v2761_v44 = vrot.slane %v2694_v9, 2  ;;  %v7773_v2 = vld [vmem:[#allocation3 + $0x58] sm:$0x3f] }
 0x5bd   : > { %2605 = vst [vmem:[#allocation1 + $0x3] ss:$4 sm:$0xff] %v2443_v27  ;;  %v2403_v24 = vpop.permute.xlu0 %2402  ;;  %v2766_v27 = vrot.slane %v2696_v6, 2  ;;  %v2771_v48 = vrot.slane %v7773_v2, 2  ;;  %v2772_v22 = vrot.slane %v7773_v2, 4 }
 0x5be   : > { %2604 = vst [vmem:[#allocation1 + $0x2] ss:$4 sm:$0xff] %v2441_v38  ;;  %v7770_v38 = vld [vmem:[#allocation3 + $0x50] sm:$0xff] }
 0x5bf   : > { %2553 = vst [vmem:[#allocation1 + $0x21] ss:$4 sm:$0xff] %v2405_v39  ;;  %v7793_v39 = vld [vmem:[#allocation3 + $0x70] sm:$0xff] }
 0x5c0   : > { %2552 = vst [vmem:[#allocation1 + $0x20] ss:$4 sm:$0xff] %v2403_v24 }
 0x5c1   : > { %2679 = vst.msk [vmem:[#allocation3 + $0xb1] sm:$0xff] %vm2464_vm1, %v2600_v52 }
 0x5c2   : > { %10464 = vst [vmem:[#allocation16_spill] sm:$0xff] %v7770_v38 }
 0x5c3   : > { %v2201_v49 = vpop.permute.xlu1 %2200  ;;  %10468 = vst [vmem:[#allocation20_spill] sm:$0xff] %v7793_v39 }
 0x5c4   : > { %v7679_v58 = vsel %vm2267_vm13, %v7194_v11, %v2201_v49 }
 0x5c5   : > { %v2609_v61 = vld.sshfl [vmem:[#allocation1] sm:$0xff pattern:$0x73625140]  ;;  %v2199_v15 = vpop.permute.xlu0 %2198  ;;  %2446 = vrot.lane.b32.xlu1 %v7679_v58, %s6626_s14 }
 0x5c6   : > { %2611 = vst [vmem:[#allocation1] ss:$4 sm:$0xff] %v7510_v42  ;;  %v7688_v62 = vsel %vm2267_vm13, %v2020_v4, %v2199_v15 }
 0x5c7   : > { %2612 = vst [vmem:[#allocation1 + $0x1] ss:$4 sm:$0xff] %v7519_v3  ;;  %v2556_v20 = vld.sshfl [vmem:[#allocation1 + $0x20] sm:$0xff pattern:$0x73625140]  ;;  %2444 = vrot.lane.b32.xlu0 %v7688_v62, %s6626_s14 }
 0x5c8   : > { %2613 = vst [vmem:[#allocation1 + $0x2] ss:$4 sm:$0xff] %v7505_v14 }
 0x5c9   : > { %2614 = vst [vmem:[#allocation1 + $0x3] ss:$4 sm:$0xff] %v7532_v41 }
 0x5ca   : > { %2561 = vst [vmem:[#allocation1 + $0x20] ss:$4 sm:$0xff] %v7582_v46 }
 0x5cb   : > { %2562 = vst [vmem:[#allocation1 + $0x21] ss:$4 sm:$0xff] %v7587_v29 }
 0x5cc   : > { %2563 = vst [vmem:[#allocation1 + $0x22] ss:$4 sm:$0xff] %v7615_v45 }
 0x5cd   : > { %2670 = vst.msk [vmem:[#allocation3 + $0x69] sm:$0x3f] %vm2659_vm2, %v2556_v20  ;;  %v7808_v20 = vld [vmem:[#allocation3 + $0x80] sm:$0xff] }
 0x5ce   : > { %2681 = vst.msk [vmem:[#allocation3 + $0xc1] sm:$0xff] %vm2464_vm1, %v2609_v61  ;;  %v7799_v61 = vrot.slane %v7793_v39, 2 }
 0x5cf   : > { %10472 = vst [vmem:[#allocation24_spill] sm:$0xff] %v7808_v20 }
 0x5d0   : > { %v2618_v59 = vld.sshfl [vmem:[#allocation1] sm:$0xff pattern:$0x73625140]  ;;  %10470 = vst [vmem:[#allocation22_spill] sm:$0xff] %v7799_v61 }
 0x5d1   : > { %2620 = vst [vmem:[#allocation1] ss:$4 sm:$0xff] %v7640_v54  ;;  %v2421_v14 = vpop.permute.xlu2 %2420  ;;  %v2762_v54 = vrot.slane %v2694_v9, 4 }
 0x5d2   : > { %2623 = vst [vmem:[#allocation1 + $0x3] ss:$4 sm:$0xff] %v2457_v47 }
 0x5d3   : > { %2622 = vst [vmem:[#allocation1 + $0x2] ss:$4 sm:$0xff] %v2455_v33  ;;  %v2565_v42 = vld.sshfl [vmem:[#allocation1 + $0x20] sm:$0xff pattern:$0x73625140] }
 0x5d4   : > { %2621 = vst [vmem:[#allocation1 + $0x1] ss:$4 sm:$0xff] %v2453_v13  ;;  %v7791_v13 = vld [vmem:[#allocation3 + $0x68] sm:$0x3f] }
 0x5d5   : > { %2572 = vst [vmem:[#allocation1 + $0x22] ss:$4 sm:$0xff] %v2421_v14  ;;  %v2777_v24 = vrot.slane %v7791_v13, 4  ;;  %v7819_v14 = vrot.slane %v7808_v20, 4 }
 0x5d6   : > { %2672 = vst.msk [vmem:[#allocation3 + $0x79] sm:$0x3f] %vm2659_vm2, %v2565_v42  ;;  %v7823_v42 = vrot.slane %v7808_v20, 6 }
 0x5d7   : > { %2683 = vst.msk [vmem:[#allocation3 + $0xd1] sm:$0xff] %vm2464_vm1, %v2618_v59 }
 0x5d8   : > { %10475 = vst [vmem:[#allocation27_spill] sm:$0xff] %v7819_v14 }
 0x5d9   : > { %v2217_v3 = vpop.permute.xlu2 %2216  ;;  %10476 = vst [vmem:[#allocation28_spill] sm:$0xff] %v7823_v42 }
 0x5da   : > { %v7704_v4 = vsel %vm2267_vm13, %v7620_v53, %v2217_v3  ;;  %v2745_v53 = vrot.slane %v2687_v36, 6 }
 0x5db   : > { %v2627_v41 = vld.sshfl [vmem:[#allocation1] sm:$0xff pattern:$0x73625140]  ;;  %2462 = vrot.lane.b32.xlu2 %v7704_v4, %s6626_s14 }
 0x5dc   : > { %2685 = vst.msk [vmem:[#allocation3 + $0xe1] sm:$0xff] %vm2464_vm1, %v2627_v41 }
 0x5dd   : > { %3822 = vst [vmem:[#allocation1] ss:$4 sm:$0xff] %v2687_v36 }
 0x5de   : > { %3824 = vst [vmem:[#allocation1 + $0x1] ss:$4 sm:$0xff] %v2743_v18 }
 0x5df   : > { %v2417_v46 = vpop.permute.xlu0 %2416  ;;  %v2419_v29 = vpop.permute.xlu1 %2418  ;;  %3826 = vst [vmem:[#allocation1 + $0x2] ss:$4 sm:$0xff] %v2744_v37 }
 0x5e0   : > { %2570 = vst [vmem:[#allocation1 + $0x20] ss:$4 sm:$0xff] %v2417_v46 }
 0x5e1   : > { %2571 = vst [vmem:[#allocation1 + $0x21] ss:$4 sm:$0xff] %v2419_v29 }
 0x5e2   : > { %3828 = vst [vmem:[#allocation1 + $0x3] ss:$4 sm:$0xff] %v2745_v53 }
 0x5e7   : > { %v2213_v25 = vpop.permute.xlu0 %2212  ;;  %v2215_v12 = vpop.permute.xlu1 %2214 }
 0x5e8   : > { %v2574_v7 = vld.sshfl [vmem:[#allocation1 + $0x20] sm:$0xff pattern:$0x73625140]  ;;  %v7712_v45 = vsel %vm2267_vm13, %v2027_v19, %v2215_v12  ;;  %v7717_v17 = vsel %vm2267_vm13, %v2026_v16, %v2213_v25  ;;  %v7728_v16 = vld [vmem:[#allocation3 + $0x10] sm:$0xff] }
 0x5e9   : > { %2579 = vst [vmem:[#allocation1 + $0x20] ss:$4 sm:$0xff] %v7632_v50  ;;  %2460 = vrot.lane.b32.xlu1 %v7712_v45, %s6626_s14  ;;  %2458 = vrot.lane.b32.xlu0 %v7717_v17, %s6626_s14  ;;  %v10203_v43 = vrot.slane %v7728_v16, 2  ;;  %v7731_v60 = vld.sshfl [vmem:[#allocation1] sm:$0xff pattern:$0x73625140] }
 0x5ea   : > { %2580 = vst [vmem:[#allocation1 + $0x21] ss:$4 sm:$0xff] %v7659_v55  ;;  %v10202_v40 = vrot.slane %v7728_v16, 4  ;;  %v10201_v23 = vrot.slane %v7728_v16, 6  ;;  %v7752_v50 = vrot.slane %v7744_v57, 6 }
 0x5eb   : > { %2581 = vst [vmem:[#allocation1 + $0x22] ss:$4 sm:$0xff] %v7651_v21  ;;  %v7778_v21 = vld [vmem:[#allocation3 + $0x60] sm:$0xff] }
 0x5ec   : > { %2674 = vst.msk [vmem:[#allocation3 + $0x89] sm:$0x3f] %vm2659_vm2, %v2574_v7  ;;  %v7786_v35 = vrot.slane %v7778_v21, 2  ;;  %v7848_v7 = vld [vmem:[#allocation3 + $0xa0] sm:$0xff] }
 0x5ed   : > { %10455 = vst [vmem:[#allocation7_spill] sm:$0xff] %v7731_v60  ;;  %v7856_v37 = vrot.slane %v7848_v7, 6 }
 0x5ee   : > { %3839 = vst [vmem:[#allocation1] ss:$4 sm:$0xff] %v10203_v43 }
 0x5ef   : > { %3840 = vst [vmem:[#allocation1 + $0x1] ss:$4 sm:$0xff] %v10202_v40 }
 0x5f0   : > { %3841 = vst [vmem:[#allocation1 + $0x2] ss:$4 sm:$0xff] %v10201_v23  ;;  %v2822_v23 = vld [vmem:[#allocation3 + $0x49] sm:$0x3f] }
 0x5f1   : > { %3842 = vst [vmem:[#allocation1 + $0x3] ss:$4 sm:$0xff] %v7739_v5  ;;  %v2892_v40 = vrot.slane %v2822_v23, 2 }
 0x5f2   : > { %v2583_v11 = vld.sshfl [vmem:[#allocation1 + $0x20] sm:$0xff pattern:$0x73625140]  ;;  %10458 = vst [vmem:[#allocation10_spill] sm:$0xff] %v7752_v50 }
 0x5f3   : > { %2676 = vst.msk [vmem:[#allocation3 + $0x99] sm:$0x3f] %vm2659_vm2, %v2583_v11 }
 0x5f4   : > { %10465 = vst [vmem:[#allocation17_spill] sm:$0xff] %v7778_v21 }
 0x5f5   : > { %10467 = vst [vmem:[#allocation19_spill] sm:$0xff] %v7786_v35 }
 0x5f6   : > { %10482 = vst [vmem:[#allocation34_spill] sm:$0xff] %v7848_v7 }
 0x5f7   : > { %10484 = vst [vmem:[#allocation36_spill] sm:$0xff] %v7856_v37 }
 0x5f8   : > { %v7754_v30 = vld.sshfl [vmem:[#allocation1] sm:$0xff pattern:$0x73625140] }
 0x5f9   : > { %10459 = vst [vmem:[#allocation11_spill] sm:$0xff] %v7754_v30  ;;  %v2688_v30 = vld [vmem:[#allocation3 + $0x8] sm:$0x3f] }
 0x5fa   : > { %3849 = vst [vmem:[#allocation1] ss:$4 sm:$0xff] %v7749_v26  ;;  %v7844_v12 = vld [vmem:[#allocation3 + $0x98] sm:$0x3f] }
 0x5fb   : > { %3850 = vst [vmem:[#allocation1 + $0x1] ss:$4 sm:$0xff] %v7752_v50 }
 0x5fc   : > { %3851 = vst [vmem:[#allocation1 + $0x2] ss:$4 sm:$0xff] %v7746_v31 }
 0x5fd   : > { %3852 = vst [vmem:[#allocation1 + $0x3] ss:$4 sm:$0xff] %v2756_v10 }
 0x5ff   : > { %v2431_v19 = vpop.permute.xlu0 %2430 }
 0x600   : > { %2588 = vst [vmem:[#allocation1 + $0x20] ss:$4 sm:$0xff] %v2431_v19  ;;  %v7864_v19 = vld [vmem:[#allocation3 + $0xb0] sm:$0xff] }
 0x601   : > { %10486 = vst [vmem:[#allocation38_spill] sm:$0xff] %v7864_v19  ;;  %v7867_v10 = vrot.slane %v7864_v19, 6 }
 0x603   : > { %10487 = vst [vmem:[#allocation39_spill] sm:$0xff] %v7867_v10 }
 0x604   : > { %v7765_v34 = vld.sshfl [vmem:[#allocation1] sm:$0xff pattern:$0x73625140] }
 0x605   : > { %10462 = vst [vmem:[#allocation14_spill] sm:$0xff] %v7765_v34  ;;  %v7976_v34 = vld [vmem:[#allocation3 + $0x91] sm:$0xff] }
 0x606   : > { %3859 = vst [vmem:[#allocation1] ss:$4 sm:$0xff] %v7763_v51  ;;  %v7979_v60 = vrot.slane %v7976_v34, 2 }
 0x607   : > { %v2435_v32 = vpop.permute.xlu2 %2434  ;;  %3860 = vst [vmem:[#allocation1 + $0x1] ss:$4 sm:$0xff] %v2694_v9 }
 0x608   : > { %2590 = vst [vmem:[#allocation1 + $0x22] ss:$4 sm:$0xff] %v2435_v32 }
 0x609   : > { %3861 = vst [vmem:[#allocation1 + $0x2] ss:$4 sm:$0xff] %v2761_v44 }
 0x60a   : > { %3862 = vst [vmem:[#allocation1 + $0x3] ss:$4 sm:$0xff] %v2762_v54 }
 0x60b   : > { %10509 = vst [vmem:[#allocation61_spill] sm:$0xff] %v7976_v34 }
 0x60c   : > { %10510 = vst [vmem:[#allocation62_spill] sm:$0xff] %v7979_v60 }
 0x60f   : > { %v2449_v33 = vpop.permute.xlu2 %2448 }
 0x611   : > { %v7768_v47 = vld.sshfl [vmem:[#allocation1] sm:$0xff pattern:$0x73625140] }
 0x612   : > { %10463 = vst [vmem:[#allocation15_spill] sm:$0xff] %v7768_v47 }
 0x613   : > { %3869 = vst [vmem:[#allocation1] ss:$4 sm:$0xff] %v2696_v6 }
 0x614   : > { %3870 = vst [vmem:[#allocation1 + $0x1] ss:$4 sm:$0xff] %v2766_v27 }
 0x615   : > { %3871 = vst [vmem:[#allocation1 + $0x2] ss:$4 sm:$0xff] %v2767_v0 }
 0x616   : > { %3872 = vst [vmem:[#allocation1 + $0x3] ss:$4 sm:$0xff] %v7770_v38 }
 0x61d   : > { %v7783_v55 = vld.sshfl [vmem:[#allocation1] sm:$0xff pattern:$0x73625140] }
 0x61e   : > { %10466 = vst [vmem:[#allocation18_spill] sm:$0xff] %v7783_v55 }
 0x61f   : > { %3879 = vst [vmem:[#allocation1] ss:$4 sm:$0xff] %v2771_v48 }
 0x620   : > { %3880 = vst [vmem:[#allocation1 + $0x1] ss:$4 sm:$0xff] %v2772_v22 }
 0x621   : > { %v2433_v1 = vpop.permute.xlu1 %2432  ;;  %3881 = vst [vmem:[#allocation1 + $0x2] ss:$4 sm:$0xff] %v7778_v21 }
 0x622   : > { %2589 = vst [vmem:[#allocation1 + $0x21] ss:$4 sm:$0xff] %v2433_v1 }
 0x623   : > { %3882 = vst [vmem:[#allocation1 + $0x3] ss:$4 sm:$0xff] %v7786_v35 }
 0x629   : > { %v2592_v8 = vld.sshfl [vmem:[#allocation1 + $0x20] sm:$0xff pattern:$0x73625140] }
 0x62a   : > { %2597 = vst [vmem:[#allocation1 + $0x20] ss:$4 sm:$0xff] %v7688_v62  ;;  %v7796_v49 = vld.sshfl [vmem:[#allocation1] sm:$0xff pattern:$0x73625140]  ;;  %v7814_v62 = vrot.slane %v7808_v20, 2 }
 0x62b   : > { %2598 = vst [vmem:[#allocation1 + $0x21] ss:$4 sm:$0xff] %v7679_v58  ;;  %v7802_v58 = vrot.slane %v7793_v39, 4 }
 0x62c   : > { %2599 = vst [vmem:[#allocation1 + $0x22] ss:$4 sm:$0xff] %v7670_v28 }
 0x62d   : > { %2678 = vst.msk [vmem:[#allocation3 + $0xa9] sm:$0x3f] %vm2659_vm2, %v2592_v8  ;;  %v7874_v8 = vld [vmem:[#allocation3 + $0xd0] sm:$0xff] }
 0x62e   : > { %10469 = vst [vmem:[#allocation21_spill] sm:$0xff] %v7796_v49 }
 0x62f   : > { %3889 = vst [vmem:[#allocation1] ss:$4 sm:$0xff] %v2777_v24 }
 0x630   : > { %10471 = vst [vmem:[#allocation23_spill] sm:$0xff] %v7802_v58 }
 0x631   : > { %3890 = vst [vmem:[#allocation1 + $0x1] ss:$4 sm:$0xff] %v7793_v39 }
 0x632   : > { %3891 = vst [vmem:[#allocation1 + $0x2] ss:$4 sm:$0xff] %v7799_v61 }
 0x633   : > { %v2601_v56 = vld.sshfl [vmem:[#allocation1 + $0x20] sm:$0xff pattern:$0x73625140]  ;;  %3892 = vst [vmem:[#allocation1 + $0x3] ss:$4 sm:$0xff] %v7802_v58  ;;  %v8037_v58 = vrot.slane %v7760_v63, 4 }
 0x634   : > { %2608 = vst [vmem:[#allocation1 + $0x22] ss:$4 sm:$0xff] %v2449_v33 }
 0x635   : > { %2680 = vst.msk [vmem:[#allocation3 + $0xb9] sm:$0x3f] %vm2659_vm2, %v2601_v56  ;;  %v2463_v3 = vpop.permute.xlu2 %2462 }
 0x636   : > { %10473 = vst [vmem:[#allocation25_spill] sm:$0xff] %v7814_v62 }
 0x637   : > { %v2447_v28 = vpop.permute.xlu1 %2446  ;;  %10490 = vst [vmem:[#allocation42_spill] sm:$0xff] %v7874_v8 }
 0x638   : > { %2607 = vst [vmem:[#allocation1 + $0x21] ss:$4 sm:$0xff] %v2447_v28  ;;  %v2813_v28 = vld [vmem:[#allocation3 + $0x1] sm:$0xff] }
 0x639   : > { %v2445_v52 = vpop.permute.xlu0 %2444  ;;  %v2870_v24 = vrot.slane %v2813_v28, 4 }
 0x63a   : > { %2606 = vst [vmem:[#allocation1 + $0x20] ss:$4 sm:$0xff] %v2445_v52  ;;  %v7816_v59 = vld.sshfl [vmem:[#allocation1] sm:$0xff pattern:$0x73625140]  ;;  %v2869_v52 = vrot.slane %v2813_v28, 2 }
 0x63b   : > { %10474 = vst [vmem:[#allocation26_spill] sm:$0xff] %v7816_v59 }
 0x63c   : > { %3899 = vst [vmem:[#allocation1] ss:$4 sm:$0xff] %v7808_v20  ;;  %v2710_v32 = vld [vmem:[#allocation3 + $0xb8] sm:$0x3f] }
 0x63d   : > { %3900 = vst [vmem:[#allocation1 + $0x1] ss:$4 sm:$0xff] %v7814_v62  ;;  %v2801_v9 = vrot.slane %v2710_v32, 2  ;;  %v2802_v44 = vrot.slane %v2710_v32, 4 }
 0x63e   : > { %3901 = vst [vmem:[#allocation1 + $0x2] ss:$4 sm:$0xff] %v7819_v14 }
 0x63f   : > { %3902 = vst [vmem:[#allocation1 + $0x3] ss:$4 sm:$0xff] %v7823_v42  ;;  %v8018_v42 = vrot.slane %v7744_v57, 2 }
 0x641   : > { %v2610_v15 = vld.sshfl [vmem:[#allocation1 + $0x20] sm:$0xff pattern:$0x73625140]  ;;  %10517 = vst [vmem:[#allocation69_spill] sm:$0xff] %v8018_v42 }
 0x642   : > { %2615 = vst [vmem:[#allocation1 + $0x20] ss:$4 sm:$0xff] %v7717_v17  ;;  %v7853_v17 = vrot.slane %v7848_v7, 4 }
 0x643   : > { %2616 = vst [vmem:[#allocation1 + $0x21] ss:$4 sm:$0xff] %v7712_v45  ;;  %v7850_v45 = vld [vmem:[#allocation3 + $0xa8] sm:$0x3f] }
 0x644   : > { %2617 = vst [vmem:[#allocation1 + $0x22] ss:$4 sm:$0xff] %v7704_v4  ;;  %v7828_v4 = vld [vmem:[#allocation3 + $0x90] sm:$0xff]  ;;  %v2796_v53 = vrot.slane %v7850_v45, 2 }
 0x645   : > { %2682 = vst.msk [vmem:[#allocation3 + $0xc9] sm:$0x3f] %vm2659_vm2, %v2610_v15  ;;  %v7832_v46 = vrot.slane %v7828_v4, 2  ;;  %v7835_v29 = vrot.slane %v7828_v4, 4  ;;  %v7842_v25 = vrot.slane %v7828_v4, 6  ;;  %v2871_v15 = vrot.slane %v2813_v28, 6 }
 0x646   : > { %10477 = vst [vmem:[#allocation29_spill] sm:$0xff] %v7828_v4  ;;  %v7837_v36 = vld.sshfl [vmem:[#allocation1] sm:$0xff pattern:$0x73625140] }
 0x647   : > { %10478 = vst [vmem:[#allocation30_spill] sm:$0xff] %v7832_v46 }
 0x648   : > { %10479 = vst [vmem:[#allocation31_spill] sm:$0xff] %v7835_v29 }
 0x649   : > { %10480 = vst [vmem:[#allocation32_spill] sm:$0xff] %v7837_v36 }
 0x64a   : > { %3909 = vst [vmem:[#allocation1] ss:$4 sm:$0xff] %v7832_v46 }
 0x64b   : > { %v2619_v41 = vld.sshfl [vmem:[#allocation1 + $0x20] sm:$0xff pattern:$0x73625140]  ;;  %3910 = vst [vmem:[#allocation1 + $0x1] ss:$4 sm:$0xff] %v7835_v29 }
 0x64c   : > { %2626 = vst [vmem:[#allocation1 + $0x22] ss:$4 sm:$0xff] %v2463_v3  ;;  %v2712_v6 = vld [vmem:[#allocation3 + $0xc8] sm:$0x3f] }
 0x64d   : > { %2684 = vst.msk [vmem:[#allocation3 + $0xd9] sm:$0x3f] %vm2659_vm2, %v2619_v41  ;;  %v2806_v1 = vrot.slane %v2712_v6, 2  ;;  %v2807_v27 = vrot.slane %v2712_v6, 4  ;;  %v7885_v41 = vld [vmem:[#allocation3 + $0x11] sm:$0xff] }
 0x64e   : > { %10481 = vst [vmem:[#allocation33_spill] sm:$0xff] %v7842_v25 }
 0x64f   : > { %3911 = vst [vmem:[#allocation1 + $0x2] ss:$4 sm:$0xff] %v7842_v25 }
 0x650   : > { %3912 = vst [vmem:[#allocation1 + $0x3] ss:$4 sm:$0xff] %v7844_v12 }
 0x651   : > { %10483 = vst [vmem:[#allocation35_spill] sm:$0xff] %v7853_v17 }
 0x652   : > { %10493 = vst [vmem:[#allocation45_spill] sm:$0xff] %v7885_v41 }
 0x654   : > { %v7877_v48 = vld [vmem:[#allocation3 + $0xd8] sm:$0x3f] }
 0x655   : > { %v2811_v22 = vrot.slane %v7877_v48, 2  ;;  %v2812_v33 = vrot.slane %v7877_v48, 4 }
 0x657   : > { %v7859_v11 = vld.sshfl [vmem:[#allocation1] sm:$0xff pattern:$0x73625140] }
 0x658   : > { %10485 = vst [vmem:[#allocation37_spill] sm:$0xff] %v7859_v11 }
 0x659   : > { %3919 = vst [vmem:[#allocation1] ss:$4 sm:$0xff] %v7853_v17 }
 0x65a   : > { %3920 = vst [vmem:[#allocation1 + $0x1] ss:$4 sm:$0xff] %v7856_v37 }
 0x65b   : > { %v2461_v18 = vpop.permute.xlu1 %2460  ;;  %3921 = vst [vmem:[#allocation1 + $0x2] ss:$4 sm:$0xff] %v7850_v45  ;;  %v2459_v47 = vpop.permute.xlu0 %2458 }
 0x65c   : > { %2625 = vst [vmem:[#allocation1 + $0x21] ss:$4 sm:$0xff] %v2461_v18  ;;  %v10200_v18 = vrot.slane %v7885_v41, 2 }
 0x65d   : > { %3922 = vst [vmem:[#allocation1 + $0x3] ss:$4 sm:$0xff] %v2796_v53  ;;  %v10199_v53 = vrot.slane %v7885_v41, 4 }
 0x65e   : > { %2624 = vst [vmem:[#allocation1 + $0x20] ss:$4 sm:$0xff] %v2459_v47 }
 0x664   : > { %v7869_v54 = vld.sshfl [vmem:[#allocation1] sm:$0xff pattern:$0x73625140] }
 0x665   : > { %10488 = vst [vmem:[#allocation40_spill] sm:$0xff] %v7869_v54  ;;  %v2628_v47 = vld.sshfl [vmem:[#allocation1 + $0x20] sm:$0xff pattern:$0x73625140] }
 0x666   : > { %3929 = vst [vmem:[#allocation1] ss:$4 sm:$0xff] %v7867_v10  ;;  %v2946_v10 = vld [vmem:[#allocation3 + $0x3a] sm:$0x3f] }
 0x667   : > { %3930 = vst [vmem:[#allocation1 + $0x1] ss:$4 sm:$0xff] %v2710_v32 }
 0x668   : > { %3931 = vst [vmem:[#allocation1 + $0x2] ss:$4 sm:$0xff] %v2801_v9  ;;  %v10198_v9 = vrot.slane %v7885_v41, 6 }
 0x669   : > { %3932 = vst [vmem:[#allocation1 + $0x3] ss:$4 sm:$0xff] %v2802_v44  ;;  %v7896_v44 = vld [vmem:[#allocation3 + $0x19] sm:$0x3f] }
 0x66a   : > { %3830 = vst [vmem:[#allocation1 + $0x20] ss:$4 sm:$0xff] %v2688_v30 }
 0x66b   : > { %3836 = vst [vmem:[#allocation1 + $0x23] ss:$4 sm:$0xff] %v7728_v16 }
 0x66c   : > { %2686 = vst.msk [vmem:[#allocation3 + $0xe9] sm:$0x3f] %vm2659_vm2, %v2628_v47 }
 0x670   : > { %v7872_v0 = vld.sshfl [vmem:[#allocation1] sm:$0xff pattern:$0x73625140] }
 0x671   : > { %10489 = vst [vmem:[#allocation41_spill] sm:$0xff] %v7872_v0  ;;  %v7932_v0 = vld [vmem:[#allocation3 + $0x61] sm:$0xff] }
 0x672   : > { %3939 = vst [vmem:[#allocation1] ss:$4 sm:$0xff] %v2712_v6  ;;  %v7901_v6 = vld [vmem:[#allocation3 + $0x21] sm:$0xff]  ;;  %v7939_v54 = vrot.slane %v7932_v0, 2 }
 0x673   : > { %3940 = vst [vmem:[#allocation1 + $0x1] ss:$4 sm:$0xff] %v2806_v1  ;;  %v7903_v1 = vld [vmem:[#allocation3 + $0x29] sm:$0x3f] }
 0x674   : > { %3941 = vst [vmem:[#allocation1 + $0x2] ss:$4 sm:$0xff] %v2807_v27  ;;  %v7906_v27 = vrot.slane %v7901_v6, 4 }
 0x675   : > { %3942 = vst [vmem:[#allocation1 + $0x3] ss:$4 sm:$0xff] %v7874_v8 }
 0x676   : > { %10494 = vst [vmem:[#allocation46_spill] sm:$0xff] %v7901_v6 }
 0x677   : > { %10495 = vst [vmem:[#allocation47_spill] sm:$0xff] %v7906_v27 }
 0x678   : > { %10500 = vst [vmem:[#allocation52_spill] sm:$0xff] %v7932_v0 }
 0x679   : > { %10501 = vst [vmem:[#allocation53_spill] sm:$0xff] %v7939_v54 }
 0x67c   : > { %v7881_v56 = vld.sshfl [vmem:[#allocation1] sm:$0xff pattern:$0x73625140] }
 0x67d   : > { %10491 = vst [vmem:[#allocation43_spill] sm:$0xff] %v7881_v56  ;;  %v7930_v56 = vld [vmem:[#allocation3 + $0x59] sm:$0x3f] }
 0x67e   : > { %3949 = vst [vmem:[#allocation1] ss:$4 sm:$0xff] %v2811_v22  ;;  %v7909_v22 = vrot.slane %v7901_v6, 6 }
 0x67f   : > { %3950 = vst [vmem:[#allocation1 + $0x1] ss:$4 sm:$0xff] %v2812_v33 }
 0x680   : > { %10496 = vst [vmem:[#allocation48_spill] sm:$0xff] %v7909_v22 }
 0x686   : > { %v7883_v3 = vld.sshfl [vmem:[#allocation1] sm:$0xff pattern:$0x73625140] }
 0x687   : > { %10492 = vst [vmem:[#allocation44_spill] sm:$0xff] %v7883_v3  ;;  %v7927_v3 = vld [vmem:[#allocation3 + $0x51] sm:$0xff] }
 0x688   : > { %3977 = vst [vmem:[#allocation1] ss:$4 sm:$0xff] %v2813_v28  ;;  %v2882_v28 = vrot.slane %v7903_v1, 2 }
 0x689   : > { %3979 = vst [vmem:[#allocation1 + $0x1] ss:$4 sm:$0xff] %v2869_v52  ;;  %v7917_v52 = vld [vmem:[#allocation3 + $0x31] sm:$0xff] }
 0x68a   : > { %3981 = vst [vmem:[#allocation1 + $0x2] ss:$4 sm:$0xff] %v2870_v24  ;;  %v2820_v24 = vld [vmem:[#allocation3 + $0x39] sm:$0x3f] }
 0x68b   : > { %3983 = vst [vmem:[#allocation1 + $0x3] ss:$4 sm:$0xff] %v2871_v15  ;;  %v7920_v15 = vrot.slane %v7917_v52, 6 }
 0x68c   : > { %10497 = vst [vmem:[#allocation49_spill] sm:$0xff] %v7917_v52 }
 0x68d   : > { %10498 = vst [vmem:[#allocation50_spill] sm:$0xff] %v7920_v15 }
 0x68e   : > { %10499 = vst [vmem:[#allocation51_spill] sm:$0xff] %v7927_v3 }
 0x692   : > { %v7889_v32 = vld.sshfl [vmem:[#allocation1] sm:$0xff pattern:$0x73625140] }
 0x693   : > { %3994 = vst [vmem:[#allocation1] ss:$4 sm:$0xff] %v10200_v18  ;;  %v2888_v18 = vrot.slane %v2820_v24, 4 }
 0x694   : > { %3995 = vst [vmem:[#allocation1 + $0x1] ss:$4 sm:$0xff] %v10199_v53  ;;  %v2887_v53 = vrot.slane %v2820_v24, 2 }
 0x695   : > { %3996 = vst [vmem:[#allocation1 + $0x2] ss:$4 sm:$0xff] %v10198_v9 }
 0x696   : > { %3997 = vst [vmem:[#allocation1 + $0x3] ss:$4 sm:$0xff] %v7896_v44 }
 0x69d   : > { %v7911_v33 = vld.sshfl [vmem:[#allocation1] sm:$0xff pattern:$0x73625140] }
 0x69e   : > { %4004 = vst [vmem:[#allocation1] ss:$4 sm:$0xff] %v7906_v27 }
 0x69f   : > { %4005 = vst [vmem:[#allocation1 + $0x1] ss:$4 sm:$0xff] %v7909_v22  ;;  %v8020_v22 = vld [vmem:[#allocation3 + $0xb1] sm:$0xff] }
 0x6a0   : > { %4006 = vst [vmem:[#allocation1 + $0x2] ss:$4 sm:$0xff] %v7903_v1 }
 0x6a1   : > { %4007 = vst [vmem:[#allocation1 + $0x3] ss:$4 sm:$0xff] %v2882_v28  ;;  %v2893_v28 = vrot.slane %v2822_v23, 4 }
 0x6a8   : > { %v7922_v9 = vld.sshfl [vmem:[#allocation1] sm:$0xff pattern:$0x73625140] }
 0x6a9   : > { %4014 = vst [vmem:[#allocation1] ss:$4 sm:$0xff] %v7920_v15 }
 0x6aa   : > { %4015 = vst [vmem:[#allocation1 + $0x1] ss:$4 sm:$0xff] %v2820_v24  ;;  %v2897_v24 = vrot.slane %v7930_v56, 2 }
 0x6ab   : > { %4016 = vst [vmem:[#allocation1 + $0x2] ss:$4 sm:$0xff] %v2887_v53 }
 0x6ac   : > { %4017 = vst [vmem:[#allocation1 + $0x3] ss:$4 sm:$0xff] %v2888_v18  ;;  %v2898_v18 = vrot.slane %v7930_v56, 4 }
 0x6b3   : > { %v7925_v43 = vld.sshfl [vmem:[#allocation1] sm:$0xff pattern:$0x73625140] }
 0x6b4   : > { %4024 = vst [vmem:[#allocation1] ss:$4 sm:$0xff] %v2822_v23  ;;  %v7945_v23 = vld [vmem:[#allocation3 + $0x71] sm:$0xff] }
 0x6b5   : > { %4025 = vst [vmem:[#allocation1 + $0x1] ss:$4 sm:$0xff] %v2892_v40  ;;  %v7943_v40 = vld [vmem:[#allocation3 + $0x69] sm:$0x3f]  ;;  %v7951_v36 = vrot.slane %v7945_v23, 2 }
 0x6b6   : > { %4026 = vst [vmem:[#allocation1 + $0x2] ss:$4 sm:$0xff] %v2893_v28  ;;  %v2903_v28 = vrot.slane %v7943_v40, 4 }
 0x6b7   : > { %4027 = vst [vmem:[#allocation1 + $0x3] ss:$4 sm:$0xff] %v7927_v3 }
 0x6b8   : > { %10502 = vst [vmem:[#allocation54_spill] sm:$0xff] %v7945_v23 }
 0x6b9   : > { %10503 = vst [vmem:[#allocation55_spill] sm:$0xff] %v7951_v36 }
 0x6be   : > { %v7936_v53 = vld.sshfl [vmem:[#allocation1] sm:$0xff pattern:$0x73625140] }
 0x6bf   : > { %4034 = vst [vmem:[#allocation1] ss:$4 sm:$0xff] %v2897_v24  ;;  %v7954_v24 = vrot.slane %v7945_v23, 4 }
 0x6c0   : > { %4035 = vst [vmem:[#allocation1 + $0x1] ss:$4 sm:$0xff] %v2898_v18  ;;  %v7959_v18 = vld [vmem:[#allocation3 + $0x81] sm:$0xff] }
 0x6c1   : > { %4036 = vst [vmem:[#allocation1 + $0x2] ss:$4 sm:$0xff] %v7932_v0  ;;  %v7962_v59 = vrot.slane %v7959_v18, 2  ;;  %v7967_v55 = vrot.slane %v7959_v18, 4 }
 0x6c2   : > { %4037 = vst [vmem:[#allocation1 + $0x3] ss:$4 sm:$0xff] %v7939_v54 }
 0x6c3   : > { %10504 = vst [vmem:[#allocation56_spill] sm:$0xff] %v7954_v24 }
 0x6c4   : > { %10505 = vst [vmem:[#allocation57_spill] sm:$0xff] %v7959_v18 }
 0x6c5   : > { %10506 = vst [vmem:[#allocation58_spill] sm:$0xff] %v7962_v59 }
 0x6c6   : > { %10507 = vst [vmem:[#allocation59_spill] sm:$0xff] %v7967_v55 }
 0x6c9   : > { %v7948_v11 = vld.sshfl [vmem:[#allocation1] sm:$0xff pattern:$0x73625140] }
 0x6ca   : > { %4044 = vst [vmem:[#allocation1] ss:$4 sm:$0xff] %v2903_v28  ;;  %v7971_v28 = vrot.slane %v7959_v18, 6 }
 0x6cb   : > { %4045 = vst [vmem:[#allocation1 + $0x1] ss:$4 sm:$0xff] %v7945_v23 }
 0x6cc   : > { %4046 = vst [vmem:[#allocation1 + $0x2] ss:$4 sm:$0xff] %v7951_v36  ;;  %v7995_v36 = vld [vmem:[#allocation3 + $0xa1] sm:$0xff] }
 0x6cd   : > { %4047 = vst [vmem:[#allocation1 + $0x3] ss:$4 sm:$0xff] %v7954_v24  ;;  %v7982_v24 = vrot.slane %v7976_v34, 4  ;;  %v8005_v15 = vrot.slane %v7995_v36, 6 }
 0x6ce   : > { %10508 = vst [vmem:[#allocation60_spill] sm:$0xff] %v7971_v28 }
 0x6cf   : > { %10511 = vst [vmem:[#allocation63_spill] sm:$0xff] %v7982_v24 }
 0x6d0   : > { %10514 = vst [vmem:[#allocation66_spill] sm:$0xff] %v8005_v15 }
 0x6d4   : > { %v7964_v49 = vld.sshfl [vmem:[#allocation1] sm:$0xff pattern:$0x73625140] }
 0x6d5   : > { %4054 = vst [vmem:[#allocation1] ss:$4 sm:$0xff] %v7959_v18  ;;  %v7987_v18 = vrot.slane %v7976_v34, 6 }
 0x6d6   : > { %4055 = vst [vmem:[#allocation1 + $0x1] ss:$4 sm:$0xff] %v7962_v59  ;;  %v7991_v59 = vld [vmem:[#allocation3 + $0x99] sm:$0x3f] }
 0x6d7   : > { %4056 = vst [vmem:[#allocation1 + $0x2] ss:$4 sm:$0xff] %v7967_v55  ;;  %v2746_v55 = vrot.slane %v2688_v30, 2 }
 0x6d8   : > { %4057 = vst [vmem:[#allocation1 + $0x3] ss:$4 sm:$0xff] %v7971_v28  ;;  %v2747_v28 = vrot.slane %v2688_v30, 4 }
 0x6d9   : > { %10512 = vst [vmem:[#allocation64_spill] sm:$0xff] %v7987_v18 }
 0x6da   : > { %3832 = vst [vmem:[#allocation1 + $0x21] ss:$4 sm:$0xff] %v2746_v55  ;;  %v2751_v55 = vrot.slane %v7739_v5, 2 }
 0x6db   : > { %3834 = vst [vmem:[#allocation1 + $0x22] ss:$4 sm:$0xff] %v2747_v28  ;;  %v2752_v28 = vrot.slane %v7739_v5, 4 }
 0x6df   : > { %v7984_v54 = vld.sshfl [vmem:[#allocation1] sm:$0xff pattern:$0x73625140] }
 0x6e0   : > { %4064 = vst [vmem:[#allocation1] ss:$4 sm:$0xff] %v7979_v60  ;;  %v7999_v60 = vld [vmem:[#allocation3 + $0xa9] sm:$0x3f] }
 0x6e1   : > { %4065 = vst [vmem:[#allocation1 + $0x1] ss:$4 sm:$0xff] %v7982_v24  ;;  %v8002_v24 = vrot.slane %v7995_v36, 4  ;;  %v2922_v30 = vrot.slane %v7999_v60, 2 }
 0x6e2   : > { %4066 = vst [vmem:[#allocation1 + $0x2] ss:$4 sm:$0xff] %v7987_v18  ;;  %v8015_v47 = vld.sshfl [vmem:[#allocation1 + $0x20] sm:$0xff pattern:$0x73625140] }
 0x6e3   : > { %4067 = vst [vmem:[#allocation1 + $0x3] ss:$4 sm:$0xff] %v7991_v59 }
 0x6e4   : > { %10513 = vst [vmem:[#allocation65_spill] sm:$0xff] %v8002_v24 }
 0x6e5   : > { %10516 = vst [vmem:[#allocation68_spill] sm:$0xff] %v8015_v47  ;;  %v8034_v47 = vrot.slane %v7760_v63, 2 }
 0x6e6   : > { %3843 = vst [vmem:[#allocation1 + $0x20] ss:$4 sm:$0xff] %v2751_v55  ;;  %v2757_v55 = vrot.slane %v7746_v31, 4 }
 0x6e7   : > { %3844 = vst [vmem:[#allocation1 + $0x21] ss:$4 sm:$0xff] %v2752_v28 }
 0x6e8   : > { %3845 = vst [vmem:[#allocation1 + $0x22] ss:$4 sm:$0xff] %v7744_v57  ;;  %v8071_v57 = vrot.slane %v7770_v38, 2 }
 0x6e9   : > { %3846 = vst [vmem:[#allocation1 + $0x23] ss:$4 sm:$0xff] %v8018_v42 }
 0x6ea   : > { %v8007_v18 = vld.sshfl [vmem:[#allocation1] sm:$0xff pattern:$0x73625140]  ;;  %10521 = vst [vmem:[#allocation73_spill] sm:$0xff] %v8034_v47 }
 0x6eb   : > { %10515 = vst [vmem:[#allocation67_spill] sm:$0xff] %v8007_v18 }
 0x6ec   : > { %4074 = vst [vmem:[#allocation1] ss:$4 sm:$0xff] %v8002_v24  ;;  %v8025_v24 = vrot.slane %v8020_v22, 6 }
 0x6ed   : > { %4075 = vst [vmem:[#allocation1 + $0x1] ss:$4 sm:$0xff] %v8005_v15  ;;  %v2836_v15 = vld [vmem:[#allocation3 + $0xb9] sm:$0x3f] }
 0x6ee   : > { %4076 = vst [vmem:[#allocation1 + $0x2] ss:$4 sm:$0xff] %v7999_v60  ;;  %v2927_v5 = vrot.slane %v2836_v15, 2 }
 0x6ef   : > { %4077 = vst [vmem:[#allocation1 + $0x3] ss:$4 sm:$0xff] %v2922_v30  ;;  %v2928_v30 = vrot.slane %v2836_v15, 4 }
 0x6f0   : > { %10518 = vst [vmem:[#allocation70_spill] sm:$0xff] %v8025_v24  ;;  %v8031_v28 = vld.sshfl [vmem:[#allocation1 + $0x20] sm:$0xff pattern:$0x73625140] }
 0x6f1   : > { %10520 = vst [vmem:[#allocation72_spill] sm:$0xff] %v8031_v28  ;;  %v8046_v28 = vld [vmem:[#allocation3 + $0xd1] sm:$0xff] }
 0x6f2   : > { %3853 = vst [vmem:[#allocation1 + $0x20] ss:$4 sm:$0xff] %v2757_v55 }
 0x6f3   : > { %3854 = vst [vmem:[#allocation1 + $0x21] ss:$4 sm:$0xff] %v7760_v63 }
 0x6f4   : > { %3855 = vst [vmem:[#allocation1 + $0x22] ss:$4 sm:$0xff] %v8034_v47 }
 0x6f5   : > { %3856 = vst [vmem:[#allocation1 + $0x23] ss:$4 sm:$0xff] %v8037_v58 }
 0x6f6   : > { %v8027_v27 = vld.sshfl [vmem:[#allocation1] sm:$0xff pattern:$0x73625140]  ;;  %10529 = vst [vmem:[#allocation81_spill] sm:$0xff] %v8071_v57 }
 0x6f7   : > { %10519 = vst [vmem:[#allocation71_spill] sm:$0xff] %v8027_v27 }
 0x6f8   : > { %4084 = vst [vmem:[#allocation1] ss:$4 sm:$0xff] %v8025_v24  ;;  %v2838_v24 = vld [vmem:[#allocation3 + $0xc9] sm:$0x3f] }
 0x6f9   : > { %4085 = vst [vmem:[#allocation1 + $0x1] ss:$4 sm:$0xff] %v2836_v15  ;;  %v2932_v15 = vrot.slane %v2838_v24, 2 }
 0x6fa   : > { %4086 = vst [vmem:[#allocation1 + $0x2] ss:$4 sm:$0xff] %v2927_v5  ;;  %v8044_v5 = vld [vmem:[#allocation3 + $0x40] sm:$0xff] }
 0x6fb   : > { %4087 = vst [vmem:[#allocation1 + $0x3] ss:$4 sm:$0xff] %v2928_v30  ;;  %v2933_v30 = vrot.slane %v2838_v24, 4  ;;  %v8049_v55 = vrot.slane %v8044_v5, 2  ;;  %v8055_v47 = vrot.slane %v8044_v5, 4  ;;  %v8059_v63 = vrot.slane %v8044_v5, 6 }
 0x6fc   : > { %10523 = vst [vmem:[#allocation75_spill] sm:$0xff] %v8044_v5  ;;  %v8052_v35 = vld.sshfl [vmem:[#allocation1 + $0x20] sm:$0xff pattern:$0x73625140] }
 0x6fd   : > { %10524 = vst [vmem:[#allocation76_spill] sm:$0xff] %v8049_v55 }
 0x6fe   : > { %10525 = vst [vmem:[#allocation77_spill] sm:$0xff] %v8052_v35 }
 0x6ff   : > { %10526 = vst [vmem:[#allocation78_spill] sm:$0xff] %v8055_v47 }
 0x700   : > { %3863 = vst [vmem:[#allocation1 + $0x20] ss:$4 sm:$0xff] %v8044_v5  ;;  %v8074_v5 = vrot.slane %v7770_v38, 4 }
 0x701   : > { %10527 = vst [vmem:[#allocation79_spill] sm:$0xff] %v8059_v63 }
 0x702   : > { %v8042_v31 = vld.sshfl [vmem:[#allocation1] sm:$0xff pattern:$0x73625140]  ;;  %3864 = vst [vmem:[#allocation1 + $0x21] ss:$4 sm:$0xff] %v8049_v55 }
 0x703   : > { %10522 = vst [vmem:[#allocation74_spill] sm:$0xff] %v8042_v31  ;;  %v2939_v55 = vld [vmem:[#allocation3 + $0x2] sm:$0xff] }
 0x704   : > { %4094 = vst [vmem:[#allocation1] ss:$4 sm:$0xff] %v2838_v24  ;;  %v8062_v24 = vld [vmem:[#allocation3 + $0xd9] sm:$0x3f]  ;;  %v2995_v27 = vrot.slane %v2939_v55, 2 }
 0x705   : > { %4095 = vst [vmem:[#allocation1 + $0x1] ss:$4 sm:$0xff] %v2932_v15  ;;  %v2937_v15 = vrot.slane %v8062_v24, 2 }
 0x706   : > { %4096 = vst [vmem:[#allocation1 + $0x2] ss:$4 sm:$0xff] %v2933_v30  ;;  %v2938_v30 = vrot.slane %v8062_v24, 4 }
 0x707   : > { %4097 = vst [vmem:[#allocation1 + $0x3] ss:$4 sm:$0xff] %v8046_v28 }
 0x708   : > { %3865 = vst [vmem:[#allocation1 + $0x22] ss:$4 sm:$0xff] %v8055_v47  ;;  %v8079_v47 = vrot.slane %v7770_v38, 6  ;;  %v8095_v38 = vld [vmem:[#allocation3 + $0x12] sm:$0xff] }
 0x709   : > { %3866 = vst [vmem:[#allocation1 + $0x23] ss:$4 sm:$0xff] %v8059_v63 }
 0x70a   : > { %10530 = vst [vmem:[#allocation82_spill] sm:$0xff] %v8074_v5 }
 0x70b   : > { %10532 = vst [vmem:[#allocation84_spill] sm:$0xff] %v8079_v47 }
 0x70e   : > { %v8068_v35 = vld.sshfl [vmem:[#allocation1] sm:$0xff pattern:$0x73625140] }
 0x70f   : > { %10528 = vst [vmem:[#allocation80_spill] sm:$0xff] %v8068_v35 }
 0x710   : > { %4104 = vst [vmem:[#allocation1] ss:$4 sm:$0xff] %v2937_v15  ;;  %v8076_v31 = vld.sshfl [vmem:[#allocation1 + $0x20] sm:$0xff pattern:$0x73625140]  ;;  %v2996_v15 = vrot.slane %v2939_v55, 4 }
 0x711   : > { %4105 = vst [vmem:[#allocation1 + $0x1] ss:$4 sm:$0xff] %v2938_v30  ;;  %v2997_v30 = vrot.slane %v2939_v55, 6 }
 0x712   : > { %10531 = vst [vmem:[#allocation83_spill] sm:$0xff] %v8076_v31  ;;  %v8088_v31 = vrot.slane %v7778_v21, 4 }
 0x713   : > { %3873 = vst [vmem:[#allocation1 + $0x20] ss:$4 sm:$0xff] %v8071_v57  ;;  %v8091_v57 = vrot.slane %v7778_v21, 6 }
 0x714   : > { %3874 = vst [vmem:[#allocation1 + $0x21] ss:$4 sm:$0xff] %v8074_v5 }
 0x715   : > { %3875 = vst [vmem:[#allocation1 + $0x22] ss:$4 sm:$0xff] %v8079_v47 }
 0x716   : > { %3876 = vst [vmem:[#allocation1 + $0x23] ss:$4 sm:$0xff] %v7773_v2  ;;  %v2776_v2 = vrot.slane %v7791_v13, 2 }
 0x717   : > { %10534 = vst [vmem:[#allocation86_spill] sm:$0xff] %v8088_v31 }
 0x718   : > { %v8085_v35 = vld.sshfl [vmem:[#allocation1] sm:$0xff pattern:$0x73625140]  ;;  %10535 = vst [vmem:[#allocation87_spill] sm:$0xff] %v8091_v57 }
 0x719   : > { %10533 = vst [vmem:[#allocation85_spill] sm:$0xff] %v8085_v35 }
 0x71a   : > { %4182 = vst [vmem:[#allocation1] ss:$4 sm:$0xff] %v2939_v55  ;;  %v10265_v55 = vrot.slane %v8095_v38, 4 }
 0x71b   : > { %4184 = vst [vmem:[#allocation1 + $0x1] ss:$4 sm:$0xff] %v2995_v27  ;;  %v10264_v27 = vrot.slane %v8095_v38, 2 }
 0x71c   : > { %4186 = vst [vmem:[#allocation1 + $0x2] ss:$4 sm:$0xff] %v2996_v15 }
 0x71d   : > { %4188 = vst [vmem:[#allocation1 + $0x3] ss:$4 sm:$0xff] %v2997_v30  ;;  %v8093_v5 = vld.sshfl [vmem:[#allocation1 + $0x20] sm:$0xff pattern:$0x73625140]  ;;  %v10266_v30 = vrot.slane %v8095_v38, 6 }
 0x71e   : > { %10536 = vst [vmem:[#allocation88_spill] sm:$0xff] %v8093_v5  ;;  %v8110_v5 = vld [vmem:[#allocation3 + $0x1a] sm:$0x3f] }
 0x71f   : > { %3883 = vst [vmem:[#allocation1 + $0x20] ss:$4 sm:$0xff] %v8088_v31  ;;  %v8120_v31 = vld [vmem:[#allocation3 + $0x22] sm:$0xff] }
 0x720   : > { %3884 = vst [vmem:[#allocation1 + $0x21] ss:$4 sm:$0xff] %v8091_v57  ;;  %v8129_v47 = vrot.slane %v8120_v31, 6 }
 0x721   : > { %3885 = vst [vmem:[#allocation1 + $0x22] ss:$4 sm:$0xff] %v7791_v13  ;;  %v2702_v13 = vld [vmem:[#allocation3 + $0x78] sm:$0x3f] }
 0x722   : > { %3886 = vst [vmem:[#allocation1 + $0x23] ss:$4 sm:$0xff] %v2776_v2  ;;  %v8116_v2 = vrot.slane %v7793_v39, 6  ;;  %v2781_v57 = vrot.slane %v2702_v13, 2 }
 0x723   : > { %10541 = vst [vmem:[#allocation93_spill] sm:$0xff] %v8129_v47 }
 0x724   : > { %v8103_v15 = vld.sshfl [vmem:[#allocation1] sm:$0xff pattern:$0x73625140]  ;;  %10538 = vst [vmem:[#allocation90_spill] sm:$0xff] %v8116_v2 }
 0x725   : > { %10537 = vst [vmem:[#allocation89_spill] sm:$0xff] %v8103_v15 }
 0x726   : > { %4199 = vst [vmem:[#allocation1] ss:$4 sm:$0xff] %v10264_v27  ;;  %v2782_v27 = vrot.slane %v2702_v13, 4 }
 0x727   : > { %4200 = vst [vmem:[#allocation1 + $0x1] ss:$4 sm:$0xff] %v10265_v55  ;;  %v8123_v55 = vld [vmem:[#allocation3 + $0x2a] sm:$0x3f] }
 0x728   : > { %4201 = vst [vmem:[#allocation1 + $0x2] ss:$4 sm:$0xff] %v10266_v30  ;;  %v8126_v30 = vrot.slane %v8120_v31, 4 }
 0x729   : > { %4202 = vst [vmem:[#allocation1 + $0x3] ss:$4 sm:$0xff] %v8110_v5  ;;  %v8118_v35 = vld.sshfl [vmem:[#allocation1 + $0x20] sm:$0xff pattern:$0x73625140] }
 0x72a   : > { %10539 = vst [vmem:[#allocation91_spill] sm:$0xff] %v8118_v35  ;;  %v3008_v35 = vrot.slane %v8123_v55, 2 }
 0x72b   : > { %3893 = vst [vmem:[#allocation1 + $0x20] ss:$4 sm:$0xff] %v8116_v2  ;;  %v2704_v2 = vld [vmem:[#allocation3 + $0x88] sm:$0x3f] }
 0x72c   : > { %3894 = vst [vmem:[#allocation1 + $0x21] ss:$4 sm:$0xff] %v2702_v13  ;;  %v2787_v18 = vrot.slane %v2704_v2, 4 }
 0x72d   : > { %3895 = vst [vmem:[#allocation1 + $0x22] ss:$4 sm:$0xff] %v2781_v57  ;;  %v2786_v57 = vrot.slane %v2704_v2, 2 }
 0x72e   : > { %10540 = vst [vmem:[#allocation92_spill] sm:$0xff] %v8126_v30 }
 0x72f   : > { %3896 = vst [vmem:[#allocation1 + $0x23] ss:$4 sm:$0xff] %v2782_v27  ;;  %v8139_v27 = vld [vmem:[#allocation3 + $0x32] sm:$0xff] }
 0x730   : > { %v8131_v15 = vld.sshfl [vmem:[#allocation1] sm:$0xff pattern:$0x73625140]  ;;  %10544 = vst [vmem:[#allocation96_spill] sm:$0xff] %v8139_v27 }
 0x731   : > { %10542 = vst [vmem:[#allocation94_spill] sm:$0xff] %v8131_v15  ;;  %v8142_v15 = vrot.slane %v8139_v27, 6  ;;  %v2948_v27 = vld [vmem:[#allocation3 + $0x4a] sm:$0x3f] }
 0x732   : > { %4209 = vst [vmem:[#allocation1] ss:$4 sm:$0xff] %v8126_v30  ;;  %v3013_v30 = vrot.slane %v2946_v10, 2 }
 0x733   : > { %4210 = vst [vmem:[#allocation1 + $0x1] ss:$4 sm:$0xff] %v8129_v47 }
 0x734   : > { %4211 = vst [vmem:[#allocation1 + $0x2] ss:$4 sm:$0xff] %v8123_v55 }
 0x735   : > { %4212 = vst [vmem:[#allocation1 + $0x3] ss:$4 sm:$0xff] %v3008_v35  ;;  %v3014_v35 = vrot.slane %v2946_v10, 4 }
 0x736   : > { %v8137_v13 = vld.sshfl [vmem:[#allocation1 + $0x20] sm:$0xff pattern:$0x73625140]  ;;  %10545 = vst [vmem:[#allocation97_spill] sm:$0xff] %v8142_v15 }
 0x737   : > { %10543 = vst [vmem:[#allocation95_spill] sm:$0xff] %v8137_v13  ;;  %v2791_v13 = vrot.slane %v7844_v12, 2 }
 0x738   : > { %3903 = vst [vmem:[#allocation1 + $0x20] ss:$4 sm:$0xff] %v2704_v2  ;;  %v2792_v2 = vrot.slane %v7844_v12, 4  ;;  %v2797_v12 = vrot.slane %v7850_v45, 4 }
 0x739   : > { %3904 = vst [vmem:[#allocation1 + $0x21] ss:$4 sm:$0xff] %v2786_v57 }
 0x73a   : > { %3905 = vst [vmem:[#allocation1 + $0x22] ss:$4 sm:$0xff] %v2787_v18  ;;  %v8153_v18 = vrot.slane %v7848_v7, 2 }
 0x73b   : > { %3906 = vst [vmem:[#allocation1 + $0x23] ss:$4 sm:$0xff] %v7828_v4 }
 0x73c   : > { %v8145_v47 = vld.sshfl [vmem:[#allocation1] sm:$0xff pattern:$0x73625140]  ;;  %10548 = vst [vmem:[#allocation100_spill] sm:$0xff] %v8153_v18 }
 0x73d   : > { %10546 = vst [vmem:[#allocation98_spill] sm:$0xff] %v8145_v47  ;;  %v3018_v47 = vrot.slane %v2948_v27, 2 }
 0x73e   : > { %4219 = vst [vmem:[#allocation1] ss:$4 sm:$0xff] %v8142_v15 }
 0x73f   : > { %4220 = vst [vmem:[#allocation1 + $0x1] ss:$4 sm:$0xff] %v2946_v10 }
 0x740   : > { %4221 = vst [vmem:[#allocation1 + $0x2] ss:$4 sm:$0xff] %v3013_v30  ;;  %v3019_v30 = vrot.slane %v2948_v27, 4 }
 0x741   : > { %4222 = vst [vmem:[#allocation1 + $0x3] ss:$4 sm:$0xff] %v3014_v35  ;;  %v8159_v35 = vld [vmem:[#allocation3 + $0x52] sm:$0xff] }
 0x742   : > { %v8150_v57 = vld.sshfl [vmem:[#allocation1 + $0x20] sm:$0xff pattern:$0x73625140]  ;;  %10550 = vst [vmem:[#allocation102_spill] sm:$0xff] %v8159_v35 }
 0x743   : > { %10547 = vst [vmem:[#allocation99_spill] sm:$0xff] %v8150_v57  ;;  %v8168_v57 = vld [vmem:[#allocation3 + $0x5a] sm:$0x3f] }
 0x744   : > { %3913 = vst [vmem:[#allocation1 + $0x20] ss:$4 sm:$0xff] %v2791_v13  ;;  %v3024_v45 = vrot.slane %v8168_v57, 4 }
 0x745   : > { %3914 = vst [vmem:[#allocation1 + $0x21] ss:$4 sm:$0xff] %v2792_v2  ;;  %v8166_v2 = vrot.slane %v7864_v19, 2 }
 0x746   : > { %3915 = vst [vmem:[#allocation1 + $0x22] ss:$4 sm:$0xff] %v7848_v7 }
 0x747   : > { %3916 = vst [vmem:[#allocation1 + $0x23] ss:$4 sm:$0xff] %v8153_v18 }
 0x748   : > { %v8157_v10 = vld.sshfl [vmem:[#allocation1] sm:$0xff pattern:$0x73625140]  ;;  %10552 = vst [vmem:[#allocation104_spill] sm:$0xff] %v8166_v2 }
 0x749   : > { %10549 = vst [vmem:[#allocation101_spill] sm:$0xff] %v8157_v10  ;;  %v8171_v10 = vrot.slane %v7864_v19, 4 }
 0x74a   : > { %4229 = vst [vmem:[#allocation1] ss:$4 sm:$0xff] %v2948_v27  ;;  %v3023_v27 = vrot.slane %v8168_v57, 2 }
 0x74b   : > { %4230 = vst [vmem:[#allocation1 + $0x1] ss:$4 sm:$0xff] %v3018_v47  ;;  %v8175_v47 = vld [vmem:[#allocation3 + $0x62] sm:$0xff] }
 0x74c   : > { %4231 = vst [vmem:[#allocation1 + $0x2] ss:$4 sm:$0xff] %v3019_v30 }
 0x74d   : > { %4232 = vst [vmem:[#allocation1 + $0x3] ss:$4 sm:$0xff] %v8159_v35 }
 0x74e   : > { %v8163_v13 = vld.sshfl [vmem:[#allocation1 + $0x20] sm:$0xff pattern:$0x73625140]  ;;  %10553 = vst [vmem:[#allocation105_spill] sm:$0xff] %v8171_v10 }
 0x74f   : > { %10551 = vst [vmem:[#allocation103_spill] sm:$0xff] %v8163_v13  ;;  %v8185_v13 = vld [vmem:[#allocation3 + $0xc0] sm:$0xff] }
 0x750   : > { %3923 = vst [vmem:[#allocation1 + $0x20] ss:$4 sm:$0xff] %v2797_v12  ;;  %v8183_v12 = vrot.slane %v8175_v47, 2  ;;  %v8190_v15 = vrot.slane %v8185_v13, 2 }
 0x751   : > { %3924 = vst [vmem:[#allocation1 + $0x21] ss:$4 sm:$0xff] %v7864_v19  ;;  %v8195_v19 = vrot.slane %v8185_v13, 4 }
 0x752   : > { %3925 = vst [vmem:[#allocation1 + $0x22] ss:$4 sm:$0xff] %v8166_v2 }
 0x753   : > { %10554 = vst [vmem:[#allocation106_spill] sm:$0xff] %v8175_v47 }
 0x754   : > { %3926 = vst [vmem:[#allocation1 + $0x23] ss:$4 sm:$0xff] %v8171_v10  ;;  %v8180_v30 = vld.sshfl [vmem:[#allocation1] sm:$0xff pattern:$0x73625140] }
 0x755   : > { %10555 = vst [vmem:[#allocation107_spill] sm:$0xff] %v8180_v30  ;;  %v8197_v30 = vld [vmem:[#allocation3 + $0x6a] sm:$0x3f] }
 0x756   : > { %4239 = vst [vmem:[#allocation1] ss:$4 sm:$0xff] %v3023_v27  ;;  %v8201_v27 = vrot.slane %v8185_v13, 6 }
 0x757   : > { %10556 = vst [vmem:[#allocation108_spill] sm:$0xff] %v8183_v12 }
 0x758   : > { %4240 = vst [vmem:[#allocation1 + $0x1] ss:$4 sm:$0xff] %v3024_v45  ;;  %v8204_v45 = vld [vmem:[#allocation3 + $0x72] sm:$0xff] }
 0x759   : > { %10557 = vst [vmem:[#allocation109_spill] sm:$0xff] %v8185_v13  ;;  %v8212_v7 = vrot.slane %v8204_v45, 2 }
 0x75a   : > { %4241 = vst [vmem:[#allocation1 + $0x2] ss:$4 sm:$0xff] %v8175_v47  ;;  %v8215_v47 = vrot.slane %v8204_v45, 4 }
 0x75b   : > { %4242 = vst [vmem:[#allocation1 + $0x3] ss:$4 sm:$0xff] %v8183_v12  ;;  %v8192_v2 = vld.sshfl [vmem:[#allocation1 + $0x20] sm:$0xff pattern:$0x73625140]  ;;  %v3029_v12 = vrot.slane %v8197_v30, 4 }
 0x75c   : > { %10558 = vst [vmem:[#allocation110_spill] sm:$0xff] %v8190_v15 }
 0x75d   : > { %10559 = vst [vmem:[#allocation111_spill] sm:$0xff] %v8192_v2 }
 0x75e   : > { %10560 = vst [vmem:[#allocation112_spill] sm:$0xff] %v8195_v19 }
 0x75f   : > { %3933 = vst [vmem:[#allocation1 + $0x20] ss:$4 sm:$0xff] %v8185_v13  ;;  %v8229_v13 = vrot.slane %v7874_v8, 6 }
 0x760   : > { %10561 = vst [vmem:[#allocation113_spill] sm:$0xff] %v8201_v27 }
 0x761   : > { %3934 = vst [vmem:[#allocation1 + $0x21] ss:$4 sm:$0xff] %v8190_v15  ;;  %v8224_v15 = vrot.slane %v7874_v8, 4 }
 0x762   : > { %10562 = vst [vmem:[#allocation114_spill] sm:$0xff] %v8204_v45  ;;  %v8209_v2 = vld.sshfl [vmem:[#allocation1] sm:$0xff pattern:$0x73625140] }
 0x763   : > { %3935 = vst [vmem:[#allocation1 + $0x22] ss:$4 sm:$0xff] %v8195_v19  ;;  %v8221_v19 = vrot.slane %v7874_v8, 2 }
 0x764   : > { %3936 = vst [vmem:[#allocation1 + $0x23] ss:$4 sm:$0xff] %v8201_v27 }
 0x765   : > { %10563 = vst [vmem:[#allocation115_spill] sm:$0xff] %v8209_v2 }
 0x766   : > { %10564 = vst [vmem:[#allocation116_spill] sm:$0xff] %v8212_v7 }
 0x767   : > { %4249 = vst [vmem:[#allocation1] ss:$4 sm:$0xff] %v3029_v12  ;;  %v8232_v12 = vld [vmem:[#allocation3 + $0x82] sm:$0xff] }
 0x768   : > { %10565 = vst [vmem:[#allocation117_spill] sm:$0xff] %v8215_v47 }
 0x769   : > { %4250 = vst [vmem:[#allocation1 + $0x1] ss:$4 sm:$0xff] %v8204_v45  ;;  %v2814_v45 = vld [vmem:[#allocation3 + $0x9] sm:$0x3f] }
 0x76a   : > { %4251 = vst [vmem:[#allocation1 + $0x2] ss:$4 sm:$0xff] %v8212_v7 }
 0x76b   : > { %4252 = vst [vmem:[#allocation1 + $0x3] ss:$4 sm:$0xff] %v8215_v47  ;;  %v8226_v2 = vld.sshfl [vmem:[#allocation1 + $0x20] sm:$0xff pattern:$0x73625140]  ;;  %v8238_v47 = vrot.slane %v8232_v12, 2 }
 0x76c   : > { %10566 = vst [vmem:[#allocation118_spill] sm:$0xff] %v8221_v19 }
 0x76d   : > { %10567 = vst [vmem:[#allocation119_spill] sm:$0xff] %v8224_v15 }
 0x76e   : > { %10568 = vst [vmem:[#allocation120_spill] sm:$0xff] %v8226_v2  ;;  %v8243_v2 = vrot.slane %v8232_v12, 4 }
 0x76f   : > { %10569 = vst [vmem:[#allocation121_spill] sm:$0xff] %v8229_v13 }
 0x770   : > { %3943 = vst [vmem:[#allocation1 + $0x20] ss:$4 sm:$0xff] %v8221_v19  ;;  %v8247_v19 = vrot.slane %v8232_v12, 6 }
 0x771   : > { %10570 = vst [vmem:[#allocation122_spill] sm:$0xff] %v8232_v12 }
 0x772   : > { %3944 = vst [vmem:[#allocation1 + $0x21] ss:$4 sm:$0xff] %v8224_v15  ;;  %v8240_v7 = vld.sshfl [vmem:[#allocation1] sm:$0xff pattern:$0x73625140] }
 0x773   : > { %3945 = vst [vmem:[#allocation1 + $0x22] ss:$4 sm:$0xff] %v8229_v13  ;;  %v2872_v13 = vrot.slane %v2814_v45, 2 }
 0x774   : > { %3946 = vst [vmem:[#allocation1 + $0x23] ss:$4 sm:$0xff] %v7877_v48  ;;  %v2873_v48 = vrot.slane %v2814_v45, 4 }
 0x775   : > { %10571 = vst [vmem:[#allocation123_spill] sm:$0xff] %v8238_v47 }
 0x776   : > { %10572 = vst [vmem:[#allocation124_spill] sm:$0xff] %v8240_v7  ;;  %v8254_v7 = vld [vmem:[#allocation3 + $0x92] sm:$0xff] }
 0x777   : > { %10573 = vst [vmem:[#allocation125_spill] sm:$0xff] %v8243_v2  ;;  %v8257_v8 = vrot.slane %v8254_v7, 2 }
 0x778   : > { %4259 = vst [vmem:[#allocation1] ss:$4 sm:$0xff] %v8232_v12  ;;  %v8281_v12 = vrot.slane %v7901_v6, 2 }
 0x779   : > { %10574 = vst [vmem:[#allocation126_spill] sm:$0xff] %v8247_v19 }
 0x77a   : > { %4260 = vst [vmem:[#allocation1 + $0x1] ss:$4 sm:$0xff] %v8238_v47  ;;  %v8261_v47 = vrot.slane %v8254_v7, 4 }
 0x77b   : > { %4261 = vst [vmem:[#allocation1 + $0x2] ss:$4 sm:$0xff] %v8243_v2  ;;  %v8252_v15 = vld.sshfl [vmem:[#allocation1 + $0x20] sm:$0xff pattern:$0x73625140] }
 0x77c   : > { %4262 = vst [vmem:[#allocation1 + $0x3] ss:$4 sm:$0xff] %v8247_v19  ;;  %v8266_v19 = vrot.slane %v8254_v7, 6 }
 0x77d   : > { %10575 = vst [vmem:[#allocation127_spill] sm:$0xff] %v8252_v15 }
 0x77e   : > { %10576 = vst [vmem:[#allocation128_spill] sm:$0xff] %v8254_v7 }
 0x77f   : > { %3985 = vst [vmem:[#allocation1 + $0x20] ss:$4 sm:$0xff] %v2814_v45  ;;  %v8270_v45 = vld [vmem:[#allocation3 + $0x9a] sm:$0x3f] }
 0x780   : > { %3987 = vst [vmem:[#allocation1 + $0x21] ss:$4 sm:$0xff] %v2872_v13  ;;  %v2877_v13 = vrot.slane %v7896_v44, 2 }
 0x781   : > { %3989 = vst [vmem:[#allocation1 + $0x22] ss:$4 sm:$0xff] %v2873_v48  ;;  %v2878_v48 = vrot.slane %v7896_v44, 4 }
 0x782   : > { %10577 = vst [vmem:[#allocation129_spill] sm:$0xff] %v8257_v8 }
 0x783   : > { %3991 = vst [vmem:[#allocation1 + $0x23] ss:$4 sm:$0xff] %v7885_v41  ;;  %v8263_v2 = vld.sshfl [vmem:[#allocation1] sm:$0xff pattern:$0x73625140]  ;;  %v8305_v41 = vld [vmem:[#allocation3 + $0xb2] sm:$0xff] }
 0x784   : > { %10578 = vst [vmem:[#allocation130_spill] sm:$0xff] %v8261_v47 }
 0x785   : > { %10579 = vst [vmem:[#allocation131_spill] sm:$0xff] %v8263_v2  ;;  %v8278_v2 = vld [vmem:[#allocation3 + $0xa2] sm:$0xff] }
 0x786   : > { %10580 = vst [vmem:[#allocation132_spill] sm:$0xff] %v8266_v19  ;;  %v8291_v44 = vrot.slane %v8278_v2, 6 }
 0x787   : > { %4269 = vst [vmem:[#allocation1] ss:$4 sm:$0xff] %v8257_v8 }
 0x788   : > { %4270 = vst [vmem:[#allocation1 + $0x1] ss:$4 sm:$0xff] %v8261_v47  ;;  %v8284_v47 = vld [vmem:[#allocation3 + $0xaa] sm:$0x3f] }
 0x789   : > { %4271 = vst [vmem:[#allocation1 + $0x2] ss:$4 sm:$0xff] %v8266_v19  ;;  %v8287_v19 = vrot.slane %v8278_v2, 4 }
 0x78a   : > { %4272 = vst [vmem:[#allocation1 + $0x3] ss:$4 sm:$0xff] %v8270_v45  ;;  %v8276_v15 = vld.sshfl [vmem:[#allocation1 + $0x20] sm:$0xff pattern:$0x73625140] }
 0x78b   : > { %10581 = vst [vmem:[#allocation133_spill] sm:$0xff] %v8278_v2 }
 0x78c   : > { %3998 = vst [vmem:[#allocation1 + $0x20] ss:$4 sm:$0xff] %v2877_v13  ;;  %v3048_v13 = vrot.slane %v8284_v47, 2 }
 0x78d   : > { %10582 = vst [vmem:[#allocation134_spill] sm:$0xff] %v8281_v12 }
 0x78e   : > { %3999 = vst [vmem:[#allocation1 + $0x21] ss:$4 sm:$0xff] %v2878_v48  ;;  %v2883_v48 = vrot.slane %v7903_v1, 4 }
 0x78f   : > { %4000 = vst [vmem:[#allocation1 + $0x22] ss:$4 sm:$0xff] %v7901_v6 }
 0x790   : > { %10583 = vst [vmem:[#allocation135_spill] sm:$0xff] %v8284_v47 }
 0x791   : > { %10584 = vst [vmem:[#allocation136_spill] sm:$0xff] %v8287_v19  ;;  %v8293_v8 = vld.sshfl [vmem:[#allocation1] sm:$0xff pattern:$0x73625140] }
 0x792   : > { %4001 = vst [vmem:[#allocation1 + $0x23] ss:$4 sm:$0xff] %v8281_v12  ;;  %v8303_v12 = vrot.slane %v7917_v52, 2 }
 0x793   : > { %10585 = vst [vmem:[#allocation137_spill] sm:$0xff] %v8291_v44 }
 0x794   : > { %10586 = vst [vmem:[#allocation138_spill] sm:$0xff] %v8293_v8  ;;  %v8308_v8 = vrot.slane %v7917_v52, 4 }
 0x795   : > { %4279 = vst [vmem:[#allocation1] ss:$4 sm:$0xff] %v8287_v19  ;;  %v2962_v19 = vld [vmem:[#allocation3 + $0xba] sm:$0x3f] }
 0x796   : > { %4280 = vst [vmem:[#allocation1 + $0x1] ss:$4 sm:$0xff] %v8291_v44  ;;  %v3053_v44 = vrot.slane %v2962_v19, 2 }
 0x797   : > { %4281 = vst [vmem:[#allocation1 + $0x2] ss:$4 sm:$0xff] %v8284_v47  ;;  %v3054_v47 = vrot.slane %v2962_v19, 4 }
 0x798   : > { %4282 = vst [vmem:[#allocation1 + $0x3] ss:$4 sm:$0xff] %v3048_v13  ;;  %v8313_v13 = vrot.slane %v8305_v41, 6 }
 0x799   : > { %v8300_v6 = vld.sshfl [vmem:[#allocation1 + $0x20] sm:$0xff pattern:$0x73625140]  ;;  %10587 = vst [vmem:[#allocation139_spill] sm:$0xff] %v8303_v12 }
 0x79a   : > { %10588 = vst [vmem:[#allocation140_spill] sm:$0xff] %v8305_v41 }
 0x79b   : > { %4008 = vst [vmem:[#allocation1 + $0x20] ss:$4 sm:$0xff] %v2883_v48  ;;  %v8319_v48 = vld [vmem:[#allocation3 + $0x41] sm:$0xff] }
 0x79c   : > { %10589 = vst [vmem:[#allocation141_spill] sm:$0xff] %v8308_v8  ;;  %v8327_v41 = vrot.slane %v8319_v48, 4 }
 0x79d   : > { %4009 = vst [vmem:[#allocation1 + $0x21] ss:$4 sm:$0xff] %v7917_v52  ;;  %v8322_v52 = vrot.slane %v8319_v48, 2 }
 0x79e   : > { %4010 = vst [vmem:[#allocation1 + $0x22] ss:$4 sm:$0xff] %v8303_v12 }
 0x79f   : > { %10590 = vst [vmem:[#allocation142_spill] sm:$0xff] %v8313_v13  ;;  %v8316_v1 = vld.sshfl [vmem:[#allocation1] sm:$0xff pattern:$0x73625140] }
 0x7a0   : > { %4011 = vst [vmem:[#allocation1 + $0x23] ss:$4 sm:$0xff] %v8308_v8  ;;  %v8338_v8 = vld [vmem:[#allocation3 + $0xd2] sm:$0xff] }
 0x7a1   : > { %10591 = vst [vmem:[#allocation143_spill] sm:$0xff] %v8316_v1  ;;  %v8331_v1 = vrot.slane %v8319_v48, 6 }
 0x7a2   : > { %4289 = vst [vmem:[#allocation1] ss:$4 sm:$0xff] %v8313_v13  ;;  %v2964_v13 = vld [vmem:[#allocation3 + $0xca] sm:$0x3f] }
 0x7a3   : > { %4290 = vst [vmem:[#allocation1 + $0x1] ss:$4 sm:$0xff] %v2962_v19  ;;  %v3058_v19 = vrot.slane %v2964_v13, 2 }
 0x7a4   : > { %10592 = vst [vmem:[#allocation144_spill] sm:$0xff] %v8319_v48 }
 0x7a5   : > { %4291 = vst [vmem:[#allocation1 + $0x2] ss:$4 sm:$0xff] %v3053_v44  ;;  %v3059_v44 = vrot.slane %v2964_v13, 4 }
 0x7a6   : > { %4292 = vst [vmem:[#allocation1 + $0x3] ss:$4 sm:$0xff] %v3054_v47 }
 0x7a7   : > { %10593 = vst [vmem:[#allocation145_spill] sm:$0xff] %v8322_v52  ;;  %v8324_v12 = vld.sshfl [vmem:[#allocation1 + $0x20] sm:$0xff pattern:$0x73625140] }
 0x7a8   : > { %10594 = vst [vmem:[#allocation146_spill] sm:$0xff] %v8327_v41 }
 0x7a9   : > { %4018 = vst [vmem:[#allocation1 + $0x20] ss:$4 sm:$0xff] %v8319_v48  ;;  %v8342_v48 = vrot.slane %v7927_v3, 2 }
 0x7aa   : > { %10595 = vst [vmem:[#allocation147_spill] sm:$0xff] %v8331_v1 }
 0x7ab   : > { %4019 = vst [vmem:[#allocation1 + $0x21] ss:$4 sm:$0xff] %v8322_v52  ;;  %v8345_v52 = vrot.slane %v7927_v3, 4 }
 0x7ac   : > { %4020 = vst [vmem:[#allocation1 + $0x22] ss:$4 sm:$0xff] %v8327_v41 }
 0x7ad   : > { %4021 = vst [vmem:[#allocation1 + $0x23] ss:$4 sm:$0xff] %v8331_v1  ;;  %v8336_v47 = vld.sshfl [vmem:[#allocation1] sm:$0xff pattern:$0x73625140]  ;;  %v8350_v1 = vrot.slane %v7927_v3, 6 }
 0x7ae   : > { %10596 = vst [vmem:[#allocation148_spill] sm:$0xff] %v8336_v47  ;;  %v8352_v47 = vld [vmem:[#allocation3 + $0xda] sm:$0x3f]  ;;  %v8363_v3 = vrot.slane %v7932_v0, 4 }
 0x7af   : > { %4299 = vst [vmem:[#allocation1] ss:$4 sm:$0xff] %v2964_v13  ;;  %v3063_v13 = vrot.slane %v8352_v47, 2 }
 0x7b0   : > { %4300 = vst [vmem:[#allocation1 + $0x1] ss:$4 sm:$0xff] %v3058_v19  ;;  %v3064_v19 = vrot.slane %v8352_v47, 4 }
 0x7b1   : > { %10597 = vst [vmem:[#allocation149_spill] sm:$0xff] %v8338_v8 }
 0x7b2   : > { %4301 = vst [vmem:[#allocation1 + $0x2] ss:$4 sm:$0xff] %v3059_v44 }
 0x7b3   : > { %4302 = vst [vmem:[#allocation1 + $0x3] ss:$4 sm:$0xff] %v8338_v8  ;;  %v8366_v8 = vrot.slane %v7932_v0, 6 }
 0x7b4   : > { %10598 = vst [vmem:[#allocation150_spill] sm:$0xff] %v8342_v48  ;;  %v8347_v41 = vld.sshfl [vmem:[#allocation1 + $0x20] sm:$0xff pattern:$0x73625140] }
 0x7b5   : > { %10599 = vst [vmem:[#allocation151_spill] sm:$0xff] %v8345_v52 }
 0x7b6   : > { %10600 = vst [vmem:[#allocation152_spill] sm:$0xff] %v8350_v1 }
 0x7b7   : > { %4028 = vst [vmem:[#allocation1 + $0x20] ss:$4 sm:$0xff] %v8342_v48 }
 0x7b8   : > { %4029 = vst [vmem:[#allocation1 + $0x21] ss:$4 sm:$0xff] %v8345_v52 }
 0x7b9   : > { %4030 = vst [vmem:[#allocation1 + $0x22] ss:$4 sm:$0xff] %v8350_v1 }
 0x7ba   : > { %4031 = vst [vmem:[#allocation1 + $0x23] ss:$4 sm:$0xff] %v7930_v56  ;;  %v8360_v44 = vld.sshfl [vmem:[#allocation1] sm:$0xff pattern:$0x73625140]  ;;  %v10605_v56 = vrot.slane %v7728_v16, 2 }
 0x7bb   : > { %10601 = vst [vmem:[#allocation153_spill] sm:$0xff] %v8360_v44  ;;  %v10607_v44 = vrot.slane %v7728_v16, 6 }
 0x7bc   : > { %4309 = vst [vmem:[#allocation1] ss:$4 sm:$0xff] %v3063_v13  ;;  %v2902_v13 = vrot.slane %v7943_v40, 2 }
 0x7bd   : > { %4310 = vst [vmem:[#allocation1 + $0x1] ss:$4 sm:$0xff] %v3064_v19  ;;  %v10606_v19 = vrot.slane %v7728_v16, 4 }
 0x7be   : > { %10602 = vst [vmem:[#allocation154_spill] sm:$0xff] %v8363_v3 }
 0x7bf   : > { %10603 = vst [vmem:[#allocation155_spill] sm:$0xff] %v8366_v8 }
 0x7c1   : > { %v8368_v48 = vld.sshfl [vmem:[#allocation1 + $0x20] sm:$0xff pattern:$0x73625140] }
 0x7c2   : > { %4038 = vst [vmem:[#allocation1 + $0x20] ss:$4 sm:$0xff] %v8363_v3 }
 0x7c3   : > { %4039 = vst [vmem:[#allocation1 + $0x21] ss:$4 sm:$0xff] %v8366_v8  ;;  %v2828_v8 = vld [vmem:[#allocation3 + $0x79] sm:$0x3f] }
 0x7c4   : > { %v8372_v1 = vld.sshfl [vmem:[#allocation1] sm:$0xff pattern:$0x73625140]  ;;  %4040 = vst [vmem:[#allocation1 + $0x22] ss:$4 sm:$0xff] %v7943_v40 }
 0x7c5   : > { %10604 = vst [vmem:[#allocation156_spill] sm:$0xff] %v8372_v1  ;;  %v8392_v40 = vld [vmem:[#allocation3 + $0x28] sm:$0x3f] }
 0x7c6   : > { %4387 = vst [vmem:[#allocation1] ss:$4 sm:$0xff] %v7728_v16  ;;  %v2907_v16 = vrot.slane %v2828_v8, 2 }
 0x7c7   : > { %4389 = vst [vmem:[#allocation1 + $0x1] ss:$4 sm:$0xff] %v10605_v56  ;;  %v8390_v56 = vrot.slane %v7945_v23, 6 }
 0x7c8   : > { %4391 = vst [vmem:[#allocation1 + $0x2] ss:$4 sm:$0xff] %v10606_v19 }
 0x7c9   : > { %4393 = vst [vmem:[#allocation1 + $0x3] ss:$4 sm:$0xff] %v10607_v44  ;;  %v2908_v44 = vrot.slane %v2828_v8, 4 }
 0x7ca   : > { %4041 = vst [vmem:[#allocation1 + $0x23] ss:$4 sm:$0xff] %v2902_v13  ;;  %v8397_v13 = vld [vmem:[#allocation3 + $0x38] sm:$0x3f] }
 0x7cb   : > { %10609 = vst [vmem:[#allocation158_spill] sm:$0xff] %v8390_v56 }
 0x7d0   : > { %v8383_v3 = vld.sshfl [vmem:[#allocation1] sm:$0xff pattern:$0x73625140] }
 0x7d1   : > { %10608 = vst [vmem:[#allocation157_spill] sm:$0xff] %v8383_v3  ;;  %v8387_v1 = vld.sshfl [vmem:[#allocation1 + $0x20] sm:$0xff pattern:$0x73625140] }
 0x7d2   : > { %4404 = vst [vmem:[#allocation1] ss:$4 sm:$0xff] %v8018_v42  ;;  %v2830_v3 = vld [vmem:[#allocation3 + $0x89] sm:$0x3f] }
 0x7d3   : > { %4405 = vst [vmem:[#allocation1 + $0x1] ss:$4 sm:$0xff] %v7749_v26  ;;  %v3134_v26 = vrot.slane %v8397_v13, 2 }
 0x7d4   : > { %4406 = vst [vmem:[#allocation1 + $0x2] ss:$4 sm:$0xff] %v7752_v50  ;;  %v2912_v50 = vrot.slane %v2830_v3, 2 }
 0x7d5   : > { %4407 = vst [vmem:[#allocation1 + $0x3] ss:$4 sm:$0xff] %v8392_v40 }
 0x7d6   : > { %4048 = vst [vmem:[#allocation1 + $0x20] ss:$4 sm:$0xff] %v8390_v56 }
 0x7d7   : > { %4049 = vst [vmem:[#allocation1 + $0x21] ss:$4 sm:$0xff] %v2828_v8  ;;  %v2913_v8 = vrot.slane %v2830_v3, 4 }
 0x7d8   : > { %4050 = vst [vmem:[#allocation1 + $0x22] ss:$4 sm:$0xff] %v2907_v16  ;;  %v6193_v16 = vpack.i.bf16 %v8276_v15, %v7889_v32  ;;  %v2918_v32 = vrot.slane %v7991_v59, 4 }
 0x7d9   : > { %4051 = vst [vmem:[#allocation1 + $0x23] ss:$4 sm:$0xff] %v2908_v44  ;;  %v3072_v44 = vld [vmem:[#allocation3 + $0x48] sm:$0x3f] }
 0x7da   : > { %6194 = vrot.lane.b32.xlu0 %v6193_v16, %s6628_s11  ;;  %v3074_v16 = vld [vmem:[#allocation3 + $0x58] sm:$0x3f] }
 0x7dc   : > { %v8399_v19 = vld.sshfl [vmem:[#allocation1] sm:$0xff pattern:$0x73625140] }
 0x7dd   : > { %10610 = vst [vmem:[#allocation159_spill] sm:$0xff] %v8399_v19 }
 0x7de   : > { %4414 = vst [vmem:[#allocation1] ss:$4 sm:$0xff] %v8037_v58 }
 0x7df   : > { %4415 = vst [vmem:[#allocation1 + $0x1] ss:$4 sm:$0xff] %v7763_v51  ;;  %v3139_v51 = vrot.slane %v3072_v44, 2 }
 0x7e0   : > { %4416 = vst [vmem:[#allocation1 + $0x2] ss:$4 sm:$0xff] %v8397_v13  ;;  %v8405_v42 = vld.sshfl [vmem:[#allocation1 + $0x20] sm:$0xff pattern:$0x73625140] }
 0x7e1   : > { %4417 = vst [vmem:[#allocation1 + $0x3] ss:$4 sm:$0xff] %v3134_v26  ;;  %v3140_v26 = vrot.slane %v3072_v44, 4 }
 0x7e2   : > { %4058 = vst [vmem:[#allocation1 + $0x20] ss:$4 sm:$0xff] %v2830_v3  ;;  %v2917_v3 = vrot.slane %v7991_v59, 2  ;;  %v2923_v59 = vrot.slane %v7999_v60, 4  ;;  %v8442_v60 = vld [vmem:[#allocation3 + $0x68] sm:$0x3f] }
 0x7e3   : > { %4059 = vst [vmem:[#allocation1 + $0x21] ss:$4 sm:$0xff] %v2912_v50  ;;  %v6198_v50 = vpack.i.bf16 %v8300_v6, %v7911_v33  ;;  %v3145_v6 = vrot.slane %v3074_v16, 4  ;;  %v6203_v33 = vpack.i.bf16 %v8324_v12, %v7922_v9  ;;  %v3149_v9 = vrot.slane %v8442_v60, 2 }
 0x7e4   : > { %4060 = vst [vmem:[#allocation1 + $0x22] ss:$4 sm:$0xff] %v2913_v8  ;;  %v8422_v8 = vrot.slane %v7995_v36, 2  ;;  %v3150_v12 = vrot.slane %v8442_v60, 4 }
 0x7e5   : > { %4061 = vst [vmem:[#allocation1 + $0x23] ss:$4 sm:$0xff] %v7976_v34  ;;  %6199 = vrot.lane.b32.xlu1 %v6198_v50, %s6628_s11  ;;  %6204 = vrot.lane.b32.xlu2 %v6203_v33, %s6628_s11  ;;  %v8439_v50 = vrot.slane %v8020_v22, 4 }
 0x7e6   : > { %10612 = vst [vmem:[#allocation161_spill] sm:$0xff] %v8422_v8 }
 0x7e7   : > { %10614 = vst [vmem:[#allocation163_spill] sm:$0xff] %v8439_v50 }
 0x7e8   : > { %v8411_v19 = vld.sshfl [vmem:[#allocation1] sm:$0xff pattern:$0x73625140] }
 0x7e9   : > { %10611 = vst [vmem:[#allocation160_spill] sm:$0xff] %v8411_v19 }
 0x7ea   : > { %4424 = vst [vmem:[#allocation1] ss:$4 sm:$0xff] %v8059_v63 }
 0x7eb   : > { %4425 = vst [vmem:[#allocation1 + $0x1] ss:$4 sm:$0xff] %v3072_v44 }
 0x7ec   : > { %4426 = vst [vmem:[#allocation1 + $0x2] ss:$4 sm:$0xff] %v3139_v51  ;;  %v8418_v15 = vld.sshfl [vmem:[#allocation1 + $0x20] sm:$0xff pattern:$0x73625140]  ;;  %v3144_v51 = vrot.slane %v3074_v16, 2 }
 0x7ed   : > { %4427 = vst [vmem:[#allocation1 + $0x3] ss:$4 sm:$0xff] %v3140_v26 }
 0x7ee   : > { %4068 = vst [vmem:[#allocation1 + $0x20] ss:$4 sm:$0xff] %v2917_v3  ;;  %v8435_v3 = vrot.slane %v8020_v22, 2 }
 0x7ef   : > { %4069 = vst [vmem:[#allocation1 + $0x21] ss:$4 sm:$0xff] %v2918_v32 }
 0x7f0   : > { %4070 = vst [vmem:[#allocation1 + $0x22] ss:$4 sm:$0xff] %v7995_v36 }
 0x7f1   : > { %4071 = vst [vmem:[#allocation1 + $0x23] ss:$4 sm:$0xff] %v8422_v8 }
 0x7f4   : > { %v8426_v44 = vld.sshfl [vmem:[#allocation1] sm:$0xff pattern:$0x73625140] }
 0x7f5   : > { %10613 = vst [vmem:[#allocation162_spill] sm:$0xff] %v8426_v44  ;;  %v8486_v44 = vrot.slane %v8046_v28, 4 }
 0x7f6   : > { %4434 = vst [vmem:[#allocation1] ss:$4 sm:$0xff] %v3074_v16  ;;  %v6208_v16 = vpack.i.bf16 %v8347_v41, %v7925_v43  ;;  %v8470_v41 = vld [vmem:[#allocation3 + $0x78] sm:$0x3f] }
 0x7f7   : > { %4435 = vst [vmem:[#allocation1 + $0x1] ss:$4 sm:$0xff] %v3144_v51  ;;  %v8452_v51 = vld [vmem:[#allocation3 + $0xc1] sm:$0xff] }
 0x7f8   : > { %4436 = vst [vmem:[#allocation1 + $0x2] ss:$4 sm:$0xff] %v3145_v6  ;;  %v8432_v26 = vld.sshfl [vmem:[#allocation1 + $0x20] sm:$0xff pattern:$0x73625140]  ;;  %6209 = vrot.lane.b32.xlu0 %v6208_v16, %s6628_s11  ;;  %v8457_v6 = vrot.slane %v8452_v51, 2  ;;  %v6213_v16 = vpack.i.bf16 %v8368_v48, %v7936_v53  ;;  %v6218_v53 = vpack.i.bf16 %v8387_v1, %v7948_v11  ;;  %v6223_v11 = vpack.i.bf16 %v8405_v42, %v7964_v49 }
 0x7f9   : > { %4437 = vst [vmem:[#allocation1 + $0x3] ss:$4 sm:$0xff] %v7778_v21  ;;  %v8463_v33 = vrot.slane %v8452_v51, 4  ;;  %v8467_v43 = vrot.slane %v8452_v51, 6  ;;  %v2940_v48 = vld [vmem:[#allocation3 + $0xa] sm:$0x3f]  ;;  %v6228_v49 = vpack.i.bf16 %v8418_v15, %v7984_v54 }
 0x7fa   : > { %4078 = vst [vmem:[#allocation1 + $0x20] ss:$4 sm:$0xff] %v2923_v59  ;;  %6214 = vrot.lane.b32.xlu1 %v6213_v16, %s6628_s11  ;;  %6219 = vrot.lane.b32.xlu2 %v6218_v53, %s6628_s11  ;;  %v2998_v16 = vrot.slane %v2940_v48, 2  ;;  %v8517_v1 = vld [vmem:[#allocation3 + $0xa8] sm:$0x3f]  ;;  %v3003_v53 = vrot.slane %v8110_v5, 2 }
 0x7fb   : > { %4079 = vst [vmem:[#allocation1 + $0x21] ss:$4 sm:$0xff] %v8020_v22  ;;  %v8528_v42 = vrot.slane %v8120_v31, 2  ;;  %v3009_v54 = vrot.slane %v8123_v55, 4  ;;  %v3088_v55 = vld [vmem:[#allocation3 + $0xc8] sm:$0x3f] }
 0x7fc   : > { %4080 = vst [vmem:[#allocation1 + $0x22] ss:$4 sm:$0xff] %v8435_v3 }
 0x7fd   : > { %4081 = vst [vmem:[#allocation1 + $0x23] ss:$4 sm:$0xff] %v8439_v50 }
 0x7fe   : > { %10616 = vst [vmem:[#allocation165_spill] sm:$0xff] %v8467_v43 }
 0x7ff   : > { %10619 = vst [vmem:[#allocation168_spill] sm:$0xff] %v8486_v44 }
 0x800   : > { %v8448_v32 = vld.sshfl [vmem:[#allocation1] sm:$0xff pattern:$0x73625140]  ;;  %6224 = vrot.lane.b32.xlu0 %v6223_v11, %s6628_s11 }
 0x801   : > { %10615 = vst [vmem:[#allocation164_spill] sm:$0xff] %v8448_v32  ;;  %v8482_v32 = vrot.slane %v8046_v28, 2 }
 0x802   : > { %4444 = vst [vmem:[#allocation1] ss:$4 sm:$0xff] %v3149_v9  ;;  %v3155_v9 = vrot.slane %v8470_v41, 4  ;;  %6229 = vrot.lane.b32.xlu1 %v6228_v49, %s6628_s11 }
 0x803   : > { %4445 = vst [vmem:[#allocation1 + $0x1] ss:$4 sm:$0xff] %v3150_v12 }
 0x804   : > { %4446 = vst [vmem:[#allocation1 + $0x2] ss:$4 sm:$0xff] %v7793_v39  ;;  %v8460_v59 = vld.sshfl [vmem:[#allocation1 + $0x20] sm:$0xff pattern:$0x73625140] }
 0x805   : > { %4447 = vst [vmem:[#allocation1 + $0x3] ss:$4 sm:$0xff] %v7799_v61  ;;  %v3066_v39 = vld [vmem:[#allocation3 + $0x18] sm:$0x3f] }
 0x806   : > { %4088 = vst [vmem:[#allocation1 + $0x20] ss:$4 sm:$0xff] %v8452_v51 }
 0x807   : > { %4089 = vst [vmem:[#allocation1 + $0x21] ss:$4 sm:$0xff] %v8457_v6 }
 0x808   : > { %4090 = vst [vmem:[#allocation1 + $0x22] ss:$4 sm:$0xff] %v8463_v33 }
 0x809   : > { %4091 = vst [vmem:[#allocation1 + $0x23] ss:$4 sm:$0xff] %v8467_v43 }
 0x80a   : > { %10618 = vst [vmem:[#allocation167_spill] sm:$0xff] %v8482_v32 }
 0x80c   : > { %v8475_v12 = vld.sshfl [vmem:[#allocation1] sm:$0xff pattern:$0x73625140] }
 0x80d   : > { %10617 = vst [vmem:[#allocation166_spill] sm:$0xff] %v8475_v12  ;;  %v8492_v12 = vrot.slane %v8046_v28, 6 }
 0x80e   : > { %4454 = vst [vmem:[#allocation1] ss:$4 sm:$0xff] %v3155_v9 }
 0x80f   : > { %4455 = vst [vmem:[#allocation1 + $0x1] ss:$4 sm:$0xff] %v7808_v20 }
 0x810   : > { %4456 = vst [vmem:[#allocation1 + $0x2] ss:$4 sm:$0xff] %v7814_v62  ;;  %v8489_v19 = vld.sshfl [vmem:[#allocation1 + $0x20] sm:$0xff pattern:$0x73625140] }
 0x811   : > { %4457 = vst [vmem:[#allocation1 + $0x3] ss:$4 sm:$0xff] %v7819_v14  ;;  %v2999_v14 = vrot.slane %v2940_v48, 4 }
 0x812   : > { %4098 = vst [vmem:[#allocation1 + $0x20] ss:$4 sm:$0xff] %v8482_v32 }
 0x813   : > { %4099 = vst [vmem:[#allocation1 + $0x21] ss:$4 sm:$0xff] %v8486_v44 }
 0x814   : > { %4100 = vst [vmem:[#allocation1 + $0x22] ss:$4 sm:$0xff] %v8492_v12 }
 0x815   : > { %4101 = vst [vmem:[#allocation1 + $0x23] ss:$4 sm:$0xff] %v8062_v24 }
 0x818   : > { %v8501_v9 = vld.sshfl [vmem:[#allocation1] sm:$0xff pattern:$0x73625140] }
 0x819   : > { %10620 = vst [vmem:[#allocation169_spill] sm:$0xff] %v8501_v9 }
 0x81a   : > { %4464 = vst [vmem:[#allocation1] ss:$4 sm:$0xff] %v7828_v4 }
 0x81b   : > { %4465 = vst [vmem:[#allocation1 + $0x1] ss:$4 sm:$0xff] %v7832_v46 }
 0x81c   : > { %4466 = vst [vmem:[#allocation1 + $0x2] ss:$4 sm:$0xff] %v7835_v29  ;;  %v8507_v61 = vld.sshfl [vmem:[#allocation1 + $0x20] sm:$0xff pattern:$0x73625140] }
 0x81d   : > { %4467 = vst [vmem:[#allocation1 + $0x3] ss:$4 sm:$0xff] %v7842_v25 }
 0x81e   : > { %4190 = vst [vmem:[#allocation1 + $0x20] ss:$4 sm:$0xff] %v2940_v48 }
 0x81f   : > { %4192 = vst [vmem:[#allocation1 + $0x21] ss:$4 sm:$0xff] %v2998_v16  ;;  %v8533_v16 = vld [vmem:[#allocation3 + $0xb8] sm:$0x3f] }
 0x820   : > { %4194 = vst [vmem:[#allocation1 + $0x22] ss:$4 sm:$0xff] %v2999_v14  ;;  %v3004_v14 = vrot.slane %v8110_v5, 4  ;;  %v3174_v11 = vrot.slane %v8533_v16, 2 }
 0x821   : > { %4196 = vst [vmem:[#allocation1 + $0x23] ss:$4 sm:$0xff] %v8095_v38 }
 0x824   : > { %v8513_v24 = vld.sshfl [vmem:[#allocation1] sm:$0xff pattern:$0x73625140] }
 0x825   : > { %10621 = vst [vmem:[#allocation170_spill] sm:$0xff] %v8513_v24  ;;  %v10626_v24 = vld [vmem:[#allocation67_spill] sm:$0xff] }
 0x826   : > { %4474 = vst [vmem:[#allocation1] ss:$4 sm:$0xff] %v8153_v18 }
 0x827   : > { %4475 = vst [vmem:[#allocation1 + $0x1] ss:$4 sm:$0xff] %v7853_v17 }
 0x828   : > { %4476 = vst [vmem:[#allocation1 + $0x2] ss:$4 sm:$0xff] %v7856_v37  ;;  %v8523_v48 = vld.sshfl [vmem:[#allocation1 + $0x20] sm:$0xff pattern:$0x73625140] }
 0x829   : > { %4477 = vst [vmem:[#allocation1 + $0x3] ss:$4 sm:$0xff] %v8517_v1 }
 0x82a   : > { %4203 = vst [vmem:[#allocation1 + $0x20] ss:$4 sm:$0xff] %v3003_v53  ;;  %v10623_v53 = vld [vmem:[#allocation39_spill] sm:$0xff] }
 0x82b   : > { %4204 = vst [vmem:[#allocation1 + $0x21] ss:$4 sm:$0xff] %v3004_v14  ;;  %v10625_v14 = vld [vmem:[#allocation96_spill] sm:$0xff] }
 0x82c   : > { %4205 = vst [vmem:[#allocation1 + $0x22] ss:$4 sm:$0xff] %v8120_v31  ;;  %v8545_v49 = vrot.slane %v10625_v14, 2  ;;  %v8550_v9 = vrot.slane %v10625_v14, 4 }
 0x82d   : > { %4206 = vst [vmem:[#allocation1 + $0x23] ss:$4 sm:$0xff] %v8528_v42 }
 0x82e   : > { %10627 = vst [vmem:[#allocation67_spill] sm:$0xff] %v8550_v9 }
 0x830   : > { %v8535_v5 = vld.sshfl [vmem:[#allocation1] sm:$0xff pattern:$0x73625140] }
 0x831   : > { %10622 = vst [vmem:[#allocation171_spill] sm:$0xff] %v8535_v5  ;;  %v6233_v5 = vpack.i.bf16 %v8432_v26, %v10626_v24  ;;  %v3180_v26 = vrot.slane %v3088_v55, 4  ;;  %v10630_v24 = vld [vmem:[#allocation71_spill] sm:$0xff] }
 0x832   : > { %4484 = vst [vmem:[#allocation1] ss:$4 sm:$0xff] %v8171_v10  ;;  %v6238_v25 = vpack.i.bf16 %v8460_v59, %v10630_v24  ;;  %v3090_v59 = vld [vmem:[#allocation3 + $0xd8] sm:$0x3f]  ;;  %v8589_v10 = vrot.slane %v8159_v35, 4 }
 0x833   : > { %4485 = vst [vmem:[#allocation1 + $0x1] ss:$4 sm:$0xff] %v10623_v53  ;;  %6234 = vrot.lane.b32.xlu2 %v6233_v5, %s6628_s11  ;;  %v8586_v53 = vld [vmem:[#allocation3 + $0xe0] sm:$0xff] }
 0x834   : > { %4486 = vst [vmem:[#allocation1 + $0x2] ss:$4 sm:$0xff] %v8533_v16  ;;  %v8542_v15 = vld.sshfl [vmem:[#allocation1 + $0x20] sm:$0xff pattern:$0x73625140]  ;;  %6239 = vrot.lane.b32.xlu0 %v6238_v25, %s6628_s11  ;;  %v10635_v25 = vld [vmem:[#allocation74_spill] sm:$0xff] }
 0x835   : > { %4487 = vst [vmem:[#allocation1 + $0x3] ss:$4 sm:$0xff] %v3174_v11  ;;  %v6243_v24 = vpack.i.bf16 %v8489_v19, %v10635_v25  ;;  %v8601_v19 = vld [vmem:[#allocation3 + $0xe8] sm:$0x3f] }
 0x836   : > { %10624 = vst [vmem:[#allocation172_spill] sm:$0xff] %v8542_v15  ;;  %v8558_v15 = vld [vmem:[#allocation3 + $0x42] sm:$0xff] }
 0x837   : > { %4213 = vst [vmem:[#allocation1 + $0x20] ss:$4 sm:$0xff] %v3009_v54  ;;  %v3179_v54 = vrot.slane %v3088_v55, 2  ;;  %v8564_v21 = vrot.slane %v8558_v15, 2  ;;  %6244 = vrot.lane.b32.xlu1 %v6243_v24, %s6628_s11  ;;  %v3190_v24 = vrot.slane %v8601_v19, 4 }
 0x838   : > { %4214 = vst [vmem:[#allocation1 + $0x21] ss:$4 sm:$0xff] %v10625_v14 }
 0x839   : > { %4215 = vst [vmem:[#allocation1 + $0x22] ss:$4 sm:$0xff] %v8545_v49 }
 0x83a   : > { %4216 = vst [vmem:[#allocation1 + $0x23] ss:$4 sm:$0xff] %v8550_v9 }
 0x83b   : > { %10629 = vst [vmem:[#allocation174_spill] sm:$0xff] %v8558_v15 }
 0x83c   : > { %v8556_v11 = vld.sshfl [vmem:[#allocation1] sm:$0xff pattern:$0x73625140]  ;;  %10631 = vst [vmem:[#allocation71_spill] sm:$0xff] %v8564_v21 }
 0x83d   : > { %10628 = vst [vmem:[#allocation173_spill] sm:$0xff] %v8556_v11  ;;  %v8570_v11 = vrot.slane %v8558_v15, 4 }
 0x83e   : > { %4494 = vst [vmem:[#allocation1] ss:$4 sm:$0xff] %v8201_v27  ;;  %v8574_v27 = vrot.slane %v8558_v15, 6 }
 0x83f   : > { %4495 = vst [vmem:[#allocation1 + $0x1] ss:$4 sm:$0xff] %v3088_v55  ;;  %v3184_v55 = vrot.slane %v3090_v59, 2 }
 0x840   : > { %4496 = vst [vmem:[#allocation1 + $0x2] ss:$4 sm:$0xff] %v3179_v54 }
 0x841   : > { %4497 = vst [vmem:[#allocation1 + $0x3] ss:$4 sm:$0xff] %v3180_v26  ;;  %v8566_v5 = vld.sshfl [vmem:[#allocation1 + $0x20] sm:$0xff pattern:$0x73625140]  ;;  %v3185_v26 = vrot.slane %v3090_v59, 4 }
 0x842   : > { %10632 = vst [vmem:[#allocation175_spill] sm:$0xff] %v8566_v5  ;;  %v8584_v5 = vrot.slane %v8159_v35, 2 }
 0x843   : > { %4223 = vst [vmem:[#allocation1 + $0x20] ss:$4 sm:$0xff] %v8558_v15 }
 0x844   : > { %10633 = vst [vmem:[#allocation176_spill] sm:$0xff] %v8574_v27 }
 0x845   : > { %4224 = vst [vmem:[#allocation1 + $0x21] ss:$4 sm:$0xff] %v8564_v21 }
 0x846   : > { %4225 = vst [vmem:[#allocation1 + $0x22] ss:$4 sm:$0xff] %v8570_v11 }
 0x847   : > { %4226 = vst [vmem:[#allocation1 + $0x23] ss:$4 sm:$0xff] %v8574_v27 }
 0x848   : > { %v8579_v54 = vld.sshfl [vmem:[#allocation1] sm:$0xff pattern:$0x73625140]  ;;  %10636 = vst [vmem:[#allocation74_spill] sm:$0xff] %v8584_v5 }
 0x849   : > { %10634 = vst [vmem:[#allocation177_spill] sm:$0xff] %v8579_v54 }
 0x84a   : > { %4504 = vst [vmem:[#allocation1] ss:$4 sm:$0xff] %v3090_v59  ;;  %v8596_v59 = vrot.slane %v8159_v35, 6 }
 0x84b   : > { %4505 = vst [vmem:[#allocation1 + $0x1] ss:$4 sm:$0xff] %v3184_v55  ;;  %v3189_v55 = vrot.slane %v8601_v19, 2 }
 0x84c   : > { %10637 = vst [vmem:[#allocation178_spill] sm:$0xff] %v8586_v53 }
 0x84d   : > { %4506 = vst [vmem:[#allocation1 + $0x2] ss:$4 sm:$0xff] %v3185_v26  ;;  %v10641_v26 = vld [vmem:[#allocation80_spill] sm:$0xff] }
 0x84e   : > { %10638 = vst [vmem:[#allocation179_spill] sm:$0xff] %v8589_v10  ;;  %v8592_v37 = vld.sshfl [vmem:[#allocation1 + $0x20] sm:$0xff pattern:$0x73625140]  ;;  %v6248_v25 = vpack.i.bf16 %v8507_v61, %v10641_v26  ;;  %v3028_v61 = vrot.slane %v8197_v30, 2 }
 0x84f   : > { %4507 = vst [vmem:[#allocation1 + $0x3] ss:$4 sm:$0xff] %v8586_v53 }
 0x850   : > { %10639 = vst [vmem:[#allocation180_spill] sm:$0xff] %v8592_v37  ;;  %6249 = vrot.lane.b32.xlu2 %v6248_v25, %s6628_s11  ;;  %v10643_v37 = vld [vmem:[#allocation106_spill] sm:$0xff] }
 0x851   : > { %10640 = vst [vmem:[#allocation181_spill] sm:$0xff] %v8596_v59  ;;  %v8612_v17 = vrot.slane %v10643_v37, 4  ;;  %v8615_v18 = vrot.slane %v10643_v37, 6  ;;  %v2954_v25 = vld [vmem:[#allocation3 + $0x7a] sm:$0x3f] }
 0x852   : > { %4233 = vst [vmem:[#allocation1 + $0x20] ss:$4 sm:$0xff] %v8584_v5  ;;  %v3034_v46 = vrot.slane %v2954_v25, 4 }
 0x853   : > { %4234 = vst [vmem:[#allocation1 + $0x21] ss:$4 sm:$0xff] %v8589_v10 }
 0x854   : > { %4235 = vst [vmem:[#allocation1 + $0x22] ss:$4 sm:$0xff] %v8596_v59 }
 0x855   : > { %4236 = vst [vmem:[#allocation1 + $0x23] ss:$4 sm:$0xff] %v8168_v57 }
 0x856   : > { %v8607_v54 = vld.sshfl [vmem:[#allocation1] sm:$0xff pattern:$0x73625140]  ;;  %10644 = vst [vmem:[#allocation182_spill] sm:$0xff] %v8612_v17 }
 0x857   : > { %10642 = vst [vmem:[#allocation80_spill] sm:$0xff] %v8607_v54 }
 0x858   : > { %4514 = vst [vmem:[#allocation1] ss:$4 sm:$0xff] %v3189_v55  ;;  %v10647_v55 = vld [vmem:[#allocation89_spill] sm:$0xff] }
 0x859   : > { %4515 = vst [vmem:[#allocation1 + $0x1] ss:$4 sm:$0xff] %v3190_v24  ;;  %v6253_v26 = vpack.i.bf16 %v8523_v48, %v10647_v55  ;;  %v10648_v24 = vld [vmem:[#allocation114_spill] sm:$0xff]  ;;  %v3043_v55 = vrot.slane %v8270_v45, 2 }
 0x85a   : > { %10645 = vst [vmem:[#allocation183_spill] sm:$0xff] %v8615_v18  ;;  %v8627_v54 = vrot.slane %v10648_v24, 6 }
 0x85b   : > { %6254 = vrot.lane.b32.xlu1 %v6253_v26, %s6626_s14  ;;  %v3044_v26 = vrot.slane %v8270_v45, 4 }
 0x85c   : > { %v8617_v57 = vld.sshfl [vmem:[#allocation1 + $0x20] sm:$0xff pattern:$0x73625140]  ;;  %10649 = vst [vmem:[#allocation89_spill] sm:$0xff] %v8627_v54 }
 0x85d   : > { %10646 = vst [vmem:[#allocation184_spill] sm:$0xff] %v8617_v57  ;;  %v3033_v57 = vrot.slane %v2954_v25, 2 }
 0x85e   : > { %4243 = vst [vmem:[#allocation1 + $0x20] ss:$4 sm:$0xff] %v8612_v17 }
 0x85f   : > { %4244 = vst [vmem:[#allocation1 + $0x21] ss:$4 sm:$0xff] %v8615_v18 }
 0x860   : > { %4245 = vst [vmem:[#allocation1 + $0x22] ss:$4 sm:$0xff] %v8197_v30  ;;  %v2956_v30 = vld [vmem:[#allocation3 + $0x8a] sm:$0x3f] }
 0x861   : > { %4246 = vst [vmem:[#allocation1 + $0x23] ss:$4 sm:$0xff] %v3028_v61  ;;  %v3038_v61 = vrot.slane %v2956_v30, 2  ;;  %v3039_v48 = vrot.slane %v2956_v30, 4 }
 0x868   : > { %v8629_v29 = vld.sshfl [vmem:[#allocation1 + $0x20] sm:$0xff pattern:$0x73625140] }
 0x869   : > { %10650 = vst [vmem:[#allocation185_spill] sm:$0xff] %v8629_v29 }
 0x86a   : > { %4253 = vst [vmem:[#allocation1 + $0x20] ss:$4 sm:$0xff] %v8627_v54 }
 0x86b   : > { %4254 = vst [vmem:[#allocation1 + $0x21] ss:$4 sm:$0xff] %v2954_v25 }
 0x86c   : > { %4255 = vst [vmem:[#allocation1 + $0x22] ss:$4 sm:$0xff] %v3033_v57  ;;  %v8640_v57 = vrot.slane %v8278_v2, 2 }
 0x86d   : > { %4256 = vst [vmem:[#allocation1 + $0x23] ss:$4 sm:$0xff] %v3034_v46  ;;  %v10654_v46 = vld [vmem:[#allocation135_spill] sm:$0xff] }
 0x86e   : > { %10653 = vst [vmem:[#allocation188_spill] sm:$0xff] %v8640_v57  ;;  %v3049_v25 = vrot.slane %v10654_v46, 4 }
 0x874   : > { %v8632_v4 = vld.sshfl [vmem:[#allocation1 + $0x20] sm:$0xff pattern:$0x73625140] }
 0x875   : > { %10651 = vst [vmem:[#allocation186_spill] sm:$0xff] %v8632_v4 }
 0x876   : > { %4263 = vst [vmem:[#allocation1 + $0x20] ss:$4 sm:$0xff] %v2956_v30 }
 0x877   : > { %4264 = vst [vmem:[#allocation1 + $0x21] ss:$4 sm:$0xff] %v3038_v61  ;;  %v10656_v61 = vld [vmem:[#allocation140_spill] sm:$0xff] }
 0x878   : > { %4265 = vst [vmem:[#allocation1 + $0x22] ss:$4 sm:$0xff] %v3039_v48  ;;  %v8648_v48 = vrot.slane %v10656_v61, 2  ;;  %v8651_v45 = vrot.slane %v10656_v61, 4 }
 0x879   : > { %4266 = vst [vmem:[#allocation1 + $0x23] ss:$4 sm:$0xff] %v8254_v7 }
 0x87a   : > { %10657 = vst [vmem:[#allocation189_spill] sm:$0xff] %v8648_v48 }
 0x87b   : > { %10658 = vst [vmem:[#allocation190_spill] sm:$0xff] %v8651_v45 }
 0x880   : > { %v8637_v29 = vld.sshfl [vmem:[#allocation1 + $0x20] sm:$0xff pattern:$0x73625140] }
 0x881   : > { %10652 = vst [vmem:[#allocation187_spill] sm:$0xff] %v8637_v29  ;;  %v10664_v29 = vld [vmem:[#allocation149_spill] sm:$0xff] }
 0x882   : > { %4273 = vst [vmem:[#allocation1 + $0x20] ss:$4 sm:$0xff] %v3043_v55  ;;  %v8656_v55 = vld [vmem:[#allocation3 + $0xc2] sm:$0xff]  ;;  %v8674_v4 = vrot.slane %v10664_v29, 2  ;;  %v8677_v62 = vrot.slane %v10664_v29, 4  ;;  %v8682_v20 = vrot.slane %v10664_v29, 6 }
 0x883   : > { %4274 = vst [vmem:[#allocation1 + $0x21] ss:$4 sm:$0xff] %v3044_v26  ;;  %v8659_v26 = vrot.slane %v8656_v55, 2  ;;  %v3129_v29 = vrot.slane %v8392_v40, 2 }
 0x884   : > { %4275 = vst [vmem:[#allocation1 + $0x22] ss:$4 sm:$0xff] %v8278_v2 }
 0x885   : > { %4276 = vst [vmem:[#allocation1 + $0x23] ss:$4 sm:$0xff] %v8640_v57 }
 0x886   : > { %10659 = vst [vmem:[#allocation191_spill] sm:$0xff] %v8656_v55 }
 0x887   : > { %10660 = vst [vmem:[#allocation192_spill] sm:$0xff] %v8659_v26 }
 0x888   : > { %10665 = vst [vmem:[#allocation196_spill] sm:$0xff] %v8674_v4 }
 0x889   : > { %10666 = vst [vmem:[#allocation197_spill] sm:$0xff] %v8677_v62 }
 0x88a   : > { %10668 = vst [vmem:[#allocation199_spill] sm:$0xff] %v8682_v20 }
 0x88c   : > { %v8645_v30 = vld.sshfl [vmem:[#allocation1 + $0x20] sm:$0xff pattern:$0x73625140] }
 0x88d   : > { %10655 = vst [vmem:[#allocation135_spill] sm:$0xff] %v8645_v30  ;;  %v8664_v30 = vrot.slane %v8656_v55, 4 }
 0x88e   : > { %4283 = vst [vmem:[#allocation1 + $0x20] ss:$4 sm:$0xff] %v3049_v25  ;;  %v8668_v25 = vrot.slane %v8656_v55, 6 }
 0x88f   : > { %4284 = vst [vmem:[#allocation1 + $0x21] ss:$4 sm:$0xff] %v10656_v61 }
 0x890   : > { %4285 = vst [vmem:[#allocation1 + $0x22] ss:$4 sm:$0xff] %v8648_v48 }
 0x891   : > { %4286 = vst [vmem:[#allocation1 + $0x23] ss:$4 sm:$0xff] %v8651_v45 }
 0x892   : > { %10662 = vst [vmem:[#allocation194_spill] sm:$0xff] %v8664_v30 }
 0x893   : > { %10663 = vst [vmem:[#allocation195_spill] sm:$0xff] %v8668_v25 }
 0x898   : > { %v8661_v46 = vld.sshfl [vmem:[#allocation1 + $0x20] sm:$0xff pattern:$0x73625140] }
 0x899   : > { %10661 = vst [vmem:[#allocation193_spill] sm:$0xff] %v8661_v46 }
 0x89a   : > { %4293 = vst [vmem:[#allocation1 + $0x20] ss:$4 sm:$0xff] %v8656_v55  ;;  %v3125_v55 = vrot.slane %v3066_v39, 4 }
 0x89b   : > { %4294 = vst [vmem:[#allocation1 + $0x21] ss:$4 sm:$0xff] %v8659_v26 }
 0x89c   : > { %4295 = vst [vmem:[#allocation1 + $0x22] ss:$4 sm:$0xff] %v8664_v30  ;;  %v3124_v30 = vrot.slane %v3066_v39, 2 }
 0x89d   : > { %4296 = vst [vmem:[#allocation1 + $0x23] ss:$4 sm:$0xff] %v8668_v25 }
 0x8a4   : > { %v8679_v46 = vld.sshfl [vmem:[#allocation1 + $0x20] sm:$0xff pattern:$0x73625140] }
 0x8a5   : > { %10667 = vst [vmem:[#allocation198_spill] sm:$0xff] %v8679_v46  ;;  %v10670_v46 = vld [vmem:[#allocation8_spill] sm:$0xff] }
 0x8a6   : > { %4303 = vst [vmem:[#allocation1 + $0x20] ss:$4 sm:$0xff] %v8674_v4  ;;  %v3130_v4 = vrot.slane %v8392_v40, 4  ;;  %v10678_v40 = vld [vmem:[#allocation75_spill] sm:$0xff] }
 0x8a7   : > { %4304 = vst [vmem:[#allocation1 + $0x21] ss:$4 sm:$0xff] %v8677_v62  ;;  %v8697_v62 = vld.sshfl [vmem:[#allocation1] sm:$0xff pattern:$0x73625140] }
 0x8a8   : > { %4305 = vst [vmem:[#allocation1 + $0x22] ss:$4 sm:$0xff] %v8682_v20  ;;  %v10672_v20 = vld [vmem:[#allocation12_spill] sm:$0xff] }
 0x8a9   : > { %4306 = vst [vmem:[#allocation1 + $0x23] ss:$4 sm:$0xff] %v8352_v47  ;;  %v10673_v47 = vld [vmem:[#allocation73_spill] sm:$0xff] }
 0x8aa   : > { %10674 = vst [vmem:[#allocation73_spill] sm:$0xff] %v8697_v62 }
 0x8b0   : > { %v8688_v26 = vld.sshfl [vmem:[#allocation1 + $0x20] sm:$0xff pattern:$0x73625140] }
 0x8b1   : > { %10669 = vst [vmem:[#allocation200_spill] sm:$0xff] %v8688_v26 }
 0x8b2   : > { %4395 = vst [vmem:[#allocation1 + $0x20] ss:$4 sm:$0xff] %v3066_v39  ;;  %v3135_v39 = vrot.slane %v8397_v13, 4 }
 0x8b3   : > { %4397 = vst [vmem:[#allocation1 + $0x21] ss:$4 sm:$0xff] %v3124_v30  ;;  %v10675_v30 = vld [vmem:[#allocation45_spill] sm:$0xff] }
 0x8b4   : > { %4399 = vst [vmem:[#allocation1 + $0x22] ss:$4 sm:$0xff] %v3125_v55  ;;  %v10677_v26 = vrot.slane %v10675_v30, 2  ;;  %v10682_v62 = vrot.slane %v10675_v30, 6 }
 0x8b5   : > { %4401 = vst [vmem:[#allocation1 + $0x23] ss:$4 sm:$0xff] %v10670_v46 }
 0x8b6   : > { %4592 = vst [vmem:[#allocation1] ss:$4 sm:$0xff] %v10675_v30 }
 0x8b7   : > { %4594 = vst [vmem:[#allocation1 + $0x1] ss:$4 sm:$0xff] %v10677_v26  ;;  %v10686_v26 = vld [vmem:[#allocation82_spill] sm:$0xff] }
 0x8b8   : > { %4598 = vst [vmem:[#allocation1 + $0x3] ss:$4 sm:$0xff] %v10682_v62 }
 0x8bc   : > { %v8693_v63 = vld.sshfl [vmem:[#allocation1 + $0x20] sm:$0xff pattern:$0x73625140] }
 0x8bd   : > { %10671 = vst [vmem:[#allocation8_spill] sm:$0xff] %v8693_v63  ;;  %v10681_v63 = vrot.slane %v10675_v30, 4  ;;  %v10693_v30 = vld [vmem:[#allocation23_spill] sm:$0xff] }
 0x8be   : > { %4408 = vst [vmem:[#allocation1 + $0x20] ss:$4 sm:$0xff] %v3129_v29  ;;  %v10679_v29 = vld [vmem:[#allocation76_spill] sm:$0xff] }
 0x8bf   : > { %4409 = vst [vmem:[#allocation1 + $0x21] ss:$4 sm:$0xff] %v3130_v4  ;;  %v10680_v4 = vld [vmem:[#allocation78_spill] sm:$0xff] }
 0x8c0   : > { %4410 = vst [vmem:[#allocation1 + $0x22] ss:$4 sm:$0xff] %v10672_v20  ;;  %v10684_v20 = vld [vmem:[#allocation16_spill] sm:$0xff] }
 0x8c1   : > { %4411 = vst [vmem:[#allocation1 + $0x23] ss:$4 sm:$0xff] %v10673_v47 }
 0x8c2   : > { %4596 = vst [vmem:[#allocation1 + $0x2] ss:$4 sm:$0xff] %v10681_v63  ;;  %v10691_v63 = vld [vmem:[#allocation87_spill] sm:$0xff] }
 0x8c8   : > { %v8701_v55 = vld.sshfl [vmem:[#allocation1 + $0x20] sm:$0xff pattern:$0x73625140] }
 0x8c9   : > { %10676 = vst [vmem:[#allocation45_spill] sm:$0xff] %v8701_v55  ;;  %v10685_v55 = vld [vmem:[#allocation81_spill] sm:$0xff] }
 0x8ca   : > { %4418 = vst [vmem:[#allocation1 + $0x20] ss:$4 sm:$0xff] %v3135_v39  ;;  %v10687_v39 = vld [vmem:[#allocation84_spill] sm:$0xff] }
 0x8cb   : > { %4419 = vst [vmem:[#allocation1 + $0x21] ss:$4 sm:$0xff] %v10678_v40 }
 0x8cc   : > { %4420 = vst [vmem:[#allocation1 + $0x22] ss:$4 sm:$0xff] %v10679_v29  ;;  %v10689_v29 = vld [vmem:[#allocation19_spill] sm:$0xff] }
 0x8cd   : > { %4421 = vst [vmem:[#allocation1 + $0x23] ss:$4 sm:$0xff] %v10680_v4  ;;  %v10690_v4 = vld [vmem:[#allocation86_spill] sm:$0xff] }
 0x8d4   : > { %v8712_v13 = vld.sshfl [vmem:[#allocation1 + $0x20] sm:$0xff pattern:$0x73625140] }
 0x8d5   : > { %10683 = vst [vmem:[#allocation201_spill] sm:$0xff] %v8712_v13  ;;  %v3154_v13 = vrot.slane %v8470_v41, 2 }
 0x8d6   : > { %4428 = vst [vmem:[#allocation1 + $0x20] ss:$4 sm:$0xff] %v10684_v20  ;;  %v10703_v20 = vld [vmem:[#allocation50_spill] sm:$0xff] }
 0x8d7   : > { %4429 = vst [vmem:[#allocation1 + $0x21] ss:$4 sm:$0xff] %v10685_v55  ;;  %v10694_v55 = vld [vmem:[#allocation90_spill] sm:$0xff] }
 0x8d8   : > { %4430 = vst [vmem:[#allocation1 + $0x22] ss:$4 sm:$0xff] %v10686_v26  ;;  %v8734_v26 = vld [vmem:[#allocation3 + $0x29] sm:$0x3f] }
 0x8d9   : > { %4431 = vst [vmem:[#allocation1 + $0x23] ss:$4 sm:$0xff] %v10687_v39  ;;  %v10707_v39 = vld [vmem:[#allocation147_spill] sm:$0xff] }
 0x8e0   : > { %v8718_v40 = vld.sshfl [vmem:[#allocation1 + $0x20] sm:$0xff pattern:$0x73625140] }
 0x8e1   : > { %10688 = vst [vmem:[#allocation202_spill] sm:$0xff] %v8718_v40  ;;  %v8730_v40 = vld.sshfl [vmem:[#allocation1] sm:$0xff pattern:$0x73625140] }
 0x8e2   : > { %4438 = vst [vmem:[#allocation1 + $0x20] ss:$4 sm:$0xff] %v10689_v29  ;;  %v10696_v29 = vld [vmem:[#allocation134_spill] sm:$0xff] }
 0x8e3   : > { %4439 = vst [vmem:[#allocation1 + $0x21] ss:$4 sm:$0xff] %v10690_v4  ;;  %v10697_v4 = vld [vmem:[#allocation47_spill] sm:$0xff] }
 0x8e4   : > { %4440 = vst [vmem:[#allocation1 + $0x22] ss:$4 sm:$0xff] %v10691_v63  ;;  %v3080_v63 = vld [vmem:[#allocation3 + $0x88] sm:$0x3f] }
 0x8e5   : > { %4441 = vst [vmem:[#allocation1 + $0x23] ss:$4 sm:$0xff] %v8442_v60  ;;  %v10698_v60 = vld [vmem:[#allocation48_spill] sm:$0xff] }
 0x8e6   : > { %10695 = vst [vmem:[#allocation204_spill] sm:$0xff] %v8730_v40 }
 0x8e7   : > { %4609 = vst [vmem:[#allocation1] ss:$4 sm:$0xff] %v10696_v29  ;;  %v3082_v29 = vld [vmem:[#allocation3 + $0x98] sm:$0x3f] }
 0x8e8   : > { %4610 = vst [vmem:[#allocation1 + $0x1] ss:$4 sm:$0xff] %v10697_v4  ;;  %v10702_v4 = vld [vmem:[#allocation141_spill] sm:$0xff] }
 0x8e9   : > { %4611 = vst [vmem:[#allocation1 + $0x2] ss:$4 sm:$0xff] %v10698_v60 }
 0x8ea   : > { %4612 = vst [vmem:[#allocation1 + $0x3] ss:$4 sm:$0xff] %v8734_v26 }
 0x8ec   : > { %v8724_v62 = vld.sshfl [vmem:[#allocation1 + $0x20] sm:$0xff pattern:$0x73625140] }
 0x8ed   : > { %10692 = vst [vmem:[#allocation203_spill] sm:$0xff] %v8724_v62 }
 0x8ee   : > { %4448 = vst [vmem:[#allocation1 + $0x20] ss:$4 sm:$0xff] %v10693_v30  ;;  %v3159_v30 = vrot.slane %v3080_v63, 2 }
 0x8ef   : > { %4449 = vst [vmem:[#allocation1 + $0x21] ss:$4 sm:$0xff] %v10694_v55  ;;  %v10700_v55 = vld [vmem:[#allocation28_spill] sm:$0xff] }
 0x8f0   : > { %4450 = vst [vmem:[#allocation1 + $0x22] ss:$4 sm:$0xff] %v8470_v41  ;;  %v3160_v41 = vrot.slane %v3080_v63, 4 }
 0x8f1   : > { %4451 = vst [vmem:[#allocation1 + $0x23] ss:$4 sm:$0xff] %v3154_v13  ;;  %v8741_v13 = vld [vmem:[#allocation3 + $0x39] sm:$0x3f] }
 0x8f2   : > { %v8743_v40 = vld.sshfl [vmem:[#allocation1] sm:$0xff pattern:$0x73625140]  ;;  %v3260_v60 = vrot.slane %v8741_v13, 2 }
 0x8f3   : > { %10701 = vst [vmem:[#allocation206_spill] sm:$0xff] %v8743_v40 }
 0x8f4   : > { %4619 = vst [vmem:[#allocation1] ss:$4 sm:$0xff] %v10702_v4 }
 0x8f5   : > { %4620 = vst [vmem:[#allocation1 + $0x1] ss:$4 sm:$0xff] %v10703_v20 }
 0x8f6   : > { %4621 = vst [vmem:[#allocation1 + $0x2] ss:$4 sm:$0xff] %v8741_v13 }
 0x8f7   : > { %4622 = vst [vmem:[#allocation1 + $0x3] ss:$4 sm:$0xff] %v3260_v60  ;;  %v3169_v60 = vrot.slane %v8517_v1, 2 }
 0x8f8   : > { %v8738_v62 = vld.sshfl [vmem:[#allocation1 + $0x20] sm:$0xff pattern:$0x73625140] }
 0x8f9   : > { %10699 = vst [vmem:[#allocation205_spill] sm:$0xff] %v8738_v62  ;;  %v3164_v62 = vrot.slane %v3082_v29, 2 }
 0x8fa   : > { %4458 = vst [vmem:[#allocation1 + $0x20] ss:$4 sm:$0xff] %v10700_v55 }
 0x8fb   : > { %4459 = vst [vmem:[#allocation1 + $0x21] ss:$4 sm:$0xff] %v3080_v63  ;;  %v3165_v63 = vrot.slane %v3082_v29, 4 }
 0x8fc   : > { %4460 = vst [vmem:[#allocation1 + $0x22] ss:$4 sm:$0xff] %v3159_v30  ;;  %v3198_v30 = vld [vmem:[#allocation3 + $0x49] sm:$0x3f] }
 0x8fd   : > { %4461 = vst [vmem:[#allocation1 + $0x23] ss:$4 sm:$0xff] %v3160_v41  ;;  %v10705_v41 = vld [vmem:[#allocation34_spill] sm:$0xff]  ;;  %v3265_v4 = vrot.slane %v3198_v30, 2  ;;  %v3266_v48 = vrot.slane %v3198_v30, 4 }
 0x8fe   : > { %v8752_v40 = vld.sshfl [vmem:[#allocation1] sm:$0xff pattern:$0x73625140] }
 0x8ff   : > { %10706 = vst [vmem:[#allocation208_spill] sm:$0xff] %v8752_v40 }
 0x900   : > { %4629 = vst [vmem:[#allocation1] ss:$4 sm:$0xff] %v10707_v39 }
 0x901   : > { %4630 = vst [vmem:[#allocation1 + $0x1] ss:$4 sm:$0xff] %v3198_v30  ;;  %v10714_v30 = vld [vmem:[#allocation110_spill] sm:$0xff] }
 0x902   : > { %4631 = vst [vmem:[#allocation1 + $0x2] ss:$4 sm:$0xff] %v3265_v4  ;;  %v10713_v4 = vld [vmem:[#allocation109_spill] sm:$0xff] }
 0x903   : > { %4632 = vst [vmem:[#allocation1 + $0x3] ss:$4 sm:$0xff] %v3266_v48  ;;  %v3175_v48 = vrot.slane %v8533_v16, 4  ;;  %v10717_v16 = vld [vmem:[#allocation55_spill] sm:$0xff] }
 0x904   : > { %v8749_v55 = vld.sshfl [vmem:[#allocation1 + $0x20] sm:$0xff pattern:$0x73625140] }
 0x905   : > { %10704 = vst [vmem:[#allocation207_spill] sm:$0xff] %v8749_v55  ;;  %v3170_v55 = vrot.slane %v8517_v1, 4 }
 0x906   : > { %4468 = vst [vmem:[#allocation1 + $0x20] ss:$4 sm:$0xff] %v3082_v29  ;;  %v3200_v29 = vld [vmem:[#allocation3 + $0x59] sm:$0x3f] }
 0x907   : > { %4469 = vst [vmem:[#allocation1 + $0x21] ss:$4 sm:$0xff] %v3164_v62  ;;  %v10709_v62 = vld [vmem:[#allocation38_spill] sm:$0xff]  ;;  %v3270_v40 = vrot.slane %v3200_v29, 2  ;;  %v3271_v39 = vrot.slane %v3200_v29, 4 }
 0x908   : > { %4470 = vst [vmem:[#allocation1 + $0x22] ss:$4 sm:$0xff] %v3165_v63  ;;  %v10710_v63 = vld [vmem:[#allocation104_spill] sm:$0xff] }
 0x909   : > { %4471 = vst [vmem:[#allocation1 + $0x23] ss:$4 sm:$0xff] %v10705_v41 }
 0x90a   : > { %v8761_v41 = vld.sshfl [vmem:[#allocation1] sm:$0xff pattern:$0x73625140] }
 0x90b   : > { %10711 = vst [vmem:[#allocation38_spill] sm:$0xff] %v8761_v41 }
 0x90c   : > { %4639 = vst [vmem:[#allocation1] ss:$4 sm:$0xff] %v3200_v29 }
 0x90d   : > { %4640 = vst [vmem:[#allocation1 + $0x1] ss:$4 sm:$0xff] %v3270_v40 }
 0x90e   : > { %4641 = vst [vmem:[#allocation1 + $0x2] ss:$4 sm:$0xff] %v3271_v39 }
 0x90f   : > { %4642 = vst [vmem:[#allocation1 + $0x3] ss:$4 sm:$0xff] %v7932_v0  ;;  %v10721_v0 = vld [vmem:[#allocation119_spill] sm:$0xff] }
 0x910   : > { %v8757_v20 = vld.sshfl [vmem:[#allocation1 + $0x20] sm:$0xff pattern:$0x73625140] }
 0x911   : > { %10708 = vst [vmem:[#allocation209_spill] sm:$0xff] %v8757_v20  ;;  %v10720_v20 = vld [vmem:[#allocation118_spill] sm:$0xff] }
 0x912   : > { %4478 = vst [vmem:[#allocation1 + $0x20] ss:$4 sm:$0xff] %v3169_v60  ;;  %v10715_v60 = vld [vmem:[#allocation112_spill] sm:$0xff] }
 0x913   : > { %4479 = vst [vmem:[#allocation1 + $0x21] ss:$4 sm:$0xff] %v3170_v55  ;;  %v8767_v55 = vld [vmem:[#allocation3 + $0x69] sm:$0x3f] }
 0x914   : > { %4480 = vst [vmem:[#allocation1 + $0x22] ss:$4 sm:$0xff] %v10709_v62  ;;  %v3275_v41 = vrot.slane %v8767_v55, 2  ;;  %v3276_v40 = vrot.slane %v8767_v55, 4 }
 0x915   : > { %4481 = vst [vmem:[#allocation1 + $0x23] ss:$4 sm:$0xff] %v10710_v63 }
 0x916   : > { %v8774_v39 = vld.sshfl [vmem:[#allocation1] sm:$0xff pattern:$0x73625140] }
 0x917   : > { %10716 = vst [vmem:[#allocation109_spill] sm:$0xff] %v8774_v39 }
 0x918   : > { %4649 = vst [vmem:[#allocation1] ss:$4 sm:$0xff] %v3275_v41 }
 0x919   : > { %4650 = vst [vmem:[#allocation1 + $0x1] ss:$4 sm:$0xff] %v3276_v40  ;;  %v10724_v40 = vld [vmem:[#allocation57_spill] sm:$0xff] }
 0x91a   : > { %4651 = vst [vmem:[#allocation1 + $0x2] ss:$4 sm:$0xff] %v7945_v23  ;;  %v10726_v23 = vld [vmem:[#allocation59_spill] sm:$0xff] }
 0x91b   : > { %4652 = vst [vmem:[#allocation1 + $0x3] ss:$4 sm:$0xff] %v10717_v16  ;;  %v10725_v16 = vld [vmem:[#allocation58_spill] sm:$0xff] }
 0x91c   : > { %v8765_v1 = vld.sshfl [vmem:[#allocation1 + $0x20] sm:$0xff pattern:$0x73625140] }
 0x91d   : > { %10712 = vst [vmem:[#allocation104_spill] sm:$0xff] %v8765_v1  ;;  %v8781_v1 = vld [vmem:[#allocation3 + $0x79] sm:$0x3f] }
 0x91e   : > { %4488 = vst [vmem:[#allocation1 + $0x20] ss:$4 sm:$0xff] %v3175_v48  ;;  %v10719_v48 = vld [vmem:[#allocation42_spill] sm:$0xff]  ;;  %v3281_v39 = vrot.slane %v8781_v1, 4 }
 0x91f   : > { %4489 = vst [vmem:[#allocation1 + $0x21] ss:$4 sm:$0xff] %v10713_v4 }
 0x920   : > { %4490 = vst [vmem:[#allocation1 + $0x22] ss:$4 sm:$0xff] %v10714_v30  ;;  %v10722_v30 = vld [vmem:[#allocation121_spill] sm:$0xff] }
 0x921   : > { %4491 = vst [vmem:[#allocation1 + $0x23] ss:$4 sm:$0xff] %v10715_v60 }
 0x922   : > { %v8787_v41 = vld.sshfl [vmem:[#allocation1] sm:$0xff pattern:$0x73625140] }
 0x923   : > { %10723 = vst [vmem:[#allocation121_spill] sm:$0xff] %v8787_v41  ;;  %v3192_v41 = vld [vmem:[#allocation3 + $0x19] sm:$0x3f] }
 0x924   : > { %4659 = vst [vmem:[#allocation1] ss:$4 sm:$0xff] %v3281_v39 }
 0x925   : > { %4660 = vst [vmem:[#allocation1 + $0x1] ss:$4 sm:$0xff] %v10724_v40 }
 0x926   : > { %4661 = vst [vmem:[#allocation1 + $0x2] ss:$4 sm:$0xff] %v10725_v16  ;;  %v10731_v16 = vld [vmem:[#allocation64_spill] sm:$0xff] }
 0x927   : > { %4662 = vst [vmem:[#allocation1 + $0x3] ss:$4 sm:$0xff] %v10726_v23  ;;  %v10729_v23 = vld [vmem:[#allocation62_spill] sm:$0xff] }
 0x928   : > { %v8778_v29 = vld.sshfl [vmem:[#allocation1 + $0x20] sm:$0xff pattern:$0x73625140] }
 0x929   : > { %10718 = vst [vmem:[#allocation112_spill] sm:$0xff] %v8778_v29  ;;  %v10403_v29 = vrot.slane %v8586_v53, 2 }
 0x92a   : > { %4498 = vst [vmem:[#allocation1 + $0x20] ss:$4 sm:$0xff] %v10719_v48  ;;  %v10404_v48 = vrot.slane %v8586_v53, 4 }
 0x92b   : > { %4499 = vst [vmem:[#allocation1 + $0x21] ss:$4 sm:$0xff] %v10720_v20 }
 0x92c   : > { %4500 = vst [vmem:[#allocation1 + $0x22] ss:$4 sm:$0xff] %v10721_v0  ;;  %v10405_v0 = vrot.slane %v8586_v53, 6 }
 0x92d   : > { %4501 = vst [vmem:[#allocation1 + $0x23] ss:$4 sm:$0xff] %v10722_v30 }
 0x92e   : > { %v8804_v39 = vld.sshfl [vmem:[#allocation1] sm:$0xff pattern:$0x73625140] }
 0x92f   : > { %10728 = vst [vmem:[#allocation211_spill] sm:$0xff] %v8804_v39  ;;  %v10735_v39 = vld [vmem:[#allocation65_spill] sm:$0xff] }
 0x930   : > { %4669 = vst [vmem:[#allocation1] ss:$4 sm:$0xff] %v7976_v34  ;;  %v3214_v34 = vld [vmem:[#allocation3 + $0xc9] sm:$0x3f] }
 0x931   : > { %4670 = vst [vmem:[#allocation1 + $0x1] ss:$4 sm:$0xff] %v10729_v23  ;;  %v8817_v23 = vld [vmem:[#allocation3 + $0xa9] sm:$0x3f] }
 0x932   : > { %4672 = vst [vmem:[#allocation1 + $0x3] ss:$4 sm:$0xff] %v10731_v16  ;;  %v3255_v16 = vrot.slane %v8734_v26, 2 }
 0x934   : > { %v8794_v20 = vld.sshfl [vmem:[#allocation1 + $0x20] sm:$0xff pattern:$0x73625140] }
 0x935   : > { %10727 = vst [vmem:[#allocation210_spill] sm:$0xff] %v8794_v20  ;;  %v10730_v20 = vld [vmem:[#allocation63_spill] sm:$0xff] }
 0x936   : > { %4508 = vst [vmem:[#allocation1 + $0x20] ss:$4 sm:$0xff] %v10403_v29  ;;  %v3250_v29 = vrot.slane %v3192_v41, 2 }
 0x937   : > { %4509 = vst [vmem:[#allocation1 + $0x21] ss:$4 sm:$0xff] %v10404_v48  ;;  %v3251_v48 = vrot.slane %v3192_v41, 4 }
 0x938   : > { %4510 = vst [vmem:[#allocation1 + $0x22] ss:$4 sm:$0xff] %v10405_v0  ;;  %v10733_v0 = vld [vmem:[#allocation46_spill] sm:$0xff] }
 0x939   : > { %4511 = vst [vmem:[#allocation1 + $0x23] ss:$4 sm:$0xff] %v8601_v19 }
 0x93a   : > { %4671 = vst [vmem:[#allocation1 + $0x2] ss:$4 sm:$0xff] %v10730_v20  ;;  %v10736_v20 = vld [vmem:[#allocation66_spill] sm:$0xff] }
 0x940   : > { %v8810_v40 = vld.sshfl [vmem:[#allocation1 + $0x20] sm:$0xff pattern:$0x73625140] }
 0x941   : > { %10732 = vst [vmem:[#allocation212_spill] sm:$0xff] %v8810_v40  ;;  %v8813_v19 = vld.sshfl [vmem:[#allocation1] sm:$0xff pattern:$0x73625140]  ;;  %v8827_v40 = vld [vmem:[#allocation3 + $0xb9] sm:$0x3f] }
 0x942   : > { %4600 = vst [vmem:[#allocation1 + $0x20] ss:$4 sm:$0xff] %v3192_v41  ;;  %v3256_v41 = vrot.slane %v8734_v26, 4  ;;  %v3261_v26 = vrot.slane %v8741_v13, 4  ;;  %v10748_v13 = vld [vmem:[#allocation51_spill] sm:$0xff] }
 0x943   : > { %4602 = vst [vmem:[#allocation1 + $0x21] ss:$4 sm:$0xff] %v3250_v29 }
 0x944   : > { %4604 = vst [vmem:[#allocation1 + $0x22] ss:$4 sm:$0xff] %v3251_v48  ;;  %v10738_v48 = vld [vmem:[#allocation49_spill] sm:$0xff] }
 0x945   : > { %4606 = vst [vmem:[#allocation1 + $0x23] ss:$4 sm:$0xff] %v10733_v0 }
 0x946   : > { %10734 = vst [vmem:[#allocation46_spill] sm:$0xff] %v8813_v19  ;;  %v10739_v19 = vld [vmem:[#allocation139_spill] sm:$0xff] }
 0x947   : > { %4679 = vst [vmem:[#allocation1] ss:$4 sm:$0xff] %v8422_v8  ;;  %v10741_v8 = vld [vmem:[#allocation70_spill] sm:$0xff] }
 0x948   : > { %4680 = vst [vmem:[#allocation1 + $0x1] ss:$4 sm:$0xff] %v10735_v39 }
 0x949   : > { %4681 = vst [vmem:[#allocation1 + $0x2] ss:$4 sm:$0xff] %v10736_v20  ;;  %v3300_v20 = vrot.slane %v8827_v40, 2 }
 0x94a   : > { %4682 = vst [vmem:[#allocation1 + $0x3] ss:$4 sm:$0xff] %v8817_v23 }
 0x94c   : > { %v8823_v29 = vld.sshfl [vmem:[#allocation1 + $0x20] sm:$0xff pattern:$0x73625140] }
 0x94d   : > { %10737 = vst [vmem:[#allocation213_spill] sm:$0xff] %v8823_v29  ;;  %v10744_v29 = vld [vmem:[#allocation145_spill] sm:$0xff] }
 0x94e   : > { %4613 = vst [vmem:[#allocation1 + $0x20] ss:$4 sm:$0xff] %v3255_v16 }
 0x94f   : > { %4614 = vst [vmem:[#allocation1 + $0x21] ss:$4 sm:$0xff] %v3256_v41  ;;  %v10743_v41 = vld [vmem:[#allocation144_spill] sm:$0xff] }
 0x950   : > { %4615 = vst [vmem:[#allocation1 + $0x22] ss:$4 sm:$0xff] %v10738_v48  ;;  %v3305_v48 = vrot.slane %v3214_v34, 2 }
 0x951   : > { %4616 = vst [vmem:[#allocation1 + $0x23] ss:$4 sm:$0xff] %v10739_v19  ;;  %v8829_v39 = vld.sshfl [vmem:[#allocation1] sm:$0xff pattern:$0x73625140] }
 0x952   : > { %10740 = vst [vmem:[#allocation139_spill] sm:$0xff] %v8829_v39  ;;  %v10745_v39 = vld [vmem:[#allocation146_spill] sm:$0xff] }
 0x953   : > { %4689 = vst [vmem:[#allocation1] ss:$4 sm:$0xff] %v8439_v50 }
 0x954   : > { %4690 = vst [vmem:[#allocation1 + $0x1] ss:$4 sm:$0xff] %v10741_v8  ;;  %v3306_v8 = vrot.slane %v3214_v34, 4 }
 0x955   : > { %4691 = vst [vmem:[#allocation1 + $0x2] ss:$4 sm:$0xff] %v8827_v40 }
 0x956   : > { %4692 = vst [vmem:[#allocation1 + $0x3] ss:$4 sm:$0xff] %v3300_v20 }
 0x958   : > { %v8836_v16 = vld.sshfl [vmem:[#allocation1 + $0x20] sm:$0xff pattern:$0x73625140] }
 0x959   : > { %10742 = vst [vmem:[#allocation214_spill] sm:$0xff] %v8836_v16  ;;  %v3216_v16 = vld [vmem:[#allocation3 + $0xd9] sm:$0x3f] }
 0x95a   : > { %4623 = vst [vmem:[#allocation1 + $0x20] ss:$4 sm:$0xff] %v3261_v26  ;;  %v10749_v26 = vld [vmem:[#allocation150_spill] sm:$0xff]  ;;  %v3311_v53 = vrot.slane %v3216_v16, 4 }
 0x95b   : > { %4624 = vst [vmem:[#allocation1 + $0x21] ss:$4 sm:$0xff] %v10743_v41  ;;  %v3310_v41 = vrot.slane %v3216_v16, 2 }
 0x95c   : > { %4625 = vst [vmem:[#allocation1 + $0x22] ss:$4 sm:$0xff] %v10744_v29  ;;  %v10750_v29 = vld [vmem:[#allocation152_spill] sm:$0xff] }
 0x95d   : > { %4626 = vst [vmem:[#allocation1 + $0x23] ss:$4 sm:$0xff] %v10745_v39  ;;  %v8841_v50 = vld.sshfl [vmem:[#allocation1] sm:$0xff pattern:$0x73625140] }
 0x95e   : > { %10746 = vst [vmem:[#allocation146_spill] sm:$0xff] %v8841_v50 }
 0x95f   : > { %4699 = vst [vmem:[#allocation1] ss:$4 sm:$0xff] %v8467_v43  ;;  %v10755_v43 = vld [vmem:[#allocation154_spill] sm:$0xff] }
 0x960   : > { %4700 = vst [vmem:[#allocation1 + $0x1] ss:$4 sm:$0xff] %v3214_v34  ;;  %v8852_v34 = vld [vmem:[#allocation3 + $0xe1] sm:$0xff] }
 0x961   : > { %4701 = vst [vmem:[#allocation1 + $0x2] ss:$4 sm:$0xff] %v3305_v48  ;;  %v10754_v48 = vld [vmem:[#allocation53_spill] sm:$0xff] }
 0x962   : > { %4702 = vst [vmem:[#allocation1 + $0x3] ss:$4 sm:$0xff] %v3306_v8 }
 0x963   : > { %10752 = vst [vmem:[#allocation150_spill] sm:$0xff] %v8852_v34 }
 0x964   : > { %v8844_v20 = vld.sshfl [vmem:[#allocation1 + $0x20] sm:$0xff pattern:$0x73625140] }
 0x965   : > { %10747 = vst [vmem:[#allocation215_spill] sm:$0xff] %v8844_v20  ;;  %v8858_v20 = vld [vmem:[#allocation3 + $0xe9] sm:$0x3f] }
 0x966   : > { %4633 = vst [vmem:[#allocation1 + $0x20] ss:$4 sm:$0xff] %v10748_v13 }
 0x967   : > { %4634 = vst [vmem:[#allocation1 + $0x21] ss:$4 sm:$0xff] %v10749_v26 }
 0x968   : > { %4635 = vst [vmem:[#allocation1 + $0x22] ss:$4 sm:$0xff] %v8345_v52  ;;  %v10756_v52 = vld [vmem:[#allocation155_spill] sm:$0xff] }
 0x969   : > { %4636 = vst [vmem:[#allocation1 + $0x23] ss:$4 sm:$0xff] %v10750_v29  ;;  %v8850_v50 = vld.sshfl [vmem:[#allocation1] sm:$0xff pattern:$0x73625140] }
 0x96a   : > { %10751 = vst [vmem:[#allocation51_spill] sm:$0xff] %v8850_v50 }
 0x96b   : > { %4709 = vst [vmem:[#allocation1] ss:$4 sm:$0xff] %v3216_v16  ;;  %v3315_v16 = vrot.slane %v8858_v20, 2 }
 0x96c   : > { %4710 = vst [vmem:[#allocation1 + $0x1] ss:$4 sm:$0xff] %v3310_v41  ;;  %v3316_v41 = vrot.slane %v8858_v20, 4 }
 0x96d   : > { %4711 = vst [vmem:[#allocation1 + $0x2] ss:$4 sm:$0xff] %v3311_v53 }
 0x96e   : > { %4712 = vst [vmem:[#allocation1 + $0x3] ss:$4 sm:$0xff] %v8852_v34 }
 0x970   : > { %v8855_v8 = vld.sshfl [vmem:[#allocation1 + $0x20] sm:$0xff pattern:$0x73625140] }
 0x971   : > { %10753 = vst [vmem:[#allocation152_spill] sm:$0xff] %v8855_v8  ;;  %v10759_v8 = vld [vmem:[#allocation56_spill] sm:$0xff] }
 0x972   : > { %4643 = vst [vmem:[#allocation1 + $0x20] ss:$4 sm:$0xff] %v10754_v48  ;;  %v3280_v48 = vrot.slane %v8781_v1, 2 }
 0x973   : > { %4644 = vst [vmem:[#allocation1 + $0x21] ss:$4 sm:$0xff] %v10755_v43 }
 0x974   : > { %4645 = vst [vmem:[#allocation1 + $0x22] ss:$4 sm:$0xff] %v10756_v52  ;;  %v10761_v52 = vrot.slane %v8095_v38, 2 }
 0x975   : > { %4646 = vst [vmem:[#allocation1 + $0x23] ss:$4 sm:$0xff] %v8767_v55  ;;  %v8865_v50 = vld.sshfl [vmem:[#allocation1] sm:$0xff pattern:$0x73625140] }
 0x976   : > { %10757 = vst [vmem:[#allocation216_spill] sm:$0xff] %v8865_v50  ;;  %v3206_v50 = vld [vmem:[#allocation3 + $0x89] sm:$0x3f] }
 0x977   : > { %4719 = vst [vmem:[#allocation1] ss:$4 sm:$0xff] %v3315_v16  ;;  %v10762_v16 = vrot.slane %v8095_v38, 4 }
 0x978   : > { %4720 = vst [vmem:[#allocation1 + $0x1] ss:$4 sm:$0xff] %v3316_v41  ;;  %v10763_v41 = vrot.slane %v8095_v38, 6 }
 0x97c   : > { %v8867_v53 = vld.sshfl [vmem:[#allocation1 + $0x20] sm:$0xff pattern:$0x73625140] }
 0x97d   : > { %10758 = vst [vmem:[#allocation217_spill] sm:$0xff] %v8867_v53 }
 0x97e   : > { %4653 = vst [vmem:[#allocation1 + $0x20] ss:$4 sm:$0xff] %v10759_v8  ;;  %v10765_v8 = vld [vmem:[#allocation60_spill] sm:$0xff] }
 0x97f   : > { %4654 = vst [vmem:[#allocation1 + $0x21] ss:$4 sm:$0xff] %v8390_v56  ;;  %v8873_v55 = vld.sshfl [vmem:[#allocation1] sm:$0xff pattern:$0x73625140]  ;;  %v3285_v56 = vrot.slane %v3206_v50, 2 }
 0x980   : > { %4655 = vst [vmem:[#allocation1 + $0x22] ss:$4 sm:$0xff] %v8781_v1  ;;  %v3286_v1 = vrot.slane %v3206_v50, 4 }
 0x981   : > { %4656 = vst [vmem:[#allocation1 + $0x23] ss:$4 sm:$0xff] %v3280_v48 }
 0x982   : > { %10760 = vst [vmem:[#allocation218_spill] sm:$0xff] %v8873_v55  ;;  %v10766_v55 = vld [vmem:[#allocation85_spill] sm:$0xff] }
 0x983   : > { %4747 = vst [vmem:[#allocation1] ss:$4 sm:$0xff] %v8095_v38  ;;  %v10768_v38 = vld [vmem:[#allocation93_spill] sm:$0xff] }
 0x984   : > { %4749 = vst [vmem:[#allocation1 + $0x1] ss:$4 sm:$0xff] %v10761_v52  ;;  %v10767_v52 = vld [vmem:[#allocation92_spill] sm:$0xff] }
 0x985   : > { %4751 = vst [vmem:[#allocation1 + $0x2] ss:$4 sm:$0xff] %v10762_v16  ;;  %v8888_v16 = vld [vmem:[#allocation3 + $0x2a] sm:$0x3f] }
 0x986   : > { %4753 = vst [vmem:[#allocation1 + $0x3] ss:$4 sm:$0xff] %v10763_v41  ;;  %v3208_v41 = vld [vmem:[#allocation3 + $0x99] sm:$0x3f] }
 0x988   : > { %v8882_v53 = vld.sshfl [vmem:[#allocation1 + $0x20] sm:$0xff pattern:$0x73625140] }
 0x989   : > { %10764 = vst [vmem:[#allocation219_spill] sm:$0xff] %v8882_v53  ;;  %v3290_v53 = vrot.slane %v3208_v41, 2 }
 0x98a   : > { %4663 = vst [vmem:[#allocation1 + $0x20] ss:$4 sm:$0xff] %v10765_v8 }
 0x98b   : > { %4664 = vst [vmem:[#allocation1 + $0x21] ss:$4 sm:$0xff] %v3206_v50 }
 0x98c   : > { %4665 = vst [vmem:[#allocation1 + $0x22] ss:$4 sm:$0xff] %v3285_v56  ;;  %v3291_v56 = vrot.slane %v3208_v41, 4 }
 0x98d   : > { %4666 = vst [vmem:[#allocation1 + $0x23] ss:$4 sm:$0xff] %v3286_v1  ;;  %v4762_v48 = vld.sshfl [vmem:[#allocation1] sm:$0xff pattern:$0x73625140] }
 0x98e   : > { %v6258_v43 = vpack.i.bf16 %v4762_v48, %v10766_v55  ;;  %4764 = vst [vmem:[#allocation1] ss:$4 sm:$0xff] %v8528_v42  ;;  %v8895_v55 = vld [vmem:[#allocation3 + $0x3a] sm:$0x3f]  ;;  %v10770_v48 = vld [vmem:[#allocation97_spill] sm:$0xff] }
 0x98f   : > { %4765 = vst [vmem:[#allocation1 + $0x1] ss:$4 sm:$0xff] %v10767_v52 }
 0x990   : > { %6259 = vrot.lane.b32.xlu0 %v6258_v43, %s6628_s11  ;;  %4766 = vst [vmem:[#allocation1 + $0x2] ss:$4 sm:$0xff] %v10768_v38  ;;  %v3386_v43 = vrot.slane %v8895_v55, 2 }
 0x991   : > { %4767 = vst [vmem:[#allocation1 + $0x3] ss:$4 sm:$0xff] %v8888_v16 }
 0x994   : > { %v8893_v50 = vld.sshfl [vmem:[#allocation1 + $0x20] sm:$0xff pattern:$0x73625140] }
 0x995   : > { %10769 = vst [vmem:[#allocation60_spill] sm:$0xff] %v8893_v50  ;;  %v3295_v50 = vrot.slane %v8817_v23, 2 }
 0x996   : > { %4673 = vst [vmem:[#allocation1 + $0x20] ss:$4 sm:$0xff] %v3208_v41 }
 0x997   : > { %4674 = vst [vmem:[#allocation1 + $0x21] ss:$4 sm:$0xff] %v3290_v53  ;;  %v3296_v53 = vrot.slane %v8817_v23, 4  ;;  %v3301_v23 = vrot.slane %v8827_v40, 4  ;;  %v8922_v40 = vld [vmem:[#allocation3 + $0x6a] sm:$0x3f] }
 0x998   : > { %4675 = vst [vmem:[#allocation1 + $0x22] ss:$4 sm:$0xff] %v3291_v56  ;;  %v8898_v1 = vld.sshfl [vmem:[#allocation1] sm:$0xff pattern:$0x73625140] }
 0x999   : > { %4676 = vst [vmem:[#allocation1 + $0x23] ss:$4 sm:$0xff] %v7995_v36  ;;  %v3324_v56 = vld [vmem:[#allocation3 + $0x4a] sm:$0x3f] }
 0x99a   : > { %4774 = vst [vmem:[#allocation1] ss:$4 sm:$0xff] %v8550_v9  ;;  %v3391_v38 = vrot.slane %v3324_v56, 2 }
 0x99b   : > { %4775 = vst [vmem:[#allocation1 + $0x1] ss:$4 sm:$0xff] %v10770_v48  ;;  %v3392_v48 = vrot.slane %v3324_v56, 4 }
 0x99c   : > { %4776 = vst [vmem:[#allocation1 + $0x2] ss:$4 sm:$0xff] %v8895_v55 }
 0x99d   : > { %4777 = vst [vmem:[#allocation1 + $0x3] ss:$4 sm:$0xff] %v3386_v43 }
 0x9a0   : > { %v8906_v41 = vld.sshfl [vmem:[#allocation1 + $0x20] sm:$0xff pattern:$0x73625140] }
 0x9a1   : > { %10771 = vst [vmem:[#allocation85_spill] sm:$0xff] %v8906_v41 }
 0x9a2   : > { %4683 = vst [vmem:[#allocation1 + $0x20] ss:$4 sm:$0xff] %v3295_v50  ;;  %v3326_v50 = vld [vmem:[#allocation3 + $0x5a] sm:$0x3f] }
 0x9a3   : > { %4684 = vst [vmem:[#allocation1 + $0x21] ss:$4 sm:$0xff] %v3296_v53  ;;  %v3396_v53 = vrot.slane %v3326_v50, 2 }
 0x9a4   : > { %4685 = vst [vmem:[#allocation1 + $0x22] ss:$4 sm:$0xff] %v8020_v22  ;;  %v8910_v9 = vld.sshfl [vmem:[#allocation1] sm:$0xff pattern:$0x73625140] }
 0x9a5   : > { %4686 = vst [vmem:[#allocation1 + $0x23] ss:$4 sm:$0xff] %v8435_v3 }
 0x9a6   : > { %4784 = vst [vmem:[#allocation1] ss:$4 sm:$0xff] %v8574_v27  ;;  %v3397_v27 = vrot.slane %v3326_v50, 4 }
 0x9a7   : > { %4785 = vst [vmem:[#allocation1 + $0x1] ss:$4 sm:$0xff] %v3324_v56  ;;  %v3402_v56 = vrot.slane %v8922_v40, 4 }
 0x9a8   : > { %4786 = vst [vmem:[#allocation1 + $0x2] ss:$4 sm:$0xff] %v3391_v38 }
 0x9a9   : > { %4787 = vst [vmem:[#allocation1 + $0x3] ss:$4 sm:$0xff] %v3392_v48  ;;  %v3401_v48 = vrot.slane %v8922_v40, 2 }
 0x9ac   : > { %v8914_v43 = vld.sshfl [vmem:[#allocation1 + $0x20] sm:$0xff pattern:$0x73625140] }
 0x9ad   : > { %10772 = vst [vmem:[#allocation92_spill] sm:$0xff] %v8914_v43 }
 0x9ae   : > { %4693 = vst [vmem:[#allocation1 + $0x20] ss:$4 sm:$0xff] %v3301_v23 }
 0x9af   : > { %4694 = vst [vmem:[#allocation1 + $0x21] ss:$4 sm:$0xff] %v8452_v51 }
 0x9b0   : > { %4695 = vst [vmem:[#allocation1 + $0x22] ss:$4 sm:$0xff] %v8457_v6  ;;  %v8919_v41 = vld.sshfl [vmem:[#allocation1] sm:$0xff pattern:$0x73625140] }
 0x9b1   : > { %4696 = vst [vmem:[#allocation1 + $0x23] ss:$4 sm:$0xff] %v8463_v33 }
 0x9b2   : > { %4794 = vst [vmem:[#allocation1] ss:$4 sm:$0xff] %v3326_v50  ;;  %v10419_v50 = vrot.slane %v8852_v34, 2 }
 0x9b3   : > { %4795 = vst [vmem:[#allocation1 + $0x1] ss:$4 sm:$0xff] %v3396_v53  ;;  %v10421_v53 = vrot.slane %v8852_v34, 4 }
 0x9b4   : > { %4796 = vst [vmem:[#allocation1 + $0x2] ss:$4 sm:$0xff] %v3397_v27  ;;  %v10774_v27 = vld [vmem:[#allocation116_spill] sm:$0xff] }
 0x9b5   : > { %4797 = vst [vmem:[#allocation1 + $0x3] ss:$4 sm:$0xff] %v10643_v37  ;;  %v10422_v37 = vrot.slane %v8852_v34, 6 }
 0x9b8   : > { %v8924_v38 = vld.sshfl [vmem:[#allocation1 + $0x20] sm:$0xff pattern:$0x73625140] }
 0x9b9   : > { %10773 = vst [vmem:[#allocation220_spill] sm:$0xff] %v8924_v38  ;;  %v8938_v38 = vld [vmem:[#allocation3 + $0x7a] sm:$0x3f] }
 0x9ba   : > { %4703 = vst [vmem:[#allocation1 + $0x20] ss:$4 sm:$0xff] %v8046_v28 }
 0x9bb   : > { %4704 = vst [vmem:[#allocation1 + $0x21] ss:$4 sm:$0xff] %v8482_v32 }
 0x9bc   : > { %4705 = vst [vmem:[#allocation1 + $0x22] ss:$4 sm:$0xff] %v8486_v44  ;;  %v8932_v23 = vld.sshfl [vmem:[#allocation1] sm:$0xff pattern:$0x73625140]  ;;  %v10778_v44 = vld [vmem:[#allocation125_spill] sm:$0xff] }
 0x9bd   : > { %4706 = vst [vmem:[#allocation1 + $0x23] ss:$4 sm:$0xff] %v8492_v12 }
 0x9be   : > { %4804 = vst [vmem:[#allocation1] ss:$4 sm:$0xff] %v3401_v48  ;;  %v3407_v48 = vrot.slane %v8938_v38, 4 }
 0x9bf   : > { %4805 = vst [vmem:[#allocation1 + $0x1] ss:$4 sm:$0xff] %v3402_v56 }
 0x9c0   : > { %4806 = vst [vmem:[#allocation1 + $0x2] ss:$4 sm:$0xff] %v10648_v24  ;;  %v3318_v24 = vld [vmem:[#allocation3 + $0x1a] sm:$0x3f] }
 0x9c1   : > { %4807 = vst [vmem:[#allocation1 + $0x3] ss:$4 sm:$0xff] %v10774_v27  ;;  %v10776_v27 = vld [vmem:[#allocation122_spill] sm:$0xff] }
 0x9c4   : > { %v8940_v43 = vld.sshfl [vmem:[#allocation1 + $0x20] sm:$0xff pattern:$0x73625140] }
 0x9c5   : > { %10775 = vst [vmem:[#allocation221_spill] sm:$0xff] %v8940_v43  ;;  %v10777_v43 = vld [vmem:[#allocation123_spill] sm:$0xff] }
 0x9c6   : > { %4713 = vst [vmem:[#allocation1 + $0x20] ss:$4 sm:$0xff] %v10419_v50  ;;  %v3376_v50 = vrot.slane %v3318_v24, 2 }
 0x9c7   : > { %4714 = vst [vmem:[#allocation1 + $0x21] ss:$4 sm:$0xff] %v10421_v53  ;;  %v3377_v53 = vrot.slane %v3318_v24, 4 }
 0x9c8   : > { %4715 = vst [vmem:[#allocation1 + $0x22] ss:$4 sm:$0xff] %v10422_v37  ;;  %v8951_v56 = vld.sshfl [vmem:[#allocation1] sm:$0xff pattern:$0x73625140]  ;;  %v10781_v37 = vld [vmem:[#allocation130_spill] sm:$0xff] }
 0x9c9   : > { %4716 = vst [vmem:[#allocation1 + $0x23] ss:$4 sm:$0xff] %v8858_v20 }
 0x9ca   : > { %4814 = vst [vmem:[#allocation1] ss:$4 sm:$0xff] %v3407_v48  ;;  %v10780_v48 = vld [vmem:[#allocation129_spill] sm:$0xff] }
 0x9cb   : > { %4815 = vst [vmem:[#allocation1 + $0x1] ss:$4 sm:$0xff] %v10776_v27 }
 0x9cc   : > { %4816 = vst [vmem:[#allocation1 + $0x2] ss:$4 sm:$0xff] %v10777_v43  ;;  %v10782_v43 = vld [vmem:[#allocation132_spill] sm:$0xff] }
 0x9cd   : > { %4817 = vst [vmem:[#allocation1 + $0x3] ss:$4 sm:$0xff] %v10778_v44  ;;  %v3381_v44 = vrot.slane %v8888_v16, 2 }
 0x9d0   : > { %v8956_v32 = vld.sshfl [vmem:[#allocation1 + $0x20] sm:$0xff pattern:$0x73625140] }
 0x9d1   : > { %10779 = vst [vmem:[#allocation222_spill] sm:$0xff] %v8956_v32  ;;  %v3382_v32 = vrot.slane %v8888_v16, 4  ;;  %v3387_v16 = vrot.slane %v8895_v55, 4 }
 0x9d2   : > { %4755 = vst [vmem:[#allocation1 + $0x20] ss:$4 sm:$0xff] %v3318_v24 }
 0x9d3   : > { %4757 = vst [vmem:[#allocation1 + $0x21] ss:$4 sm:$0xff] %v3376_v50  ;;  %v10783_v50 = vld [vmem:[#allocation136_spill] sm:$0xff] }
 0x9d4   : > { %4759 = vst [vmem:[#allocation1 + $0x22] ss:$4 sm:$0xff] %v3377_v53  ;;  %v8959_v20 = vld.sshfl [vmem:[#allocation1] sm:$0xff pattern:$0x73625140] }
 0x9d5   : > { %4761 = vst [vmem:[#allocation1 + $0x23] ss:$4 sm:$0xff] %v8120_v31  ;;  %v8975_v53 = vld [vmem:[#allocation3 + $0xaa] sm:$0x3f] }
 0x9d6   : > { %4824 = vst [vmem:[#allocation1] ss:$4 sm:$0xff] %v8254_v7 }
 0x9d7   : > { %4825 = vst [vmem:[#allocation1 + $0x1] ss:$4 sm:$0xff] %v10780_v48  ;;  %v3342_v48 = vld [vmem:[#allocation3 + $0xda] sm:$0x3f] }
 0x9d8   : > { %4826 = vst [vmem:[#allocation1 + $0x2] ss:$4 sm:$0xff] %v10781_v37  ;;  %v3437_v7 = vrot.slane %v3342_v48, 4 }
 0x9d9   : > { %4827 = vst [vmem:[#allocation1 + $0x3] ss:$4 sm:$0xff] %v10782_v43  ;;  %v10784_v43 = vld [vmem:[#allocation137_spill] sm:$0xff] }
 0x9dc   : > { %v8967_v27 = vld.sshfl [vmem:[#allocation1 + $0x20] sm:$0xff pattern:$0x73625140] }
 0x9dd   : > { %4768 = vst [vmem:[#allocation1 + $0x20] ss:$4 sm:$0xff] %v3381_v44 }
 0x9de   : > { %4769 = vst [vmem:[#allocation1 + $0x21] ss:$4 sm:$0xff] %v3382_v32  ;;  %v8983_v32 = vld [vmem:[#allocation3 + $0xba] sm:$0x3f] }
 0x9df   : > { %4770 = vst [vmem:[#allocation1 + $0x22] ss:$4 sm:$0xff] %v10625_v14 }
 0x9e0   : > { %4771 = vst [vmem:[#allocation1 + $0x23] ss:$4 sm:$0xff] %v8545_v49  ;;  %v8971_v24 = vld.sshfl [vmem:[#allocation1] sm:$0xff pattern:$0x73625140] }
 0x9e1   : > { %4834 = vst [vmem:[#allocation1] ss:$4 sm:$0xff] %v8640_v57  ;;  %v10786_v57 = vld [vmem:[#allocation142_spill] sm:$0xff] }
 0x9e2   : > { %4835 = vst [vmem:[#allocation1 + $0x1] ss:$4 sm:$0xff] %v10783_v50 }
 0x9e3   : > { %4836 = vst [vmem:[#allocation1 + $0x2] ss:$4 sm:$0xff] %v10784_v43  ;;  %v3426_v43 = vrot.slane %v8983_v32, 2 }
 0x9e4   : > { %4837 = vst [vmem:[#allocation1 + $0x3] ss:$4 sm:$0xff] %v8975_v53 }
 0x9e7   : > { %v8980_v44 = vld.sshfl [vmem:[#allocation1 + $0x20] sm:$0xff pattern:$0x73625140] }
 0x9e8   : > { %4778 = vst [vmem:[#allocation1 + $0x20] ss:$4 sm:$0xff] %v3387_v16  ;;  %v3340_v16 = vld [vmem:[#allocation3 + $0xca] sm:$0x3f] }
 0x9e9   : > { %4779 = vst [vmem:[#allocation1 + $0x21] ss:$4 sm:$0xff] %v8558_v15 }
 0x9ea   : > { %4780 = vst [vmem:[#allocation1 + $0x22] ss:$4 sm:$0xff] %v8564_v21 }
 0x9eb   : > { %4781 = vst [vmem:[#allocation1 + $0x23] ss:$4 sm:$0xff] %v8570_v11  ;;  %v8987_v50 = vld.sshfl [vmem:[#allocation1] sm:$0xff pattern:$0x73625140] }
 0x9ec   : > { %10785 = vst [vmem:[#allocation223_spill] sm:$0xff] %v8987_v50 }
 0x9ed   : > { %4844 = vst [vmem:[#allocation1] ss:$4 sm:$0xff] %v8651_v45  ;;  %v3431_v45 = vrot.slane %v3340_v16, 2 }
 0x9ee   : > { %4845 = vst [vmem:[#allocation1 + $0x1] ss:$4 sm:$0xff] %v10786_v57  ;;  %v3432_v57 = vrot.slane %v3340_v16, 4 }
 0x9ef   : > { %4846 = vst [vmem:[#allocation1 + $0x2] ss:$4 sm:$0xff] %v8983_v32 }
 0x9f0   : > { %4847 = vst [vmem:[#allocation1 + $0x3] ss:$4 sm:$0xff] %v3426_v43 }
 0x9f2   : > { %v8993_v55 = vld.sshfl [vmem:[#allocation1 + $0x20] sm:$0xff pattern:$0x73625140] }
 0x9f3   : > { %4788 = vst [vmem:[#allocation1 + $0x20] ss:$4 sm:$0xff] %v8159_v35  ;;  %v10788_v35 = vld [vmem:[#allocation108_spill] sm:$0xff] }
 0x9f4   : > { %4789 = vst [vmem:[#allocation1 + $0x21] ss:$4 sm:$0xff] %v8584_v5 }
 0x9f5   : > { %4790 = vst [vmem:[#allocation1 + $0x22] ss:$4 sm:$0xff] %v8589_v10  ;;  %v3436_v10 = vrot.slane %v3342_v48, 2 }
 0x9f6   : > { %4791 = vst [vmem:[#allocation1 + $0x23] ss:$4 sm:$0xff] %v8596_v59 }
 0x9f7   : > { %v8999_v37 = vld.sshfl [vmem:[#allocation1] sm:$0xff pattern:$0x73625140] }
 0x9f8   : > { %10787 = vst [vmem:[#allocation224_spill] sm:$0xff] %v8999_v37 }
 0x9f9   : > { %4854 = vst [vmem:[#allocation1] ss:$4 sm:$0xff] %v8668_v25  ;;  %v10791_v25 = vld [vmem:[#allocation117_spill] sm:$0xff] }
 0x9fa   : > { %4855 = vst [vmem:[#allocation1 + $0x1] ss:$4 sm:$0xff] %v3340_v16  ;;  %v9010_v16 = vld [vmem:[#allocation3 + $0xe2] sm:$0xff] }
 0x9fb   : > { %4856 = vst [vmem:[#allocation1 + $0x2] ss:$4 sm:$0xff] %v3431_v45 }
 0x9fc   : > { %4857 = vst [vmem:[#allocation1 + $0x3] ss:$4 sm:$0xff] %v3432_v57  ;;  %v9013_v57 = vld [vmem:[#allocation3 + $0xea] sm:$0x3f] }
 0x9fd   : > { %v9002_v43 = vld.sshfl [vmem:[#allocation1 + $0x20] sm:$0xff pattern:$0x73625140]  ;;  %10790 = vst [vmem:[#allocation226_spill] sm:$0xff] %v9010_v16 }
 0x9fe   : > { %4798 = vst [vmem:[#allocation1 + $0x20] ss:$4 sm:$0xff] %v10788_v35 }
 0x9ff   : > { %4799 = vst [vmem:[#allocation1 + $0x21] ss:$4 sm:$0xff] %v8612_v17 }
 0xa00   : > { %4800 = vst [vmem:[#allocation1 + $0x22] ss:$4 sm:$0xff] %v8615_v18  ;;  %v3406_v18 = vrot.slane %v8938_v38, 2 }
 0xa01   : > { %4801 = vst [vmem:[#allocation1 + $0x23] ss:$4 sm:$0xff] %v8922_v40  ;;  %v3441_v40 = vrot.slane %v9013_v57, 2 }
 0xa03   : > { %v9008_v5 = vld.sshfl [vmem:[#allocation1] sm:$0xff pattern:$0x73625140] }
 0xa04   : > { %10789 = vst [vmem:[#allocation225_spill] sm:$0xff] %v9008_v5 }
 0xa05   : > { %4864 = vst [vmem:[#allocation1] ss:$4 sm:$0xff] %v3342_v48  ;;  %v3332_v48 = vld [vmem:[#allocation3 + $0x8a] sm:$0x3f] }
 0xa06   : > { %4865 = vst [vmem:[#allocation1 + $0x1] ss:$4 sm:$0xff] %v3436_v10  ;;  %v3442_v10 = vrot.slane %v9013_v57, 4  ;;  %v3411_v35 = vrot.slane %v3332_v48, 2  ;;  %v3412_v21 = vrot.slane %v3332_v48, 4 }
 0xa07   : > { %4866 = vst [vmem:[#allocation1 + $0x2] ss:$4 sm:$0xff] %v3437_v7 }
 0xa08   : > { %4867 = vst [vmem:[#allocation1 + $0x3] ss:$4 sm:$0xff] %v9010_v16  ;;  %v9015_v45 = vld.sshfl [vmem:[#allocation1 + $0x20] sm:$0xff pattern:$0x73625140] }
 0xa09   : > { %4808 = vst [vmem:[#allocation1 + $0x20] ss:$4 sm:$0xff] %v10791_v25  ;;  %v10793_v25 = vld [vmem:[#allocation126_spill] sm:$0xff] }
 0xa0a   : > { %4809 = vst [vmem:[#allocation1 + $0x21] ss:$4 sm:$0xff] %v8627_v54 }
 0xa0b   : > { %4810 = vst [vmem:[#allocation1 + $0x22] ss:$4 sm:$0xff] %v8938_v38  ;;  %v10795_v38 = vld [vmem:[#allocation69_spill] sm:$0xff] }
 0xa0c   : > { %4811 = vst [vmem:[#allocation1 + $0x23] ss:$4 sm:$0xff] %v3406_v18  ;;  %v10796_v18 = vld [vmem:[#allocation9_spill] sm:$0xff] }
 0xa0f   : > { %v9023_v7 = vld.sshfl [vmem:[#allocation1] sm:$0xff pattern:$0x73625140] }
 0xa10   : > { %10792 = vst [vmem:[#allocation227_spill] sm:$0xff] %v9023_v7 }
 0xa11   : > { %4874 = vst [vmem:[#allocation1] ss:$4 sm:$0xff] %v3441_v40  ;;  %v3334_v40 = vld [vmem:[#allocation3 + $0x9a] sm:$0x3f] }
 0xa12   : > { %4875 = vst [vmem:[#allocation1 + $0x1] ss:$4 sm:$0xff] %v3442_v10  ;;  %v10797_v10 = vld [vmem:[#allocation10_spill] sm:$0xff]  ;;  %v3416_v7 = vrot.slane %v3334_v40, 2  ;;  %v3417_v14 = vrot.slane %v3334_v40, 4 }
 0xa13   : > { %v9025_v17 = vld.sshfl [vmem:[#allocation1 + $0x20] sm:$0xff pattern:$0x73625140] }
 0xa14   : > { %4818 = vst [vmem:[#allocation1 + $0x20] ss:$4 sm:$0xff] %v10793_v25  ;;  %v10806_v25 = vld [vmem:[#allocation194_spill] sm:$0xff] }
 0xa15   : > { %4819 = vst [vmem:[#allocation1 + $0x21] ss:$4 sm:$0xff] %v3332_v48  ;;  %v3421_v48 = vrot.slane %v8975_v53, 2 }
 0xa16   : > { %4820 = vst [vmem:[#allocation1 + $0x22] ss:$4 sm:$0xff] %v3411_v35 }
 0xa17   : > { %4821 = vst [vmem:[#allocation1 + $0x23] ss:$4 sm:$0xff] %v3412_v21  ;;  %v9041_v21 = vld [vmem:[#allocation3 + $0x38] sm:$0x3f] }
 0xa19   : > { %v9028_v54 = vld.sshfl [vmem:[#allocation1] sm:$0xff pattern:$0x73625140] }
 0xa1a   : > { %10794 = vst [vmem:[#allocation228_spill] sm:$0xff] %v9028_v54  ;;  %v10807_v54 = vld [vmem:[#allocation84_spill] sm:$0xff] }
 0xa1b   : > { %4952 = vst [vmem:[#allocation1] ss:$4 sm:$0xff] %v10670_v46  ;;  %v10798_v46 = vld [vmem:[#allocation13_spill] sm:$0xff] }
 0xa1c   : > { %4954 = vst [vmem:[#allocation1 + $0x1] ss:$4 sm:$0xff] %v10795_v38  ;;  %v3422_v38 = vrot.slane %v8975_v53, 4  ;;  %v3427_v53 = vrot.slane %v8983_v32, 4 }
 0xa1d   : > { %4956 = vst [vmem:[#allocation1 + $0x2] ss:$4 sm:$0xff] %v10796_v18  ;;  %v10801_v18 = vld [vmem:[#allocation78_spill] sm:$0xff] }
 0xa1e   : > { %4958 = vst [vmem:[#allocation1 + $0x3] ss:$4 sm:$0xff] %v10797_v10  ;;  %v9034_v15 = vld.sshfl [vmem:[#allocation1 + $0x20] sm:$0xff pattern:$0x73625140]  ;;  %v10802_v10 = vld [vmem:[#allocation79_spill] sm:$0xff] }
 0xa1f   : > { %4828 = vst [vmem:[#allocation1 + $0x20] ss:$4 sm:$0xff] %v3334_v40 }
 0xa20   : > { %4829 = vst [vmem:[#allocation1 + $0x21] ss:$4 sm:$0xff] %v3416_v7 }
 0xa21   : > { %4830 = vst [vmem:[#allocation1 + $0x22] ss:$4 sm:$0xff] %v3417_v14  ;;  %v9049_v14 = vld [vmem:[#allocation3 + $0x48] sm:$0x3f] }
 0xa22   : > { %4831 = vst [vmem:[#allocation1 + $0x23] ss:$4 sm:$0xff] %v8278_v2  ;;  %v3513_v40 = vrot.slane %v9049_v14, 2  ;;  %v10810_v2 = vld [vmem:[#allocation196_spill] sm:$0xff] }
 0xa25   : > { %v9037_v35 = vld.sshfl [vmem:[#allocation1] sm:$0xff pattern:$0x73625140] }
 0xa26   : > { %4969 = vst [vmem:[#allocation1] ss:$4 sm:$0xff] %v10673_v47  ;;  %v10800_v47 = vld [vmem:[#allocation189_spill] sm:$0xff] }
 0xa27   : > { %4970 = vst [vmem:[#allocation1 + $0x1] ss:$4 sm:$0xff] %v8037_v58 }
 0xa28   : > { %4971 = vst [vmem:[#allocation1 + $0x2] ss:$4 sm:$0xff] %v10798_v46 }
 0xa29   : > { %4972 = vst [vmem:[#allocation1 + $0x3] ss:$4 sm:$0xff] %v9041_v21  ;;  %v9047_v7 = vld.sshfl [vmem:[#allocation1 + $0x20] sm:$0xff pattern:$0x73625140] }
 0xa2a   : > { %10799 = vst [vmem:[#allocation69_spill] sm:$0xff] %v9047_v7 }
 0xa2b   : > { %4838 = vst [vmem:[#allocation1 + $0x20] ss:$4 sm:$0xff] %v3421_v48  ;;  %v3451_v48 = vld [vmem:[#allocation3 + $0x58] sm:$0x3f] }
 0xa2c   : > { %4839 = vst [vmem:[#allocation1 + $0x21] ss:$4 sm:$0xff] %v3422_v38  ;;  %v10804_v38 = vld [vmem:[#allocation191_spill] sm:$0xff] }
 0xa2d   : > { %4840 = vst [vmem:[#allocation1 + $0x22] ss:$4 sm:$0xff] %v10656_v61  ;;  %v10805_v61 = vld [vmem:[#allocation192_spill] sm:$0xff] }
 0xa2e   : > { %4841 = vst [vmem:[#allocation1 + $0x23] ss:$4 sm:$0xff] %v10800_v47  ;;  %v3518_v47 = vrot.slane %v3451_v48, 2 }
 0xa30   : > { %v9053_v58 = vld.sshfl [vmem:[#allocation1] sm:$0xff pattern:$0x73625140] }
 0xa31   : > { %4979 = vst [vmem:[#allocation1] ss:$4 sm:$0xff] %v10801_v18 }
 0xa32   : > { %4980 = vst [vmem:[#allocation1 + $0x1] ss:$4 sm:$0xff] %v10802_v10  ;;  %v3519_v10 = vrot.slane %v3451_v48, 4 }
 0xa33   : > { %4981 = vst [vmem:[#allocation1 + $0x2] ss:$4 sm:$0xff] %v9049_v14 }
 0xa34   : > { %4982 = vst [vmem:[#allocation1 + $0x3] ss:$4 sm:$0xff] %v3513_v40  ;;  %v3453_v40 = vld [vmem:[#allocation3 + $0x68] sm:$0x3f] }
 0xa35   : > { %v9060_v46 = vld.sshfl [vmem:[#allocation1 + $0x20] sm:$0xff pattern:$0x73625140]  ;;  %v3524_v37 = vrot.slane %v3453_v40, 4 }
 0xa36   : > { %10803 = vst [vmem:[#allocation9_spill] sm:$0xff] %v9060_v46 }
 0xa37   : > { %4848 = vst [vmem:[#allocation1 + $0x20] ss:$4 sm:$0xff] %v3427_v53  ;;  %v10809_v53 = vld [vmem:[#allocation149_spill] sm:$0xff] }
 0xa38   : > { %4849 = vst [vmem:[#allocation1 + $0x21] ss:$4 sm:$0xff] %v10804_v38  ;;  %v10811_v38 = vld [vmem:[#allocation197_spill] sm:$0xff] }
 0xa39   : > { %4850 = vst [vmem:[#allocation1 + $0x22] ss:$4 sm:$0xff] %v10805_v61  ;;  %v3523_v61 = vrot.slane %v3453_v40, 2 }
 0xa3a   : > { %4851 = vst [vmem:[#allocation1 + $0x23] ss:$4 sm:$0xff] %v10806_v25  ;;  %v10812_v25 = vld [vmem:[#allocation199_spill] sm:$0xff] }
 0xa3b   : > { %v9065_v18 = vld.sshfl [vmem:[#allocation1] sm:$0xff pattern:$0x73625140] }
 0xa3c   : > { %4989 = vst [vmem:[#allocation1] ss:$4 sm:$0xff] %v10807_v54  ;;  %v10813_v54 = vld [vmem:[#allocation20_spill] sm:$0xff] }
 0xa3d   : > { %4990 = vst [vmem:[#allocation1 + $0x1] ss:$4 sm:$0xff] %v3451_v48  ;;  %v10439_v48 = vrot.slane %v9010_v16, 4 }
 0xa3e   : > { %4991 = vst [vmem:[#allocation1 + $0x2] ss:$4 sm:$0xff] %v3518_v47  ;;  %v10438_v47 = vrot.slane %v9010_v16, 2 }
 0xa3f   : > { %4992 = vst [vmem:[#allocation1 + $0x3] ss:$4 sm:$0xff] %v3519_v10 }
 0xa41   : > { %v9068_v32 = vld.sshfl [vmem:[#allocation1 + $0x20] sm:$0xff pattern:$0x73625140] }
 0xa42   : > { %10808 = vst [vmem:[#allocation10_spill] sm:$0xff] %v9068_v32  ;;  %v3509_v32 = vrot.slane %v9041_v21, 4 }
 0xa43   : > { %4858 = vst [vmem:[#allocation1 + $0x20] ss:$4 sm:$0xff] %v10809_v53  ;;  %v10815_v53 = vld [vmem:[#allocation24_spill] sm:$0xff] }
 0xa44   : > { %4859 = vst [vmem:[#allocation1 + $0x21] ss:$4 sm:$0xff] %v10810_v2  ;;  %v9081_v2 = vld [vmem:[#allocation3 + $0x78] sm:$0x3f] }
 0xa45   : > { %4860 = vst [vmem:[#allocation1 + $0x22] ss:$4 sm:$0xff] %v10811_v38  ;;  %v10442_v38 = vrot.slane %v9010_v16, 6  ;;  %v9099_v16 = vld [vmem:[#allocation3 + $0x88] sm:$0x3f] }
 0xa46   : > { %4861 = vst [vmem:[#allocation1 + $0x23] ss:$4 sm:$0xff] %v10812_v25  ;;  %v9074_v5 = vld.sshfl [vmem:[#allocation1] sm:$0xff pattern:$0x73625140] }
 0xa47   : > { %4999 = vst [vmem:[#allocation1] ss:$4 sm:$0xff] %v3453_v40 }
 0xa48   : > { %5000 = vst [vmem:[#allocation1 + $0x1] ss:$4 sm:$0xff] %v3523_v61  ;;  %v3529_v61 = vrot.slane %v9081_v2, 4 }
 0xa49   : > { %5001 = vst [vmem:[#allocation1 + $0x2] ss:$4 sm:$0xff] %v3524_v37  ;;  %v3528_v37 = vrot.slane %v9081_v2, 2 }
 0xa4a   : > { %5002 = vst [vmem:[#allocation1 + $0x3] ss:$4 sm:$0xff] %v10813_v54  ;;  %v3445_v54 = vld [vmem:[#allocation3 + $0x28] sm:$0x3f] }
 0xa4b   : > { %v3503_v25 = vrot.slane %v3445_v54, 2 }
 0xa4d   : > { %v9079_v10 = vld.sshfl [vmem:[#allocation1 + $0x20] sm:$0xff pattern:$0x73625140] }
 0xa4e   : > { %10814 = vst [vmem:[#allocation13_spill] sm:$0xff] %v9079_v10  ;;  %v10818_v10 = vld [vmem:[#allocation12_spill] sm:$0xff] }
 0xa4f   : > { %4868 = vst [vmem:[#allocation1 + $0x20] ss:$4 sm:$0xff] %v10438_v47  ;;  %v10816_v47 = vld [vmem:[#allocation25_spill] sm:$0xff] }
 0xa50   : > { %4869 = vst [vmem:[#allocation1 + $0x21] ss:$4 sm:$0xff] %v10439_v48 }
 0xa51   : > { %4870 = vst [vmem:[#allocation1 + $0x22] ss:$4 sm:$0xff] %v10442_v38  ;;  %v9093_v40 = vld.sshfl [vmem:[#allocation1] sm:$0xff pattern:$0x73625140]  ;;  %v3504_v38 = vrot.slane %v3445_v54, 4 }
 0xa52   : > { %4871 = vst [vmem:[#allocation1 + $0x23] ss:$4 sm:$0xff] %v9013_v57  ;;  %v3534_v57 = vrot.slane %v9099_v16, 4 }
 0xa53   : > { %5009 = vst [vmem:[#allocation1] ss:$4 sm:$0xff] %v3528_v37 }
 0xa54   : > { %5010 = vst [vmem:[#allocation1 + $0x1] ss:$4 sm:$0xff] %v3529_v61  ;;  %v10819_v61 = vld [vmem:[#allocation29_spill] sm:$0xff] }
 0xa55   : > { %5011 = vst [vmem:[#allocation1 + $0x2] ss:$4 sm:$0xff] %v10815_v53  ;;  %v10820_v53 = vld [vmem:[#allocation30_spill] sm:$0xff] }
 0xa56   : > { %5012 = vst [vmem:[#allocation1 + $0x3] ss:$4 sm:$0xff] %v10816_v47  ;;  %v10821_v47 = vld [vmem:[#allocation31_spill] sm:$0xff] }
 0xa59   : > { %v9097_v48 = vld.sshfl [vmem:[#allocation1 + $0x20] sm:$0xff pattern:$0x73625140] }
 0xa5a   : > { %10817 = vst [vmem:[#allocation78_spill] sm:$0xff] %v9097_v48  ;;  %v3508_v48 = vrot.slane %v9041_v21, 2  ;;  %v10827_v21 = vld [vmem:[#allocation94_spill] sm:$0xff] }
 0xa5b   : > { %4960 = vst [vmem:[#allocation1 + $0x20] ss:$4 sm:$0xff] %v3445_v54  ;;  %v6283_v46 = vpack.i.bf16 %v9053_v58, %v10827_v21  ;;  %v10831_v58 = vld [vmem:[#allocation16_spill] sm:$0xff] }
 0xa5c   : > { %4962 = vst [vmem:[#allocation1 + $0x21] ss:$4 sm:$0xff] %v3503_v25 }
 0xa5d   : > { %4964 = vst [vmem:[#allocation1 + $0x22] ss:$4 sm:$0xff] %v3504_v38  ;;  %v9103_v37 = vld.sshfl [vmem:[#allocation1] sm:$0xff pattern:$0x73625140]  ;;  %v10822_v38 = vld [vmem:[#allocation75_spill] sm:$0xff] }
 0xa5e   : > { %4966 = vst [vmem:[#allocation1 + $0x23] ss:$4 sm:$0xff] %v10818_v10  ;;  %v10823_v10 = vld [vmem:[#allocation76_spill] sm:$0xff] }
 0xa5f   : > { %5019 = vst [vmem:[#allocation1] ss:$4 sm:$0xff] %v3534_v57 }
 0xa60   : > { %5020 = vst [vmem:[#allocation1 + $0x1] ss:$4 sm:$0xff] %v10819_v61  ;;  %v10824_v61 = vld [vmem:[#allocation34_spill] sm:$0xff] }
 0xa61   : > { %5021 = vst [vmem:[#allocation1 + $0x2] ss:$4 sm:$0xff] %v10820_v53  ;;  %v10825_v53 = vld [vmem:[#allocation100_spill] sm:$0xff] }
 0xa62   : > { %5022 = vst [vmem:[#allocation1 + $0x3] ss:$4 sm:$0xff] %v10821_v47  ;;  %v10826_v47 = vld [vmem:[#allocation35_spill] sm:$0xff] }
 0xa65   : > { %v4968_v54 = vld.sshfl [vmem:[#allocation1 + $0x20] sm:$0xff pattern:$0x73625140] }
 0xa66   : > { %v6263_v25 = vpack.i.bf16 %v4968_v54, %v9037_v35  ;;  %4973 = vst [vmem:[#allocation1 + $0x20] ss:$4 sm:$0xff] %v3508_v48  ;;  %v10828_v35 = vld [vmem:[#allocation36_spill] sm:$0xff]  ;;  %v9126_v48 = vld [vmem:[#allocation3 + $0xb8] sm:$0x3f]  ;;  %v10829_v54 = vld [vmem:[#allocation105_spill] sm:$0xff] }
 0xa67   : > { %4974 = vst [vmem:[#allocation1 + $0x21] ss:$4 sm:$0xff] %v3509_v32 }
 0xa68   : > { %6264 = vrot.lane.b32.xlu0 %v6263_v25, %s6626_s14  ;;  %4975 = vst [vmem:[#allocation1 + $0x22] ss:$4 sm:$0xff] %v10822_v38  ;;  %v3514_v25 = vrot.slane %v9049_v14, 4  ;;  %v10830_v38 = vld [vmem:[#allocation39_spill] sm:$0xff] }
 0xa69   : > { %4976 = vst [vmem:[#allocation1 + $0x23] ss:$4 sm:$0xff] %v10823_v10  ;;  %v9114_v57 = vld.sshfl [vmem:[#allocation1] sm:$0xff pattern:$0x73625140] }
 0xa6a   : > { %5029 = vst [vmem:[#allocation1] ss:$4 sm:$0xff] %v10824_v61  ;;  %v10833_v61 = vld [vmem:[#allocation82_spill] sm:$0xff] }
 0xa6b   : > { %5030 = vst [vmem:[#allocation1 + $0x1] ss:$4 sm:$0xff] %v10825_v53 }
 0xa6c   : > { %5031 = vst [vmem:[#allocation1 + $0x2] ss:$4 sm:$0xff] %v10826_v47  ;;  %v10834_v47 = vld [vmem:[#allocation113_spill] sm:$0xff] }
 0xa6d   : > { %5032 = vst [vmem:[#allocation1 + $0x3] ss:$4 sm:$0xff] %v10828_v35  ;;  %v10835_v35 = vld [vmem:[#allocation17_spill] sm:$0xff] }
 0xa70   : > { %6284 = vrot.lane.b32.xlu0 %v6283_v46, %s6626_s14  ;;  %v9131_v10 = vld.sshfl [vmem:[#allocation1 + $0x20] sm:$0xff pattern:$0x73625140]  ;;  %v10832_v46 = vld [vmem:[#allocation81_spill] sm:$0xff] }
 0xa71   : > { %4983 = vst [vmem:[#allocation1 + $0x20] ss:$4 sm:$0xff] %v3514_v25  ;;  %v10837_v25 = vld [vmem:[#allocation86_spill] sm:$0xff] }
 0xa72   : > { %4984 = vst [vmem:[#allocation1 + $0x21] ss:$4 sm:$0xff] %v10831_v58  ;;  %v3467_v58 = vld [vmem:[#allocation3 + $0xd8] sm:$0x3f] }
 0xa73   : > { %4985 = vst [vmem:[#allocation1 + $0x22] ss:$4 sm:$0xff] %v10832_v46 }
 0xa74   : > { %v9123_v32 = vld.sshfl [vmem:[#allocation1] sm:$0xff pattern:$0x73625140]  ;;  %4986 = vst [vmem:[#allocation1 + $0x23] ss:$4 sm:$0xff] %v10833_v61  ;;  %v3559_v61 = vrot.slane %v3467_v58, 4 }
 0xa75   : > { %5039 = vst [vmem:[#allocation1] ss:$4 sm:$0xff] %v10710_v63  ;;  %v9137_v63 = vld [vmem:[#allocation3 + $0xc8] sm:$0x3f] }
 0xa76   : > { %5040 = vst [vmem:[#allocation1 + $0x1] ss:$4 sm:$0xff] %v10829_v54  ;;  %v3553_v14 = vrot.slane %v9137_v63, 2  ;;  %v10836_v54 = vld [vmem:[#allocation19_spill] sm:$0xff] }
 0xa77   : > { %5041 = vst [vmem:[#allocation1 + $0x2] ss:$4 sm:$0xff] %v10830_v38  ;;  %v10838_v38 = vld [vmem:[#allocation87_spill] sm:$0xff] }
 0xa78   : > { %5042 = vst [vmem:[#allocation1 + $0x3] ss:$4 sm:$0xff] %v9126_v48 }
 0xa7b   : > { %v9145_v21 = vld.sshfl [vmem:[#allocation1 + $0x20] sm:$0xff pattern:$0x73625140] }
 0xa7c   : > { %4993 = vst [vmem:[#allocation1 + $0x20] ss:$4 sm:$0xff] %v10835_v35  ;;  %v10841_v35 = vld [vmem:[#allocation23_spill] sm:$0xff] }
 0xa7d   : > { %4994 = vst [vmem:[#allocation1 + $0x21] ss:$4 sm:$0xff] %v10836_v54  ;;  %v10842_v54 = vld [vmem:[#allocation90_spill] sm:$0xff] }
 0xa7e   : > { %4995 = vst [vmem:[#allocation1 + $0x22] ss:$4 sm:$0xff] %v10837_v25  ;;  %v3469_v25 = vld [vmem:[#allocation3 + $0xe8] sm:$0x3f] }
 0xa7f   : > { %v9139_v53 = vld.sshfl [vmem:[#allocation1] sm:$0xff pattern:$0x73625140]  ;;  %4996 = vst [vmem:[#allocation1 + $0x23] ss:$4 sm:$0xff] %v10838_v38  ;;  %v3563_v38 = vrot.slane %v3469_v25, 2 }
 0xa80   : > { %5049 = vst [vmem:[#allocation1] ss:$4 sm:$0xff] %v10715_v60  ;;  %v3558_v60 = vrot.slane %v3467_v58, 2  ;;  %v3564_v59 = vrot.slane %v3469_v25, 4 }
 0xa81   : > { %5050 = vst [vmem:[#allocation1 + $0x1] ss:$4 sm:$0xff] %v10834_v47  ;;  %v10840_v47 = vld [vmem:[#allocation22_spill] sm:$0xff] }
 0xa82   : > { %5051 = vst [vmem:[#allocation1 + $0x2] ss:$4 sm:$0xff] %v9137_v63 }
 0xa83   : > { %5052 = vst [vmem:[#allocation1 + $0x3] ss:$4 sm:$0xff] %v3553_v14 }
 0xa86   : > { %v9154_v14 = vld.sshfl [vmem:[#allocation1 + $0x20] sm:$0xff pattern:$0x73625140] }
 0xa87   : > { %5003 = vst [vmem:[#allocation1 + $0x20] ss:$4 sm:$0xff] %v10840_v47  ;;  %v3533_v47 = vrot.slane %v9099_v16, 2 }
 0xa88   : > { %5004 = vst [vmem:[#allocation1 + $0x21] ss:$4 sm:$0xff] %v10841_v35 }
 0xa89   : > { %5005 = vst [vmem:[#allocation1 + $0x22] ss:$4 sm:$0xff] %v10842_v54 }
 0xa8a   : > { %v9151_v46 = vld.sshfl [vmem:[#allocation1] sm:$0xff pattern:$0x73625140]  ;;  %5006 = vst [vmem:[#allocation1 + $0x23] ss:$4 sm:$0xff] %v9081_v2 }
 0xa8b   : > { %10839 = vst [vmem:[#allocation79_spill] sm:$0xff] %v9151_v46  ;;  %v10845_v2 = vld [vmem:[#allocation28_spill] sm:$0xff] }
 0xa8c   : > { %5059 = vst [vmem:[#allocation1] ss:$4 sm:$0xff] %v10722_v30  ;;  %v9162_v30 = vld [vmem:[#allocation3 + $0xf0] sm:$0xff] }
 0xa8d   : > { %5060 = vst [vmem:[#allocation1 + $0x1] ss:$4 sm:$0xff] %v3467_v58 }
 0xa8e   : > { %5061 = vst [vmem:[#allocation1 + $0x2] ss:$4 sm:$0xff] %v3558_v60  ;;  %v9167_v60 = vld [vmem:[#allocation3 + $0xf8] sm:$0x3f] }
 0xa8f   : > { %5062 = vst [vmem:[#allocation1 + $0x3] ss:$4 sm:$0xff] %v3559_v61  ;;  %v10844_v61 = vld [vmem:[#allocation27_spill] sm:$0xff]  ;;  %v3568_v35 = vrot.slane %v9167_v60, 2  ;;  %v3569_v54 = vrot.slane %v9167_v60, 4 }
 0xa91   : > { %v9165_v58 = vld.sshfl [vmem:[#allocation1 + $0x20] sm:$0xff pattern:$0x73625140] }
 0xa92   : > { %5013 = vst [vmem:[#allocation1 + $0x20] ss:$4 sm:$0xff] %v10844_v61  ;;  %v10847_v61 = vld [vmem:[#allocation33_spill] sm:$0xff] }
 0xa93   : > { %5014 = vst [vmem:[#allocation1 + $0x21] ss:$4 sm:$0xff] %v10845_v2  ;;  %v3461_v2 = vld [vmem:[#allocation3 + $0xa8] sm:$0x3f] }
 0xa94   : > { %5015 = vst [vmem:[#allocation1 + $0x22] ss:$4 sm:$0xff] %v9099_v16  ;;  %v3544_v7 = vrot.slane %v3461_v2, 4 }
 0xa95   : > { %5016 = vst [vmem:[#allocation1 + $0x23] ss:$4 sm:$0xff] %v3533_v47  ;;  %v10849_v47 = vld [vmem:[#allocation134_spill] sm:$0xff] }
 0xa96   : > { %v9160_v46 = vld.sshfl [vmem:[#allocation1] sm:$0xff pattern:$0x73625140] }
 0xa97   : > { %10843 = vst [vmem:[#allocation84_spill] sm:$0xff] %v9160_v46 }
 0xa98   : > { %5069 = vst [vmem:[#allocation1] ss:$4 sm:$0xff] %v3469_v25  ;;  %v3459_v25 = vld [vmem:[#allocation3 + $0x98] sm:$0x3f] }
 0xa99   : > { %5070 = vst [vmem:[#allocation1 + $0x1] ss:$4 sm:$0xff] %v3563_v38  ;;  %v3538_v46 = vrot.slane %v3459_v25, 2  ;;  %v3539_v34 = vrot.slane %v3459_v25, 4 }
 0xa9a   : > { %5071 = vst [vmem:[#allocation1 + $0x2] ss:$4 sm:$0xff] %v3564_v59 }
 0xa9b   : > { %5072 = vst [vmem:[#allocation1 + $0x3] ss:$4 sm:$0xff] %v9162_v30 }
 0xa9c   : > { %v9177_v38 = vld.sshfl [vmem:[#allocation1 + $0x20] sm:$0xff pattern:$0x73625140] }
 0xa9d   : > { %5023 = vst [vmem:[#allocation1 + $0x20] ss:$4 sm:$0xff] %v10847_v61  ;;  %v9192_v61 = vld [vmem:[#allocation3 + $0x39] sm:$0x3f] }
 0xa9e   : > { %5024 = vst [vmem:[#allocation1 + $0x21] ss:$4 sm:$0xff] %v3459_v25 }
 0xa9f   : > { %5025 = vst [vmem:[#allocation1 + $0x22] ss:$4 sm:$0xff] %v3538_v46  ;;  %v10852_v46 = vld [vmem:[#allocation157_spill] sm:$0xff] }
 0xaa0   : > { %5026 = vst [vmem:[#allocation1 + $0x23] ss:$4 sm:$0xff] %v3539_v34 }
 0xaa2   : > { %v9175_v59 = vld.sshfl [vmem:[#allocation1] sm:$0xff pattern:$0x73625140] }
 0xaa3   : > { %10846 = vst [vmem:[#allocation20_spill] sm:$0xff] %v9175_v59  ;;  %v10850_v59 = vld [vmem:[#allocation47_spill] sm:$0xff] }
 0xaa4   : > { %5079 = vst [vmem:[#allocation1] ss:$4 sm:$0xff] %v3568_v35  ;;  %v10851_v35 = vld [vmem:[#allocation48_spill] sm:$0xff] }
 0xaa5   : > { %5080 = vst [vmem:[#allocation1 + $0x1] ss:$4 sm:$0xff] %v3569_v54  ;;  %v3543_v54 = vrot.slane %v3461_v2, 2 }
 0xaa7   : > { %v9186_v50 = vld.sshfl [vmem:[#allocation1 + $0x20] sm:$0xff pattern:$0x73625140] }
 0xaa8   : > { %5033 = vst [vmem:[#allocation1 + $0x20] ss:$4 sm:$0xff] %v3461_v2  ;;  %v9204_v2 = vld [vmem:[#allocation3 + $0x49] sm:$0x3f] }
 0xaa9   : > { %5034 = vst [vmem:[#allocation1 + $0x21] ss:$4 sm:$0xff] %v3543_v54 }
 0xaaa   : > { %5035 = vst [vmem:[#allocation1 + $0x22] ss:$4 sm:$0xff] %v3544_v7  ;;  %v3549_v7 = vrot.slane %v9126_v48, 4 }
 0xaab   : > { %5036 = vst [vmem:[#allocation1 + $0x23] ss:$4 sm:$0xff] %v10709_v62 }
 0xaac   : > { %v9180_v16 = vld.sshfl [vmem:[#allocation1] sm:$0xff pattern:$0x73625140] }
 0xaad   : > { %10848 = vst [vmem:[#allocation24_spill] sm:$0xff] %v9180_v16  ;;  %v10872_v16 = vld [vmem:[#allocation49_spill] sm:$0xff] }
 0xaae   : > { %5157 = vst [vmem:[#allocation1] ss:$4 sm:$0xff] %v10733_v0  ;;  %v10853_v0 = vld [vmem:[#allocation141_spill] sm:$0xff] }
 0xaaf   : > { %5159 = vst [vmem:[#allocation1 + $0x1] ss:$4 sm:$0xff] %v10849_v47  ;;  %v3548_v47 = vrot.slane %v9126_v48, 2  ;;  %v3639_v48 = vrot.slane %v9204_v2, 2 }
 0xab0   : > { %5161 = vst [vmem:[#allocation1 + $0x2] ss:$4 sm:$0xff] %v10850_v59  ;;  %v10854_v59 = vld [vmem:[#allocation50_spill] sm:$0xff] }
 0xab1   : > { %5163 = vst [vmem:[#allocation1 + $0x3] ss:$4 sm:$0xff] %v10851_v35  ;;  %v10855_v35 = vld [vmem:[#allocation110_spill] sm:$0xff] }
 0xab2   : > { %v9199_v62 = vld.sshfl [vmem:[#allocation1 + $0x20] sm:$0xff pattern:$0x73625140] }
 0xab3   : > { %5043 = vst [vmem:[#allocation1 + $0x20] ss:$4 sm:$0xff] %v3548_v47 }
 0xab4   : > { %5044 = vst [vmem:[#allocation1 + $0x21] ss:$4 sm:$0xff] %v3549_v7 }
 0xab5   : > { %5045 = vst [vmem:[#allocation1 + $0x22] ss:$4 sm:$0xff] %v10713_v4  ;;  %v10857_v4 = vld [vmem:[#allocation172_spill] sm:$0xff] }
 0xab6   : > { %5046 = vst [vmem:[#allocation1 + $0x23] ss:$4 sm:$0xff] %v10855_v35 }
 0xab8   : > { %v5172_v34 = vld.sshfl [vmem:[#allocation1] sm:$0xff pattern:$0x73625140] }
 0xab9   : > { %v6273_v25 = vpack.i.bf16 %v5172_v34, %v10852_v46  ;;  %5174 = vst [vmem:[#allocation1] ss:$4 sm:$0xff] %v10739_v19  ;;  %v6278_v19 = vpack.i.bf16 %v8898_v1, %v8967_v27  ;;  %v10856_v34 = vld [vmem:[#allocation147_spill] sm:$0xff]  ;;  %v3554_v1 = vrot.slane %v9137_v63, 4  ;;  %v6288_v27 = vpack.i.bf16 %v9131_v10, %v10857_v4  ;;  %v10861_v10 = vld [vmem:[#allocation98_spill] sm:$0xff] }
 0xaba   : > { %5175 = vst [vmem:[#allocation1 + $0x1] ss:$4 sm:$0xff] %v10853_v0  ;;  %v10859_v0 = vld [vmem:[#allocation118_spill] sm:$0xff] }
 0xabb   : > { %6274 = vrot.lane.b32.xlu2 %v6273_v25, %s6627_s10  ;;  %5176 = vst [vmem:[#allocation1 + $0x2] ss:$4 sm:$0xff] %v10854_v59  ;;  %v10858_v25 = vld [vmem:[#allocation42_spill] sm:$0xff]  ;;  %v10860_v59 = vld [vmem:[#allocation119_spill] sm:$0xff] }
 0xabc   : > { %5177 = vst [vmem:[#allocation1 + $0x3] ss:$4 sm:$0xff] %v9192_v61 }
 0xabd   : > { %v9217_v46 = vld.sshfl [vmem:[#allocation1 + $0x20] sm:$0xff pattern:$0x73625140] }
 0xabe   : > { %5053 = vst [vmem:[#allocation1 + $0x20] ss:$4 sm:$0xff] %v3554_v1 }
 0xabf   : > { %5054 = vst [vmem:[#allocation1 + $0x21] ss:$4 sm:$0xff] %v10858_v25  ;;  %v5674_v25 = vld [vmem:[%s10195_s5 + $0xf8] sm:$0xff] }
 0xac0   : > { %5055 = vst [vmem:[#allocation1 + $0x22] ss:$4 sm:$0xff] %v10859_v0  ;;  %5825 = vmatpush.msrb.mxu3 %v5674_v25 }
 0xac1   : > { %5056 = vst [vmem:[#allocation1 + $0x23] ss:$4 sm:$0xff] %v10860_v59  ;;  %v3565_v59 = vrot.slane %v9162_v30, 2 }
 0xac3   : > { %6279 = vrot.lane.b32.xlu2 %v6278_v19, %s6628_s11  ;;  %v9208_v54 = vld.sshfl [vmem:[#allocation1] sm:$0xff pattern:$0x73625140]  ;;  %v6308_v19 = vpack.i.bf16 %v9065_v18, %v10861_v10  ;;  %v5658_v18 = vld [vmem:[%s10195_s5 + $0x78] sm:$0xff]  ;;  %v3567_v10 = vrot.slane %v9162_v30, 6 }
 0xac4   : > { %5184 = vst [vmem:[#allocation1] ss:$4 sm:$0xff] %v10745_v39  ;;  %v3577_v39 = vld [vmem:[#allocation3 + $0x59] sm:$0x3f]  ;;  %5733 = vmatpush.msrb.mxu2 %v5658_v18  ;;  %v5671_v18 = vld [vmem:[%s10195_s5 + $0xe0] sm:$0xff] }
 0xac5   : > { %5185 = vst [vmem:[#allocation1 + $0x1] ss:$4 sm:$0xff] %v10856_v34  ;;  %v3644_v7 = vrot.slane %v3577_v39, 2  ;;  %v3645_v63 = vrot.slane %v3577_v39, 4  ;;  %v3579_v34 = vld [vmem:[#allocation3 + $0x69] sm:$0x3f] }
 0xac6   : > { %5186 = vst [vmem:[#allocation1 + $0x2] ss:$4 sm:$0xff] %v9204_v2  ;;  %v3650_v0 = vrot.slane %v3579_v34, 4 }
 0xac7   : > { %5187 = vst [vmem:[#allocation1 + $0x3] ss:$4 sm:$0xff] %v3639_v48  ;;  %v10863_v48 = vld [vmem:[#allocation178_spill] sm:$0xff] }
 0xac8   : > { %v9229_v35 = vld.sshfl [vmem:[#allocation1 + $0x20] sm:$0xff pattern:$0x73625140]  ;;  %v10864_v1 = vrot.slane %v10863_v48, 2  ;;  %v10865_v4 = vrot.slane %v10863_v48, 4 }
 0xac9   : > { %10862 = vst [vmem:[#allocation25_spill] sm:$0xff] %v9229_v35 }
 0xaca   : > { %5063 = vst [vmem:[#allocation1 + $0x20] ss:$4 sm:$0xff] %v10863_v48 }
 0xacb   : > { %6289 = vrot.lane.b32.xlu2 %v6288_v27, %s6626_s14  ;;  %5064 = vst [vmem:[#allocation1 + $0x21] ss:$4 sm:$0xff] %v10864_v1  ;;  %v3649_v27 = vrot.slane %v3579_v34, 2  ;;  %v5673_v1 = vld [vmem:[%s10195_s5 + $0xf0] sm:$0xff] }
 0xacc   : > { %5065 = vst [vmem:[#allocation1 + $0x22] ss:$4 sm:$0xff] %v10865_v4  ;;  %5826 = vmatpush.msrb.mxu3 %v5673_v1 }
 0xace   : > { %v9223_v47 = vld.sshfl [vmem:[#allocation1] sm:$0xff pattern:$0x73625140] }
 0xacf   : > { %5194 = vst [vmem:[#allocation1] ss:$4 sm:$0xff] %v10750_v29  ;;  %v10866_v29 = vrot.slane %v10863_v48, 6  ;;  %v9252_v48 = vld [vmem:[#allocation3 + $0x79] sm:$0x3f] }
 0xad0   : > { %5195 = vst [vmem:[#allocation1 + $0x1] ss:$4 sm:$0xff] %v3577_v39  ;;  %v3654_v4 = vrot.slane %v9252_v48, 2 }
 0xad1   : > { %5196 = vst [vmem:[#allocation1 + $0x2] ss:$4 sm:$0xff] %v3644_v7  ;;  %v3566_v7 = vrot.slane %v9162_v30, 4  ;;  %v5656_v30 = vld [vmem:[%s10195_s5 + $0x68] sm:$0xff] }
 0xad2   : > { %5197 = vst [vmem:[#allocation1 + $0x3] ss:$4 sm:$0xff] %v3645_v63  ;;  %v10867_v63 = vld [vmem:[#allocation54_spill] sm:$0xff] }
 0xad3   : > { %6309 = vrot.lane.b32.xlu2 %v6308_v19, %s6626_s14  ;;  %5066 = vst [vmem:[#allocation1 + $0x23] ss:$4 sm:$0xff] %v10866_v29  ;;  %v3655_v29 = vrot.slane %v9252_v48, 4 }
 0xad9   : > { %v9244_v39 = vld.sshfl [vmem:[#allocation1] sm:$0xff pattern:$0x73625140] }
 0xada   : > { %5204 = vst [vmem:[#allocation1] ss:$4 sm:$0xff] %v3579_v34  ;;  %v9250_v19 = vld.sshfl [vmem:[#allocation1 + $0x20] sm:$0xff pattern:$0x73625140]  ;;  %v5657_v34 = vld [vmem:[%s10195_s5 + $0x70] sm:$0xff] }
 0xadb   : > { %5205 = vst [vmem:[#allocation1 + $0x1] ss:$4 sm:$0xff] %v3649_v27  ;;  %5734 = vmatpush.msrb.mxu2 %v5657_v34  ;;  %v5655_v27 = vld [vmem:[%s10195_s5 + $0x60] sm:$0xff] }
 0xadc   : > { %5206 = vst [vmem:[#allocation1 + $0x2] ss:$4 sm:$0xff] %v3650_v0  ;;  %v3571_v0 = vld [vmem:[#allocation3 + $0x29] sm:$0x3f] }
 0xadd   : > { %5207 = vst [vmem:[#allocation1 + $0x3] ss:$4 sm:$0xff] %v10867_v63  ;;  %5735 = vmatpush.msrb.mxu2 %v5656_v30  ;;  %v5670_v63 = vld [vmem:[%s10195_s5 + $0xd8] sm:$0xff]  ;;  %v3629_v34 = vrot.slane %v3571_v0, 2  ;;  %v10871_v30 = vld [vmem:[#allocation58_spill] sm:$0xff] }
 0xade   : > { %10868 = vst [vmem:[#allocation12_spill] sm:$0xff] %v9250_v19  ;;  %v10877_v19 = vld [vmem:[#allocation63_spill] sm:$0xff] }
 0xadf   : > { %5073 = vst [vmem:[#allocation1 + $0x20] ss:$4 sm:$0xff] %v3565_v59  ;;  %v9277_v59 = vpop.permute.xlu0 %6194  ;;  %5736 = vmatpush.msrb.mxu2 %v5655_v27  ;;  %v5669_v27 = vld [vmem:[%s10195_s5 + $0xd0] sm:$0xff] }
 0xae0   : > { %5074 = vst [vmem:[#allocation1 + $0x21] ss:$4 sm:$0xff] %v3566_v7  ;;  %v5654_v7 = vld [vmem:[%s10195_s5 + $0x58] sm:$0xff] }
 0xae1   : > { %5075 = vst [vmem:[#allocation1 + $0x22] ss:$4 sm:$0xff] %v3567_v10  ;;  %v10869_v10 = vld [vmem:[#allocation57_spill] sm:$0xff]  ;;  %5737 = vmatpush.msrb.mxu2 %v5654_v7  ;;  %v9302_v7 = vpop.permute.xlu1 %6199 }
 0xae2   : > { %5076 = vst [vmem:[#allocation1 + $0x23] ss:$4 sm:$0xff] %v9167_v60  ;;  %v5672_v60 = vld [vmem:[%s10195_s5 + $0xe8] sm:$0xff] }
 0xae3   : > { %5827 = vmatpush.msrb.mxu3 %v5672_v60  ;;  %v9289_v60 = vld [vmem:[#allocation3 + $0x89] sm:$0x3f]  ;;  %10873 = vst [vmem:[#allocation30_spill] sm:$0xff] %v9302_v7 }
 0xae4   : > { %v9275_v25 = vld.sshfl [vmem:[#allocation1] sm:$0xff pattern:$0x73625140] }
 0xae5   : > { %5214 = vst [vmem:[#allocation1] ss:$4 sm:$0xff] %v3654_v4  ;;  %5828 = vmatpush.msrb.mxu3 %v5671_v18  ;;  %v3630_v4 = vrot.slane %v3571_v0, 4  ;;  %v5652_v18 = vld [vmem:[%s10195_s5 + $0x48] sm:$0xff]  ;;  %v10878_v7 = vld [vmem:[#allocation8_spill] sm:$0xff] }
 0xae6   : > { %5215 = vst [vmem:[#allocation1 + $0x1] ss:$4 sm:$0xff] %v3655_v29  ;;  %v5653_v29 = vld [vmem:[%s10195_s5 + $0x50] sm:$0xff] }
 0xae7   : > { %5216 = vst [vmem:[#allocation1 + $0x2] ss:$4 sm:$0xff] %v10869_v10  ;;  %5829 = vmatpush.msrb.mxu3 %v5670_v63  ;;  %v9304_v63 = vpop.permute.xlu0 %6209  ;;  %5738 = vmatpush.msrb.mxu2 %v5653_v29  ;;  %v5651_v10 = vld [vmem:[%s10195_s5 + $0x40] sm:$0xff]  ;;  %v5666_v29 = vld [vmem:[%s10195_s5 + $0xb8] sm:$0xff] }
 0xae8   : > { %5217 = vst [vmem:[#allocation1 + $0x3] ss:$4 sm:$0xff] %v10871_v30 }
 0xae9   : > { %v9286_v1 = vld.sshfl [vmem:[#allocation1 + $0x20] sm:$0xff pattern:$0x73625140]  ;;  %10874 = vst [vmem:[#allocation31_spill] sm:$0xff] %v9304_v63  ;;  %5830 = vmatpush.msrb.mxu3 %v5669_v27  ;;  %5739 = vmatpush.msrb.mxu2 %v5652_v18  ;;  %v10875_v27 = vld [vmem:[#allocation61_spill] sm:$0xff]  ;;  %v3634_v63 = vrot.slane %v9192_v61, 2 }
 0xaea   : > { %10870 = vst [vmem:[#allocation29_spill] sm:$0xff] %v9286_v1  ;;  %v10876_v1 = vld [vmem:[#allocation62_spill] sm:$0xff]  ;;  %v3635_v18 = vrot.slane %v9192_v61, 4  ;;  %v5648_v61 = vld [vmem:[%s10195_s5 + $0x28] sm:$0xff] }
 0xaeb   : > { %5165 = vst [vmem:[#allocation1 + $0x20] ss:$4 sm:$0xff] %v3571_v0  ;;  %v3660_v0 = vrot.slane %v9289_v60, 4  ;;  %5740 = vmatpush.msrb.mxu2 %v5651_v10  ;;  %v9340_v10 = vpop.permute.xlu1 %6214 }
 0xaec   : > { %5167 = vst [vmem:[#allocation1 + $0x21] ss:$4 sm:$0xff] %v3629_v34  ;;  %v5667_v34 = vld [vmem:[%s10195_s5 + $0xc0] sm:$0xff] }
 0xaed   : > { %5169 = vst [vmem:[#allocation1 + $0x22] ss:$4 sm:$0xff] %v3630_v4  ;;  %v5650_v4 = vld [vmem:[%s10195_s5 + $0x38] sm:$0xff] }
 0xaee   : > { %5171 = vst [vmem:[#allocation1 + $0x23] ss:$4 sm:$0xff] %v10872_v16  ;;  %v5668_v16 = vld [vmem:[%s10195_s5 + $0xc8] sm:$0xff]  ;;  %5741 = vmatpush.msrb.mxu2 %v5650_v4  ;;  %v5647_v4 = vld [vmem:[%s10195_s5 + $0x20] sm:$0xff] }
 0xaef   : > { %v9315_v30 = vld.sshfl [vmem:[#allocation1] sm:$0xff pattern:$0x73625140]  ;;  %5831 = vmatpush.msrb.mxu3 %v5668_v16  ;;  %v9327_v16 = vpop.permute.xlu2 %6204 }
 0xaf0   : > { %5224 = vst [vmem:[#allocation1] ss:$4 sm:$0xff] %v3660_v0 }
 0xaf1   : > { %5225 = vst [vmem:[#allocation1 + $0x1] ss:$4 sm:$0xff] %v10875_v27  ;;  %5832 = vmatpush.msrb.mxu3 %v5667_v34  ;;  %v5649_v27 = vld [vmem:[%s10195_s5 + $0x30] sm:$0xff]  ;;  %v10881_v34 = vld [vmem:[#allocation145_spill] sm:$0xff] }
 0xaf2   : > { %5226 = vst [vmem:[#allocation1 + $0x2] ss:$4 sm:$0xff] %v10876_v1  ;;  %v5665_v1 = vld [vmem:[%s10195_s5 + $0xb0] sm:$0xff]  ;;  %5742 = vmatpush.msrb.mxu2 %v5649_v27 }
 0xaf3   : > { %5227 = vst [vmem:[#allocation1 + $0x3] ss:$4 sm:$0xff] %v10877_v19  ;;  %5833 = vmatpush.msrb.mxu3 %v5666_v29  ;;  %v9342_v19 = vpop.permute.xlu0 %6224  ;;  %v5663_v29 = vld [vmem:[%s10195_s5 + $0xa0] sm:$0xff] }
 0xaf4   : > { %10879 = vst [vmem:[#allocation75_spill] sm:$0xff] %v9342_v19  ;;  %5743 = vmatpush.msrb.mxu2 %v5648_v61 }
 0xaf5   : > { %v5173_v0 = vld.sshfl [vmem:[#allocation1 + $0x20] sm:$0xff pattern:$0x73625140]  ;;  %5834 = vmatpush.msrb.mxu3 %v5665_v1  ;;  %v10883_v1 = vld [vmem:[#allocation159_spill] sm:$0xff] }
 0xaf6   : > { %v6268_v35 = vpack.i.bf16 %v5173_v0, %v10878_v7  ;;  %5178 = vst [vmem:[#allocation1 + $0x20] ss:$4 sm:$0xff] %v3634_v63  ;;  %v10880_v7 = vld [vmem:[#allocation144_spill] sm:$0xff]  ;;  %v5664_v63 = vld [vmem:[%s10195_s5 + $0xa8] sm:$0xff]  ;;  %5744 = vmatpush.msrb.mxu2 %v5647_v4  ;;  %v6298_v61 = vpack.i.bf16 %v9208_v54, %v10883_v1  ;;  %v3640_v4 = vrot.slane %v9204_v2, 4  ;;  %v5678_v2 = vld [vmem:[%s10195_s5 + $0x118] sm:$0xff] }
 0xaf7   : > { %5179 = vst [vmem:[#allocation1 + $0x21] ss:$4 sm:$0xff] %v3635_v18  ;;  %5835 = vmatpush.msrb.mxu3 %v5664_v63  ;;  %v5662_v18 = vld [vmem:[%s10195_s5 + $0x98] sm:$0xff]  ;;  %v9364_v27 = vpop.permute.xlu2 %6219  ;;  %v5661_v63 = vld [vmem:[%s10195_s5 + $0x90] sm:$0xff]  ;;  %v5660_v54 = vld [vmem:[%s10195_s5 + $0x88] sm:$0xff]  ;;  %5929 = vmatpush.msrb.mxu0 %v5678_v2 }
 0xaf8   : > { %6269 = vrot.lane.b32.xlu1 %v6268_v35, %s6627_s10  ;;  %5180 = vst [vmem:[#allocation1 + $0x22] ss:$4 sm:$0xff] %v10880_v7  ;;  %v5646_v35 = vld [vmem:[%s10195_s5 + $0x18] sm:$0xff]  ;;  %v5645_v7 = vld [vmem:[%s10195_s5 + $0x10] sm:$0xff]  ;;  %6162 = vmatpush.msra.mxu1 %v5678_v2 }
 0xaf9   : > { %5181 = vst [vmem:[#allocation1 + $0x23] ss:$4 sm:$0xff] %v10881_v34  ;;  %5836 = vmatpush.msrb.mxu3 %v5663_v29  ;;  %5745 = vmatpush.msrb.mxu2 %v5646_v35  ;;  %v10884_v34 = vld [vmem:[#allocation161_spill] sm:$0xff]  ;;  %v9384_v35 = vpop.permute.xlu1 %6229  ;;  %v10894_v2 = vld [vmem:[#allocation163_spill] sm:$0xff] }
 0xafa   : > { %v9362_v0 = vld.sshfl [vmem:[#allocation1] sm:$0xff pattern:$0x73625140]  ;;  %10882 = vst [vmem:[#allocation76_spill] sm:$0xff] %v9364_v27  ;;  %v10885_v29 = vld [vmem:[#allocation65_spill] sm:$0xff] }
 0xafb   : > { %5234 = vst [vmem:[#allocation1] ss:$4 sm:$0xff] %v7995_v36  ;;  %5837 = vmatpush.msrb.mxu3 %v5662_v18  ;;  %v5644_v36 = vld [vmem:[%s10195_s5 + $0x8] sm:$0xff]  ;;  %v9386_v1 = vpop.permute.xlu0 %6239  ;;  %5746 = vmatpush.msrb.mxu2 %v5645_v7  ;;  %v10887_v18 = vld [vmem:[#allocation66_spill] sm:$0xff] }
 0xafc   : > { %5235 = vst [vmem:[#allocation1 + $0x1] ss:$4 sm:$0xff] %v10884_v34  ;;  %v10888_v34 = vld [vmem:[#allocation45_spill] sm:$0xff] }
 0xafd   : > { %5236 = vst [vmem:[#allocation1 + $0x2] ss:$4 sm:$0xff] %v10885_v29  ;;  %5838 = vmatpush.msrb.mxu3 %v5661_v63  ;;  %v5643_v29 = vld [vmem:[%s10195_s5] sm:$0xff]  ;;  %5747 = vmatpush.msrb.mxu2 %v5644_v36  ;;  %v5677_v63 = vld [vmem:[%s10195_s5 + $0x110] sm:$0xff] }
 0xafe   : > { %10886 = vst [vmem:[#allocation34_spill] sm:$0xff] %v9386_v1  ;;  %5930 = vmatpush.msrb.mxu0 %v5677_v63  ;;  %6163 = vmatpush.msra.mxu1 %v5677_v63  ;;  %v10900_v63 = vld [vmem:[#allocation154_spill] sm:$0xff]  ;;  %v10907_v1 = vld [vmem:[#allocation204_spill] sm:$0xff] }
 0xaff   : > { %5237 = vst [vmem:[#allocation1 + $0x3] ss:$4 sm:$0xff] %v10887_v18  ;;  %5839 = vmatpush.msrb.mxu3 %v5660_v54  ;;  %5748 = vmatpush.msrb.mxu2 %v5643_v29  ;;  %v9404_v7 = vpop.permute.xlu2 %6234  ;;  %v9428_v18 = vld [vmem:[#allocation3 + $0xb9] sm:$0x3f] }
 0xb00   : > { %v5183_v19 = vld.sshfl [vmem:[#allocation1 + $0x20] sm:$0xff pattern:$0x73625140]  ;;  %6299 = vrot.lane.b32.xlu1 %v6298_v61, %s6627_s10  ;;  %10890 = vst [vmem:[#allocation100_spill] sm:$0xff] %v9404_v7 }
 0xb01   : > { %v6293_v27 = vpack.i.bf16 %v5183_v19, %v10888_v34  ;;  %5188 = vst [vmem:[#allocation1 + $0x20] ss:$4 sm:$0xff] %v3640_v4  ;;  %v5659_v61 = vld [vmem:[%s10195_s5 + $0x80] sm:$0xff]  ;;  %v10889_v19 = vld [vmem:[#allocation151_spill] sm:$0xff]  ;;  %v9416_v4 = vpop.permute.xlu1 %6244  ;;  %v10895_v34 = vld [vmem:[#allocation70_spill] sm:$0xff] }
 0xb02   : > { %5189 = vst [vmem:[#allocation1 + $0x21] ss:$4 sm:$0xff] %v10748_v13  ;;  %5840 = vmatpush.msrb.mxu3 %v5659_v61  ;;  %v6303_v13 = vpack.i.bf16 %v8910_v9, %v8980_v44  ;;  %v5675_v9 = vld [vmem:[%s10195_s5 + $0x100] sm:$0xff]  ;;  %v10896_v61 = vld [vmem:[#allocation201_spill] sm:$0xff] }
 0xb03   : > { %6294 = vrot.lane.b32.xlu0 %v6293_v27, %s6627_s10  ;;  %5190 = vst [vmem:[#allocation1 + $0x22] ss:$4 sm:$0xff] %v10749_v26  ;;  %v5676_v27 = vld [vmem:[%s10195_s5 + $0x108] sm:$0xff]  ;;  %v9418_v36 = vpop.permute.xlu0 %6259  ;;  %v10893_v44 = vld [vmem:[#allocation160_spill] sm:$0xff] }
 0xb04   : > { %5191 = vst [vmem:[#allocation1 + $0x23] ss:$4 sm:$0xff] %v10889_v19  ;;  %v6323_v54 = vpack.i.bf16 %v9223_v47, %v10893_v44  ;;  %5931 = vmatpush.msrb.mxu0 %v5676_v27  ;;  %6164 = vmatpush.msra.mxu1 %v5676_v27  ;;  %v10901_v27 = vld [vmem:[#allocation175_spill] sm:$0xff] }
 0xb05   : > { %10891 = vst [vmem:[#allocation35_spill] sm:$0xff] %v9416_v4  ;;  %v6313_v44 = vpack.i.bf16 %v9145_v21, %v10901_v27  ;;  %v10903_v27 = vld [vmem:[#allocation162_spill] sm:$0xff] }
 0xb06   : > { %v9414_v26 = vld.sshfl [vmem:[#allocation1] sm:$0xff pattern:$0x73625140]  ;;  %10892 = vst [vmem:[#allocation94_spill] sm:$0xff] %v9418_v36  ;;  %5932 = vmatpush.msrb.mxu0 %v5675_v9  ;;  %6165 = vmatpush.msra.mxu1 %v5675_v9 }
 0xb07   : > { %5244 = vst [vmem:[#allocation1] ss:$4 sm:$0xff] %v8435_v3  ;;  %v10897_v3 = vld [vmem:[#allocation52_spill] sm:$0xff]  ;;  %v9435_v47 = vpop.permute.xlu2 %6249 }
 0xb08   : > { %6304 = vrot.lane.b32.xlu1 %v6303_v13, %s6628_s11  ;;  %5245 = vst [vmem:[#allocation1 + $0x1] ss:$4 sm:$0xff] %v10894_v2  ;;  %v10899_v13 = vld [vmem:[#allocation53_spill] sm:$0xff]  ;;  %v9448_v9 = vld [vmem:[#allocation3 + $0xc9] sm:$0x3f] }
 0xb09   : > { %5246 = vst [vmem:[#allocation1 + $0x2] ss:$4 sm:$0xff] %v10895_v34  ;;  %v9443_v2 = vpop.permute.xlu1 %6254 }
 0xb0a   : > { %5247 = vst [vmem:[#allocation1 + $0x3] ss:$4 sm:$0xff] %v9428_v18  ;;  %v6256_v21 = vunpack.i.l.bf16 %v9443_v2 }
 0xb0b   : > { %v5193_v29 = vld.sshfl [vmem:[#allocation1 + $0x20] sm:$0xff pattern:$0x73625140]  ;;  %6324 = vrot.lane.b32.xlu0 %v6323_v54, %s6627_s10  ;;  %10898 = vst [vmem:[#allocation36_spill] sm:$0xff] %v9435_v47  ;;  %v10902_v54 = vld [vmem:[#allocation155_spill] sm:$0xff]  ;;  %v9445_v34 = vpop.permute.xlu0 %6264  ;;  %v10906_v47 = vld [vmem:[#allocation101_spill] sm:$0xff] }
 0xb0c   : > { %v6318_v19 = vpack.i.bf16 %v5193_v29, %v10896_v61  ;;  %5198 = vst [vmem:[#allocation1 + $0x20] ss:$4 sm:$0xff] %v10897_v3  ;;  %v6196_v29 = vunpack.i.l.bf16 %v9277_v59  ;;  %v6328_v61 = vpack.i.bf16 %v8919_v41, %v8993_v55  ;;  %v10905_v55 = vld [vmem:[#allocation7_spill] sm:$0xff] }
 0xb0d   : > { %5199 = vst [vmem:[#allocation1 + $0x21] ss:$4 sm:$0xff] %v10899_v13  ;;  %v6266_v13 = vunpack.i.l.bf16 %v9445_v34 }
 0xb0e   : > { %6319 = vrot.lane.b32.xlu2 %v6318_v19, %s6627_s10  ;;  %5200 = vst [vmem:[#allocation1 + $0x22] ss:$4 sm:$0xff] %v10900_v63  ;;  %v6262_v19 = vunpack.i.h.bf16 %v9418_v36  ;;  %v3679_v63 = vrot.slane %v9448_v9, 2  ;;  %v5492_v36 = vsel %vm2464_vm1, %v10905_v55, %v6196_v29  ;;  %v10908_v29 = vld [vmem:[#allocation55_spill] sm:$0xff] }
 0xb0f   : > { %5201 = vst [vmem:[#allocation1 + $0x23] ss:$4 sm:$0xff] %v10902_v54  ;;  %v10904_v54 = vld [vmem:[#allocation165_spill] sm:$0xff] }
 0xb10   : > { %6314 = vrot.lane.b32.xlu1 %v6313_v44, %s6626_s14  ;;  %v6348_v44 = vpack.i.bf16 %v9244_v39, %v10903_v27  ;;  %v5568_v7 = vsel %vm2464_vm1, %v10907_v1, %v6262_v19  ;;  %v5517_v27 = vsel %vm296_vm0, %v5492_v36, %v6256_v21  ;;  %v10911_v1 = vld [vmem:[#allocation158_spill] sm:$0xff]  ;;  %v6353_v36 = vpack.i.bf16 %v8932_v23, %v9002_v43  ;;  %v10914_v23 = vld [vmem:[#allocation59_spill] sm:$0xff] }
 0xb11   : > { %v9454_v3 = vld.sshfl [vmem:[#allocation1] sm:$0xff pattern:$0x73625140]  ;;  %v10912_v21 = vld [vmem:[#allocation202_spill] sm:$0xff]  ;;  %v3659_v43 = vrot.slane %v9289_v60, 2 }
 0xb12   : > { %5254 = vst [vmem:[#allocation1] ss:$4 sm:$0xff] %v8463_v33 }
 0xb13   : > { %6329 = vrot.lane.b32.xlu0 %v6328_v61, %s6628_s11  ;;  %5255 = vst [vmem:[#allocation1 + $0x1] ss:$4 sm:$0xff] %v10904_v54  ;;  %v6333_v61 = vpack.i.bf16 %v9074_v5, %v10906_v47  ;;  %v5593_v54 = vsel %vm296_vm0, %v5568_v7, %v6266_v13  ;;  %v10909_v5 = vld [vmem:[#allocation56_spill] sm:$0xff]  ;;  %v3593_v7 = vld [vmem:[#allocation3 + $0xd9] sm:$0x3f] }
 0xb14   : > { %5256 = vst [vmem:[#allocation1 + $0x2] ss:$4 sm:$0xff] %v9448_v9  ;;  %v10910_v47 = vld [vmem:[#allocation180_spill] sm:$0xff]  ;;  %v3684_v19 = vrot.slane %v3593_v7, 2 }
 0xb15   : > { %v6275_v41 = vpop.permute.xlu2 %6274  ;;  %5257 = vst [vmem:[#allocation1 + $0x3] ss:$4 sm:$0xff] %v3679_v63 }
 0xb16   : > { %6349 = vrot.lane.b32.xlu2 %v6348_v44, %s6627_s10  ;;  %v6277_v33 = vunpack.i.h.bf16 %v6275_v41  ;;  %v6276_v4 = vunpack.i.l.bf16 %v6275_v41  ;;  %v5203_v39 = vld.sshfl [vmem:[#allocation1 + $0x20] sm:$0xff pattern:$0x73625140]  ;;  %v6338_v41 = vpack.i.bf16 %v9154_v14, %v10910_v47  ;;  %v3685_v14 = vrot.slane %v3593_v7, 4 }
 0xb17   : > { %5208 = vst [vmem:[#allocation1 + $0x20] ss:$4 sm:$0xff] %v10908_v29  ;;  %v6343_v13 = vpack.i.bf16 %v5203_v39, %v10912_v21  ;;  %v3595_v39 = vld [vmem:[#allocation3 + $0xe9] sm:$0x3f] }
 0xb18   : > { %6334 = vrot.lane.b32.xlu1 %v6333_v61, %s6626_s14  ;;  %v5543_v44 = vsel %vm5542_vm5, %v5517_v27, %v6276_v4  ;;  %v5618_v55 = vsel %vm5542_vm5, %v5593_v54, %v6277_v33  ;;  %5209 = vst [vmem:[#allocation1 + $0x21] ss:$4 sm:$0xff] %v10909_v5  ;;  %v10915_v33 = vld [vmem:[#allocation184_spill] sm:$0xff]  ;;  %v3689_v54 = vrot.slane %v3595_v39, 2  ;;  %v3585_v5 = vld [vmem:[#allocation3 + $0x99] sm:$0x3f] }
 0xb19   : > { %5749 = vmatmul.f32.vlgmr.msrb.gmra.mxu2 %v5543_v44  ;;  %5841 = vmatmul.f32.vlgmr.msrb.gmra.mxu3 %v5618_v55  ;;  %5210 = vst [vmem:[#allocation1 + $0x22] ss:$4 sm:$0xff] %v10911_v1  ;;  %v3690_v44 = vrot.slane %v3595_v39, 4  ;;  %v9507_v55 = vld [vmem:[#allocation3 + $0xf1] sm:$0xff]  ;;  %v9514_v1 = vld [vmem:[#allocation3 + $0xf9] sm:$0x3f] }
 0xb1a   : > { %5211 = vst [vmem:[#allocation1 + $0x23] ss:$4 sm:$0xff] %v9252_v48  ;;  %v10913_v48 = vld [vmem:[#allocation107_spill] sm:$0xff]  ;;  %v3694_v21 = vrot.slane %v9514_v1, 2 }
 0xb1b   : > { %6339 = vrot.lane.b32.xlu0 %v6338_v41, %s6626_s14  ;;  %v6358_v63 = vpack.i.bf16 %v9093_v40, %v10913_v48  ;;  %v10916_v40 = vld [vmem:[#allocation164_spill] sm:$0xff]  ;;  %v3664_v41 = vrot.slane %v3585_v5, 2 }
 0xb1c   : > { %v9486_v4 = vld.sshfl [vmem:[#allocation1] sm:$0xff pattern:$0x73625140]  ;;  %v6373_v27 = vpack.i.bf16 %v9275_v25, %v10916_v40  ;;  %v10923_v40 = vld [vmem:[#allocation169_spill] sm:$0xff] }
 0xb1d   : > { %5264 = vst [vmem:[#allocation1] ss:$4 sm:$0xff] %v8492_v12  ;;  %v6363_v12 = vpack.i.bf16 %v9165_v58, %v10915_v33 }
 0xb1e   : > { %6354 = vrot.lane.b32.xlu2 %v6353_v36, %s6628_s11  ;;  %5265 = vst [vmem:[#allocation1 + $0x1] ss:$4 sm:$0xff] %v3593_v7  ;;  %v10919_v7 = vld [vmem:[#allocation64_spill] sm:$0xff]  ;;  %v3665_v36 = vrot.slane %v3585_v5, 4 }
 0xb1f   : > { %5266 = vst [vmem:[#allocation1 + $0x2] ss:$4 sm:$0xff] %v3684_v19  ;;  %v6378_v19 = vpack.i.bf16 %v8951_v56, %v9015_v45  ;;  %v10922_v56 = vld [vmem:[#allocation185_spill] sm:$0xff] }
 0xb20   : > { %6344 = vrot.lane.b32.xlu1 %v6343_v13, %s6627_s10  ;;  %5267 = vst [vmem:[#allocation1 + $0x3] ss:$4 sm:$0xff] %v3685_v14  ;;  %v10920_v13 = vld [vmem:[#allocation166_spill] sm:$0xff]  ;;  %v6388_v45 = vpack.i.bf16 %v9177_v38, %v10922_v56  ;;  %v6423_v38 = vpack.i.bf16 %v9362_v0, %v10923_v40 }
 0xb21   : > { %v5213_v61 = vld.sshfl [vmem:[#allocation1 + $0x20] sm:$0xff pattern:$0x73625140]  ;;  %v6398_v14 = vpack.i.bf16 %v9315_v30, %v10920_v13  ;;  %v6403_v30 = vpack.i.bf16 %v8959_v20, %v9025_v17  ;;  %v10925_v20 = vld [vmem:[#allocation93_spill] sm:$0xff] }
 0xb22   : > { %5218 = vst [vmem:[#allocation1 + $0x20] ss:$4 sm:$0xff] %v10914_v23 }
 0xb23   : > { %6359 = vrot.lane.b32.xlu0 %v6358_v63, %s6626_s14  ;;  %5219 = vst [vmem:[#allocation1 + $0x21] ss:$4 sm:$0xff] %v10765_v8  ;;  %v10917_v8 = vld [vmem:[#allocation203_spill] sm:$0xff]  ;;  %v3587_v63 = vld [vmem:[#allocation3 + $0xa9] sm:$0x3f] }
 0xb24   : > { %5220 = vst [vmem:[#allocation1 + $0x22] ss:$4 sm:$0xff] %v9289_v60  ;;  %v6368_v58 = vpack.i.bf16 %v5213_v61, %v10917_v8  ;;  %v10918_v60 = vld [vmem:[#allocation115_spill] sm:$0xff]  ;;  %v10921_v61 = vld [vmem:[#allocation205_spill] sm:$0xff] }
 0xb25   : > { %5221 = vst [vmem:[#allocation1 + $0x23] ss:$4 sm:$0xff] %v3659_v43  ;;  %v6383_v25 = vpack.i.bf16 %v9103_v37, %v10918_v60  ;;  %v3695_v37 = vrot.slane %v9514_v1, 4  ;;  %v3669_v43 = vrot.slane %v3587_v63, 2  ;;  %v10932_v60 = vld [vmem:[#allocation170_spill] sm:$0xff] }
 0xb26   : > { %6364 = vrot.lane.b32.xlu2 %v6363_v12, %s6626_s14  ;;  %v3670_v12 = vrot.slane %v3587_v63, 4 }
 0xb27   : > { %v9504_v29 = vld.sshfl [vmem:[#allocation1] sm:$0xff pattern:$0x73625140] }
 0xb28   : > { %6374 = vrot.lane.b32.xlu1 %v6373_v27, %s6627_s10  ;;  %5274 = vst [vmem:[#allocation1] ss:$4 sm:$0xff] %v3595_v39  ;;  %v10924_v27 = vld [vmem:[#allocation124_spill] sm:$0xff] }
 0xb29   : > { %5275 = vst [vmem:[#allocation1 + $0x1] ss:$4 sm:$0xff] %v3689_v54  ;;  %v6408_v17 = vpack.i.bf16 %v9114_v57, %v10924_v27  ;;  %v10926_v54 = vld [vmem:[#allocation186_spill] sm:$0xff] }
 0xb2a   : > { %5276 = vst [vmem:[#allocation1 + $0x2] ss:$4 sm:$0xff] %v3690_v44  ;;  %v6413_v0 = vpack.i.bf16 %v9186_v50, %v10926_v54  ;;  %v10928_v50 = vld [vmem:[#allocation67_spill] sm:$0xff]  ;;  %v10949_v54 = vld [vmem:[#allocation224_spill] sm:$0xff] }
 0xb2b   : > { %6369 = vrot.lane.b32.xlu0 %v6368_v58, %s6627_s10  ;;  %5277 = vst [vmem:[#allocation1 + $0x3] ss:$4 sm:$0xff] %v9507_v55  ;;  %v10931_v58 = vld [vmem:[#allocation187_spill] sm:$0xff] }
 0xb2c   : > { %v5223_v47 = vld.sshfl [vmem:[#allocation1 + $0x20] sm:$0xff pattern:$0x73625140] }
 0xb2d   : > { %5228 = vst [vmem:[#allocation1 + $0x20] ss:$4 sm:$0xff] %v10919_v7  ;;  %v6393_v23 = vpack.i.bf16 %v5223_v47, %v10921_v61  ;;  %v9580_v47 = vld [vmem:[#allocation3 + $0x4a] sm:$0x3f] }
 0xb2e   : > { %6384 = vrot.lane.b32.xlu2 %v6383_v25, %s6626_s14  ;;  %5229 = vst [vmem:[#allocation1 + $0x21] ss:$4 sm:$0xff] %v3585_v5  ;;  %v6448_v25 = vpack.i.bf16 %v9414_v26, %v10932_v60  ;;  %v10935_v7 = vld [vmem:[#allocation168_spill] sm:$0xff]  ;;  %v3765_v26 = vrot.slane %v9580_v47, 2 }
 0xb2f   : > { %5230 = vst [vmem:[#allocation1 + $0x22] ss:$4 sm:$0xff] %v3664_v41  ;;  %v10934_v41 = vld [vmem:[#allocation209_spill] sm:$0xff] }
 0xb30   : > { %5231 = vst [vmem:[#allocation1 + $0x23] ss:$4 sm:$0xff] %v3665_v36  ;;  %6379 = vrot.lane.b32.xlu1 %v6378_v19, %s6628_s11  ;;  %v10936_v36 = vld [vmem:[#allocation138_spill] sm:$0xff]  ;;  %v10937_v19 = vld [vmem:[#allocation176_spill] sm:$0xff] }
 0xb32   : > { %v9525_v48 = vld.sshfl [vmem:[#allocation1] sm:$0xff pattern:$0x73625140] }
 0xb33   : > { %6399 = vrot.lane.b32.xlu0 %v6398_v14, %s6627_s10  ;;  %5284 = vst [vmem:[#allocation1] ss:$4 sm:$0xff] %v3694_v21  ;;  %v10938_v21 = vld [vmem:[#allocation69_spill] sm:$0xff] }
 0xb34   : > { %5285 = vst [vmem:[#allocation1 + $0x1] ss:$4 sm:$0xff] %v3695_v37  ;;  %v10939_v37 = vld [vmem:[#allocation223_spill] sm:$0xff] }
 0xb35   : > { %v6453_v13 = vpack.i.bf16 %v10939_v37, %v10938_v21 }
 0xb36   : > { %6394 = vrot.lane.b32.xlu2 %v6393_v23, %s6627_s10  ;;  %v3703_v23 = vld [vmem:[#allocation3 + $0x5a] sm:$0x3f] }
 0xb37   : > { %v5233_v33 = vld.sshfl [vmem:[#allocation1 + $0x20] sm:$0xff pattern:$0x73625140]  ;;  %v3771_v27 = vrot.slane %v3703_v23, 4 }
 0xb38   : > { %6389 = vrot.lane.b32.xlu1 %v6388_v45, %s6626_s14  ;;  %5238 = vst [vmem:[#allocation1 + $0x20] ss:$4 sm:$0xff] %v3587_v63  ;;  %v10941_v63 = vld [vmem:[#allocation171_spill] sm:$0xff] }
 0xb39   : > { %5239 = vst [vmem:[#allocation1 + $0x21] ss:$4 sm:$0xff] %v3669_v43  ;;  %v6473_v61 = vpack.i.bf16 %v9454_v3, %v10941_v63  ;;  %v10945_v43 = vld [vmem:[#allocation104_spill] sm:$0xff]  ;;  %v10946_v3 = vld [vmem:[#allocation135_spill] sm:$0xff] }
 0xb3a   : > { %5240 = vst [vmem:[#allocation1 + $0x22] ss:$4 sm:$0xff] %v3670_v12  ;;  %v6463_v40 = vpack.i.bf16 %v9217_v46, %v10946_v3  ;;  %v10950_v46 = vld [vmem:[#allocation173_spill] sm:$0xff] }
 0xb3b   : > { %6404 = vrot.lane.b32.xlu0 %v6403_v30, %s6628_s11  ;;  %5241 = vst [vmem:[#allocation1 + $0x23] ss:$4 sm:$0xff] %v8020_v22  ;;  %v9537_v39 = vld.sshfl [vmem:[#allocation1] sm:$0xff pattern:$0x73625140]  ;;  %v3674_v22 = vrot.slane %v9428_v18, 2 }
 0xb3c   : > { %5362 = vst [vmem:[#allocation1] ss:$4 sm:$0xff] %v8120_v31  ;;  %v3675_v31 = vrot.slane %v9428_v18, 4  ;;  %v10929_v18 = vld [vmem:[#allocation131_spill] sm:$0xff]  ;;  %v3770_v30 = vrot.slane %v3703_v23, 2 }
 0xb3d   : > { %5364 = vst [vmem:[#allocation1 + $0x1] ss:$4 sm:$0xff] %v8528_v42  ;;  %v6428_v42 = vpack.i.bf16 %v8971_v24, %v9034_v15  ;;  %v6433_v15 = vpack.i.bf16 %v9123_v32, %v10929_v18  ;;  %v9566_v24 = vld [vmem:[#allocation3 + $0x3a] sm:$0x3f]  ;;  %v10933_v32 = vld [vmem:[#allocation167_spill] sm:$0xff] }
 0xb3e   : > { %6424 = vrot.lane.b32.xlu2 %v6423_v38, %s6627_s10  ;;  %5366 = vst [vmem:[#allocation1 + $0x2] ss:$4 sm:$0xff] %v10767_v52  ;;  %v10927_v52 = vld [vmem:[#allocation207_spill] sm:$0xff]  ;;  %v10947_v38 = vld [vmem:[#allocation181_spill] sm:$0xff] }
 0xb3f   : > { %5368 = vst [vmem:[#allocation1 + $0x3] ss:$4 sm:$0xff] %v10925_v20  ;;  %v6418_v57 = vpack.i.bf16 %v5233_v33, %v10927_v52  ;;  %v3692_v20 = vrot.slane %v9507_v55, 4  ;;  %v6498_v52 = vpack.i.bf16 %v9486_v4, %v10950_v46  ;;  %v10952_v18 = vld [vmem:[#allocation79_spill] sm:$0xff] }
 0xb40   : > { %6409 = vrot.lane.b32.xlu1 %v6408_v17, %s6626_s14  ;;  %v3691_v17 = vrot.slane %v9507_v55, 2 }
 0xb42   : > { %v5243_v44 = vld.sshfl [vmem:[#allocation1 + $0x20] sm:$0xff pattern:$0x73625140] }
 0xb43   : > { %6414 = vrot.lane.b32.xlu0 %v6413_v0, %s6626_s14  ;;  %5248 = vst [vmem:[#allocation1 + $0x20] ss:$4 sm:$0xff] %v3674_v22  ;;  %v10948_v22 = vld [vmem:[#allocation9_spill] sm:$0xff] }
 0xb44   : > { %5249 = vst [vmem:[#allocation1 + $0x21] ss:$4 sm:$0xff] %v3675_v31  ;;  %v6478_v0 = vpack.i.bf16 %v10949_v54, %v10948_v22  ;;  %v6280_v31 = vpop.permute.xlu2 %6279 }
 0xb45   : > { %5250 = vst [vmem:[#allocation1 + $0x22] ss:$4 sm:$0xff] %v8452_v51  ;;  %v10930_v51 = vld [vmem:[#allocation97_spill] sm:$0xff] }
 0xb46   : > { %6429 = vrot.lane.b32.xlu2 %v6428_v42, %s6628_s11  ;;  %5251 = vst [vmem:[#allocation1 + $0x23] ss:$4 sm:$0xff] %v8457_v6  ;;  %v5377_v8 = vld.sshfl [vmem:[#allocation1] sm:$0xff pattern:$0x73625140]  ;;  %v3680_v6 = vrot.slane %v9448_v9, 4  ;;  %v6443_v9 = vpack.i.bf16 %v5243_v44, %v10934_v41  ;;  %v6267_v41 = vunpack.i.h.bf16 %v9445_v34  ;;  %v6285_v34 = vpop.permute.xlu0 %6284 }
 0xb47   : > { %6119 = vmatmul.msk.f32.vlgmr.msrb.gmra.mxu0 %vm2464_vm1, %v5377_v8  ;;  %5379 = vst [vmem:[#allocation1] ss:$4 sm:$0xff] %v8545_v49  ;;  %v6438_v49 = vpack.i.bf16 %v9199_v62, %v10931_v58  ;;  %v3693_v44 = vrot.slane %v9507_v55, 6  ;;  %v6281_v8 = vunpack.i.l.bf16 %v6280_v31  ;;  %v6287_v54 = vunpack.i.h.bf16 %v6285_v34 }
 0xb48   : > { %6419 = vrot.lane.b32.xlu1 %v6418_v57, %s6627_s10  ;;  %5380 = vst [vmem:[#allocation1 + $0x1] ss:$4 sm:$0xff] %v10928_v50  ;;  %v3705_v57 = vld [vmem:[#allocation3 + $0x6a] sm:$0x3f]  ;;  %v10951_v50 = vld [vmem:[#allocation143_spill] sm:$0xff] }
 0xb49   : > { %5381 = vst [vmem:[#allocation1 + $0x2] ss:$4 sm:$0xff] %v10930_v51  ;;  %v6197_v51 = vunpack.i.h.bf16 %v9277_v59  ;;  %v3775_v55 = vrot.slane %v3705_v57, 2  ;;  %v3776_v4 = vrot.slane %v3705_v57, 4 }
 0xb4a   : > { %5382 = vst [vmem:[#allocation1 + $0x3] ss:$4 sm:$0xff] %v9566_v24 }
 0xb4b   : > { %6434 = vrot.lane.b32.xlu0 %v6433_v15, %s6626_s14  ;;  %v6483_v15 = vpack.i.bf16 %v10952_v18, %v10951_v50 }
 0xb4c   : > { %v9667_v46 = vpop.permute.xlu2 %6289 }
 0xb4d   : > { %v5253_v5 = vld.sshfl [vmem:[#allocation1 + $0x20] sm:$0xff pattern:$0x73625140] }
 0xb4e   : > { %6439 = vrot.lane.b32.xlu2 %v6438_v49, %s6626_s14  ;;  %5258 = vst [vmem:[#allocation1 + $0x20] ss:$4 sm:$0xff] %v3680_v6  ;;  %v6468_v33 = vpack.i.bf16 %v5253_v5, %v10945_v43  ;;  %v6257_v6 = vunpack.i.h.bf16 %v9443_v2  ;;  %v10953_v49 = vld [vmem:[#allocation193_spill] sm:$0xff]  ;;  %v9656_v43 = vld [vmem:[#allocation3 + $0x7a] sm:$0x3f] }
 0xb4f   : > { %5259 = vst [vmem:[#allocation1 + $0x21] ss:$4 sm:$0xff] %v8046_v28  ;;  %v6458_v28 = vpack.i.bf16 %v9139_v53, %v10936_v36  ;;  %v10954_v5 = vld [vmem:[#allocation25_spill] sm:$0xff]  ;;  %v10957_v36 = vld [vmem:[#allocation10_spill] sm:$0xff] }
 0xb50   : > { %6449 = vrot.lane.b32.xlu1 %v6448_v25, %s6627_s10  ;;  %5260 = vst [vmem:[#allocation1 + $0x22] ss:$4 sm:$0xff] %v10933_v32  ;;  %v6488_v60 = vpack.i.bf16 %v10954_v5, %v10953_v49  ;;  %v10955_v25 = vld [vmem:[#allocation213_spill] sm:$0xff] }
 0xb51   : > { %5261 = vst [vmem:[#allocation1 + $0x23] ss:$4 sm:$0xff] %v10935_v7  ;;  %v9584_v62 = vld.sshfl [vmem:[#allocation1] sm:$0xff pattern:$0x73625140]  ;;  %v5569_v32 = vsel %vm2464_vm1, %v10955_v25, %v6281_v8  ;;  %v10966_v8 = vld [vmem:[#allocation11_spill] sm:$0xff] }
 0xb52   : > { %5389 = vst [vmem:[#allocation1] ss:$4 sm:$0xff] %v8570_v11  ;;  %v10940_v11 = vld [vmem:[#allocation150_spill] sm:$0xff]  ;;  %v10956_v7 = vld [vmem:[#allocation68_spill] sm:$0xff]  ;;  %v5594_v37 = vsel %vm296_vm0, %v5569_v32, %v6267_v41  ;;  %v10969_v25 = vld [vmem:[#allocation177_spill] sm:$0xff] }
 0xb53   : > { %6444 = vrot.lane.b32.xlu0 %v6443_v9, %s6627_s10  ;;  %5390 = vst [vmem:[#allocation1 + $0x1] ss:$4 sm:$0xff] %v10937_v19  ;;  %v10942_v53 = vrot.slane %v10940_v11, 2  ;;  %v10943_v56 = vrot.slane %v10940_v11, 4  ;;  %v10944_v45 = vrot.slane %v10940_v11, 6  ;;  %v6523_v32 = vpack.i.bf16 %v9504_v29, %v10969_v25  ;;  %v10970_v41 = vld [vmem:[#allocation122_spill] sm:$0xff] }
 0xb54   : > { %5391 = vst [vmem:[#allocation1 + $0x2] ss:$4 sm:$0xff] %v9580_v47  ;;  %v10989_v25 = vld [vmem:[#allocation29_spill] sm:$0xff] }
 0xb55   : > { %5392 = vst [vmem:[#allocation1 + $0x3] ss:$4 sm:$0xff] %v3765_v26  ;;  %v5493_v26 = vsel %vm2464_vm1, %v10956_v7, %v6197_v51  ;;  %v10968_v51 = vld [vmem:[#allocation12_spill] sm:$0xff]  ;;  %v3761_v7 = vrot.slane %v9566_v24, 4 }
 0xb56   : > { %6459 = vrot.lane.b32.xlu2 %v6458_v28, %s6626_s14  ;;  %v10958_v28 = vld [vmem:[#allocation225_spill] sm:$0xff]  ;;  %v5518_v21 = vsel %vm296_vm0, %v5493_v26, %v6257_v6 }
 0xb57   : > { %v6503_v19 = vpack.i.bf16 %v10958_v28, %v10957_v36  ;;  %v10972_v28 = vld [vmem:[#allocation210_spill] sm:$0xff] }
 0xb58   : > { %v9596_v14 = vld.sshfl [vmem:[#allocation1 + $0x20] sm:$0xff pattern:$0x73625140]  ;;  %6454 = vrot.lane.b32.xlu1 %v6453_v13, %s6628_s11  ;;  %v10959_v13 = vld [vmem:[#allocation114_spill] sm:$0xff] }
 0xb59   : > { %5268 = vst [vmem:[#allocation1 + $0x20] ss:$4 sm:$0xff] %v10940_v11  ;;  %v6282_v11 = vunpack.i.h.bf16 %v6280_v31 }
 0xb5a   : > { %5269 = vst [vmem:[#allocation1 + $0x21] ss:$4 sm:$0xff] %v10942_v53 }
 0xb5b   : > { %5270 = vst [vmem:[#allocation1 + $0x22] ss:$4 sm:$0xff] %v10943_v56  ;;  %6474 = vrot.lane.b32.xlu0 %v6473_v61, %s6627_s10  ;;  %v10960_v56 = vld [vmem:[#allocation112_spill] sm:$0xff] }
 0xb5c   : > { %5271 = vst [vmem:[#allocation1 + $0x23] ss:$4 sm:$0xff] %v10944_v45  ;;  %v9610_v12 = vld.sshfl [vmem:[#allocation1] sm:$0xff pattern:$0x73625140]  ;;  %v6493_v45 = vpack.i.bf16 %v9596_v14, %v10960_v56  ;;  %v3780_v14 = vrot.slane %v9656_v43, 2 }
 0xb5d   : > { %5399 = vst [vmem:[#allocation1] ss:$4 sm:$0xff] %v10947_v38  ;;  %v10962_v38 = vld [vmem:[#allocation148_spill] sm:$0xff]  ;;  %v10977_v56 = vld [vmem:[#allocation71_spill] sm:$0xff] }
 0xb5e   : > { %6469 = vrot.lane.b32.xlu2 %v6468_v33, %s6627_s10  ;;  %5400 = vst [vmem:[#allocation1 + $0x1] ss:$4 sm:$0xff] %v3703_v23 }
 0xb5f   : > { %5401 = vst [vmem:[#allocation1 + $0x2] ss:$4 sm:$0xff] %v3770_v30  ;;  %v10961_v30 = vld [vmem:[#allocation30_spill] sm:$0xff] }
 0xb60   : > { %6464 = vrot.lane.b32.xlu1 %v6463_v40, %s6626_s14  ;;  %5402 = vst [vmem:[#allocation1 + $0x3] ss:$4 sm:$0xff] %v3771_v27  ;;  %v6201_v3 = vunpack.i.l.bf16 %v10961_v30  ;;  %v6286_v40 = vunpack.i.l.bf16 %v6285_v34  ;;  %v10963_v27 = vld [vmem:[#allocation84_spill] sm:$0xff]  ;;  %v10974_v34 = vld [vmem:[#allocation174_spill] sm:$0xff] }
 0xb62   : > { %v5494_v50 = vsel %vm2464_vm1, %v10966_v8, %v6201_v3  ;;  %v10978_v3 = vld [vmem:[#allocation13_spill] sm:$0xff] }
 0xb63   : > { %v9622_v42 = vld.sshfl [vmem:[#allocation1 + $0x20] sm:$0xff pattern:$0x73625140]  ;;  %6479 = vrot.lane.b32.xlu0 %v6478_v0, %s6628_s11  ;;  %v5519_v6 = vsel %vm296_vm0, %v5494_v50, %v6286_v40  ;;  %v10979_v40 = vld [vmem:[#allocation227_spill] sm:$0xff]  ;;  %v10984_v50 = vld [vmem:[#allocation130_spill] sm:$0xff] }
 0xb64   : > { %5278 = vst [vmem:[#allocation1 + $0x20] ss:$4 sm:$0xff] %v3691_v17  ;;  %v6508_v17 = vpack.i.bf16 %v10963_v27, %v10962_v38  ;;  %v10965_v0 = vld [vmem:[#allocation96_spill] sm:$0xff]  ;;  %v6518_v29 = vpack.i.bf16 %v9622_v42, %v10972_v28  ;;  %v6528_v38 = vpack.i.bf16 %v10979_v40, %v10978_v3  ;;  %v10997_v28 = vld [vmem:[#allocation137_spill] sm:$0xff]  ;;  %v11007_v3 = vld [vmem:[#allocation142_spill] sm:$0xff] }
 0xb65   : > { %5279 = vst [vmem:[#allocation1 + $0x21] ss:$4 sm:$0xff] %v3692_v20  ;;  %v10964_v20 = vld [vmem:[#allocation206_spill] sm:$0xff] }
 0xb66   : > { %5280 = vst [vmem:[#allocation1 + $0x22] ss:$4 sm:$0xff] %v3693_v44  ;;  %6499 = vrot.lane.b32.xlu2 %v6498_v52, %s6627_s10  ;;  %v5570_v22 = vsel %vm2464_vm1, %v10964_v20, %v6282_v11  ;;  %v3781_v44 = vrot.slane %v9656_v43, 4  ;;  %v10976_v11 = vld [vmem:[#allocation20_spill] sm:$0xff] }
 0xb67   : > { %5281 = vst [vmem:[#allocation1 + $0x23] ss:$4 sm:$0xff] %v9514_v1  ;;  %v9634_v58 = vld.sshfl [vmem:[#allocation1] sm:$0xff pattern:$0x73625140] }
 0xb68   : > { %6484 = vrot.lane.b32.xlu1 %v6483_v15, %s6626_s14  ;;  %5409 = vst [vmem:[#allocation1] ss:$4 sm:$0xff] %v3705_v57  ;;  %v3697_v1 = vld [vmem:[#allocation3 + $0x2a] sm:$0x3f]  ;;  %v10967_v15 = vld [vmem:[#allocation198_spill] sm:$0xff] }
 0xb69   : > { %5410 = vst [vmem:[#allocation1 + $0x1] ss:$4 sm:$0xff] %v3775_v55  ;;  %v3755_v53 = vrot.slane %v3697_v1, 2  ;;  %v3756_v33 = vrot.slane %v3697_v1, 4  ;;  %v6513_v55 = vpack.i.bf16 %v10968_v51, %v10967_v15  ;;  %v3766_v15 = vrot.slane %v9580_v47, 4  ;;  %v10985_v51 = vld [vmem:[#allocation14_spill] sm:$0xff] }
 0xb6a   : > { %v6270_v59 = vpop.permute.xlu1 %6269  ;;  %5411 = vst [vmem:[#allocation1 + $0x2] ss:$4 sm:$0xff] %v3776_v4  ;;  %v5595_v4 = vsel %vm296_vm0, %v5570_v22, %v6287_v54  ;;  %v10980_v22 = vld [vmem:[#allocation128_spill] sm:$0xff]  ;;  %v10987_v47 = vld [vmem:[#allocation102_spill] sm:$0xff] }
 0xb6b   : > { %6489 = vrot.lane.b32.xlu0 %v6488_v60, %s6626_s14  ;;  %v6272_v2 = vunpack.i.h.bf16 %v6270_v59  ;;  %v6271_v9 = vunpack.i.l.bf16 %v6270_v59  ;;  %5412 = vst [vmem:[#allocation1 + $0x3] ss:$4 sm:$0xff] %v10959_v13  ;;  %v6202_v59 = vunpack.i.h.bf16 %v10961_v30 }
 0xb6d   : > { %v5544_v63 = vsel %vm5542_vm5, %v5518_v21, %v6271_v9  ;;  %v5619_v61 = vsel %vm5542_vm5, %v5594_v37, %v6272_v2  ;;  %v3760_v2 = vrot.slane %v9566_v24, 2  ;;  %v6291_v9 = vunpack.i.l.bf16 %v9667_v46  ;;  %v10973_v37 = vld [vmem:[#allocation72_spill] sm:$0xff]  ;;  %v10975_v24 = vld [vmem:[#allocation153_spill] sm:$0xff] }
 0xb6e   : > { %v9651_v23 = vld.sshfl [vmem:[#allocation1 + $0x20] sm:$0xff pattern:$0x73625140]  ;;  %6504 = vrot.lane.b32.xlu2 %v6503_v19, %s6628_s11  ;;  %5752 = vmatmul.f32.gmra.mxu2 %v5544_v63  ;;  %v5495_v13 = vsel %vm2464_vm1, %v10973_v37, %v6202_v59  ;;  %v6533_v63 = vpack.i.bf16 %v10976_v11, %v10975_v24  ;;  %v10991_v59 = vld [vmem:[#allocation179_spill] sm:$0xff]  ;;  %v11000_v24 = vld [vmem:[#allocation106_spill] sm:$0xff] }
 0xb6f   : > { %5370 = vst [vmem:[#allocation1 + $0x20] ss:$4 sm:$0xff] %v3697_v1  ;;  %5844 = vmatmul.f32.gmra.mxu3 %v5619_v61  ;;  %v10971_v1 = vld [vmem:[#allocation123_spill] sm:$0xff]  ;;  %v9692_v19 = vld [vmem:[#allocation3 + $0x8a] sm:$0x3f]  ;;  %v5520_v42 = vsel %vm296_vm0, %v5495_v13, %v6291_v9  ;;  %v10994_v9 = vld [vmem:[#allocation78_spill] sm:$0xff] }
 0xb70   : > { %5372 = vst [vmem:[#allocation1 + $0x21] ss:$4 sm:$0xff] %v3755_v53  ;;  %6494 = vrot.lane.b32.xlu1 %v6493_v45, %s6627_s10  ;;  %v3786_v61 = vrot.slane %v9692_v19, 4  ;;  %v9705_v53 = vpop.permute.xlu2 %6309  ;;  %v10999_v37 = vld [vmem:[#allocation24_spill] sm:$0xff] }
 0xb71   : > { %5374 = vst [vmem:[#allocation1 + $0x22] ss:$4 sm:$0xff] %v3756_v33  ;;  %v6311_v20 = vunpack.i.l.bf16 %v9705_v53  ;;  %v11001_v11 = vld [vmem:[#allocation108_spill] sm:$0xff] }
 0xb72   : > { %5376 = vst [vmem:[#allocation1 + $0x23] ss:$4 sm:$0xff] %v10965_v0  ;;  %v6300_v31 = vpop.permute.xlu1 %6299  ;;  %v9672_v18 = vld.sshfl [vmem:[#allocation1] sm:$0xff pattern:$0x73625140] }
 0xb73   : > { %6509 = vrot.lane.b32.xlu0 %v6508_v17, %s6626_s14  ;;  %v6302_v52 = vunpack.i.h.bf16 %v6300_v31  ;;  %v6301_v57 = vunpack.i.l.bf16 %v6300_v31  ;;  %5419 = vst [vmem:[#allocation1] ss:$4 sm:$0xff] %v3780_v14  ;;  %v6206_v17 = vunpack.i.l.bf16 %v9327_v16  ;;  %v6292_v14 = vunpack.i.h.bf16 %v9667_v46  ;;  %v10981_v0 = vld [vmem:[#allocation80_spill] sm:$0xff] }
 0xb74   : > { %5420 = vst [vmem:[#allocation1 + $0x1] ss:$4 sm:$0xff] %v3781_v44  ;;  %v6548_v31 = vpack.i.bf16 %v9525_v48, %v10981_v0  ;;  %v10982_v44 = vld [vmem:[#allocation129_spill] sm:$0xff]  ;;  %v6312_v0 = vunpack.i.h.bf16 %v9705_v53 }
 0xb75   : > { %v6295_v49 = vpop.permute.xlu0 %6294  ;;  %v5545_v5 = vsel %vm5542_vm5, %v5519_v6, %v6301_v57  ;;  %v5620_v60 = vsel %vm5542_vm5, %v5595_v4, %v6302_v52  ;;  %5421 = vst [vmem:[#allocation1 + $0x2] ss:$4 sm:$0xff] %v10970_v41  ;;  %v10983_v57 = vld [vmem:[#allocation214_spill] sm:$0xff]  ;;  %v5496_v48 = vsel %vm2464_vm1, %v10985_v51, %v6206_v17  ;;  %v10986_v4 = vld [vmem:[#allocation212_spill] sm:$0xff]  ;;  %v11009_v17 = vld [vmem:[#allocation117_spill] sm:$0xff] }
 0xb76   : > { %6514 = vrot.lane.b32.xlu2 %v6513_v55, %s6626_s14  ;;  %5755 = vmatmul.f32.gmra.mxu2 %v5545_v5  ;;  %5422 = vst [vmem:[#allocation1 + $0x3] ss:$4 sm:$0xff] %v10971_v1  ;;  %v6296_v36 = vunpack.i.l.bf16 %v6295_v49  ;;  %v6297_v52 = vunpack.i.h.bf16 %v6295_v49  ;;  %v5521_v49 = vsel %vm296_vm0, %v5496_v48, %v6311_v20  ;;  %v10990_v41 = vld [vmem:[#allocation74_spill] sm:$0xff]  ;;  %v10992_v1 = vld [vmem:[#allocation133_spill] sm:$0xff] }
 0xb77   : > { %5847 = vmatmul.f32.gmra.mxu3 %v5620_v60  ;;  %v10988_v60 = vld [vmem:[#allocation200_spill] sm:$0xff] }
 0xb78   : > { %6524 = vrot.lane.b32.xlu1 %v6523_v32, %s6627_s10  ;;  %v5546_v45 = vsel %vm5542_vm5, %v5520_v42, %v6296_v36  ;;  %v6538_v32 = vpack.i.bf16 %v10989_v25, %v10988_v60  ;;  %v11004_v42 = vld [vmem:[#allocation228_spill] sm:$0xff]  ;;  %v6320_v40 = vpop.permute.xlu2 %6319  ;;  %v11017_v25 = vld [vmem:[#allocation215_spill] sm:$0xff] }
 0xb79   : > { %v5378_v26 = vld.sshfl [vmem:[#allocation1 + $0x20] sm:$0xff pattern:$0x73625140] }
 0xb7a   : > { %6120 = vmatmul.msk.f32.gmra.mxu0 %vm2464_vm1, %v5378_v26  ;;  %5383 = vst [vmem:[#allocation1 + $0x20] ss:$4 sm:$0xff] %v3760_v2  ;;  %v9696_v21 = vpop.permute.xlu1 %6304  ;;  %v10993_v2 = vld [vmem:[#allocation188_spill] sm:$0xff]  ;;  %v10996_v26 = vld [vmem:[#allocation73_spill] sm:$0xff] }
 0xb7b   : > { %5384 = vst [vmem:[#allocation1 + $0x21] ss:$4 sm:$0xff] %v3761_v7  ;;  %6519 = vrot.lane.b32.xlu0 %v6518_v29, %s6627_s10  ;;  %v6306_v33 = vunpack.i.l.bf16 %v9696_v21  ;;  %v10995_v7 = vld [vmem:[#allocation136_spill] sm:$0xff]  ;;  %v6558_v36 = vpack.i.bf16 %v9537_v39, %v10996_v26  ;;  %v11003_v39 = vld [vmem:[#allocation183_spill] sm:$0xff]  ;;  %v6307_v20 = vunpack.i.h.bf16 %v9696_v21 }
 0xb7c   : > { %5385 = vst [vmem:[#allocation1 + $0x22] ss:$4 sm:$0xff] %v10974_v34  ;;  %v10998_v29 = vld [vmem:[#allocation156_spill] sm:$0xff] }
 0xb7d   : > { %5386 = vst [vmem:[#allocation1 + $0x23] ss:$4 sm:$0xff] %v10977_v56  ;;  %v9711_v30 = vpop.permute.xlu0 %6324  ;;  %v9715_v27 = vld.sshfl [vmem:[#allocation1] sm:$0xff pattern:$0x73625140]  ;;  %v5571_v8 = vsel %vm2464_vm1, %v10983_v57, %v6306_v33  ;;  %v6553_v13 = vpack.i.bf16 %v10999_v37, %v10998_v29  ;;  %v11005_v56 = vld [vmem:[#allocation189_spill] sm:$0xff] }
 0xb7e   : > { %6534 = vrot.lane.b32.xlu2 %v6533_v63, %s6626_s14  ;;  %5758 = vmatmul.f32.gmra.mxu2 %v5546_v45  ;;  %5429 = vst [vmem:[#allocation1] ss:$4 sm:$0xff] %v3786_v61  ;;  %v6326_v54 = vunpack.i.l.bf16 %v9711_v30  ;;  %v5596_v46 = vsel %vm296_vm0, %v5571_v8, %v6292_v14  ;;  %v11002_v63 = vld [vmem:[#allocation182_spill] sm:$0xff]  ;;  %v9784_v14 = vld [vmem:[#allocation3 + $0xca] sm:$0x3f]  ;;  %v6327_v8 = vunpack.i.h.bf16 %v9711_v30 }
 0xb7f   : > { %5430 = vst [vmem:[#allocation1 + $0x1] ss:$4 sm:$0xff] %v10980_v22  ;;  %v5621_v6 = vsel %vm5542_vm5, %v5596_v46, %v6297_v52  ;;  %v11006_v45 = vld [vmem:[#allocation190_spill] sm:$0xff]  ;;  %v11010_v22 = vld [vmem:[#allocation89_spill] sm:$0xff]  ;;  %v3805_v57 = vrot.slane %v9784_v14, 2  ;;  %v11013_v21 = vld [vmem:[#allocation208_spill] sm:$0xff]  ;;  %v6207_v46 = vunpack.i.h.bf16 %v9327_v16 }
 0xb80   : > { %6529 = vrot.lane.b32.xlu1 %v6528_v38, %s6628_s11  ;;  %5431 = vst [vmem:[#allocation1 + $0x2] ss:$4 sm:$0xff] %v10982_v44  ;;  %5850 = vmatmul.f32.gmra.mxu3 %v5621_v6  ;;  %v5547_v5 = vsel %vm5542_vm5, %v5521_v49, %v6326_v54  ;;  %v9775_v33 = vld [vmem:[#allocation3 + $0xba] sm:$0x3f]  ;;  %v11008_v38 = vld [vmem:[#allocation116_spill] sm:$0xff]  ;;  %v6350_v51 = vpop.permute.xlu2 %6349 }
 0xb81   : > { %5432 = vst [vmem:[#allocation1 + $0x3] ss:$4 sm:$0xff] %v10984_v50  ;;  %v11011_v52 = vld [vmem:[#allocation194_spill] sm:$0xff]  ;;  %v11012_v50 = vld [vmem:[#allocation195_spill] sm:$0xff] }
 0xb82   : > { %6121 = vmatmul.msk.f32.gmra.mxu0 %vm2464_vm1, %v9584_v62  ;;  %v6543_v62 = vpack.i.bf16 %v9651_v23, %v10986_v4  ;;  %v11014_v4 = vld [vmem:[#allocation125_spill] sm:$0xff]  ;;  %v3719_v49 = vld [vmem:[#allocation3 + $0xda] sm:$0x3f] }
 0xb83   : > { %6549 = vrot.lane.b32.xlu0 %v6548_v31, %s6627_s10  ;;  %v6315_v31 = vpop.permute.xlu1 %6314  ;;  %v3811_v37 = vrot.slane %v3719_v49, 4 }
 0xb84   : > { %v5388_v55 = vld.sshfl [vmem:[#allocation1 + $0x20] sm:$0xff pattern:$0x73625140]  ;;  %v6316_v30 = vunpack.i.l.bf16 %v6315_v31  ;;  %v6317_v6 = vunpack.i.h.bf16 %v6315_v31  ;;  %v6352_v31 = vunpack.i.h.bf16 %v6350_v51 }
 0xb85   : > { %5393 = vst [vmem:[#allocation1 + $0x20] ss:$4 sm:$0xff] %v3766_v15  ;;  %v6330_v44 = vpop.permute.xlu0 %6329  ;;  %v5572_v15 = vsel %vm2464_vm1, %v11013_v21, %v6307_v20  ;;  %v11022_v20 = vld [vmem:[#allocation132_spill] sm:$0xff] }
 0xb86   : > { %5394 = vst [vmem:[#allocation1 + $0x21] ss:$4 sm:$0xff] %v10987_v47  ;;  %6544 = vrot.lane.b32.xlu2 %v6543_v62, %s6627_s10  ;;  %5761 = vmatmul.f32.gmra.mxu2 %v5547_v5  ;;  %v6331_v48 = vunpack.i.l.bf16 %v6330_v44  ;;  %v11015_v62 = vld [vmem:[#allocation126_spill] sm:$0xff]  ;;  %v6321_v5 = vunpack.i.l.bf16 %v6320_v40  ;;  %v11016_v47 = vld [vmem:[#allocation77_spill] sm:$0xff] }
 0xb87   : > { %5395 = vst [vmem:[#allocation1 + $0x22] ss:$4 sm:$0xff] %v10990_v41  ;;  %v5497_v60 = vsel %vm2464_vm1, %v11016_v47, %v6207_v46  ;;  %v11018_v41 = vld [vmem:[#allocation31_spill] sm:$0xff]  ;;  %v9845_v46 = vld [vmem:[#allocation3 + $0xf2] sm:$0xff] }
 0xb88   : > { %5396 = vst [vmem:[#allocation1 + $0x23] ss:$4 sm:$0xff] %v10991_v59  ;;  %6539 = vrot.lane.b32.xlu1 %v6538_v32, %s6626_s14  ;;  %v9748_v23 = vld.sshfl [vmem:[#allocation1] sm:$0xff pattern:$0x73625140]  ;;  %v5522_v16 = vsel %vm296_vm0, %v5497_v60, %v6316_v30  ;;  %v5573_v32 = vsel %vm2464_vm1, %v11017_v25, %v6331_v48  ;;  %v6211_v59 = vunpack.i.l.bf16 %v11018_v41 }
 0xb89   : > { %5439 = vst [vmem:[#allocation1] ss:$4 sm:$0xff] %v10992_v1  ;;  %v6322_v1 = vunpack.i.h.bf16 %v6320_v40  ;;  %v5548_v26 = vsel %vm5542_vm5, %v5522_v16, %v6321_v5  ;;  %v3713_v48 = vld [vmem:[#allocation3 + $0xaa] sm:$0x3f]  ;;  %v9854_v5 = vld [vmem:[#allocation3 + $0xfa] sm:$0x3f] }
 0xb8a   : > { %6122 = vmatmul.msk.f32.gmra.mxu0 %vm2464_vm1, %v5388_v55  ;;  %5440 = vst [vmem:[#allocation1 + $0x1] ss:$4 sm:$0xff] %v10993_v2  ;;  %v11024_v25 = vld [vmem:[#allocation152_spill] sm:$0xff] }
 0xb8b   : > { %4923 = vrot.lane.b32.xlu0 %v10994_v9, %s6628_s11  ;;  %5441 = vst [vmem:[#allocation1 + $0x2] ss:$4 sm:$0xff] %v10995_v7  ;;  %v6335_v9 = vpop.permute.xlu1 %6334 }
 0xb8c   : > { %5442 = vst [vmem:[#allocation1 + $0x3] ss:$4 sm:$0xff] %v10997_v28  ;;  %v11019_v28 = vld [vmem:[#allocation199_spill] sm:$0xff]  ;;  %v6336_v29 = vunpack.i.l.bf16 %v6335_v9 }
 0xb8d   : > { %v9817_v7 = vpop.permute.xlu0 %6339 }
 0xb8e   : > { %6559 = vrot.lane.b32.xlu2 %v6558_v36, %s6627_s10  ;;  %v3810_v36 = vrot.slane %v3719_v49, 2  ;;  %5764 = vmatmul.f32.gmra.mxu2 %v5548_v26  ;;  %v6342_v30 = vunpack.i.h.bf16 %v9817_v7  ;;  %v6216_v26 = vunpack.i.l.bf16 %v9340_v10 }
 0xb8f   : > { %v5398_v34 = vld.sshfl [vmem:[#allocation1 + $0x20] sm:$0xff pattern:$0x73625140] }
 0xb90   : > { %5403 = vst [vmem:[#allocation1 + $0x20] ss:$4 sm:$0xff] %v11000_v24  ;;  %6554 = vrot.lane.b32.xlu1 %v6553_v13, %s6626_s14  ;;  %v6332_v13 = vunpack.i.h.bf16 %v6330_v44  ;;  %v6337_v24 = vunpack.i.h.bf16 %v6335_v9 }
 0xb91   : > { %5404 = vst [vmem:[#allocation1 + $0x21] ss:$4 sm:$0xff] %v11001_v11  ;;  %v3711_v11 = vld [vmem:[#allocation3 + $0x9a] sm:$0x3f] }
 0xb92   : > { %6123 = vmatmul.msk.f32.gmra.mxu0 %vm2464_vm1, %v9610_v12  ;;  %5405 = vst [vmem:[#allocation1 + $0x22] ss:$4 sm:$0xff] %v11002_v63  ;;  %v11020_v63 = vld [vmem:[#allocation15_spill] sm:$0xff] }
 0xb93   : > { %5406 = vst [vmem:[#allocation1 + $0x23] ss:$4 sm:$0xff] %v11003_v39  ;;  %4925 = vrot.lane.b32.xlu0 %v11004_v42, %s6628_s11  ;;  %v9771_v61 = vld.sshfl [vmem:[#allocation1] sm:$0xff pattern:$0x73625140]  ;;  %v5498_v39 = vsel %vm2464_vm1, %v11020_v63, %v6211_v59  ;;  %v9825_v42 = vpop.permute.xlu2 %6354  ;;  %v6345_v44 = vpop.permute.xlu1 %6344  ;;  %v3795_v59 = vrot.slane %v3713_v48, 2 }
 0xb94   : > { %5449 = vst [vmem:[#allocation1] ss:$4 sm:$0xff] %v11005_v56  ;;  %v5523_v56 = vsel %vm296_vm0, %v5498_v39, %v6336_v29  ;;  %v3821_v29 = vrot.slane %v9854_v5, 4  ;;  %s6167_s11 = smul.u32 200, %s11077_s28 }
 0xb95   : > { %5450 = vst [vmem:[#allocation1 + $0x1] ss:$4 sm:$0xff] %v11006_v45  ;;  %v6351_v45 = vunpack.i.l.bf16 %v6350_v51  ;;  %v6346_v51 = vunpack.i.l.bf16 %v6345_v44 }
 0xb96   : > { %5451 = vst [vmem:[#allocation1 + $0x2] ss:$4 sm:$0xff] %v11007_v3  ;;  %v11021_v3 = vld [vmem:[#allocation38_spill] sm:$0xff]  ;;  %s9899_s13 = scalar_lea.vmem %s10197_s7, %s6167_s11 }
 0xb97   : > { %5452 = vst [vmem:[#allocation1 + $0x3] ss:$4 sm:$0xff] %v9775_v33 }
 0xb9a   : > { %6124 = vmatmul.msk.f32.gmra.mxu0 %vm2464_vm1, %v5398_v34  ;;  %v5408_v12 = vld.sshfl [vmem:[#allocation1 + $0x20] sm:$0xff pattern:$0x73625140] }
 0xb9b   : > { %5413 = vst [vmem:[#allocation1 + $0x20] ss:$4 sm:$0xff] %v11008_v38  ;;  %v3790_v38 = vrot.slane %v3711_v11, 2  ;;  %v6375_v60 = vpop.permute.xlu1 %6374 }
 0xb9c   : > { %5414 = vst [vmem:[#allocation1 + $0x21] ss:$4 sm:$0xff] %v11009_v17  ;;  %v5750_v9 = vpop.f32.mrf.mxu2  ;;  %v6377_v39 = vunpack.i.h.bf16 %v6375_v60 }
 0xb9d   : > { %5415 = vst [vmem:[#allocation1 + $0x22] ss:$4 sm:$0xff] %v11010_v22  ;;  %v3791_v22 = vrot.slane %v3711_v11, 4 }
 0xb9e   : > { %5416 = vst [vmem:[#allocation1 + $0x23] ss:$4 sm:$0xff] %v9656_v43  ;;  %v9787_v54 = vld.sshfl [vmem:[#allocation1] sm:$0xff pattern:$0x73625140]  ;;  %v5597_v43 = vsel %vm296_vm0, %v5572_v15, %v6312_v0 }
 0xb9f   : > { %5459 = vst [vmem:[#allocation1] ss:$4 sm:$0xff] %v11011_v52  ;;  %v5622_v53 = vsel %vm5542_vm5, %v5597_v43, %v6327_v8  ;;  %v3721_v0 = vld [vmem:[#allocation3 + $0xea] sm:$0x3f]  ;;  %v9836_v52 = vpop.permute.xlu0 %6359  ;;  %v6212_v8 = vunpack.i.h.bf16 %v11018_v41  ;;  %v6341_v43 = vunpack.i.l.bf16 %v9817_v7  ;;  %v9866_v41 = vld [vmem:[%s10196_s6] ss:$0 sm:$0xff] }
 0xba0   : > { %5460 = vst [vmem:[#allocation1 + $0x1] ss:$4 sm:$0xff] %v11012_v50  ;;  %5853 = vmatmul.f32.gmra.mxu3 %v5622_v53  ;;  %v3815_v21 = vrot.slane %v3721_v0, 2  ;;  %v6356_v53 = vunpack.i.l.bf16 %v9825_v42 }
 0xba1   : > { %5461 = vst [vmem:[#allocation1 + $0x2] ss:$4 sm:$0xff] %v9784_v14 }
 0xba2   : > { %6125 = vmatmul.msk.f32.gmra.mxu0 %vm2464_vm1, %v9634_v58  ;;  %5462 = vst [vmem:[#allocation1 + $0x3] ss:$4 sm:$0xff] %v3805_v57  ;;  %v3785_v58 = vrot.slane %v9692_v19, 2  ;;  %v5549_v57 = vsel %vm5542_vm5, %v5523_v56, %v6351_v45  ;;  %v11026_v56 = vld [vmem:[#allocation18_spill] sm:$0xff] }
 0xba3   : > { %5767 = vmatmul.f32.gmra.mxu2 %v5549_v57  ;;  %v5500_v45 = vsel %vm2464_vm1, %v11026_v56, %v6216_v26  ;;  %v6217_v57 = vunpack.i.h.bf16 %v9340_v10 }
 0xba5   : > { %v9802_v55 = vld.sshfl [vmem:[#allocation1 + $0x20] sm:$0xff pattern:$0x73625140] }
 0xba6   : > { %5423 = vst [vmem:[#allocation1 + $0x20] ss:$4 sm:$0xff] %v11014_v4  ;;  %v11023_v4 = vld [vmem:[#allocation83_spill] sm:$0xff] }
 0xba7   : > { %5424 = vst [vmem:[#allocation1 + $0x21] ss:$4 sm:$0xff] %v11015_v62  ;;  %v9850_v62 = vpop.permute.xlu2 %6364  ;;  %v9858_v47 = vpop.permute.xlu0 %6369 }
 0xba8   : > { %5425 = vst [vmem:[#allocation1 + $0x22] ss:$4 sm:$0xff] %v9692_v19  ;;  %v5598_v19 = vsel %vm296_vm0, %v5573_v32, %v6317_v6  ;;  %v6347_v6 = vunpack.i.h.bf16 %v6345_v44  ;;  %v5575_v32 = vsel %vm2464_vm1, %v11024_v25, %v6356_v53  ;;  %v11028_v53 = vld [vmem:[#allocation217_spill] sm:$0xff] }
 0xba9   : > { %5426 = vst [vmem:[#allocation1 + $0x23] ss:$4 sm:$0xff] %v3785_v58  ;;  %v9815_v2 = vld.sshfl [vmem:[#allocation1] sm:$0xff pattern:$0x73625140]  ;;  %v5623_v34 = vsel %vm5542_vm5, %v5598_v19, %v6322_v1  ;;  %v5499_v58 = vsel %vm2464_vm1, %v11023_v4, %v6212_v8  ;;  %v5600_v1 = vsel %vm296_vm0, %v5575_v32, %v6342_v30  ;;  %v3801_v30 = vrot.slane %v9775_v33, 4 }
 0xbaa   : > { %6126 = vmatmul.msk.f32.gmra.mxu0 %vm2464_vm1, %v5408_v12  ;;  %5469 = vst [vmem:[#allocation1] ss:$4 sm:$0xff] %v11019_v28  ;;  %5856 = vmatmul.f32.gmra.mxu3 %v5623_v34  ;;  %v5574_v12 = vsel %vm2464_vm1, %v11021_v3, %v6332_v13  ;;  %v5625_v19 = vsel %vm5542_vm5, %v5600_v1, %v6347_v6  ;;  %v6361_v28 = vunpack.i.l.bf16 %v9836_v52  ;;  %v6376_v13 = vunpack.i.l.bf16 %v6375_v60  ;;  %v5842_v3 = vpop.f32.mrf.mxu3  ;;  %v11029_v6 = vld [vmem:[#allocation88_spill] sm:$0xff]  ;;  %v11030_v32 = vld [vmem:[#allocation191_spill] sm:$0xff] }
 0xbab   : > { %5470 = vst [vmem:[#allocation1 + $0x1] ss:$4 sm:$0xff] %v3719_v49  ;;  %v5599_v17 = vsel %vm296_vm0, %v5574_v12, %v6337_v24  ;;  %v5524_v49 = vsel %vm296_vm0, %v5499_v58, %v6341_v43  ;;  %v5751_v34 = vadd.f32 %v9866_v41, %v5750_v9  ;;  %v6362_v24 = vunpack.i.h.bf16 %v9836_v52  ;;  %v11032_v1 = vld [vmem:[#allocation76_spill] sm:$0xff] }
 0xbac   : > { %5471 = vst [vmem:[#allocation1 + $0x2] ss:$4 sm:$0xff] %v3810_v36  ;;  %v5624_v50 = vsel %vm5542_vm5, %v5599_v17, %v6352_v31  ;;  %v5550_v16 = vsel %vm5542_vm5, %v5524_v49, %v6346_v51  ;;  %v3820_v36 = vrot.slane %v9854_v5, 2  ;;  %v5525_v12 = vsel %vm296_vm0, %v5500_v45, %v6361_v28  ;;  %v11033_v28 = vld [vmem:[#allocation121_spill] sm:$0xff] }
 0xbad   : > { %5472 = vst [vmem:[#allocation1 + $0x3] ss:$4 sm:$0xff] %v3811_v37  ;;  %5770 = vmatmul.f32.gmra.mxu2 %v5550_v16  ;;  %v6357_v37 = vunpack.i.h.bf16 %v9825_v42  ;;  %v5843_v42 = vadd.f32 %v5842_v3, %v5751_v34  ;;  %v6371_v43 = vunpack.i.l.bf16 %v9858_v47  ;;  %v5501_v4 = vsel %vm2464_vm1, %v11029_v6, %v6217_v57 }
 0xbae   : > { %v6372_v16 = vunpack.i.h.bf16 %v9858_v47  ;;  %v6221_v9 = vunpack.i.l.bf16 %v11032_v1  ;;  %v3806_v34 = vrot.slane %v9784_v14, 4 }
 0xbaf   : > { %v6400_v17 = vpop.permute.xlu0 %6399  ;;  %v6385_v31 = vpop.permute.xlu2 %6384 }
 0xbb0   : > { %v9830_v40 = vld.sshfl [vmem:[#allocation1 + $0x20] sm:$0xff pattern:$0x73625140]  ;;  %v6401_v47 = vunpack.i.l.bf16 %v6400_v17  ;;  %v6402_v56 = vunpack.i.h.bf16 %v6400_v17  ;;  %v11036_v17 = vld [vmem:[#allocation91_spill] sm:$0xff] }
 0xbb1   : > { %5433 = vst [vmem:[#allocation1 + $0x20] ss:$4 sm:$0xff] %v11022_v20  ;;  %v5551_v20 = vsel %vm5542_vm5, %v5525_v12, %v6376_v13 }
 0xbb2   : > { %6127 = vmatmul.msk.f32.gmra.mxu0 %vm2464_vm1, %v9672_v18  ;;  %5434 = vst [vmem:[#allocation1 + $0x21] ss:$4 sm:$0xff] %v3711_v11  ;;  %5859 = vmatmul.f32.gmra.mxu3 %v5624_v50  ;;  %v3816_v18 = vrot.slane %v3721_v0, 4  ;;  %v11025_v11 = vld [vmem:[#allocation140_spill] sm:$0xff]  ;;  %v3800_v50 = vrot.slane %v9775_v33, 2 }
 0xbb3   : > { %5435 = vst [vmem:[#allocation1 + $0x22] ss:$4 sm:$0xff] %v3790_v38  ;;  %v6380_v38 = vpop.permute.xlu1 %6379 }
 0xbb4   : > { %5436 = vst [vmem:[#allocation1 + $0x23] ss:$4 sm:$0xff] %v3791_v22  ;;  %v9841_v15 = vld.sshfl [vmem:[#allocation1] sm:$0xff pattern:$0x73625140]  ;;  %v11027_v22 = vld [vmem:[#allocation109_spill] sm:$0xff]  ;;  %v6381_v44 = vunpack.i.l.bf16 %v6380_v38  ;;  %v6382_v25 = vunpack.i.h.bf16 %v6380_v38 }
 0xbb5   : > { %5479 = vst [vmem:[#allocation1] ss:$4 sm:$0xff] %v3721_v0  ;;  %v5576_v0 = vsel %vm2464_vm1, %v11027_v22, %v6357_v37  ;;  %5773 = vmatmul.f32.gmra.mxu2 %v5551_v20  ;;  %v11034_v37 = vld [vmem:[#allocation21_spill] sm:$0xff] }
 0xbb6   : > { %5480 = vst [vmem:[#allocation1 + $0x1] ss:$4 sm:$0xff] %v3815_v21  ;;  %v5601_v52 = vsel %vm296_vm0, %v5576_v0, %v6362_v24  ;;  %v5577_v10 = vsel %vm2464_vm1, %v11028_v53, %v6381_v44  ;;  %v5502_v13 = vsel %vm2464_vm1, %v11034_v37, %v6221_v9  ;;  %v11035_v20 = vld [vmem:[#allocation149_spill] sm:$0xff]  ;;  %v11037_v44 = vld [vmem:[#allocation219_spill] sm:$0xff] }
 0xbb7   : > { %5481 = vst [vmem:[#allocation1 + $0x2] ss:$4 sm:$0xff] %v3816_v18  ;;  %v5626_v8 = vsel %vm5542_vm5, %v5601_v52, %v6377_v39  ;;  %v6222_v39 = vunpack.i.h.bf16 %v11032_v1  ;;  %v11038_v52 = vld [vmem:[#allocation196_spill] sm:$0xff] }
 0xbb8   : > { %5482 = vst [vmem:[#allocation1 + $0x3] ss:$4 sm:$0xff] %v9845_v46 }
 0xbba   : > { %6128 = vmatmul.msk.f32.gmra.mxu0 %vm2464_vm1, %v9802_v55  ;;  %v3796_v55 = vrot.slane %v3713_v48, 4  ;;  %5862 = vmatmul.f32.gmra.mxu3 %v5625_v19  ;;  %v6386_v19 = vunpack.i.l.bf16 %v6385_v31 }
 0xbbb   : > { %v9869_v7 = vld.sshfl [vmem:[#allocation1 + $0x20] sm:$0xff pattern:$0x73625140]  ;;  %v6390_v33 = vpop.permute.xlu1 %6389 }
 0xbbc   : > { %5443 = vst [vmem:[#allocation1 + $0x20] ss:$4 sm:$0xff] %v3713_v48  ;;  %v6367_v48 = vunpack.i.h.bf16 %v9850_v62  ;;  %v5527_v24 = vsel %vm296_vm0, %v5502_v13, %v6386_v19  ;;  %v6391_v38 = vunpack.i.l.bf16 %v6390_v33  ;;  %v6392_v22 = vunpack.i.h.bf16 %v6390_v33  ;;  %v11042_v33 = vld [vmem:[#allocation226_spill] sm:$0xff] }
 0xbbd   : > { %5444 = vst [vmem:[#allocation1 + $0x21] ss:$4 sm:$0xff] %v3795_v59  ;;  %v11031_v59 = vld [vmem:[#allocation192_spill] sm:$0xff]  ;;  %v5553_v12 = vsel %vm5542_vm5, %v5527_v24, %v6401_v47  ;;  %v11044_v1 = vrot.slane %v11042_v33, 2  ;;  %v11046_v47 = vrot.slane %v11042_v33, 6 }
 0xbbe   : > { %5445 = vst [vmem:[#allocation1 + $0x22] ss:$4 sm:$0xff] %v3796_v55  ;;  %v5602_v60 = vsel %vm296_vm0, %v5577_v10, %v6367_v48  ;;  %v6405_v55 = vpop.permute.xlu0 %6404 }
 0xbbf   : > { %5446 = vst [vmem:[#allocation1 + $0x23] ss:$4 sm:$0xff] %v11025_v11  ;;  %v9880_v63 = vld.sshfl [vmem:[#allocation1] sm:$0xff pattern:$0x73625140]  ;;  %v5627_v26 = vsel %vm5542_vm5, %v5602_v60, %v6372_v16  ;;  %v6406_v45 = vunpack.i.l.bf16 %v6405_v55  ;;  %v6407_v6 = vunpack.i.h.bf16 %v6405_v55 }
 0xbc0   : > { %5489 = vst [vmem:[#allocation1] ss:$4 sm:$0xff] %v3820_v36  ;;  %v6395_v36 = vpop.permute.xlu2 %6394 }
 0xbc1   : > { %5490 = vst [vmem:[#allocation1 + $0x1] ss:$4 sm:$0xff] %v3821_v29  ;;  %v6387_v29 = vunpack.i.h.bf16 %v6385_v31  ;;  %v5503_v31 = vsel %vm2464_vm1, %v11036_v17, %v6222_v39  ;;  %v6397_v53 = vunpack.i.h.bf16 %v6395_v36  ;;  %v11047_v39 = vld [vmem:[#allocation95_spill] sm:$0xff] }
 0xbc2   : > { %6129 = vmatmul.msk.f32.gmra.mxu0 %vm2464_vm1, %v9715_v27  ;;  %v6366_v27 = vunpack.i.l.bf16 %v9850_v62  ;;  %5865 = vmatmul.f32.gmra.mxu3 %v5626_v8  ;;  %v5528_v8 = vsel %vm296_vm0, %v5503_v31, %v6391_v38  ;;  %v11048_v38 = vld [vmem:[#allocation60_spill] sm:$0xff] }
 0xbc3   : > { %v6410_v3 = vpop.permute.xlu1 %6409 }
 0xbc4   : > { %v5934_v21 = vpop.f32.mrf.mxu0  ;;  %v5526_v49 = vsel %vm296_vm0, %v5501_v4, %v6366_v27  ;;  %v6396_v27 = vunpack.i.l.bf16 %v6395_v36  ;;  %v6411_v48 = vunpack.i.l.bf16 %v6410_v3 }
 0xbc5   : > { %v5935_v18 = vadd.f32 %v5934_v21, %v5843_v42  ;;  %v5552_v62 = vsel %vm5542_vm5, %v5526_v49, %v6371_v43  ;;  %v11040_v43 = vld [vmem:[#allocation75_spill] sm:$0xff]  ;;  %v11041_v49 = vld [vmem:[#allocation26_spill] sm:$0xff] }
 0xbc6   : > { %v9904_v51 = vld.sshfl [vmem:[#allocation1 + $0x20] sm:$0xff pattern:$0x73625140]  ;;  %5776 = vmatmul.f32.gmra.mxu2 %v5552_v62  ;;  %v6415_v0 = vpop.permute.xlu0 %6414 }
 0xbc7   : > { %5453 = vst [vmem:[#allocation1 + $0x20] ss:$4 sm:$0xff] %v3800_v50  ;;  %v11039_v50 = vld [vmem:[#allocation197_spill] sm:$0xff]  ;;  %v6416_v37 = vunpack.i.l.bf16 %v6415_v0  ;;  %v6417_v24 = vunpack.i.h.bf16 %v6415_v0  ;;  %v6231_v0 = vunpack.i.l.bf16 %v9384_v35 }
 0xbc8   : > { %6010 = vst.msk [vmem:[%s9899_s13] sm:$0xff] %vm6009_vm6, %v5935_v18  ;;  %v5491_v58 = vld.sshfl [vmem:[#allocation1] sm:$0xff pattern:$0x73625140]  ;;  %v6425_v57 = vpop.permute.xlu2 %6424  ;;  %v6226_v18 = vunpack.i.l.bf16 %v11040_v43 }
 0xbc9   : > { %5454 = vst [vmem:[#allocation1 + $0x21] ss:$4 sm:$0xff] %v3801_v30  ;;  %6143 = vmatmul.msk.f32.vlgmr.msra.gmra.mxu1 %vm2464_vm1, %v5491_v58  ;;  %v5554_v30 = vsel %vm5542_vm5, %v5528_v8, %v6396_v27  ;;  %v6412_v58 = vunpack.i.h.bf16 %v6410_v3  ;;  %v6427_v19 = vunpack.i.h.bf16 %v6425_v57  ;;  %v11049_v8 = vld [vmem:[#allocation32_spill] sm:$0xff] }
 0xbca   : > { %6130 = vmatmul.msk.f32.gmra.mxu0 %vm2464_vm1, %v9830_v40  ;;  %5455 = vst [vmem:[#allocation1 + $0x22] ss:$4 sm:$0xff] %v11030_v32  ;;  %5868 = vmatmul.f32.gmra.mxu3 %v5627_v26  ;;  %v5578_v40 = vsel %vm2464_vm1, %v11033_v28, %v6382_v25  ;;  %v5504_v60 = vsel %vm2464_vm1, %v11041_v49, %v6226_v18  ;;  %v11043_v32 = vld [vmem:[#allocation211_spill] sm:$0xff]  ;;  %v11045_v26 = vrot.slane %v11042_v33, 4 }
 0xbcb   : > { %5456 = vst [vmem:[#allocation1 + $0x23] ss:$4 sm:$0xff] %v11031_v59  ;;  %v5603_v11 = vsel %vm296_vm0, %v5578_v40, %v6387_v29  ;;  %v6420_v10 = vpop.permute.xlu1 %6419  ;;  %v5529_v25 = vsel %vm296_vm0, %v5504_v60, %v6411_v48  ;;  %v5580_v59 = vsel %vm2464_vm1, %v11043_v32, %v6407_v6  ;;  %v6227_v40 = vunpack.i.h.bf16 %v11040_v43  ;;  %v11050_v43 = vld [vmem:[#allocation46_spill] sm:$0xff] }
 0xbcc   : > { %v5628_v14 = vsel %vm5542_vm5, %v5603_v11, %v6402_v56  ;;  %v5605_v55 = vsel %vm296_vm0, %v5580_v59, %v6412_v58  ;;  %v6422_v11 = vunpack.i.h.bf16 %v6420_v10 }
 0xbcd   : > { %v5630_v29 = vsel %vm5542_vm5, %v5605_v55, %v6427_v19 }
 0xbce   : > { %5779 = vmatmul.f32.gmra.mxu2 %v5553_v12  ;;  %v6435_v62 = vpop.permute.xlu0 %6434 }
 0xbcf   : > { %v6436_v31 = vunpack.i.l.bf16 %v6435_v62 }
 0xbd0   : > { %v6430_v9 = vpop.permute.xlu2 %6429 }
 0xbd1   : > { %v6431_v13 = vunpack.i.l.bf16 %v6430_v9 }
 0xbd2   : > { %6131 = vmatmul.msk.f32.gmra.mxu0 %vm2464_vm1, %v9748_v23  ;;  %v9934_v42 = vld.sshfl [vmem:[#allocation1 + $0x20] sm:$0xff pattern:$0x73625140]  ;;  %5871 = vmatmul.f32.gmra.mxu3 %v5628_v14  ;;  %v5579_v23 = vsel %vm2464_vm1, %v11037_v44, %v6406_v45 }
 0xbd3   : > { %5463 = vst [vmem:[#allocation1 + $0x20] ss:$4 sm:$0xff] %v3806_v34  ;;  %v5604_v21 = vsel %vm296_vm0, %v5579_v23, %v6392_v22  ;;  %v6450_v28 = vpop.permute.xlu1 %6449  ;;  %v6421_v34 = vunpack.i.l.bf16 %v6420_v10  ;;  %v5581_v14 = vsel %vm2464_vm1, %v11048_v38, %v6431_v13  ;;  %v6432_v23 = vunpack.i.h.bf16 %v6430_v9 }
 0xbd4   : > { %5464 = vst [vmem:[#allocation1 + $0x21] ss:$4 sm:$0xff] %v11035_v20  ;;  %v5629_v4 = vsel %vm5542_vm5, %v5604_v21, %v6397_v53  ;;  %v5606_v22 = vsel %vm296_vm0, %v5581_v14, %v6417_v24  ;;  %v11055_v14 = vld [vmem:[#allocation37_spill] sm:$0xff] }
 0xbd5   : > { %5465 = vst [vmem:[#allocation1 + $0x22] ss:$4 sm:$0xff] %v11038_v52  ;;  %v5631_v17 = vsel %vm5542_vm5, %v5606_v22, %v6422_v11  ;;  %v6437_v52 = vunpack.i.h.bf16 %v6435_v62  ;;  %v5582_v18 = vsel %vm2464_vm1, %v11050_v43, %v6432_v23 }
 0xbd6   : > { %5466 = vst [vmem:[#allocation1 + $0x23] ss:$4 sm:$0xff] %v11039_v50  ;;  %5782 = vmatmul.f32.gmra.mxu2 %v5554_v30  ;;  %v6445_v3 = vpop.permute.xlu0 %6444  ;;  %v5506_v50 = vsel %vm2464_vm1, %v11049_v8, %v6231_v0  ;;  %v6232_v30 = vunpack.i.h.bf16 %v9384_v35 }
 0xbd7   : > { %v5607_v53 = vsel %vm296_vm0, %v5582_v18, %v6437_v52  ;;  %v6447_v19 = vunpack.i.h.bf16 %v6445_v3  ;;  %v11057_v18 = vld [vmem:[#allocation92_spill] sm:$0xff] }
 0xbd8   : > { %v6440_v20 = vpop.permute.xlu2 %6439 }
 0xbd9   : > { %v6441_v49 = vunpack.i.l.bf16 %v6440_v20  ;;  %v6442_v62 = vunpack.i.h.bf16 %v6440_v20 }
 0xbda   : > { %6132 = vmatmul.msk.f32.gmra.mxu0 %vm2464_vm1, %v9869_v7  ;;  %5874 = vmatmul.f32.gmra.mxu3 %v5629_v4  ;;  %v6426_v7 = vunpack.i.l.bf16 %v6425_v57  ;;  %v6452_v57 = vunpack.i.h.bf16 %v6450_v28 }
 0xbdb   : > { %v6455_v44 = vpop.permute.xlu1 %6454 }
 0xbdc   : > { %v5555_v36 = vsel %vm5542_vm5, %v5529_v25, %v6426_v7  ;;  %v6456_v27 = vunpack.i.l.bf16 %v6455_v44  ;;  %v5632_v6 = vsel %vm5542_vm5, %v5607_v53, %v6452_v57  ;;  %v11051_v25 = vld [vmem:[#allocation85_spill] sm:$0xff] }
 0xbdd   : > { %v9953_v16 = vld.sshfl [vmem:[#allocation1 + $0x20] sm:$0xff pattern:$0x73625140] }
 0xbde   : > { %5473 = vst [vmem:[#allocation1 + $0x20] ss:$4 sm:$0xff] %v11042_v33  ;;  %5785 = vmatmul.f32.gmra.mxu2 %v5555_v36  ;;  %v6475_v48 = vpop.permute.xlu0 %6474  ;;  %v5583_v33 = vsel %vm2464_vm1, %v11051_v25, %v6456_v27  ;;  %v6457_v36 = vunpack.i.h.bf16 %v6455_v44 }
 0xbdf   : > { %5474 = vst [vmem:[#allocation1 + $0x21] ss:$4 sm:$0xff] %v11044_v1  ;;  %v11052_v1 = vld [vmem:[#allocation99_spill] sm:$0xff]  ;;  %v6476_v11 = vunpack.i.l.bf16 %v6475_v48  ;;  %v6477_v23 = vunpack.i.h.bf16 %v6475_v48 }
 0xbe0   : > { %5475 = vst [vmem:[#allocation1 + $0x22] ss:$4 sm:$0xff] %v11045_v26  ;;  %v6460_v60 = vpop.permute.xlu2 %6459  ;;  %v5507_v35 = vsel %vm2464_vm1, %v11052_v1, %v6232_v30  ;;  %v5608_v26 = vsel %vm296_vm0, %v5583_v33, %v6442_v62 }
 0xbe1   : > { %5476 = vst [vmem:[#allocation1 + $0x23] ss:$4 sm:$0xff] %v11046_v47  ;;  %v5532_v55 = vsel %vm296_vm0, %v5507_v35, %v6441_v49 }
 0xbe2   : > { %6133 = vmatmul.msk.f32.gmra.mxu0 %vm2464_vm1, %v9771_v61  ;;  %5877 = vmatmul.f32.gmra.mxu3 %v5630_v29  ;;  %v5505_v61 = vsel %vm2464_vm1, %v11047_v39, %v6227_v40  ;;  %v11053_v40 = vld [vmem:[#allocation100_spill] sm:$0xff] }
 0xbe3   : > { %v5530_v56 = vsel %vm296_vm0, %v5505_v61, %v6416_v37  ;;  %v6465_v32 = vpop.permute.xlu1 %6464  ;;  %v6236_v29 = vunpack.i.l.bf16 %v11053_v40  ;;  %v5633_v37 = vsel %vm5542_vm5, %v5608_v26, %v6447_v19  ;;  %v11054_v61 = vld [vmem:[#allocation139_spill] sm:$0xff]  ;;  %v6237_v44 = vunpack.i.h.bf16 %v11053_v40 }
 0xbe4   : > { %v5556_v12 = vsel %vm5542_vm5, %v5530_v56, %v6421_v34  ;;  %v6461_v34 = vunpack.i.l.bf16 %v6460_v60  ;;  %v6466_v57 = vunpack.i.l.bf16 %v6465_v32 }
 0xbe5   : > { %v5508_v20 = vsel %vm2464_vm1, %v11055_v14, %v6236_v29 }
 0xbe6   : > { %5788 = vmatmul.f32.gmra.mxu2 %v5556_v12  ;;  %v6480_v39 = vpop.permute.xlu0 %6479 }
 0xbe8   : > { %v9974_v45 = vld.sshfl [vmem:[#allocation1 + $0x20] sm:$0xff pattern:$0x73625140]  ;;  %v6470_v12 = vpop.permute.xlu2 %6469 }
 0xbe9   : > { %5486 = vst [vmem:[#allocation1 + $0x23] ss:$4 sm:$0xff] %v9854_v5  ;;  %v5531_v5 = vsel %vm296_vm0, %v5506_v50, %v6436_v31  ;;  %v6471_v30 = vunpack.i.l.bf16 %v6470_v12  ;;  %v6472_v25 = vunpack.i.h.bf16 %v6470_v12 }
 0xbea   : > { %6134 = vmatmul.msk.f32.gmra.mxu0 %vm2464_vm1, %v9904_v51  ;;  %5880 = vmatmul.f32.gmra.mxu3 %v5631_v17  ;;  %v6451_v51 = vunpack.i.l.bf16 %v6450_v28  ;;  %v5533_v17 = vsel %vm296_vm0, %v5508_v20, %v6461_v34 }
 0xbeb   : > { %v6485_v0 = vpop.permute.xlu1 %6484  ;;  %v5559_v52 = vsel %vm5542_vm5, %v5533_v17, %v6476_v11 }
 0xbec   : > { %v5557_v21 = vsel %vm5542_vm5, %v5531_v5, %v6451_v51  ;;  %v6481_v51 = vunpack.i.l.bf16 %v6480_v39  ;;  %v6467_v5 = vunpack.i.h.bf16 %v6465_v32  ;;  %v6482_v32 = vunpack.i.h.bf16 %v6480_v39 }
 0xbed   : > { %v6487_v35 = vunpack.i.h.bf16 %v6485_v0 }
 0xbee   : > { %5791 = vmatmul.f32.gmra.mxu2 %v5557_v21  ;;  %v11056_v21 = vld [vmem:[#allocation103_spill] sm:$0xff]  ;;  %v5585_v53 = vsel %vm2464_vm1, %v11057_v18, %v6481_v51  ;;  %v6490_v48 = vpop.permute.xlu0 %6489 }
 0xbef   : > { %v5509_v43 = vsel %vm2464_vm1, %v11056_v21, %v6237_v44  ;;  %v6491_v11 = vunpack.i.l.bf16 %v6490_v48 }
 0xbf1   : > { %v5753_v10 = vpop.f32.mrf.mxu2 }
 0xbf2   : > { %6135 = vmatmul.msk.f32.gmra.mxu0 %vm2464_vm1, %v9787_v54  ;;  %v5754_v4 = vadd.f32 %v9866_v41, %v5753_v10  ;;  %v5845_v58 = vpop.f32.mrf.mxu3  ;;  %5883 = vmatmul.f32.gmra.mxu3 %v5632_v6  ;;  %v6446_v54 = vunpack.i.l.bf16 %v6445_v3  ;;  %v6462_v3 = vunpack.i.h.bf16 %v6460_v60  ;;  %v5534_v10 = vsel %vm296_vm0, %v5509_v43, %v6466_v57  ;;  %v11058_v60 = vld [vmem:[#allocation34_spill] sm:$0xff]  ;;  %v11064_v43 = vld [vmem:[#allocation41_spill] sm:$0xff] }
 0xbf3   : > { %v5560_v33 = vsel %vm5542_vm5, %v5534_v10, %v6471_v30  ;;  %v6495_v62 = vpop.permute.xlu1 %6494  ;;  %v6242_v34 = vunpack.i.h.bf16 %v11058_v60  ;;  %v11065_v30 = vld [vmem:[#allocation51_spill] sm:$0xff] }
 0xbf4   : > { %v5846_v7 = vadd.f32 %v5845_v58, %v5754_v4  ;;  %v5558_v47 = vsel %vm5542_vm5, %v5532_v55, %v6446_v54  ;;  %v6500_v4 = vpop.permute.xlu2 %6499  ;;  %v5610_v58 = vsel %vm296_vm0, %v5585_v53, %v6467_v5  ;;  %v6241_v54 = vunpack.i.l.bf16 %v11058_v60 }
 0xbf5   : > { %v6501_v19 = vunpack.i.l.bf16 %v6500_v4  ;;  %v6502_v40 = vunpack.i.h.bf16 %v6500_v4  ;;  %v6497_v12 = vunpack.i.h.bf16 %v6495_v62 }
 0xbf6   : > { %5794 = vmatmul.f32.gmra.mxu2 %v5558_v47  ;;  %v6510_v29 = vpop.permute.xlu0 %6509 }
 0xbf7   : > { %v5937_v59 = vpop.f32.mrf.mxu0  ;;  %v6512_v5 = vunpack.i.h.bf16 %v6510_v29 }
 0xbf8   : > { %v5938_v9 = vadd.f32 %v5937_v59, %v5846_v7  ;;  %v6486_v7 = vunpack.i.l.bf16 %v6485_v0  ;;  %v5635_v59 = vsel %vm5542_vm5, %v5610_v58, %v6472_v25  ;;  %v11066_v25 = vld [vmem:[#allocation221_spill] sm:$0xff] }
 0xbf9   : > { %v5756_v28 = vpop.f32.mrf.mxu2 }
 0xbfa   : > { %6136 = vmatmul.msk.f32.gmra.mxu0 %vm2464_vm1, %v9934_v42  ;;  %6011 = vst.msk [vmem:[%s9899_s13 + $0x8] sm:$0xff] %vm6009_vm6, %v5938_v9  ;;  %v5757_v13 = vadd.f32 %v9866_v41, %v5756_v28  ;;  %5886 = vmatmul.f32.gmra.mxu3 %v5633_v37  ;;  %v5848_v24 = vpop.f32.mrf.mxu3  ;;  %v5584_v42 = vsel %vm2464_vm1, %v11054_v61, %v6457_v36  ;;  %v11059_v9 = vld [vmem:[#allocation40_spill] sm:$0xff]  ;;  %v11060_v36 = vld [vmem:[#allocation146_spill] sm:$0xff] }
 0xbfb   : > { %v5609_v31 = vsel %vm296_vm0, %v5584_v42, %v6462_v3  ;;  %v5510_v55 = vsel %vm2464_vm1, %v11059_v9, %v6241_v54  ;;  %v5586_v47 = vsel %vm2464_vm1, %v11060_v36, %v6482_v32  ;;  %v6525_v39 = vpop.permute.xlu1 %6524  ;;  %v6496_v42 = vunpack.i.l.bf16 %v6495_v62  ;;  %v11067_v9 = vld [vmem:[#allocation120_spill] sm:$0xff] }
 0xbfc   : > { %v5849_v56 = vadd.f32 %v5848_v24, %v5757_v13  ;;  %v5634_v50 = vsel %vm5542_vm5, %v5609_v31, %v6477_v23  ;;  %v5611_v28 = vsel %vm296_vm0, %v5586_v47, %v6487_v35  ;;  %v6505_v13 = vpop.permute.xlu2 %6504  ;;  %v11063_v31 = vld [vmem:[#allocation35_spill] sm:$0xff]  ;;  %v6527_v21 = vunpack.i.h.bf16 %v6525_v39 }
 0xbfd   : > { %v5636_v24 = vsel %vm5542_vm5, %v5611_v28, %v6502_v40  ;;  %v6506_v61 = vunpack.i.l.bf16 %v6505_v13  ;;  %v6246_v44 = vunpack.i.l.bf16 %v11063_v31  ;;  %v6507_v57 = vunpack.i.h.bf16 %v6505_v13  ;;  %v11068_v13 = vld [vmem:[#allocation36_spill] sm:$0xff] }
 0xbfe   : > { %5797 = vmatmul.f32.gmra.mxu2 %v5559_v52  ;;  %v6520_v23 = vpop.permute.xlu0 %6519  ;;  %v6511_v52 = vunpack.i.l.bf16 %v6510_v29  ;;  %v6247_v4 = vunpack.i.h.bf16 %v11063_v31  ;;  %v3817_v32 = vrot.slane %v9845_v46, 2 }
 0xbff   : > { %v5940_v38 = vpop.f32.mrf.mxu0  ;;  %v5512_v18 = vsel %vm2464_vm1, %v11064_v43, %v6246_v44  ;;  %v6521_v60 = vunpack.i.l.bf16 %v6520_v23  ;;  %v6522_v28 = vunpack.i.h.bf16 %v6520_v23  ;;  %v6252_v44 = vunpack.i.h.bf16 %v11068_v13  ;;  %v11071_v43 = vld [vmem:[#allocation222_spill] sm:$0xff] }
 0xc00   : > { %v5941_v22 = vadd.f32 %v5940_v38, %v5849_v56  ;;  %v6492_v56 = vunpack.i.h.bf16 %v6490_v48  ;;  %v11061_v38 = vld [vmem:[#allocation111_spill] sm:$0xff]  ;;  %v5537_v53 = vsel %vm296_vm0, %v5512_v18, %v6511_v52  ;;  %v5588_v48 = vsel %vm2464_vm1, %v11065_v30, %v6507_v57  ;;  %5483 = vst [vmem:[#allocation1 + $0x20] ss:$4 sm:$0xff] %v3817_v32 }
 0xc01   : > { %v5759_v8 = vpop.f32.mrf.mxu2 }
 0xc02   : > { %6137 = vmatmul.msk.f32.gmra.mxu0 %vm2464_vm1, %v9815_v2  ;;  %6012 = vst.msk [vmem:[%s9899_s13 + $0x10] sm:$0xff] %vm6009_vm6, %v5941_v22  ;;  %5889 = vmatmul.f32.gmra.mxu3 %v5634_v50  ;;  %v5760_v27 = vadd.f32 %v9866_v41, %v5759_v8  ;;  %v11062_v22 = vld [vmem:[#allocation220_spill] sm:$0xff]  ;;  %v6526_v50 = vunpack.i.l.bf16 %v6525_v39 }
 0xc03   : > { %v5851_v6 = vpop.f32.mrf.mxu3  ;;  %v5587_v0 = vsel %vm2464_vm1, %v11062_v22, %v6506_v61  ;;  %v11070_v22 = vld [vmem:[#allocation43_spill] sm:$0xff] }
 0xc04   : > { %v5852_v49 = vadd.f32 %v5851_v6, %v5760_v27  ;;  %v5612_v17 = vsel %vm296_vm0, %v5587_v0, %v6492_v56  ;;  %v6515_v8 = vpop.permute.xlu2 %6514  ;;  %v5563_v10 = vsel %vm5542_vm5, %v5537_v53, %v6526_v50  ;;  %v5613_v6 = vsel %vm296_vm0, %v5588_v48, %v6512_v5  ;;  %v11072_v53 = vld [vmem:[#allocation127_spill] sm:$0xff] }
 0xc05   : > { %v5637_v51 = vsel %vm5542_vm5, %v5612_v17, %v6497_v12  ;;  %v5638_v58 = vsel %vm5542_vm5, %v5613_v6, %v6527_v21 }
 0xc06   : > { %5800 = vmatmul.f32.gmra.mxu2 %v5560_v33  ;;  %v6550_v54 = vpop.permute.xlu0 %6549 }
 0xc07   : > { %v5943_v2 = vpop.f32.mrf.mxu0  ;;  %v6551_v39 = vunpack.i.l.bf16 %v6550_v54  ;;  %v6552_v23 = vunpack.i.h.bf16 %v6550_v54 }
 0xc08   : > { %v5944_v1 = vadd.f32 %v5943_v2, %v5852_v49  ;;  %v6516_v49 = vunpack.i.l.bf16 %v6515_v8 }
 0xc09   : > { %v5762_v62 = vpop.f32.mrf.mxu2 }
 0xc0a   : > { %6138 = vmatmul.msk.f32.gmra.mxu0 %vm2464_vm1, %v9953_v16  ;;  %5892 = vmatmul.f32.gmra.mxu3 %v5635_v59  ;;  %6013 = vst.msk [vmem:[%s9899_s13 + $0x18] sm:$0xff] %vm6009_vm6, %v5944_v1  ;;  %v5535_v16 = vsel %vm296_vm0, %v5510_v55, %v6486_v7  ;;  %v3818_v59 = vrot.slane %v9845_v46, 4  ;;  %v5763_v1 = vadd.f32 %v9866_v41, %v5762_v62 }
 0xc0b   : > { %v5561_v37 = vsel %vm5542_vm5, %v5535_v16, %v6501_v19  ;;  %v5513_v55 = vsel %vm2464_vm1, %v11067_v9, %v6247_v4  ;;  %v3819_v16 = vrot.slane %v9845_v46, 6 }
 0xc0c   : > { %v6535_v19 = vpop.permute.xlu2 %6534  ;;  %v5538_v36 = vsel %vm296_vm0, %v5513_v55, %v6516_v49  ;;  %5484 = vst [vmem:[#allocation1 + $0x21] ss:$4 sm:$0xff] %v3818_v59  ;;  %v11074_v55 = vld [vmem:[#allocation218_spill] sm:$0xff] }
 0xc0d   : > { %5485 = vst [vmem:[#allocation1 + $0x22] ss:$4 sm:$0xff] %v3819_v16  ;;  %v6537_v12 = vunpack.i.h.bf16 %v6535_v19 }
 0xc0e   : > { %5803 = vmatmul.f32.gmra.mxu2 %v5561_v37  ;;  %v5564_v37 = vsel %vm5542_vm5, %v5538_v36, %v6521_v60  ;;  %v4924_v0 = vpop.permute.xlu0 %4923  ;;  %v11073_v60 = vld [vmem:[#allocation94_spill] sm:$0xff] }
 0xc0f   : > { %v10040_v26 = vpop.f32.mrf.mxu0  ;;  %v5591_v18 = vsel %vm2464_vm1, %v11071_v43, %v4924_v0  ;;  %v6261_v54 = vunpack.i.l.bf16 %v11073_v60 }
 0xc12   : > { %6139 = vmatmul.msk.f32.gmra.mxu0 %vm2464_vm1, %v9841_v15  ;;  %5895 = vmatmul.f32.gmra.mxu3 %v5636_v24  ;;  %v5511_v15 = vsel %vm2464_vm1, %v11061_v38, %v6242_v34  ;;  %v6251_v34 = vunpack.i.l.bf16 %v11068_v13 }
 0xc13   : > { %v5536_v14 = vsel %vm296_vm0, %v5511_v15, %v6491_v11  ;;  %v6536_v11 = vunpack.i.l.bf16 %v6535_v19  ;;  %v5765_v15 = vpop.f32.mrf.mxu2  ;;  %v11075_v19 = vld [vmem:[#allocation44_spill] sm:$0xff] }
 0xc14   : > { %v5562_v20 = vsel %vm5542_vm5, %v5536_v14, %v6496_v42  ;;  %v11069_v42 = vld [vmem:[#allocation216_spill] sm:$0xff]  ;;  %v5766_v14 = vadd.f32 %v9866_v41, %v5765_v15  ;;  %v5516_v36 = vsel %vm2464_vm1, %v11075_v19, %v6261_v54 }
 0xc15   : > { %v5488_v57 = vld.sshfl [vmem:[#allocation1 + $0x20] sm:$0xff pattern:$0x73625140] }
 0xc16   : > { %5806 = vmatmul.f32.gmra.mxu2 %v5562_v20  ;;  %v4926_v32 = vpop.permute.xlu0 %4925 }
 0xc17   : > { %v10051_v3 = vpop.f32.mrf.mxu0  ;;  %v5592_v16 = vsel %vm2464_vm1, %v11074_v55, %v4926_v32 }
 0xc1a   : > { %6140 = vmatmul.msk.f32.gmra.mxu0 %vm2464_vm1, %v9974_v45  ;;  %5898 = vmatmul.f32.gmra.mxu3 %v5637_v51  ;;  %v6530_v45 = vpop.permute.xlu1 %6529 }
 0xc1b   : > { %v6531_v2 = vunpack.i.l.bf16 %v6530_v45  ;;  %v6532_v40 = vunpack.i.h.bf16 %v6530_v45 }
 0xc1d   : > { %v5589_v33 = vsel %vm2464_vm1, %v11066_v25, %v6531_v2  ;;  %v5590_v56 = vsel %vm2464_vm1, %v11069_v42, %v6532_v40  ;;  %v5515_v2 = vsel %vm2464_vm1, %v11072_v53, %v6252_v44 }
 0xc1e   : > { %5809 = vmatmul.f32.gmra.mxu2 %v5563_v10  ;;  %v5615_v31 = vsel %vm296_vm0, %v5590_v56, %v6537_v12 }
 0xc1f   : > { %v10064_v27 = vpop.f32.mrf.mxu0  ;;  %v5640_v45 = vsel %vm5542_vm5, %v5615_v31, %v6552_v23 }
 0xc22   : > { %6141 = vmatmul.msk.f32.gmra.mxu0 %vm2464_vm1, %v9880_v63  ;;  %5901 = vmatmul.f32.gmra.mxu3 %v5638_v58  ;;  %v6517_v63 = vunpack.i.h.bf16 %v6515_v8  ;;  %v6540_v61 = vpop.permute.xlu1 %6539  ;;  %v6545_v8 = vpop.permute.xlu2 %6544 }
 0xc23   : > { %v5854_v35 = vpop.f32.mrf.mxu3  ;;  %v6541_v50 = vunpack.i.l.bf16 %v6540_v61  ;;  %v6542_v21 = vunpack.i.h.bf16 %v6540_v61  ;;  %v6546_v6 = vunpack.i.l.bf16 %v6545_v8  ;;  %v6547_v25 = vunpack.i.h.bf16 %v6545_v8 }
 0xc24   : > { %v5614_v47 = vsel %vm296_vm0, %v5589_v33, %v6517_v63  ;;  %v5855_v29 = vadd.f32 %v5854_v35, %v5763_v1 }
 0xc25   : > { %v5639_v46 = vsel %vm5542_vm5, %v5614_v47, %v6522_v28  ;;  %v5540_v48 = vsel %vm296_vm0, %v5515_v2, %v6541_v50  ;;  %v5616_v49 = vsel %vm296_vm0, %v5591_v18, %v6542_v21 }
 0xc26   : > { %5812 = vmatmul.f32.gmra.mxu2 %v5564_v37  ;;  %v5947_v24 = vadd.f32 %v10040_v26, %v5855_v29  ;;  %v5514_v26 = vsel %vm2464_vm1, %v11070_v22, %v6251_v34  ;;  %v5768_v30 = vpop.f32.mrf.mxu2  ;;  %v5566_v63 = vsel %vm5542_vm5, %v5540_v48, %v6546_v6  ;;  %v5641_v1 = vsel %vm5542_vm5, %v5616_v49, %v6547_v25 }
 0xc27   : > { %v10079_v7 = vpop.f32.mrf.mxu0  ;;  %v5539_v17 = vsel %vm296_vm0, %v5514_v26, %v6536_v11 }
 0xc28   : > { %6014 = vst.msk [vmem:[%s9899_s13 + $0x20] sm:$0xff] %vm6009_vm6, %v5947_v24  ;;  %v5565_v52 = vsel %vm5542_vm5, %v5539_v17, %v6551_v39 }
 0xc2a   : > { %5904 = vmatmul.f32.gmra.mxu3 %v5639_v46  ;;  %6142 = vmatmul.msk.f32.gmra.mxu0 %vm2464_vm1, %v5488_v57  ;;  %v6555_v4 = vpop.permute.xlu1 %6554  ;;  %v6560_v35 = vpop.permute.xlu2 %6559 }
 0xc2b   : > { %v6556_v62 = vunpack.i.l.bf16 %v6555_v4  ;;  %v6557_v9 = vunpack.i.h.bf16 %v6555_v4  ;;  %v6561_v40 = vunpack.i.l.bf16 %v6560_v35  ;;  %v6562_v34 = vunpack.i.h.bf16 %v6560_v35 }
 0xc2d   : > { %v5857_v20 = vpop.f32.mrf.mxu3  ;;  %v5541_v28 = vsel %vm296_vm0, %v5516_v36, %v6556_v62  ;;  %v5617_v13 = vsel %vm296_vm0, %v5592_v16, %v6557_v9  ;;  %vm6034_vm0 = vcmask 27648  }
 0xc2e   : > { %v5858_v51 = vadd.f32 %v5857_v20, %v5766_v14  ;;  %5815 = vmatmul.f32.gmra.mxu2 %v5565_v52  ;;  %v5567_v46 = vsel %vm5542_vm5, %v5541_v28, %v6561_v40  ;;  %v5642_v39 = vsel %vm5542_vm5, %v5617_v13, %v6562_v34 }
 0xc2f   : > { %v10097_v38 = vpop.f32.mrf.mxu0 }
 0xc30   : > { %v5950_v5 = vadd.f32 %v10051_v3, %v5858_v51  ;;  %v5769_v3 = vadd.f32 %v9866_v41, %v5768_v30  ;;  %v5771_v47 = vpop.f32.mrf.mxu2 }
 0xc32   : > { %5907 = vmatmul.f32.gmra.mxu3 %v5640_v45  ;;  %6015 = vst.msk [vmem:[%s9899_s13 + $0x28] sm:$0xff] %vm6009_vm6, %v5950_v5 }
 0xc35   : > { %v5860_v58 = vpop.f32.mrf.mxu3 }
 0xc36   : > { %v5861_v33 = vadd.f32 %v5860_v58, %v5769_v3  ;;  %5818 = vmatmul.f32.gmra.mxu2 %v5566_v63 }
 0xc37   : > { %v5961_v10 = vpop.f32.mrf.mxu0 }
 0xc38   : > { %v5953_v59 = vadd.f32 %v10064_v27, %v5861_v33  ;;  %v5772_v27 = vadd.f32 %v9866_v41, %v5771_v47  ;;  %v5774_v61 = vpop.f32.mrf.mxu2 }
 0xc39   : > { %v5775_v56 = vadd.f32 %v9866_v41, %v5774_v61 }
 0xc3a   : > { %5910 = vmatmul.f32.gmra.mxu3 %v5641_v1  ;;  %6016 = vst.msk [vmem:[%s9899_s13 + $0x30] sm:$0xff] %vm6009_vm6, %v5953_v59 }
 0xc3d   : > { %v5863_v29 = vpop.f32.mrf.mxu3 }
 0xc3e   : > { %v5864_v24 = vadd.f32 %v5863_v29, %v5772_v27  ;;  %5821 = vmatmul.f32.gmra.mxu2 %v5567_v46 }
 0xc3f   : > { %v5964_v37 = vpop.f32.mrf.mxu0 }
 0xc40   : > { %v5956_v11 = vadd.f32 %v10079_v7, %v5864_v24 }
 0xc42   : > { %5913 = vmatmul.f32.gmra.mxu3 %v5642_v39  ;;  %6017 = vst.msk [vmem:[%s9899_s13 + $0x38] sm:$0xff] %vm6009_vm6, %v5956_v11 }
 0xc45   : > { %v5866_v42 = vpop.f32.mrf.mxu3 }
 0xc46   : > { %v5867_v15 = vadd.f32 %v5866_v42, %v5775_v56 }
 0xc47   : > { %v5967_v12 = vpop.f32.mrf.mxu0 }
 0xc48   : > { %v5959_v14 = vadd.f32 %v10097_v38, %v5867_v15 }
 0xc49   : > { %v5777_v20 = vpop.f32.mrf.mxu2 }
 0xc4a   : > { %6018 = vst.msk [vmem:[%s9899_s13 + $0x40] sm:$0xff] %vm6009_vm6, %v5959_v14  ;;  %v5778_v7 = vadd.f32 %v9866_v41, %v5777_v20 }
 0xc4d   : > { %v5869_v22 = vpop.f32.mrf.mxu3 }
 0xc4e   : > { %v5870_v26 = vadd.f32 %v5869_v22, %v5778_v7 }
 0xc4f   : > { %v5970_v0 = vpop.f32.mrf.mxu0 }
 0xc50   : > { %v5962_v17 = vadd.f32 %v5961_v10, %v5870_v26 }
 0xc51   : > { %v5780_v31 = vpop.f32.mrf.mxu2 }
 0xc52   : > { %6019 = vst.msk [vmem:[%s9899_s13 + $0x48] sm:$0xff] %vm6009_vm6, %v5962_v17  ;;  %v5781_v23 = vadd.f32 %v9866_v41, %v5780_v31 }
 0xc55   : > { %v5872_v44 = vpop.f32.mrf.mxu3 }
 0xc56   : > { %v5873_v51 = vadd.f32 %v5872_v44, %v5781_v23 }
 0xc57   : > { %v5973_v38 = vpop.f32.mrf.mxu0 }
 0xc58   : > { %v5965_v52 = vadd.f32 %v5964_v37, %v5873_v51 }
 0xc59   : > { %v5783_v57 = vpop.f32.mrf.mxu2 }
 0xc5a   : > { %6020 = vst.msk [vmem:[%s9899_s13 + $0x50] sm:$0xff] %vm6009_vm6, %v5965_v52  ;;  %v5784_v50 = vadd.f32 %v9866_v41, %v5783_v57 }
 0xc5d   : > { %v5875_v8 = vpop.f32.mrf.mxu3 }
 0xc5e   : > { %v5876_v5 = vadd.f32 %v5875_v8, %v5784_v50 }
 0xc5f   : > { %v5976_v18 = vpop.f32.mrf.mxu0 }
 0xc60   : > { %v5968_v45 = vadd.f32 %v5967_v12, %v5876_v5 }
 0xc61   : > { %v5786_v21 = vpop.f32.mrf.mxu2 }
 0xc62   : > { %6021 = vst.msk [vmem:[%s9899_s13 + $0x58] sm:$0xff] %vm6009_vm6, %v5968_v45  ;;  %v5787_v53 = vadd.f32 %v9866_v41, %v5786_v21 }
 0xc65   : > { %v5878_v43 = vpop.f32.mrf.mxu3 }
 0xc66   : > { %v5879_v2 = vadd.f32 %v5878_v43, %v5787_v53 }
 0xc67   : > { %v5979_v4 = vpop.f32.mrf.mxu0 }
 0xc68   : > { %v5971_v10 = vadd.f32 %v5970_v0, %v5879_v2 }
 0xc69   : > { %v5789_v30 = vpop.f32.mrf.mxu2 }
 0xc6a   : > { %6022 = vst.msk [vmem:[%s9899_s13 + $0x60] sm:$0xff] %vm6009_vm6, %v5971_v10  ;;  %v5790_v6 = vadd.f32 %v9866_v41, %v5789_v30 }
 0xc6d   : > { %v5881_v48 = vpop.f32.mrf.mxu3 }
 0xc6e   : > { %v5882_v3 = vadd.f32 %v5881_v48, %v5790_v6 }
 0xc6f   : > { %v5982_v33 = vpop.f32.mrf.mxu0 }
 0xc70   : > { %v5974_v58 = vadd.f32 %v5973_v38, %v5882_v3 }
 0xc71   : > { %v5792_v49 = vpop.f32.mrf.mxu2 }
 0xc72   : > { %6023 = vst.msk [vmem:[%s9899_s13 + $0x68] sm:$0xff] %vm6009_vm6, %v5974_v58  ;;  %v5793_v54 = vadd.f32 %v9866_v41, %v5792_v49  ;;  %v6006_v58 = vpop.f32.mrf.mxu1 }
 0xc75   : > { %v5884_v60 = vpop.f32.mrf.mxu3 }
 0xc76   : > { %v5885_v25 = vadd.f32 %v5884_v60, %v5793_v54 }
 0xc77   : > { %v5985_v9 = vpop.f32.mrf.mxu0 }
 0xc78   : > { %v5977_v63 = vadd.f32 %v5976_v18, %v5885_v25 }
 0xc79   : > { %v5795_v62 = vpop.f32.mrf.mxu2 }
 0xc7a   : > { %6024 = vst.msk [vmem:[%s9899_s13 + $0x70] sm:$0xff] %vm6009_vm6, %v5977_v63  ;;  %v5796_v59 = vadd.f32 %v9866_v41, %v5795_v62 }
 0xc7d   : > { %v5887_v32 = vpop.f32.mrf.mxu3 }
 0xc7e   : > { %v5888_v1 = vadd.f32 %v5887_v32, %v5796_v59 }
 0xc7f   : > { %v5988_v27 = vpop.f32.mrf.mxu0 }
 0xc80   : > { %v5980_v35 = vadd.f32 %v5979_v4, %v5888_v1 }
 0xc81   : > { %v5798_v55 = vpop.f32.mrf.mxu2 }
 0xc82   : > { %6025 = vst.msk [vmem:[%s9899_s13 + $0x78] sm:$0xff] %vm6009_vm6, %v5980_v35  ;;  %v5799_v19 = vadd.f32 %v9866_v41, %v5798_v55 }
 0xc85   : > { %v5890_v16 = vpop.f32.mrf.mxu3 }
 0xc86   : > { %v5891_v36 = vadd.f32 %v5890_v16, %v5799_v19 }
 0xc87   : > { %v5991_v11 = vpop.f32.mrf.mxu0 }
 0xc88   : > { %v5983_v47 = vadd.f32 %v5982_v33, %v5891_v36 }
 0xc89   : > { %v5801_v28 = vpop.f32.mrf.mxu2 }
 0xc8a   : > { %6026 = vst.msk [vmem:[%s9899_s13 + $0x80] sm:$0xff] %vm6009_vm6, %v5983_v47  ;;  %v5802_v29 = vadd.f32 %v9866_v41, %v5801_v28 }
 0xc8d   : > { %v5893_v40 = vpop.f32.mrf.mxu3 }
 0xc8e   : > { %v5894_v37 = vadd.f32 %v5893_v40, %v5802_v29 }
 0xc8f   : > { %v5994_v14 = vpop.f32.mrf.mxu0 }
 0xc90   : > { %v5986_v13 = vadd.f32 %v5985_v9, %v5894_v37 }
 0xc91   : > { %v5804_v34 = vpop.f32.mrf.mxu2 }
 0xc92   : > { %6027 = vst.msk [vmem:[%s9899_s13 + $0x88] sm:$0xff] %vm6009_vm6, %v5986_v13  ;;  %v5805_v46 = vadd.f32 %v9866_v41, %v5804_v34 }
 0xc95   : > { %v5896_v24 = vpop.f32.mrf.mxu3 }
 0xc96   : > { %v5897_v39 = vadd.f32 %v5896_v24, %v5805_v46 }
 0xc97   : > { %v5997_v31 = vpop.f32.mrf.mxu0 }
 0xc98   : > { %v5989_v61 = vadd.f32 %v5988_v27, %v5897_v39 }
 0xc99   : > { %v5807_v42 = vpop.f32.mrf.mxu2 }
 0xc9a   : > { %6028 = vst.msk [vmem:[%s9899_s13 + $0x90] sm:$0xff] %vm6009_vm6, %v5989_v61  ;;  %v5808_v12 = vadd.f32 %v9866_v41, %v5807_v42 }
 0xc9d   : > { %v5899_v56 = vpop.f32.mrf.mxu3 }
 0xc9e   : > { %v5900_v15 = vadd.f32 %v5899_v56, %v5808_v12 }
 0xc9f   : > { %v6000_v5 = vpop.f32.mrf.mxu0 }
 0xca0   : > { %v5992_v20 = vadd.f32 %v5991_v11, %v5900_v15 }
 0xca1   : > { %v5810_v22 = vpop.f32.mrf.mxu2 }
 0xca2   : > { %6029 = vst.msk [vmem:[%s9899_s13 + $0x98] sm:$0xff] %vm6009_vm6, %v5992_v20  ;;  %v5811_v26 = vadd.f32 %v9866_v41, %v5810_v22 }
 0xca5   : > { %v5902_v7 = vpop.f32.mrf.mxu3 }
 0xca6   : > { %v5903_v0 = vadd.f32 %v5902_v7, %v5811_v26 }
 0xca7   : > { %v6003_v2 = vpop.f32.mrf.mxu0 }
 0xca8   : > { %v5995_v17 = vadd.f32 %v5994_v14, %v5903_v0 }
 0xca9   : > { %v5813_v44 = vpop.f32.mrf.mxu2 }
 0xcaa   : > { %6030 = vst.msk [vmem:[%s9899_s13 + $0xa0] sm:$0xff] %vm6009_vm6, %v5995_v17  ;;  %v5814_v51 = vadd.f32 %v9866_v41, %v5813_v44 }
 0xcad   : > { %v5905_v23 = vpop.f32.mrf.mxu3 }
 0xcae   : > { %v5906_v52 = vadd.f32 %v5905_v23, %v5814_v51 }
 0xcb0   : > { %v5998_v38 = vadd.f32 %v5997_v31, %v5906_v52 }
 0xcb1   : > { %v5816_v57 = vpop.f32.mrf.mxu2 }
 0xcb2   : > { %6031 = vst.msk [vmem:[%s9899_s13 + $0xa8] sm:$0xff] %vm6009_vm6, %v5998_v38  ;;  %v5817_v50 = vadd.f32 %v9866_v41, %v5816_v57 }
 0xcb5   : > { %v5908_v8 = vpop.f32.mrf.mxu3 }
 0xcb6   : > { %v5909_v45 = vadd.f32 %v5908_v8, %v5817_v50 }
 0xcb8   : > { %v6001_v21 = vadd.f32 %v6000_v5, %v5909_v45 }
 0xcb9   : > { %v5819_v43 = vpop.f32.mrf.mxu2 }
 0xcba   : > { %6032 = vst.msk [vmem:[%s9899_s13 + $0xb0] sm:$0xff] %vm6009_vm6, %v6001_v21  ;;  %v5820_v53 = vadd.f32 %v9866_v41, %v5819_v43 }
 0xcbd   : > { %v5911_v18 = vpop.f32.mrf.mxu3 }
 0xcbe   : > { %v5912_v10 = vadd.f32 %v5911_v18, %v5820_v53 }
 0xcc0   : > { %v6004_v30 = vadd.f32 %v6003_v2, %v5912_v10 }
 0xcc1   : > { %v5822_v48 = vpop.f32.mrf.mxu2 }
 0xcc2   : > { %6033 = vst.msk [vmem:[%s9899_s13 + $0xb8] sm:$0xff] %vm6009_vm6, %v6004_v30  ;;  %v5823_v4 = vadd.f32 %v9866_v41, %v5822_v48 }
 0xcc5   : > { %v5914_v6 = vpop.f32.mrf.mxu3 }
 0xcc6   : > { %v5915_v3 = vadd.f32 %v5914_v6, %v5823_v4 }
 0xcc8   : > { %v6007_v49 = vadd.f32 %v6006_v58, %v5915_v3 }
 0xcca   : > { %6035 = vst.msk [vmem:[%s9899_s13 + $0xc0] sm:$0xf] %vm6034_vm0, %v6007_v49 }
 0xccb PF: > { %s18_s24 = sadd.s32 1, %s6620_s24  }
 0xccc   : > { %p15_p7 = scmp.ge.s32.totalorder %s18_s24, 4  }
 0xcce   :  { %17 = sbr.rel (!%p15_p7) target bundleno = 1 (0x1), region = 219 }
 0xcd3   :  { %6057 = vsyncpa [#allocation5], 1 }
 0xcd4   :  { %6059 = vsyncpa [#allocation5 + $0x1], 1 }

</bundles_post_ra>
